<compile_context>
chip_gen: v7x
topology: tpu7x:2x2x1
jax: 0.10.0
libtpu: 0.0.40
codegen_flags: <defaults>
</compile_context>

<pallas_src>
import functools

import numpy as np
import jax
import jax.numpy as jnp
from jax import lax
from jax.experimental import pallas as pl
from jax.experimental.pallas import tpu as pltpu


def _round_up(x, m):
    return ((x + m - 1) // m) * m


# ----------------------------------------------------------------------------
# Fused kernel: leaf transform + full tree recursion in one pallas_call.
# Shapes inside the kernel are the per-grid-tile (batch-blocked) shapes.
# ----------------------------------------------------------------------------
def _fused_tree_lstm_kernel(x_ref, w_word_ref, b_word_ref, w_comp_ref, b_comp_ref,
                            q_ref, len_ref,
                            hfin_ref, cfin_ref, nodes_ref, sel_ref,
                            h_s, c_s, *, matmul_dtype=jnp.float32):
    B, L, Dp = x_ref.shape
    Hp = q_ref.shape[-1]
    G = 5 * Hp
    md = matmul_dtype

    # ---- leaf transform: one flattened, lane-aligned matmul ------------------
    x2 = x_ref[...].reshape(B * L, Dp)
    y2 = jnp.dot(x2.astype(md), w_word_ref[...].astype(md),
                 preferred_element_type=jnp.float32) + b_word_ref[...]
    y = y2.reshape(B, L, 2 * Hp)
    h_leaf = y[..., :Hp]
    c_leaf = y[..., Hp:]
    h_s[...] = h_leaf
    c_s[...] = c_leaf
    # dense, sublane-aligned store of the leaf rows of the node slab
    nodes_ref[:, :L, :] = h_leaf

    # ---- loop-invariant constants hoisted out of the unrolled step loop ------
    w_comp = w_comp_ref[...].astype(md)               # (2Hp, 5Hp), +1 folded in bias
    b_comp = b_comp_ref[...].reshape(1, 1, G)         # (1, 1, 5Hp)
    qv = q_ref[...].reshape(1, 1, Hp)                 # (1, 1, Hp)
    length = len_ref[:, 0, :]                         # (B, 1) float32
    cand_pos = lax.broadcasted_iota(jnp.int32, (1, L), 1).astype(jnp.float32)

    sel_list = []        # per-step one-hot select masks (B, L)
    node_list = []       # per-step selected parent h       (B, Hp)

    # L is small & static here -> unrolled.  TODO(synk): fori_loop at large L.
    for i in range(L - 1):
        h_full = h_s[...]                             # (B, L, Hp)
        c_full = c_s[...]
        # shift-by-one-row copies of the Hp-wide state (row m <- row m+1);
        # the wrapped last row is a dead candidate, killed by the valid mask.
        h_shift = jnp.concatenate([h_full[:, 1:, :], h_full[:, :1, :]], axis=1)
        c_shift = jnp.concatenate([c_full[:, 1:, :], c_full[:, :1, :]], axis=1)

        # single MXU matmul per step on the lane-aligned (left | right) pair
        pair = jnp.concatenate([h_full, h_shift], axis=-1)       # (B, L, 2Hp)
        v = jnp.dot(pair.reshape(B * L, 2 * Hp).astype(md), w_comp,
                    preferred_element_type=jnp.float32).reshape(B, L, G) + b_comp

        i_g = v[..., 0 * Hp:1 * Hp]
        f_l = v[..., 1 * Hp:2 * Hp]     # "+1.0" already folded into the bias
        f_r = v[..., 2 * Hp:3 * Hp]
        u_g = v[..., 3 * Hp:4 * Hp]
        o_g = v[..., 4 * Hp:5 * Hp]
        new_c = (c_full * jax.nn.sigmoid(f_l) + c_shift * jax.nn.sigmoid(f_r)
                 + jnp.tanh(u_g) * jax.nn.sigmoid(i_g))
        new_h = jax.nn.sigmoid(o_g) * jnp.tanh(new_c)

        done = (jnp.float32(i + 1) < length).astype(jnp.float32)  # (B, 1)

        if i < L - 2:
            # select_composition (eval-mode greedy, first-argmax tie-break),
            # implemented with one lane reduce + VPU compares (no MXU).
            comp_w = jnp.sum(new_h * qv, axis=-1)                 # (B, L)
            valid = (cand_pos + jnp.float32(i + 1)) < length      # (B, L) bool
            masked = jnp.where(valid, comp_w, jnp.float32(-1e30))
            rowmax = jnp.max(masked, axis=1, keepdims=True)
            ismax = masked >= rowmax
            pos = jnp.min(jnp.where(ismax, cand_pos, jnp.float32(L)),
                          axis=1, keepdims=True)                  # (B, 1)
            sel = (cand_pos == pos).astype(jnp.float32)           # (B, L) one-hot
            left_m = (cand_pos < pos).astype(jnp.float32)[:, :, None]
            right_m = (cand_pos > pos).astype(jnp.float32)[:, :, None]
            sel_e = sel[:, :, None]

            comb_h = sel_e * new_h + left_m * h_full + right_m * h_shift
            comb_c = sel_e * new_c + left_m * c_full + right_m * c_shift
            selected_h = jnp.sum(sel_e * new_h, axis=1)           # (B, Hp)

            sel_list.append(sel)
            node_list.append(selected_h)
            upd_h, upd_c = comb_h, comb_c
        else:
            upd_h, upd_c = new_h, new_c

        d3 = done[:, :, None]
        h_s[...] = d3 * upd_h + (1.0 - d3) * h_full
        c_s[...] = d3 * upd_c + (1.0 - d3) * c_full

    h_last = h_s[...]
    c_last = c_s[...]
    hfin_ref[...] = h_last[:, 0:1, :]
    cfin_ref[...] = c_last[:, 0:1, :]
    # single dense flush of the interior-node rows + root (sublane-aligned
    # offset L) and of all select masks.
    tail = jnp.concatenate([jnp.stack(node_list, axis=1), h_last[:, 0:1, :]], axis=1)
    nodes_ref[:, L:, :] = tail                                     # (B, L-1, Hp)
    sel_ref[...] = jnp.stack(sel_list, axis=1)                     # (B, L-2, L)


# ----------------------------------------------------------------------------
# Wrapper: host-side lane-aligned weight layout, batch-tiled grid, un-padding.
# ----------------------------------------------------------------------------
def binary_tree_lstm_forward(x, length, params, *, block_batch=None,
                             matmul_dtype=jnp.float32):
    """Runs the fused Pallas kernel; returns (h, c, select_masks, nodes)."""
    f32 = jnp.float32
    B, L, D = x.shape
    H = params['comp_query'].shape[-1]
    Hp = _round_up(H, 128)
    Dp = _round_up(D, 128)

    if block_batch is None:
        # prefer 8 (full sublanes) at production; fall back for tiny demos.
        block_batch = next(bt for bt in (8, 4, 2, 1) if B % bt == 0)
    assert B % block_batch == 0
    nb = B // block_batch

    # ---- host-side padding / re-layout: each gate gets its own 128-lane block
    x_p = jnp.zeros((B, L, Dp), f32).at[:, :, :D].set(x.astype(f32))

    w_word = params['w_word_t'].astype(f32)                # (D, 2H)
    w_word_p = jnp.zeros((Dp, 2 * Hp), f32)
    w_word_p = w_word_p.at[:D, :H].set(w_word[:, :H])
    w_word_p = w_word_p.at[:D, Hp:Hp + H].set(w_word[:, H:])
    b_word = params['b_word'].astype(f32).reshape(2 * H)
    b_word_p = jnp.zeros((1, 2 * Hp), f32)
    b_word_p = b_word_p.at[0, :H].set(b_word[:H])
    b_word_p = b_word_p.at[0, Hp:Hp + H].set(b_word[H:])

    w_comp = params['w_comp_t'].astype(f32)                # (2H, 5H)
    b_comp = params['b_comp'].astype(f32).reshape(5 * H)
    w_comp_p = jnp.zeros((2 * Hp, 5 * Hp), f32)
    b_comp_p = jnp.zeros((1, 5 * Hp), f32)
    for g in range(5):
        blk = w_comp[:, g * H:(g + 1) * H]
        w_comp_p = w_comp_p.at[:H, g * Hp:g * Hp + H].set(blk[:H, :])
        w_comp_p = w_comp_p.at[Hp:Hp + H, g * Hp:g * Hp + H].set(blk[H:, :])
        b_comp_p = b_comp_p.at[0, g * Hp:g * Hp + H].set(b_comp[g * H:(g + 1) * H])
    # fold the forget-gate "+1.0" into the bias once (gates 1 and 2)
    for g in (1, 2):
        b_comp_p = b_comp_p.at[0, g * Hp:g * Hp + H].add(1.0)

    q_p = jnp.zeros((1, Hp), f32).at[0, :H].set(
        params['comp_query'].astype(f32).reshape(H))
    len_p = length.astype(f32).reshape(B, 1, 1)

    kernel = functools.partial(_fused_tree_lstm_kernel, matmul_dtype=matmul_dtype)

    out_shape = (
        jax.ShapeDtypeStruct((B, 1, Hp), f32),             # h final
        jax.ShapeDtypeStruct((B, 1, Hp), f32),             # c final
        jax.ShapeDtypeStruct((B, 2 * L - 1, Hp), f32),     # nodes slab
        jax.ShapeDtypeStruct((B, L - 2, L), f32),          # select-mask slab
    )
    in_specs = [
        pl.BlockSpec((block_batch, L, Dp), lambda b: (b, 0, 0)),   # x
        pl.BlockSpec((Dp, 2 * Hp), lambda b: (0, 0)),              # w_word
        pl.BlockSpec((1, 2 * Hp), lambda b: (0, 0)),               # b_word
        pl.BlockSpec((2 * Hp, 5 * Hp), lambda b: (0, 0)),          # w_comp
        pl.BlockSpec((1, 5 * Hp), lambda b: (0, 0)),               # b_comp (+1 folded)
        pl.BlockSpec((1, Hp), lambda b: (0, 0)),                   # comp_query
        pl.BlockSpec((block_batch, 1, 1), lambda b: (b, 0, 0)),    # length
    ]
    out_specs = (
        pl.BlockSpec((block_batch, 1, Hp), lambda b: (b, 0, 0)),
        pl.BlockSpec((block_batch, 1, Hp), lambda b: (b, 0, 0)),
        pl.BlockSpec((block_batch, 2 * L - 1, Hp), lambda b: (b, 0, 0)),
        pl.BlockSpec((block_batch, L - 2, L), lambda b: (b, 0, 0)),
    )

    h_fin, c_fin, nodes_p, sel_slab = pl.pallas_call(
        kernel,
        out_shape=out_shape,
        grid=(nb,),
        in_specs=in_specs,
        out_specs=out_specs,
        scratch_shapes=[pltpu.VMEM((block_batch, L, Hp), f32),
                        pltpu.VMEM((block_batch, L, Hp), f32)],
        compiler_params=pltpu.CompilerParams(
            dimension_semantics=("parallel",),
            vmem_limit_bytes=32 * 1024 * 1024),
    )(x_p, w_word_p, b_word_p, w_comp_p, b_comp_p, q_p, len_p)

    # Un-pad back to the PyTorch interface (wrapper-side layout plumbing).
    h = h_fin[:, 0, :H]
    c = c_fin[:, 0, :H]
    nodes = nodes_p[:, :, :H]
    select_masks = [sel_slab[:, i, :L - 1 - i] for i in range(L - 2)]
    return h, c, select_masks, nodes


# ----------------------------------------------------------------------------
# Pure-JAX reference (mirrors the PyTorch forward, shrinking shapes).
# ----------------------------------------------------------------------------
def ref_forward(x, length, params):
    B, L, _ = x.shape
    H = params['comp_query'].shape[-1]
    q = params['comp_query']
    w = params['w_comp_t']
    b = params['b_comp']
    length_mask = (jnp.arange(L)[None, :] < length[:, None]).astype(jnp.float32)

    y = jnp.einsum('bld,dk->blk', x, params['w_word_t']) + params['b_word'][None, :, :]
    h, c = y[..., :H], y[..., H:]
    nodes = [h]
    select_masks = []
    for i in range(L - 1):
        hl, hr = h[:, :-1, :], h[:, 1:, :]
        cl, cr = c[:, :-1, :], c[:, 1:, :]
        hlr = jnp.concatenate([hl, hr], axis=2)
        v = jnp.einsum('bmk,kg->bmg', hlr, w) + b[None, :, :]
        i_g, f_l, f_r, u, o = [v[..., k * H:(k + 1) * H] for k in range(5)]
        new_c = (cl * jax.nn.sigmoid(f_l + 1.0) + cr * jax.nn.sigmoid(f_r + 1.0)
                 + jnp.tanh(u) * jax.nn.sigmoid(i_g))
        new_h = jax.nn.sigmoid(o) * jnp.tanh(new_c)
        done = length_mask[:, i + 1][:, None, None]
        if i < L - 2:
            mask = length_mask[:, i + 1:]
            comp_w = jnp.sum(new_h * q[:, None, :], axis=-1)
            masked = jnp.where(mask > 0.5, comp_w, -1e30)
            sel = jax.nn.one_hot(jnp.argmax(masked, axis=1), masked.shape[1],
                                 dtype=jnp.float32)
            cs = jnp.cumsum(sel, axis=1)
            left_m = (1.0 - cs)[:, :, None]
            right_m = jnp.concatenate([jnp.zeros((B, 1), jnp.float32), cs[:, :-1]],
                                      axis=1)[:, :, None]
            comb_h = sel[:, :, None] * new_h + left_m * hl + right_m * hr
            comb_c = sel[:, :, None] * new_c + left_m * cl + right_m * cr
            selected_h = jnp.sum(sel[:, :, None] * comb_h, axis=1)
            select_masks.append(sel)
            nodes.append(selected_h[:, None, :])
            upd_h, upd_c = comb_h, comb_c
        else:
            upd_h, upd_c = new_h, new_c
        h = done * upd_h + (1.0 - done) * hl
        c = done * upd_c + (1.0 - done) * cl
        if i >= L - 2:
            nodes.append(h)
    return h[:, 0, :], c[:, 0, :], select_masks, jnp.concatenate(nodes, axis=1)


# ----------------------------------------------------------------------------
# Host-side integer bookkeeping, mirrors _select_masks_to_boundaries.
# ----------------------------------------------------------------------------
def select_masks_to_boundaries(select_masks_np, max_length):
    B = select_masks_np[0].shape[0]
    results = []
    for bi in range(B):
        node_covers = [[j, j] for j in range(max_length)]
        res = []
        for node_idx in range(max_length - 2):
            sel = select_masks_np[node_idx][bi]
            idx = int(np.argmax(sel))
            merge = [node_covers[idx][0], node_covers[idx + 1][1]]
            node_covers = node_covers[:idx] + [merge] + node_covers[idx + 2:]
            res.append(merge)
        results.append(res)
    return np.asarray(results, dtype=np.int64)                     # (B, L-2, 2)


if __name__ == "__main__":
    B, L, D, H = 4, 8, 16, 32
    key = jax.random.PRNGKey(0)
    kx, kw1, kw2, kq = jax.random.split(key, 4)

    # Deterministic parameter init matching reset_parameters():
    #   word_linear: kaiming_normal_ (fan_in=D),  bias 0
    #   comp_linear: kaiming_normal_ (fan_in=2H), bias 0
    #   comp_query:  N(0, 0.01)
    params = {
        'w_word_t': (jax.random.normal(kw1, (2 * H, D), jnp.float32)
                     * jnp.sqrt(2.0 / D)).T,                       # (D, 2H)
        'b_word': jnp.zeros((1, 2 * H), jnp.float32),
        'w_comp_t': (jax.random.normal(kw2, (5 * H, 2 * H), jnp.float32)
                     * jnp.sqrt(2.0 / (2 * H))).T,                 # (2H, 5H)
        'b_comp': jnp.zeros((1, 5 * H), jnp.float32),
        'comp_query': jax.random.normal(kq, (1, H), jnp.float32) * 0.01,
    }

    x = jax.random.normal(kx, (B, L, D), jnp.float32)
    length = jnp.array([8, 6, 5, 7], dtype=jnp.int32)

    # block_batch=2 -> grid=(2,), exercising the batch-parallel grid path.
    h, c, select_masks, nodes = binary_tree_lstm_forward(
        x, length, params, block_batch=2, matmul_dtype=jnp.float32)
    h = jax.block_until_ready(h)
    c = jax.block_until_ready(c)
    nodes = jax.block_until_ready(nodes)
    select_masks = [jax.block_until_ready(s) for s in select_masks]

    # boundaries = cat(leaf, median, root) along the node axis (host-side ints)
    sm_np = [np.asarray(s) for s in select_masks]
    median = select_masks_to_boundaries(sm_np, L)
    leaf = np.tile(np.arange(L)[None, :, None], (B, 1, 2)).astype(np.int64)
    root = np.zeros((B, 1, 2), np.int64)
    root[:, :, 1] = L - 1
    boundaries = np.concatenate([leaf, median, root], axis=1)

    # correctness vs pure-JAX reference
    h_r, c_r, sm_r, nodes_r = ref_forward(x, length, params)
    np.testing.assert_allclose(np.asarray(h), np.asarray(h_r), rtol=1e-2, atol=1e-2)
    np.testing.assert_allclose(np.asarray(c), np.asarray(c_r), rtol=1e-2, atol=1e-2)
    np.testing.assert_allclose(np.asarray(nodes), np.asarray(nodes_r), rtol=1e-2, atol=1e-2)

    assert h.shape == (B, H) and c.shape == (B, H)
    assert nodes.shape == (B, 2 * L - 1, H)
    assert boundaries.shape == (B, 2 * L - 1, 2)
    assert len(select_masks) == L - 2
    assert all(select_masks[i].shape == (B, L - 1 - i) for i in range(L - 2))

    print("KERNEL_OK")
</pallas_src>

<mosaic_0001>
module attributes {stable_mosaic.version = 11 : i64} {
  func.func @_fused_tree_lstm_kernel(%arg0: i32, %arg1: memref<2x8x128xf32, #tpu.memory_space<vmem>>, %arg2: memref<128x256xf32, #tpu.memory_space<vmem>>, %arg3: memref<1x256xf32, #tpu.memory_space<vmem>>, %arg4: memref<256x640xf32, #tpu.memory_space<vmem>>, %arg5: memref<1x640xf32, #tpu.memory_space<vmem>>, %arg6: memref<1x128xf32, #tpu.memory_space<vmem>>, %arg7: memref<2x1x1xf32, #tpu.memory_space<vmem>>, %arg8: memref<2x1x128xf32, #tpu.memory_space<vmem>>, %arg9: memref<2x1x128xf32, #tpu.memory_space<vmem>>, %arg10: memref<2x15x128xf32, #tpu.memory_space<vmem>>, %arg11: memref<2x6x8xf32, #tpu.memory_space<vmem>>, %arg12: memref<2x8x128xf32, #tpu.memory_space<vmem>>, %arg13: memref<2x8x128xf32, #tpu.memory_space<vmem>>) attributes {dimension_semantics = [#tpu.dimension_semantics<parallel>], iteration_bounds = array<i64: 2>, scalar_prefetch = 0 : i64, scratch_operands = 2 : i64, tpu.core_type = #tpu.core_type<tc>, window_params = [{transform_indices = @transform_0, window_bounds = array<i64: 2, 8, 128>}, {pipeline_mode = #tpu.pipeline_mode<synchronous>, transform_indices = @transform_1, window_bounds = array<i64: 128, 256>}, {pipeline_mode = #tpu.pipeline_mode<synchronous>, transform_indices = @transform_2, window_bounds = array<i64: 1, 256>}, {pipeline_mode = #tpu.pipeline_mode<synchronous>, transform_indices = @transform_3, window_bounds = array<i64: 256, 640>}, {pipeline_mode = #tpu.pipeline_mode<synchronous>, transform_indices = @transform_4, window_bounds = array<i64: 1, 640>}, {pipeline_mode = #tpu.pipeline_mode<synchronous>, transform_indices = @transform_5, window_bounds = array<i64: 1, 128>}, {transform_indices = @transform_6, window_bounds = array<i64: 2, 1, 1>}, {transform_indices = @transform_7, window_bounds = array<i64: 2, 1, 128>}, {transform_indices = @transform_8, window_bounds = array<i64: 2, 1, 128>}, {transform_indices = @transform_9, window_bounds = array<i64: 2, 15, 128>}, {transform_indices = @transform_10, window_bounds = array<i64: 2, 6, 8>}]} {
    %c0 = arith.constant 0 : index
    %c0_0 = arith.constant 0 : index
    %c0_1 = arith.constant 0 : index
    %0 = vector.load %arg1[%c0, %c0_0, %c0_1] : memref<2x8x128xf32, #tpu.memory_space<vmem>>, vector<2x8x128xf32>
    %1 = vector.shape_cast %0 : vector<2x8x128xf32> to vector<16x128xf32>
    %c0_2 = arith.constant 0 : index
    %c0_3 = arith.constant 0 : index
    %2 = vector.load %arg2[%c0_2, %c0_3] : memref<128x256xf32, #tpu.memory_space<vmem>>, vector<128x256xf32>
    %cst = arith.constant dense<0.000000e+00> : vector<16x256xf32>
    %3 = tpu.matmul %1, %2, %cst {dimension_numbers = #tpu.dot_dimension_numbers<[1], [0], [0], [1], [0, 0, 1, 1], [], []>} : vector<16x128xf32>, vector<128x256xf32>, vector<16x256xf32> -> vector<16x256xf32>
    %c0_4 = arith.constant 0 : index
    %c0_5 = arith.constant 0 : index
    %4 = vector.load %arg3[%c0_4, %c0_5] : memref<1x256xf32, #tpu.memory_space<vmem>>, vector<1x256xf32>
    %5 = vector.broadcast %4 : vector<1x256xf32> to vector<16x256xf32>
    %6 = arith.addf %3, %5 : vector<16x256xf32>
    %7 = vector.shape_cast %6 : vector<16x256xf32> to vector<2x8x256xf32>
    %8 = vector.extract_strided_slice %7 {offsets = [0, 0, 0], sizes = [2, 8, 128], strides = [1, 1, 1]} : vector<2x8x256xf32> to vector<2x8x128xf32>
    %9 = vector.extract_strided_slice %7 {offsets = [0, 0, 128], sizes = [2, 8, 128], strides = [1, 1, 1]} : vector<2x8x256xf32> to vector<2x8x128xf32>
    %c0_6 = arith.constant 0 : index
    %c0_7 = arith.constant 0 : index
    %c0_8 = arith.constant 0 : index
    %10 = vector.load %arg12[%c0_6, %c0_7, %c0_8] : memref<2x8x128xf32, #tpu.memory_space<vmem>>, vector<2x8x128xf32>
    tpu.vector_store %arg12[%c0_6, %c0_7, %c0_8], %8 {strides = array<i32>} : memref<2x8x128xf32, #tpu.memory_space<vmem>>, vector<2x8x128xf32>,
    %c0_9 = arith.constant 0 : index
    %c0_10 = arith.constant 0 : index
    %c0_11 = arith.constant 0 : index
    %11 = vector.load %arg13[%c0_9, %c0_10, %c0_11] : memref<2x8x128xf32, #tpu.memory_space<vmem>>, vector<2x8x128xf32>
    tpu.vector_store %arg13[%c0_9, %c0_10, %c0_11], %9 {strides = array<i32>} : memref<2x8x128xf32, #tpu.memory_space<vmem>>, vector<2x8x128xf32>,
    %c0_12 = arith.constant 0 : index
    %c0_13 = arith.constant 0 : index
    %c0_14 = arith.constant 0 : index
    %12 = vector.load %arg10[%c0_12, %c0_13, %c0_14] : memref<2x15x128xf32, #tpu.memory_space<vmem>>, vector<2x8x128xf32>
    tpu.vector_store %arg10[%c0_12, %c0_13, %c0_14], %8 {strides = array<i32>} : memref<2x15x128xf32, #tpu.memory_space<vmem>>, vector<2x8x128xf32>,
    %c0_15 = arith.constant 0 : index
    %c0_16 = arith.constant 0 : index
    %13 = vector.load %arg4[%c0_15, %c0_16] : memref<256x640xf32, #tpu.memory_space<vmem>>, vector<256x640xf32>
    %c0_17 = arith.constant 0 : index
    %c0_18 = arith.constant 0 : index
    %14 = vector.load %arg5[%c0_17, %c0_18] : memref<1x640xf32, #tpu.memory_space<vmem>>, vector<1x640xf32>
    %15 = vector.shape_cast %14 : vector<1x640xf32> to vector<1x1x640xf32>
    %c0_19 = arith.constant 0 : index
    %c0_20 = arith.constant 0 : index
    %16 = vector.load %arg6[%c0_19, %c0_20] : memref<1x128xf32, #tpu.memory_space<vmem>>, vector<1x128xf32>
    %17 = vector.shape_cast %16 : vector<1x128xf32> to vector<1x1x128xf32>
    %c0_21 = arith.constant 0 : index
    %c0_22 = arith.constant 0 : index
    %c0_23 = arith.constant 0 : index
    %18 = vector.load %arg7[%c0_21, %c0_22, %c0_23] : memref<2x1x1xf32, #tpu.memory_space<vmem>>, vector<2x1x1xf32>
    %19 = vector.shape_cast %18 : vector<2x1x1xf32> to vector<2x1xf32>
    %20 = tpu.iota {dimensions = array<i32: 1>} : vector<1x8xi32>
    %21 = arith.sitofp %20 : vector<1x8xi32> to vector<1x8xf32>
    %c0_24 = arith.constant 0 : index
    %c0_25 = arith.constant 0 : index
    %c0_26 = arith.constant 0 : index
    %22 = vector.load %arg12[%c0_24, %c0_25, %c0_26] : memref<2x8x128xf32, #tpu.memory_space<vmem>>, vector<2x8x128xf32>
    %c0_27 = arith.constant 0 : index
    %c0_28 = arith.constant 0 : index
    %c0_29 = arith.constant 0 : index
    %23 = vector.load %arg13[%c0_27, %c0_28, %c0_29] : memref<2x8x128xf32, #tpu.memory_space<vmem>>, vector<2x8x128xf32>
    %24 = vector.extract_strided_slice %22 {offsets = [0, 1, 0], sizes = [2, 7, 128], strides = [1, 1, 1]} : vector<2x8x128xf32> to vector<2x7x128xf32>
    %25 = vector.extract_strided_slice %22 {offsets = [0, 0, 0], sizes = [2, 1, 128], strides = [1, 1, 1]} : vector<2x8x128xf32> to vector<2x1x128xf32>
    %26 = tpu.concatenate %24, %25 in 1 : vector<2x7x128xf32>, vector<2x1x128xf32> -> vector<2x8x128xf32>
    %27 = vector.extract_strided_slice %23 {offsets = [0, 1, 0], sizes = [2, 7, 128], strides = [1, 1, 1]} : vector<2x8x128xf32> to vector<2x7x128xf32>
    %28 = vector.extract_strided_slice %23 {offsets = [0, 0, 0], sizes = [2, 1, 128], strides = [1, 1, 1]} : vector<2x8x128xf32> to vector<2x1x128xf32>
    %29 = tpu.concatenate %27, %28 in 1 : vector<2x7x128xf32>, vector<2x1x128xf32> -> vector<2x8x128xf32>
    %30 = tpu.concatenate %22, %26 in 2 : vector<2x8x128xf32>, vector<2x8x128xf32> -> vector<2x8x256xf32>
    %31 = vector.shape_cast %30 : vector<2x8x256xf32> to vector<16x256xf32>
    %cst_30 = arith.constant dense<0.000000e+00> : vector<16x640xf32>
    %32 = tpu.matmul %31, %13, %cst_30 {dimension_numbers = #tpu.dot_dimension_numbers<[1], [0], [0], [1], [0, 0, 1, 1], [], []>} : vector<16x256xf32>, vector<256x640xf32>, vector<16x640xf32> -> vector<16x640xf32>
    %33 = vector.shape_cast %32 : vector<16x640xf32> to vector<2x8x640xf32>
    %34 = vector.broadcast %15 : vector<1x1x640xf32> to vector<2x8x640xf32>
    %35 = arith.addf %33, %34 : vector<2x8x640xf32>
    %36 = vector.extract_strided_slice %35 {offsets = [0, 0, 0], sizes = [2, 8, 128], strides = [1, 1, 1]} : vector<2x8x640xf32> to vector<2x8x128xf32>
    %37 = vector.extract_strided_slice %35 {offsets = [0, 0, 128], sizes = [2, 8, 128], strides = [1, 1, 1]} : vector<2x8x640xf32> to vector<2x8x128xf32>
    %38 = vector.extract_strided_slice %35 {offsets = [0, 0, 256], sizes = [2, 8, 128], strides = [1, 1, 1]} : vector<2x8x640xf32> to vector<2x8x128xf32>
    %39 = vector.extract_strided_slice %35 {offsets = [0, 0, 384], sizes = [2, 8, 128], strides = [1, 1, 1]} : vector<2x8x640xf32> to vector<2x8x128xf32>
    %40 = vector.extract_strided_slice %35 {offsets = [0, 0, 512], sizes = [2, 8, 128], strides = [1, 1, 1]} : vector<2x8x640xf32> to vector<2x8x128xf32>
    %41 = arith.negf %37 : vector<2x8x128xf32>
    %42 = math.exp %41 : vector<2x8x128xf32>
    %cst_31 = arith.constant 1.000000e+00 : f32
    %43 = vector.broadcast %cst_31 : f32 to vector<2x8x128xf32>
    %44 = arith.addf %43, %42 : vector<2x8x128xf32>
    %45 = arith.divf %43, %44 : vector<2x8x128xf32>
    %46 = arith.mulf %23, %45 : vector<2x8x128xf32>
    %47 = arith.negf %38 : vector<2x8x128xf32>
    %48 = math.exp %47 : vector<2x8x128xf32>
    %cst_32 = arith.constant 1.000000e+00 : f32
    %49 = vector.broadcast %cst_32 : f32 to vector<2x8x128xf32>
    %50 = arith.addf %49, %48 : vector<2x8x128xf32>
    %51 = arith.divf %49, %50 : vector<2x8x128xf32>
    %52 = arith.mulf %29, %51 : vector<2x8x128xf32>
    %53 = arith.addf %46, %52 : vector<2x8x128xf32>
    %54 = math.tanh %39 : vector<2x8x128xf32>
    %55 = arith.negf %36 : vector<2x8x128xf32>
    %56 = math.exp %55 : vector<2x8x128xf32>
    %cst_33 = arith.constant 1.000000e+00 : f32
    %57 = vector.broadcast %cst_33 : f32 to vector<2x8x128xf32>
    %58 = arith.addf %57, %56 : vector<2x8x128xf32>
    %59 = arith.divf %57, %58 : vector<2x8x128xf32>
    %60 = arith.mulf %54, %59 : vector<2x8x128xf32>
    %61 = arith.addf %53, %60 : vector<2x8x128xf32>
    %62 = arith.negf %40 : vector<2x8x128xf32>
    %63 = math.exp %62 : vector<2x8x128xf32>
    %cst_34 = arith.constant 1.000000e+00 : f32
    %64 = vector.broadcast %cst_34 : f32 to vector<2x8x128xf32>
    %65 = arith.addf %64, %63 : vector<2x8x128xf32>
    %66 = arith.divf %64, %65 : vector<2x8x128xf32>
    %67 = math.tanh %61 : vector<2x8x128xf32>
    %68 = arith.mulf %66, %67 : vector<2x8x128xf32>
    %cst_35 = arith.constant 1.000000e+00 : f32
    %69 = vector.broadcast %cst_35 : f32 to vector<2x1xf32>
    %70 = arith.cmpf olt, %69, %19 : vector<2x1xf32>
    %71 = arith.extui %70 : vector<2x1xi1> to vector<2x1xi32>
    %72 = arith.sitofp %71 : vector<2x1xi32> to vector<2x1xf32>
    %73 = vector.broadcast %17 : vector<1x1x128xf32> to vector<2x8x128xf32>
    %74 = arith.mulf %68, %73 : vector<2x8x128xf32>
    %cst_36 = arith.constant dense<0.000000e+00> : vector<2x8xf32>
    %75 = vector.multi_reduction <add>, %74, %cst_36 [2] : vector<2x8x128xf32> to vector<2x8xf32>
    %cst_37 = arith.constant 1.000000e+00 : f32
    %76 = vector.broadcast %cst_37 : f32 to vector<1x8xf32>
    %77 = arith.addf %21, %76 : vector<1x8xf32>
    %78 = vector.broadcast %77 : vector<1x8xf32> to vector<2x8xf32>
    %79 = vector.broadcast %19 : vector<2x1xf32> to vector<2x8xf32>
    %80 = arith.cmpf olt, %78, %79 : vector<2x8xf32>
    %cst_38 = arith.constant -1.000000e+30 : f32
    %81 = vector.broadcast %cst_38 : f32 to vector<2x8xf32>
    %82 = arith.select %80, %75, %81 : vector<2x8xi1>, vector<2x8xf32>
    %cst_39 = arith.constant dense<0xFF800000> : vector<2xf32>
    %83 = vector.multi_reduction <maximumf>, %82, %cst_39 [1] : vector<2x8xf32> to vector<2xf32>
    %84 = vector.shape_cast %83 : vector<2xf32> to vector<2x1xf32>
    %85 = vector.broadcast %84 : vector<2x1xf32> to vector<2x8xf32>
    %86 = arith.cmpf oge, %82, %85 : vector<2x8xf32>
    %cst_40 = arith.constant 8.000000e+00 : f32
    %87 = vector.shape_cast %21 : vector<1x8xf32> to vector<1x8xf32>
    %88 = vector.broadcast %87 : vector<1x8xf32> to vector<2x8xf32>
    %89 = vector.broadcast %cst_40 : f32 to vector<2x8xf32>
    %90 = arith.select %86, %88, %89 : vector<2x8xi1>, vector<2x8xf32>
    %cst_41 = arith.constant dense<0x7F800000> : vector<2xf32>
    %91 = vector.multi_reduction <minimumf>, %90, %cst_41 [1] : vector<2x8xf32> to vector<2xf32>
    %92 = vector.shape_cast %91 : vector<2xf32> to vector<2x1xf32>
    %93 = vector.broadcast %21 : vector<1x8xf32> to vector<2x8xf32>
    %94 = vector.broadcast %92 : vector<2x1xf32> to vector<2x8xf32>
    %95 = arith.cmpf oeq, %93, %94 : vector<2x8xf32>
    %96 = arith.extui %95 : vector<2x8xi1> to vector<2x8xi32>
    %97 = arith.sitofp %96 : vector<2x8xi32> to vector<2x8xf32>
    %98 = vector.broadcast %21 : vector<1x8xf32> to vector<2x8xf32>
    %99 = vector.broadcast %92 : vector<2x1xf32> to vector<2x8xf32>
    %100 = arith.cmpf olt, %98, %99 : vector<2x8xf32>
    %101 = arith.extui %100 : vector<2x8xi1> to vector<2x8xi32>
    %102 = arith.sitofp %101 : vector<2x8xi32> to vector<2x8xf32>
    %103 = vector.shape_cast %102 : vector<2x8xf32> to vector<2x8x1xf32>
    %104 = vector.broadcast %21 : vector<1x8xf32> to vector<2x8xf32>
    %105 = vector.broadcast %92 : vector<2x1xf32> to vector<2x8xf32>
    %106 = arith.cmpf ogt, %104, %105 : vector<2x8xf32>
    %107 = arith.extui %106 : vector<2x8xi1> to vector<2x8xi32>
    %108 = arith.sitofp %107 : vector<2x8xi32> to vector<2x8xf32>
    %109 = vector.shape_cast %108 : vector<2x8xf32> to vector<2x8x1xf32>
    %110 = vector.shape_cast %97 : vector<2x8xf32> to vector<2x8x1xf32>
    %111 = vector.broadcast %110 : vector<2x8x1xf32> to vector<2x8x128xf32>
    %112 = arith.mulf %111, %68 : vector<2x8x128xf32>
    %113 = vector.broadcast %103 : vector<2x8x1xf32> to vector<2x8x128xf32>
    %114 = arith.mulf %113, %22 : vector<2x8x128xf32>
    %115 = arith.addf %112, %114 : vector<2x8x128xf32>
    %116 = vector.broadcast %109 : vector<2x8x1xf32> to vector<2x8x128xf32>
    %117 = arith.mulf %116, %26 : vector<2x8x128xf32>
    %118 = arith.addf %115, %117 : vector<2x8x128xf32>
    %119 = vector.broadcast %110 : vector<2x8x1xf32> to vector<2x8x128xf32>
    %120 = arith.mulf %119, %61 : vector<2x8x128xf32>
    %121 = vector.broadcast %103 : vector<2x8x1xf32> to vector<2x8x128xf32>
    %122 = arith.mulf %121, %23 : vector<2x8x128xf32>
    %123 = arith.addf %120, %122 : vector<2x8x128xf32>
    %124 = vector.broadcast %109 : vector<2x8x1xf32> to vector<2x8x128xf32>
    %125 = arith.mulf %124, %29 : vector<2x8x128xf32>
    %126 = arith.addf %123, %125 : vector<2x8x128xf32>
    %127 = vector.broadcast %110 : vector<2x8x1xf32> to vector<2x8x128xf32>
    %128 = arith.mulf %127, %68 : vector<2x8x128xf32>
    %cst_42 = arith.constant dense<0.000000e+00> : vector<2x128xf32>
    %129 = vector.multi_reduction <add>, %128, %cst_42 [1] : vector<2x8x128xf32> to vector<2x128xf32>
    %130 = vector.shape_cast %72 : vector<2x1xf32> to vector<2x1x1xf32>
    %131 = vector.broadcast %130 : vector<2x1x1xf32> to vector<2x8x128xf32>
    %132 = arith.mulf %131, %118 : vector<2x8x128xf32>
    %cst_43 = arith.constant 1.000000e+00 : f32
    %133 = vector.broadcast %cst_43 : f32 to vector<2x1x1xf32>
    %134 = arith.subf %133, %130 : vector<2x1x1xf32>
    %135 = vector.broadcast %134 : vector<2x1x1xf32> to vector<2x8x128xf32>
    %136 = arith.mulf %135, %22 : vector<2x8x128xf32>
    %137 = arith.addf %132, %136 : vector<2x8x128xf32>
    %c0_44 = arith.constant 0 : index
    %c0_45 = arith.constant 0 : index
    %c0_46 = arith.constant 0 : index
    %138 = vector.load %arg12[%c0_44, %c0_45, %c0_46] : memref<2x8x128xf32, #tpu.memory_space<vmem>>, vector<2x8x128xf32>
    tpu.vector_store %arg12[%c0_44, %c0_45, %c0_46], %137 {strides = array<i32>} : memref<2x8x128xf32, #tpu.memory_space<vmem>>, vector<2x8x128xf32>,
    %139 = vector.broadcast %130 : vector<2x1x1xf32> to vector<2x8x128xf32>
    %140 = arith.mulf %139, %126 : vector<2x8x128xf32>
    %cst_47 = arith.constant 1.000000e+00 : f32
    %141 = vector.broadcast %cst_47 : f32 to vector<2x1x1xf32>
    %142 = arith.subf %141, %130 : vector<2x1x1xf32>
    %143 = vector.broadcast %142 : vector<2x1x1xf32> to vector<2x8x128xf32>
    %144 = arith.mulf %143, %23 : vector<2x8x128xf32>
    %145 = arith.addf %140, %144 : vector<2x8x128xf32>
    %c0_48 = arith.constant 0 : index
    %c0_49 = arith.constant 0 : index
    %c0_50 = arith.constant 0 : index
    %146 = vector.load %arg13[%c0_48, %c0_49, %c0_50] : memref<2x8x128xf32, #tpu.memory_space<vmem>>, vector<2x8x128xf32>
    tpu.vector_store %arg13[%c0_48, %c0_49, %c0_50], %145 {strides = array<i32>} : memref<2x8x128xf32, #tpu.memory_space<vmem>>, vector<2x8x128xf32>,
    %c0_51 = arith.constant 0 : index
    %c0_52 = arith.constant 0 : index
    %c0_53 = arith.constant 0 : index
    %147 = vector.load %arg12[%c0_51, %c0_52, %c0_53] : memref<2x8x128xf32, #tpu.memory_space<vmem>>, vector<2x8x128xf32>
    %c0_54 = arith.constant 0 : index
    %c0_55 = arith.constant 0 : index
    %c0_56 = arith.constant 0 : index
    %148 = vector.load %arg13[%c0_54, %c0_55, %c0_56] : memref<2x8x128xf32, #tpu.memory_space<vmem>>, vector<2x8x128xf32>
    %149 = vector.extract_strided_slice %147 {offsets = [0, 1, 0], sizes = [2, 7, 128], strides = [1, 1, 1]} : vector<2x8x128xf32> to vector<2x7x128xf32>
    %150 = vector.extract_strided_slice %147 {offsets = [0, 0, 0], sizes = [2, 1, 128], strides = [1, 1, 1]} : vector<2x8x128xf32> to vector<2x1x128xf32>
    %151 = tpu.concatenate %149, %150 in 1 : vector<2x7x128xf32>, vector<2x1x128xf32> -> vector<2x8x128xf32>
    %152 = vector.extract_strided_slice %148 {offsets = [0, 1, 0], sizes = [2, 7, 128], strides = [1, 1, 1]} : vector<2x8x128xf32> to vector<2x7x128xf32>
    %153 = vector.extract_strided_slice %148 {offsets = [0, 0, 0], sizes = [2, 1, 128], strides = [1, 1, 1]} : vector<2x8x128xf32> to vector<2x1x128xf32>
    %154 = tpu.concatenate %152, %153 in 1 : vector<2x7x128xf32>, vector<2x1x128xf32> -> vector<2x8x128xf32>
    %155 = tpu.concatenate %147, %151 in 2 : vector<2x8x128xf32>, vector<2x8x128xf32> -> vector<2x8x256xf32>
    %156 = vector.shape_cast %155 : vector<2x8x256xf32> to vector<16x256xf32>
    %cst_57 = arith.constant dense<0.000000e+00> : vector<16x640xf32>
    %157 = tpu.matmul %156, %13, %cst_57 {dimension_numbers = #tpu.dot_dimension_numbers<[1], [0], [0], [1], [0, 0, 1, 1], [], []>} : vector<16x256xf32>, vector<256x640xf32>, vector<16x640xf32> -> vector<16x640xf32>
    %158 = vector.shape_cast %157 : vector<16x640xf32> to vector<2x8x640xf32>
    %159 = vector.broadcast %15 : vector<1x1x640xf32> to vector<2x8x640xf32>
    %160 = arith.addf %158, %159 : vector<2x8x640xf32>
    %161 = vector.extract_strided_slice %160 {offsets = [0, 0, 0], sizes = [2, 8, 128], strides = [1, 1, 1]} : vector<2x8x640xf32> to vector<2x8x128xf32>
    %162 = vector.extract_strided_slice %160 {offsets = [0, 0, 128], sizes = [2, 8, 128], strides = [1, 1, 1]} : vector<2x8x640xf32> to vector<2x8x128xf32>
    %163 = vector.extract_strided_slice %160 {offsets = [0, 0, 256], sizes = [2, 8, 128], strides = [1, 1, 1]} : vector<2x8x640xf32> to vector<2x8x128xf32>
    %164 = vector.extract_strided_slice %160 {offsets = [0, 0, 384], sizes = [2, 8, 128], strides = [1, 1, 1]} : vector<2x8x640xf32> to vector<2x8x128xf32>
    %165 = vector.extract_strided_slice %160 {offsets = [0, 0, 512], sizes = [2, 8, 128], strides = [1, 1, 1]} : vector<2x8x640xf32> to vector<2x8x128xf32>
    %166 = arith.negf %162 : vector<2x8x128xf32>
    %167 = math.exp %166 : vector<2x8x128xf32>
    %cst_58 = arith.constant 1.000000e+00 : f32
    %168 = vector.broadcast %cst_58 : f32 to vector<2x8x128xf32>
    %169 = arith.addf %168, %167 : vector<2x8x128xf32>
    %170 = arith.divf %168, %169 : vector<2x8x128xf32>
    %171 = arith.mulf %148, %170 : vector<2x8x128xf32>
    %172 = arith.negf %163 : vector<2x8x128xf32>
    %173 = math.exp %172 : vector<2x8x128xf32>
    %cst_59 = arith.constant 1.000000e+00 : f32
    %174 = vector.broadcast %cst_59 : f32 to vector<2x8x128xf32>
    %175 = arith.addf %174, %173 : vector<2x8x128xf32>
    %176 = arith.divf %174, %175 : vector<2x8x128xf32>
    %177 = arith.mulf %154, %176 : vector<2x8x128xf32>
    %178 = arith.addf %171, %177 : vector<2x8x128xf32>
    %179 = math.tanh %164 : vector<2x8x128xf32>
    %180 = arith.negf %161 : vector<2x8x128xf32>
    %181 = math.exp %180 : vector<2x8x128xf32>
    %cst_60 = arith.constant 1.000000e+00 : f32
    %182 = vector.broadcast %cst_60 : f32 to vector<2x8x128xf32>
    %183 = arith.addf %182, %181 : vector<2x8x128xf32>
    %184 = arith.divf %182, %183 : vector<2x8x128xf32>
    %185 = arith.mulf %179, %184 : vector<2x8x128xf32>
    %186 = arith.addf %178, %185 : vector<2x8x128xf32>
    %187 = arith.negf %165 : vector<2x8x128xf32>
    %188 = math.exp %187 : vector<2x8x128xf32>
    %cst_61 = arith.constant 1.000000e+00 : f32
    %189 = vector.broadcast %cst_61 : f32 to vector<2x8x128xf32>
    %190 = arith.addf %189, %188 : vector<2x8x128xf32>
    %191 = arith.divf %189, %190 : vector<2x8x128xf32>
    %192 = math.tanh %186 : vector<2x8x128xf32>
    %193 = arith.mulf %191, %192 : vector<2x8x128xf32>
    %cst_62 = arith.constant 2.000000e+00 : f32
    %194 = vector.broadcast %cst_62 : f32 to vector<2x1xf32>
    %195 = arith.cmpf olt, %194, %19 : vector<2x1xf32>
    %196 = arith.extui %195 : vector<2x1xi1> to vector<2x1xi32>
    %197 = arith.sitofp %196 : vector<2x1xi32> to vector<2x1xf32>
    %198 = vector.broadcast %17 : vector<1x1x128xf32> to vector<2x8x128xf32>
    %199 = arith.mulf %193, %198 : vector<2x8x128xf32>
    %cst_63 = arith.constant dense<0.000000e+00> : vector<2x8xf32>
    %200 = vector.multi_reduction <add>, %199, %cst_63 [2] : vector<2x8x128xf32> to vector<2x8xf32>
    %cst_64 = arith.constant 2.000000e+00 : f32
    %201 = vector.broadcast %cst_64 : f32 to vector<1x8xf32>
    %202 = arith.addf %21, %201 : vector<1x8xf32>
    %203 = vector.broadcast %202 : vector<1x8xf32> to vector<2x8xf32>
    %204 = vector.broadcast %19 : vector<2x1xf32> to vector<2x8xf32>
    %205 = arith.cmpf olt, %203, %204 : vector<2x8xf32>
    %cst_65 = arith.constant -1.000000e+30 : f32
    %206 = vector.broadcast %cst_65 : f32 to vector<2x8xf32>
    %207 = arith.select %205, %200, %206 : vector<2x8xi1>, vector<2x8xf32>
    %cst_66 = arith.constant dense<0xFF800000> : vector<2xf32>
    %208 = vector.multi_reduction <maximumf>, %207, %cst_66 [1] : vector<2x8xf32> to vector<2xf32>
    %209 = vector.shape_cast %208 : vector<2xf32> to vector<2x1xf32>
    %210 = vector.broadcast %209 : vector<2x1xf32> to vector<2x8xf32>
    %211 = arith.cmpf oge, %207, %210 : vector<2x8xf32>
    %cst_67 = arith.constant 8.000000e+00 : f32
    %212 = vector.shape_cast %21 : vector<1x8xf32> to vector<1x8xf32>
    %213 = vector.broadcast %212 : vector<1x8xf32> to vector<2x8xf32>
    %214 = vector.broadcast %cst_67 : f32 to vector<2x8xf32>
    %215 = arith.select %211, %213, %214 : vector<2x8xi1>, vector<2x8xf32>
    %cst_68 = arith.constant dense<0x7F800000> : vector<2xf32>
    %216 = vector.multi_reduction <minimumf>, %215, %cst_68 [1] : vector<2x8xf32> to vector<2xf32>
    %217 = vector.shape_cast %216 : vector<2xf32> to vector<2x1xf32>
    %218 = vector.broadcast %21 : vector<1x8xf32> to vector<2x8xf32>
    %219 = vector.broadcast %217 : vector<2x1xf32> to vector<2x8xf32>
    %220 = arith.cmpf oeq, %218, %219 : vector<2x8xf32>
    %221 = arith.extui %220 : vector<2x8xi1> to vector<2x8xi32>
    %222 = arith.sitofp %221 : vector<2x8xi32> to vector<2x8xf32>
    %223 = vector.broadcast %21 : vector<1x8xf32> to vector<2x8xf32>
    %224 = vector.broadcast %217 : vector<2x1xf32> to vector<2x8xf32>
    %225 = arith.cmpf olt, %223, %224 : vector<2x8xf32>
    %226 = arith.extui %225 : vector<2x8xi1> to vector<2x8xi32>
    %227 = arith.sitofp %226 : vector<2x8xi32> to vector<2x8xf32>
    %228 = vector.shape_cast %227 : vector<2x8xf32> to vector<2x8x1xf32>
    %229 = vector.broadcast %21 : vector<1x8xf32> to vector<2x8xf32>
    %230 = vector.broadcast %217 : vector<2x1xf32> to vector<2x8xf32>
    %231 = arith.cmpf ogt, %229, %230 : vector<2x8xf32>
    %232 = arith.extui %231 : vector<2x8xi1> to vector<2x8xi32>
    %233 = arith.sitofp %232 : vector<2x8xi32> to vector<2x8xf32>
    %234 = vector.shape_cast %233 : vector<2x8xf32> to vector<2x8x1xf32>
    %235 = vector.shape_cast %222 : vector<2x8xf32> to vector<2x8x1xf32>
    %236 = vector.broadcast %235 : vector<2x8x1xf32> to vector<2x8x128xf32>
    %237 = arith.mulf %236, %193 : vector<2x8x128xf32>
    %238 = vector.broadcast %228 : vector<2x8x1xf32> to vector<2x8x128xf32>
    %239 = arith.mulf %238, %147 : vector<2x8x128xf32>
    %240 = arith.addf %237, %239 : vector<2x8x128xf32>
    %241 = vector.broadcast %234 : vector<2x8x1xf32> to vector<2x8x128xf32>
    %242 = arith.mulf %241, %151 : vector<2x8x128xf32>
    %243 = arith.addf %240, %242 : vector<2x8x128xf32>
    %244 = vector.broadcast %235 : vector<2x8x1xf32> to vector<2x8x128xf32>
    %245 = arith.mulf %244, %186 : vector<2x8x128xf32>
    %246 = vector.broadcast %228 : vector<2x8x1xf32> to vector<2x8x128xf32>
    %247 = arith.mulf %246, %148 : vector<2x8x128xf32>
    %248 = arith.addf %245, %247 : vector<2x8x128xf32>
    %249 = vector.broadcast %234 : vector<2x8x1xf32> to vector<2x8x128xf32>
    %250 = arith.mulf %249, %154 : vector<2x8x128xf32>
    %251 = arith.addf %248, %250 : vector<2x8x128xf32>
    %252 = vector.broadcast %235 : vector<2x8x1xf32> to vector<2x8x128xf32>
    %253 = arith.mulf %252, %193 : vector<2x8x128xf32>
    %cst_69 = arith.constant dense<0.000000e+00> : vector<2x128xf32>
    %254 = vector.multi_reduction <add>, %253, %cst_69 [1] : vector<2x8x128xf32> to vector<2x128xf32>
    %255 = vector.shape_cast %197 : vector<2x1xf32> to vector<2x1x1xf32>
    %256 = vector.broadcast %255 : vector<2x1x1xf32> to vector<2x8x128xf32>
    %257 = arith.mulf %256, %243 : vector<2x8x128xf32>
    %cst_70 = arith.constant 1.000000e+00 : f32
    %258 = vector.broadcast %cst_70 : f32 to vector<2x1x1xf32>
    %259 = arith.subf %258, %255 : vector<2x1x1xf32>
    %260 = vector.broadcast %259 : vector<2x1x1xf32> to vector<2x8x128xf32>
    %261 = arith.mulf %260, %147 : vector<2x8x128xf32>
    %262 = arith.addf %257, %261 : vector<2x8x128xf32>
    %c0_71 = arith.constant 0 : index
    %c0_72 = arith.constant 0 : index
    %c0_73 = arith.constant 0 : index
    %263 = vector.load %arg12[%c0_71, %c0_72, %c0_73] : memref<2x8x128xf32, #tpu.memory_space<vmem>>, vector<2x8x128xf32>
    tpu.vector_store %arg12[%c0_71, %c0_72, %c0_73], %262 {strides = array<i32>} : memref<2x8x128xf32, #tpu.memory_space<vmem>>, vector<2x8x128xf32>,
    %264 = vector.broadcast %255 : vector<2x1x1xf32> to vector<2x8x128xf32>
    %265 = arith.mulf %264, %251 : vector<2x8x128xf32>
    %cst_74 = arith.constant 1.000000e+00 : f32
    %266 = vector.broadcast %cst_74 : f32 to vector<2x1x1xf32>
    %267 = arith.subf %266, %255 : vector<2x1x1xf32>
    %268 = vector.broadcast %267 : vector<2x1x1xf32> to vector<2x8x128xf32>
    %269 = arith.mulf %268, %148 : vector<2x8x128xf32>
    %270 = arith.addf %265, %269 : vector<2x8x128xf32>
    %c0_75 = arith.constant 0 : index
    %c0_76 = arith.constant 0 : index
    %c0_77 = arith.constant 0 : index
    %271 = vector.load %arg13[%c0_75, %c0_76, %c0_77] : memref<2x8x128xf32, #tpu.memory_space<vmem>>, vector<2x8x128xf32>
    tpu.vector_store %arg13[%c0_75, %c0_76, %c0_77], %270 {strides = array<i32>} : memref<2x8x128xf32, #tpu.memory_space<vmem>>, vector<2x8x128xf32>,
    %c0_78 = arith.constant 0 : index
    %c0_79 = arith.constant 0 : index
    %c0_80 = arith.constant 0 : index
    %272 = vector.load %arg12[%c0_78, %c0_79, %c0_80] : memref<2x8x128xf32, #tpu.memory_space<vmem>>, vector<2x8x128xf32>
    %c0_81 = arith.constant 0 : index
    %c0_82 = arith.constant 0 : index
    %c0_83 = arith.constant 0 : index
    %273 = vector.load %arg13[%c0_81, %c0_82, %c0_83] : memref<2x8x128xf32, #tpu.memory_space<vmem>>, vector<2x8x128xf32>
    %274 = vector.extract_strided_slice %272 {offsets = [0, 1, 0], sizes = [2, 7, 128], strides = [1, 1, 1]} : vector<2x8x128xf32> to vector<2x7x128xf32>
    %275 = vector.extract_strided_slice %272 {offsets = [0, 0, 0], sizes = [2, 1, 128], strides = [1, 1, 1]} : vector<2x8x128xf32> to vector<2x1x128xf32>
    %276 = tpu.concatenate %274, %275 in 1 : vector<2x7x128xf32>, vector<2x1x128xf32> -> vector<2x8x128xf32>
    %277 = vector.extract_strided_slice %273 {offsets = [0, 1, 0], sizes = [2, 7, 128], strides = [1, 1, 1]} : vector<2x8x128xf32> to vector<2x7x128xf32>
    %278 = vector.extract_strided_slice %273 {offsets = [0, 0, 0], sizes = [2, 1, 128], strides = [1, 1, 1]} : vector<2x8x128xf32> to vector<2x1x128xf32>
    %279 = tpu.concatenate %277, %278 in 1 : vector<2x7x128xf32>, vector<2x1x128xf32> -> vector<2x8x128xf32>
    %280 = tpu.concatenate %272, %276 in 2 : vector<2x8x128xf32>, vector<2x8x128xf32> -> vector<2x8x256xf32>
    %281 = vector.shape_cast %280 : vector<2x8x256xf32> to vector<16x256xf32>
    %cst_84 = arith.constant dense<0.000000e+00> : vector<16x640xf32>
    %282 = tpu.matmul %281, %13, %cst_84 {dimension_numbers = #tpu.dot_dimension_numbers<[1], [0], [0], [1], [0, 0, 1, 1], [], []>} : vector<16x256xf32>, vector<256x640xf32>, vector<16x640xf32> -> vector<16x640xf32>
    %283 = vector.shape_cast %282 : vector<16x640xf32> to vector<2x8x640xf32>
    %284 = vector.broadcast %15 : vector<1x1x640xf32> to vector<2x8x640xf32>
    %285 = arith.addf %283, %284 : vector<2x8x640xf32>
    %286 = vector.extract_strided_slice %285 {offsets = [0, 0, 0], sizes = [2, 8, 128], strides = [1, 1, 1]} : vector<2x8x640xf32> to vector<2x8x128xf32>
    %287 = vector.extract_strided_slice %285 {offsets = [0, 0, 128], sizes = [2, 8, 128], strides = [1, 1, 1]} : vector<2x8x640xf32> to vector<2x8x128xf32>
    %288 = vector.extract_strided_slice %285 {offsets = [0, 0, 256], sizes = [2, 8, 128], strides = [1, 1, 1]} : vector<2x8x640xf32> to vector<2x8x128xf32>
    %289 = vector.extract_strided_slice %285 {offsets = [0, 0, 384], sizes = [2, 8, 128], strides = [1, 1, 1]} : vector<2x8x640xf32> to vector<2x8x128xf32>
    %290 = vector.extract_strided_slice %285 {offsets = [0, 0, 512], sizes = [2, 8, 128], strides = [1, 1, 1]} : vector<2x8x640xf32> to vector<2x8x128xf32>
    %291 = arith.negf %287 : vector<2x8x128xf32>
    %292 = math.exp %291 : vector<2x8x128xf32>
    %cst_85 = arith.constant 1.000000e+00 : f32
    %293 = vector.broadcast %cst_85 : f32 to vector<2x8x128xf32>
    %294 = arith.addf %293, %292 : vector<2x8x128xf32>
    %295 = arith.divf %293, %294 : vector<2x8x128xf32>
    %296 = arith.mulf %273, %295 : vector<2x8x128xf32>
    %297 = arith.negf %288 : vector<2x8x128xf32>
    %298 = math.exp %297 : vector<2x8x128xf32>
    %cst_86 = arith.constant 1.000000e+00 : f32
    %299 = vector.broadcast %cst_86 : f32 to vector<2x8x128xf32>
    %300 = arith.addf %299, %298 : vector<2x8x128xf32>
    %301 = arith.divf %299, %300 : vector<2x8x128xf32>
    %302 = arith.mulf %279, %301 : vector<2x8x128xf32>
    %303 = arith.addf %296, %302 : vector<2x8x128xf32>
    %304 = math.tanh %289 : vector<2x8x128xf32>
    %305 = arith.negf %286 : vector<2x8x128xf32>
    %306 = math.exp %305 : vector<2x8x128xf32>
    %cst_87 = arith.constant 1.000000e+00 : f32
    %307 = vector.broadcast %cst_87 : f32 to vector<2x8x128xf32>
    %308 = arith.addf %307, %306 : vector<2x8x128xf32>
    %309 = arith.divf %307, %308 : vector<2x8x128xf32>
    %310 = arith.mulf %304, %309 : vector<2x8x128xf32>
    %311 = arith.addf %303, %310 : vector<2x8x128xf32>
    %312 = arith.negf %290 : vector<2x8x128xf32>
    %313 = math.exp %312 : vector<2x8x128xf32>
    %cst_88 = arith.constant 1.000000e+00 : f32
    %314 = vector.broadcast %cst_88 : f32 to vector<2x8x128xf32>
    %315 = arith.addf %314, %313 : vector<2x8x128xf32>
    %316 = arith.divf %314, %315 : vector<2x8x128xf32>
    %317 = math.tanh %311 : vector<2x8x128xf32>
    %318 = arith.mulf %316, %317 : vector<2x8x128xf32>
    %cst_89 = arith.constant 3.000000e+00 : f32
    %319 = vector.broadcast %cst_89 : f32 to vector<2x1xf32>
    %320 = arith.cmpf olt, %319, %19 : vector<2x1xf32>
    %321 = arith.extui %320 : vector<2x1xi1> to vector<2x1xi32>
    %322 = arith.sitofp %321 : vector<2x1xi32> to vector<2x1xf32>
    %323 = vector.broadcast %17 : vector<1x1x128xf32> to vector<2x8x128xf32>
    %324 = arith.mulf %318, %323 : vector<2x8x128xf32>
    %cst_90 = arith.constant dense<0.000000e+00> : vector<2x8xf32>
    %325 = vector.multi_reduction <add>, %324, %cst_90 [2] : vector<2x8x128xf32> to vector<2x8xf32>
    %cst_91 = arith.constant 3.000000e+00 : f32
    %326 = vector.broadcast %cst_91 : f32 to vector<1x8xf32>
    %327 = arith.addf %21, %326 : vector<1x8xf32>
    %328 = vector.broadcast %327 : vector<1x8xf32> to vector<2x8xf32>
    %329 = vector.broadcast %19 : vector<2x1xf32> to vector<2x8xf32>
    %330 = arith.cmpf olt, %328, %329 : vector<2x8xf32>
    %cst_92 = arith.constant -1.000000e+30 : f32
    %331 = vector.broadcast %cst_92 : f32 to vector<2x8xf32>
    %332 = arith.select %330, %325, %331 : vector<2x8xi1>, vector<2x8xf32>
    %cst_93 = arith.constant dense<0xFF800000> : vector<2xf32>
    %333 = vector.multi_reduction <maximumf>, %332, %cst_93 [1] : vector<2x8xf32> to vector<2xf32>
    %334 = vector.shape_cast %333 : vector<2xf32> to vector<2x1xf32>
    %335 = vector.broadcast %334 : vector<2x1xf32> to vector<2x8xf32>
    %336 = arith.cmpf oge, %332, %335 : vector<2x8xf32>
    %cst_94 = arith.constant 8.000000e+00 : f32
    %337 = vector.shape_cast %21 : vector<1x8xf32> to vector<1x8xf32>
    %338 = vector.broadcast %337 : vector<1x8xf32> to vector<2x8xf32>
    %339 = vector.broadcast %cst_94 : f32 to vector<2x8xf32>
    %340 = arith.select %336, %338, %339 : vector<2x8xi1>, vector<2x8xf32>
    %cst_95 = arith.constant dense<0x7F800000> : vector<2xf32>
    %341 = vector.multi_reduction <minimumf>, %340, %cst_95 [1] : vector<2x8xf32> to vector<2xf32>
    %342 = vector.shape_cast %341 : vector<2xf32> to vector<2x1xf32>
    %343 = vector.broadcast %21 : vector<1x8xf32> to vector<2x8xf32>
    %344 = vector.broadcast %342 : vector<2x1xf32> to vector<2x8xf32>
    %345 = arith.cmpf oeq, %343, %344 : vector<2x8xf32>
    %346 = arith.extui %345 : vector<2x8xi1> to vector<2x8xi32>
    %347 = arith.sitofp %346 : vector<2x8xi32> to vector<2x8xf32>
    %348 = vector.broadcast %21 : vector<1x8xf32> to vector<2x8xf32>
    %349 = vector.broadcast %342 : vector<2x1xf32> to vector<2x8xf32>
    %350 = arith.cmpf olt, %348, %349 : vector<2x8xf32>
    %351 = arith.extui %350 : vector<2x8xi1> to vector<2x8xi32>
    %352 = arith.sitofp %351 : vector<2x8xi32> to vector<2x8xf32>
    %353 = vector.shape_cast %352 : vector<2x8xf32> to vector<2x8x1xf32>
    %354 = vector.broadcast %21 : vector<1x8xf32> to vector<2x8xf32>
    %355 = vector.broadcast %342 : vector<2x1xf32> to vector<2x8xf32>
    %356 = arith.cmpf ogt, %354, %355 : vector<2x8xf32>
    %357 = arith.extui %356 : vector<2x8xi1> to vector<2x8xi32>
    %358 = arith.sitofp %357 : vector<2x8xi32> to vector<2x8xf32>
    %359 = vector.shape_cast %358 : vector<2x8xf32> to vector<2x8x1xf32>
    %360 = vector.shape_cast %347 : vector<2x8xf32> to vector<2x8x1xf32>
    %361 = vector.broadcast %360 : vector<2x8x1xf32> to vector<2x8x128xf32>
    %362 = arith.mulf %361, %318 : vector<2x8x128xf32>
    %363 = vector.broadcast %353 : vector<2x8x1xf32> to vector<2x8x128xf32>
    %364 = arith.mulf %363, %272 : vector<2x8x128xf32>
    %365 = arith.addf %362, %364 : vector<2x8x128xf32>
    %366 = vector.broadcast %359 : vector<2x8x1xf32> to vector<2x8x128xf32>
    %367 = arith.mulf %366, %276 : vector<2x8x128xf32>
    %368 = arith.addf %365, %367 : vector<2x8x128xf32>
    %369 = vector.broadcast %360 : vector<2x8x1xf32> to vector<2x8x128xf32>
    %370 = arith.mulf %369, %311 : vector<2x8x128xf32>
    %371 = vector.broadcast %353 : vector<2x8x1xf32> to vector<2x8x128xf32>
    %372 = arith.mulf %371, %273 : vector<2x8x128xf32>
    %373 = arith.addf %370, %372 : vector<2x8x128xf32>
    %374 = vector.broadcast %359 : vector<2x8x1xf32> to vector<2x8x128xf32>
    %375 = arith.mulf %374, %279 : vector<2x8x128xf32>
    %376 = arith.addf %373, %375 : vector<2x8x128xf32>
    %377 = vector.broadcast %360 : vector<2x8x1xf32> to vector<2x8x128xf32>
    %378 = arith.mulf %377, %318 : vector<2x8x128xf32>
    %cst_96 = arith.constant dense<0.000000e+00> : vector<2x128xf32>
    %379 = vector.multi_reduction <add>, %378, %cst_96 [1] : vector<2x8x128xf32> to vector<2x128xf32>
    %380 = vector.shape_cast %322 : vector<2x1xf32> to vector<2x1x1xf32>
    %381 = vector.broadcast %380 : vector<2x1x1xf32> to vector<2x8x128xf32>
    %382 = arith.mulf %381, %368 : vector<2x8x128xf32>
    %cst_97 = arith.constant 1.000000e+00 : f32
    %383 = vector.broadcast %cst_97 : f32 to vector<2x1x1xf32>
    %384 = arith.subf %383, %380 : vector<2x1x1xf32>
    %385 = vector.broadcast %384 : vector<2x1x1xf32> to vector<2x8x128xf32>
    %386 = arith.mulf %385, %272 : vector<2x8x128xf32>
    %387 = arith.addf %382, %386 : vector<2x8x128xf32>
    %c0_98 = arith.constant 0 : index
    %c0_99 = arith.constant 0 : index
    %c0_100 = arith.constant 0 : index
    %388 = vector.load %arg12[%c0_98, %c0_99, %c0_100] : memref<2x8x128xf32, #tpu.memory_space<vmem>>, vector<2x8x128xf32>
    tpu.vector_store %arg12[%c0_98, %c0_99, %c0_100], %387 {strides = array<i32>} : memref<2x8x128xf32, #tpu.memory_space<vmem>>, vector<2x8x128xf32>,
    %389 = vector.broadcast %380 : vector<2x1x1xf32> to vector<2x8x128xf32>
    %390 = arith.mulf %389, %376 : vector<2x8x128xf32>
    %cst_101 = arith.constant 1.000000e+00 : f32
    %391 = vector.broadcast %cst_101 : f32 to vector<2x1x1xf32>
    %392 = arith.subf %391, %380 : vector<2x1x1xf32>
    %393 = vector.broadcast %392 : vector<2x1x1xf32> to vector<2x8x128xf32>
    %394 = arith.mulf %393, %273 : vector<2x8x128xf32>
    %395 = arith.addf %390, %394 : vector<2x8x128xf32>
    %c0_102 = arith.constant 0 : index
    %c0_103 = arith.constant 0 : index
    %c0_104 = arith.constant 0 : index
    %396 = vector.load %arg13[%c0_102, %c0_103, %c0_104] : memref<2x8x128xf32, #tpu.memory_space<vmem>>, vector<2x8x128xf32>
    tpu.vector_store %arg13[%c0_102, %c0_103, %c0_104], %395 {strides = array<i32>} : memref<2x8x128xf32, #tpu.memory_space<vmem>>, vector<2x8x128xf32>,
    %c0_105 = arith.constant 0 : index
    %c0_106 = arith.constant 0 : index
    %c0_107 = arith.constant 0 : index
    %397 = vector.load %arg12[%c0_105, %c0_106, %c0_107] : memref<2x8x128xf32, #tpu.memory_space<vmem>>, vector<2x8x128xf32>
    %c0_108 = arith.constant 0 : index
    %c0_109 = arith.constant 0 : index
    %c0_110 = arith.constant 0 : index
    %398 = vector.load %arg13[%c0_108, %c0_109, %c0_110] : memref<2x8x128xf32, #tpu.memory_space<vmem>>, vector<2x8x128xf32>
    %399 = vector.extract_strided_slice %397 {offsets = [0, 1, 0], sizes = [2, 7, 128], strides = [1, 1, 1]} : vector<2x8x128xf32> to vector<2x7x128xf32>
    %400 = vector.extract_strided_slice %397 {offsets = [0, 0, 0], sizes = [2, 1, 128], strides = [1, 1, 1]} : vector<2x8x128xf32> to vector<2x1x128xf32>
    %401 = tpu.concatenate %399, %400 in 1 : vector<2x7x128xf32>, vector<2x1x128xf32> -> vector<2x8x128xf32>
    %402 = vector.extract_strided_slice %398 {offsets = [0, 1, 0], sizes = [2, 7, 128], strides = [1, 1, 1]} : vector<2x8x128xf32> to vector<2x7x128xf32>
    %403 = vector.extract_strided_slice %398 {offsets = [0, 0, 0], sizes = [2, 1, 128], strides = [1, 1, 1]} : vector<2x8x128xf32> to vector<2x1x128xf32>
    %404 = tpu.concatenate %402, %403 in 1 : vector<2x7x128xf32>, vector<2x1x128xf32> -> vector<2x8x128xf32>
    %405 = tpu.concatenate %397, %401 in 2 : vector<2x8x128xf32>, vector<2x8x128xf32> -> vector<2x8x256xf32>
    %406 = vector.shape_cast %405 : vector<2x8x256xf32> to vector<16x256xf32>
    %cst_111 = arith.constant dense<0.000000e+00> : vector<16x640xf32>
    %407 = tpu.matmul %406, %13, %cst_111 {dimension_numbers = #tpu.dot_dimension_numbers<[1], [0], [0], [1], [0, 0, 1, 1], [], []>} : vector<16x256xf32>, vector<256x640xf32>, vector<16x640xf32> -> vector<16x640xf32>
    %408 = vector.shape_cast %407 : vector<16x640xf32> to vector<2x8x640xf32>
    %409 = vector.broadcast %15 : vector<1x1x640xf32> to vector<2x8x640xf32>
    %410 = arith.addf %408, %409 : vector<2x8x640xf32>
    %411 = vector.extract_strided_slice %410 {offsets = [0, 0, 0], sizes = [2, 8, 128], strides = [1, 1, 1]} : vector<2x8x640xf32> to vector<2x8x128xf32>
    %412 = vector.extract_strided_slice %410 {offsets = [0, 0, 128], sizes = [2, 8, 128], strides = [1, 1, 1]} : vector<2x8x640xf32> to vector<2x8x128xf32>
    %413 = vector.extract_strided_slice %410 {offsets = [0, 0, 256], sizes = [2, 8, 128], strides = [1, 1, 1]} : vector<2x8x640xf32> to vector<2x8x128xf32>
    %414 = vector.extract_strided_slice %410 {offsets = [0, 0, 384], sizes = [2, 8, 128], strides = [1, 1, 1]} : vector<2x8x640xf32> to vector<2x8x128xf32>
    %415 = vector.extract_strided_slice %410 {offsets = [0, 0, 512], sizes = [2, 8, 128], strides = [1, 1, 1]} : vector<2x8x640xf32> to vector<2x8x128xf32>
    %416 = arith.negf %412 : vector<2x8x128xf32>
    %417 = math.exp %416 : vector<2x8x128xf32>
    %cst_112 = arith.constant 1.000000e+00 : f32
    %418 = vector.broadcast %cst_112 : f32 to vector<2x8x128xf32>
    %419 = arith.addf %418, %417 : vector<2x8x128xf32>
    %420 = arith.divf %418, %419 : vector<2x8x128xf32>
    %421 = arith.mulf %398, %420 : vector<2x8x128xf32>
    %422 = arith.negf %413 : vector<2x8x128xf32>
    %423 = math.exp %422 : vector<2x8x128xf32>
    %cst_113 = arith.constant 1.000000e+00 : f32
    %424 = vector.broadcast %cst_113 : f32 to vector<2x8x128xf32>
    %425 = arith.addf %424, %423 : vector<2x8x128xf32>
    %426 = arith.divf %424, %425 : vector<2x8x128xf32>
    %427 = arith.mulf %404, %426 : vector<2x8x128xf32>
    %428 = arith.addf %421, %427 : vector<2x8x128xf32>
    %429 = math.tanh %414 : vector<2x8x128xf32>
    %430 = arith.negf %411 : vector<2x8x128xf32>
    %431 = math.exp %430 : vector<2x8x128xf32>
    %cst_114 = arith.constant 1.000000e+00 : f32
    %432 = vector.broadcast %cst_114 : f32 to vector<2x8x128xf32>
    %433 = arith.addf %432, %431 : vector<2x8x128xf32>
    %434 = arith.divf %432, %433 : vector<2x8x128xf32>
    %435 = arith.mulf %429, %434 : vector<2x8x128xf32>
    %436 = arith.addf %428, %435 : vector<2x8x128xf32>
    %437 = arith.negf %415 : vector<2x8x128xf32>
    %438 = math.exp %437 : vector<2x8x128xf32>
    %cst_115 = arith.constant 1.000000e+00 : f32
    %439 = vector.broadcast %cst_115 : f32 to vector<2x8x128xf32>
    %440 = arith.addf %439, %438 : vector<2x8x128xf32>
    %441 = arith.divf %439, %440 : vector<2x8x128xf32>
    %442 = math.tanh %436 : vector<2x8x128xf32>
    %443 = arith.mulf %441, %442 : vector<2x8x128xf32>
    %cst_116 = arith.constant 4.000000e+00 : f32
    %444 = vector.broadcast %cst_116 : f32 to vector<2x1xf32>
    %445 = arith.cmpf olt, %444, %19 : vector<2x1xf32>
    %446 = arith.extui %445 : vector<2x1xi1> to vector<2x1xi32>
    %447 = arith.sitofp %446 : vector<2x1xi32> to vector<2x1xf32>
    %448 = vector.broadcast %17 : vector<1x1x128xf32> to vector<2x8x128xf32>
    %449 = arith.mulf %443, %448 : vector<2x8x128xf32>
    %cst_117 = arith.constant dense<0.000000e+00> : vector<2x8xf32>
    %450 = vector.multi_reduction <add>, %449, %cst_117 [2] : vector<2x8x128xf32> to vector<2x8xf32>
    %cst_118 = arith.constant 4.000000e+00 : f32
    %451 = vector.broadcast %cst_118 : f32 to vector<1x8xf32>
    %452 = arith.addf %21, %451 : vector<1x8xf32>
    %453 = vector.broadcast %452 : vector<1x8xf32> to vector<2x8xf32>
    %454 = vector.broadcast %19 : vector<2x1xf32> to vector<2x8xf32>
    %455 = arith.cmpf olt, %453, %454 : vector<2x8xf32>
    %cst_119 = arith.constant -1.000000e+30 : f32
    %456 = vector.broadcast %cst_119 : f32 to vector<2x8xf32>
    %457 = arith.select %455, %450, %456 : vector<2x8xi1>, vector<2x8xf32>
    %cst_120 = arith.constant dense<0xFF800000> : vector<2xf32>
    %458 = vector.multi_reduction <maximumf>, %457, %cst_120 [1] : vector<2x8xf32> to vector<2xf32>
    %459 = vector.shape_cast %458 : vector<2xf32> to vector<2x1xf32>
    %460 = vector.broadcast %459 : vector<2x1xf32> to vector<2x8xf32>
    %461 = arith.cmpf oge, %457, %460 : vector<2x8xf32>
    %cst_121 = arith.constant 8.000000e+00 : f32
    %462 = vector.shape_cast %21 : vector<1x8xf32> to vector<1x8xf32>
    %463 = vector.broadcast %462 : vector<1x8xf32> to vector<2x8xf32>
    %464 = vector.broadcast %cst_121 : f32 to vector<2x8xf32>
    %465 = arith.select %461, %463, %464 : vector<2x8xi1>, vector<2x8xf32>
    %cst_122 = arith.constant dense<0x7F800000> : vector<2xf32>
    %466 = vector.multi_reduction <minimumf>, %465, %cst_122 [1] : vector<2x8xf32> to vector<2xf32>
    %467 = vector.shape_cast %466 : vector<2xf32> to vector<2x1xf32>
    %468 = vector.broadcast %21 : vector<1x8xf32> to vector<2x8xf32>
    %469 = vector.broadcast %467 : vector<2x1xf32> to vector<2x8xf32>
    %470 = arith.cmpf oeq, %468, %469 : vector<2x8xf32>
    %471 = arith.extui %470 : vector<2x8xi1> to vector<2x8xi32>
    %472 = arith.sitofp %471 : vector<2x8xi32> to vector<2x8xf32>
    %473 = vector.broadcast %21 : vector<1x8xf32> to vector<2x8xf32>
    %474 = vector.broadcast %467 : vector<2x1xf32> to vector<2x8xf32>
    %475 = arith.cmpf olt, %473, %474 : vector<2x8xf32>
    %476 = arith.extui %475 : vector<2x8xi1> to vector<2x8xi32>
    %477 = arith.sitofp %476 : vector<2x8xi32> to vector<2x8xf32>
    %478 = vector.shape_cast %477 : vector<2x8xf32> to vector<2x8x1xf32>
    %479 = vector.broadcast %21 : vector<1x8xf32> to vector<2x8xf32>
    %480 = vector.broadcast %467 : vector<2x1xf32> to vector<2x8xf32>
    %481 = arith.cmpf ogt, %479, %480 : vector<2x8xf32>
    %482 = arith.extui %481 : vector<2x8xi1> to vector<2x8xi32>
    %483 = arith.sitofp %482 : vector<2x8xi32> to vector<2x8xf32>
    %484 = vector.shape_cast %483 : vector<2x8xf32> to vector<2x8x1xf32>
    %485 = vector.shape_cast %472 : vector<2x8xf32> to vector<2x8x1xf32>
    %486 = vector.broadcast %485 : vector<2x8x1xf32> to vector<2x8x128xf32>
    %487 = arith.mulf %486, %443 : vector<2x8x128xf32>
    %488 = vector.broadcast %478 : vector<2x8x1xf32> to vector<2x8x128xf32>
    %489 = arith.mulf %488, %397 : vector<2x8x128xf32>
    %490 = arith.addf %487, %489 : vector<2x8x128xf32>
    %491 = vector.broadcast %484 : vector<2x8x1xf32> to vector<2x8x128xf32>
    %492 = arith.mulf %491, %401 : vector<2x8x128xf32>
    %493 = arith.addf %490, %492 : vector<2x8x128xf32>
    %494 = vector.broadcast %485 : vector<2x8x1xf32> to vector<2x8x128xf32>
    %495 = arith.mulf %494, %436 : vector<2x8x128xf32>
    %496 = vector.broadcast %478 : vector<2x8x1xf32> to vector<2x8x128xf32>
    %497 = arith.mulf %496, %398 : vector<2x8x128xf32>
    %498 = arith.addf %495, %497 : vector<2x8x128xf32>
    %499 = vector.broadcast %484 : vector<2x8x1xf32> to vector<2x8x128xf32>
    %500 = arith.mulf %499, %404 : vector<2x8x128xf32>
    %501 = arith.addf %498, %500 : vector<2x8x128xf32>
    %502 = vector.broadcast %485 : vector<2x8x1xf32> to vector<2x8x128xf32>
    %503 = arith.mulf %502, %443 : vector<2x8x128xf32>
    %cst_123 = arith.constant dense<0.000000e+00> : vector<2x128xf32>
    %504 = vector.multi_reduction <add>, %503, %cst_123 [1] : vector<2x8x128xf32> to vector<2x128xf32>
    %505 = vector.shape_cast %447 : vector<2x1xf32> to vector<2x1x1xf32>
    %506 = vector.broadcast %505 : vector<2x1x1xf32> to vector<2x8x128xf32>
    %507 = arith.mulf %506, %493 : vector<2x8x128xf32>
    %cst_124 = arith.constant 1.000000e+00 : f32
    %508 = vector.broadcast %cst_124 : f32 to vector<2x1x1xf32>
    %509 = arith.subf %508, %505 : vector<2x1x1xf32>
    %510 = vector.broadcast %509 : vector<2x1x1xf32> to vector<2x8x128xf32>
    %511 = arith.mulf %510, %397 : vector<2x8x128xf32>
    %512 = arith.addf %507, %511 : vector<2x8x128xf32>
    %c0_125 = arith.constant 0 : index
    %c0_126 = arith.constant 0 : index
    %c0_127 = arith.constant 0 : index
    %513 = vector.load %arg12[%c0_125, %c0_126, %c0_127] : memref<2x8x128xf32, #tpu.memory_space<vmem>>, vector<2x8x128xf32>
    tpu.vector_store %arg12[%c0_125, %c0_126, %c0_127], %512 {strides = array<i32>} : memref<2x8x128xf32, #tpu.memory_space<vmem>>, vector<2x8x128xf32>,
    %514 = vector.broadcast %505 : vector<2x1x1xf32> to vector<2x8x128xf32>
    %515 = arith.mulf %514, %501 : vector<2x8x128xf32>
    %cst_128 = arith.constant 1.000000e+00 : f32
    %516 = vector.broadcast %cst_128 : f32 to vector<2x1x1xf32>
    %517 = arith.subf %516, %505 : vector<2x1x1xf32>
    %518 = vector.broadcast %517 : vector<2x1x1xf32> to vector<2x8x128xf32>
    %519 = arith.mulf %518, %398 : vector<2x8x128xf32>
    %520 = arith.addf %515, %519 : vector<2x8x128xf32>
    %c0_129 = arith.constant 0 : index
    %c0_130 = arith.constant 0 : index
    %c0_131 = arith.constant 0 : index
    %521 = vector.load %arg13[%c0_129, %c0_130, %c0_131] : memref<2x8x128xf32, #tpu.memory_space<vmem>>, vector<2x8x128xf32>
    tpu.vector_store %arg13[%c0_129, %c0_130, %c0_131], %520 {strides = array<i32>} : memref<2x8x128xf32, #tpu.memory_space<vmem>>, vector<2x8x128xf32>,
    %c0_132 = arith.constant 0 : index
    %c0_133 = arith.constant 0 : index
    %c0_134 = arith.constant 0 : index
    %522 = vector.load %arg12[%c0_132, %c0_133, %c0_134] : memref<2x8x128xf32, #tpu.memory_space<vmem>>, vector<2x8x128xf32>
    %c0_135 = arith.constant 0 : index
    %c0_136 = arith.constant 0 : index
    %c0_137 = arith.constant 0 : index
    %523 = vector.load %arg13[%c0_135, %c0_136, %c0_137] : memref<2x8x128xf32, #tpu.memory_space<vmem>>, vector<2x8x128xf32>
    %524 = vector.extract_strided_slice %522 {offsets = [0, 1, 0], sizes = [2, 7, 128], strides = [1, 1, 1]} : vector<2x8x128xf32> to vector<2x7x128xf32>
    %525 = vector.extract_strided_slice %522 {offsets = [0, 0, 0], sizes = [2, 1, 128], strides = [1, 1, 1]} : vector<2x8x128xf32> to vector<2x1x128xf32>
    %526 = tpu.concatenate %524, %525 in 1 : vector<2x7x128xf32>, vector<2x1x128xf32> -> vector<2x8x128xf32>
    %527 = vector.extract_strided_slice %523 {offsets = [0, 1, 0], sizes = [2, 7, 128], strides = [1, 1, 1]} : vector<2x8x128xf32> to vector<2x7x128xf32>
    %528 = vector.extract_strided_slice %523 {offsets = [0, 0, 0], sizes = [2, 1, 128], strides = [1, 1, 1]} : vector<2x8x128xf32> to vector<2x1x128xf32>
    %529 = tpu.concatenate %527, %528 in 1 : vector<2x7x128xf32>, vector<2x1x128xf32> -> vector<2x8x128xf32>
    %530 = tpu.concatenate %522, %526 in 2 : vector<2x8x128xf32>, vector<2x8x128xf32> -> vector<2x8x256xf32>
    %531 = vector.shape_cast %530 : vector<2x8x256xf32> to vector<16x256xf32>
    %cst_138 = arith.constant dense<0.000000e+00> : vector<16x640xf32>
    %532 = tpu.matmul %531, %13, %cst_138 {dimension_numbers = #tpu.dot_dimension_numbers<[1], [0], [0], [1], [0, 0, 1, 1], [], []>} : vector<16x256xf32>, vector<256x640xf32>, vector<16x640xf32> -> vector<16x640xf32>
    %533 = vector.shape_cast %532 : vector<16x640xf32> to vector<2x8x640xf32>
    %534 = vector.broadcast %15 : vector<1x1x640xf32> to vector<2x8x640xf32>
    %535 = arith.addf %533, %534 : vector<2x8x640xf32>
    %536 = vector.extract_strided_slice %535 {offsets = [0, 0, 0], sizes = [2, 8, 128], strides = [1, 1, 1]} : vector<2x8x640xf32> to vector<2x8x128xf32>
    %537 = vector.extract_strided_slice %535 {offsets = [0, 0, 128], sizes = [2, 8, 128], strides = [1, 1, 1]} : vector<2x8x640xf32> to vector<2x8x128xf32>
    %538 = vector.extract_strided_slice %535 {offsets = [0, 0, 256], sizes = [2, 8, 128], strides = [1, 1, 1]} : vector<2x8x640xf32> to vector<2x8x128xf32>
    %539 = vector.extract_strided_slice %535 {offsets = [0, 0, 384], sizes = [2, 8, 128], strides = [1, 1, 1]} : vector<2x8x640xf32> to vector<2x8x128xf32>
    %540 = vector.extract_strided_slice %535 {offsets = [0, 0, 512], sizes = [2, 8, 128], strides = [1, 1, 1]} : vector<2x8x640xf32> to vector<2x8x128xf32>
    %541 = arith.negf %537 : vector<2x8x128xf32>
    %542 = math.exp %541 : vector<2x8x128xf32>
    %cst_139 = arith.constant 1.000000e+00 : f32
    %543 = vector.broadcast %cst_139 : f32 to vector<2x8x128xf32>
    %544 = arith.addf %543, %542 : vector<2x8x128xf32>
    %545 = arith.divf %543, %544 : vector<2x8x128xf32>
    %546 = arith.mulf %523, %545 : vector<2x8x128xf32>
    %547 = arith.negf %538 : vector<2x8x128xf32>
    %548 = math.exp %547 : vector<2x8x128xf32>
    %cst_140 = arith.constant 1.000000e+00 : f32
    %549 = vector.broadcast %cst_140 : f32 to vector<2x8x128xf32>
    %550 = arith.addf %549, %548 : vector<2x8x128xf32>
    %551 = arith.divf %549, %550 : vector<2x8x128xf32>
    %552 = arith.mulf %529, %551 : vector<2x8x128xf32>
    %553 = arith.addf %546, %552 : vector<2x8x128xf32>
    %554 = math.tanh %539 : vector<2x8x128xf32>
    %555 = arith.negf %536 : vector<2x8x128xf32>
    %556 = math.exp %555 : vector<2x8x128xf32>
    %cst_141 = arith.constant 1.000000e+00 : f32
    %557 = vector.broadcast %cst_141 : f32 to vector<2x8x128xf32>
    %558 = arith.addf %557, %556 : vector<2x8x128xf32>
    %559 = arith.divf %557, %558 : vector<2x8x128xf32>
    %560 = arith.mulf %554, %559 : vector<2x8x128xf32>
    %561 = arith.addf %553, %560 : vector<2x8x128xf32>
    %562 = arith.negf %540 : vector<2x8x128xf32>
    %563 = math.exp %562 : vector<2x8x128xf32>
    %cst_142 = arith.constant 1.000000e+00 : f32
    %564 = vector.broadcast %cst_142 : f32 to vector<2x8x128xf32>
    %565 = arith.addf %564, %563 : vector<2x8x128xf32>
    %566 = arith.divf %564, %565 : vector<2x8x128xf32>
    %567 = math.tanh %561 : vector<2x8x128xf32>
    %568 = arith.mulf %566, %567 : vector<2x8x128xf32>
    %cst_143 = arith.constant 5.000000e+00 : f32
    %569 = vector.broadcast %cst_143 : f32 to vector<2x1xf32>
    %570 = arith.cmpf olt, %569, %19 : vector<2x1xf32>
    %571 = arith.extui %570 : vector<2x1xi1> to vector<2x1xi32>
    %572 = arith.sitofp %571 : vector<2x1xi32> to vector<2x1xf32>
    %573 = vector.broadcast %17 : vector<1x1x128xf32> to vector<2x8x128xf32>
    %574 = arith.mulf %568, %573 : vector<2x8x128xf32>
    %cst_144 = arith.constant dense<0.000000e+00> : vector<2x8xf32>
    %575 = vector.multi_reduction <add>, %574, %cst_144 [2] : vector<2x8x128xf32> to vector<2x8xf32>
    %cst_145 = arith.constant 5.000000e+00 : f32
    %576 = vector.broadcast %cst_145 : f32 to vector<1x8xf32>
    %577 = arith.addf %21, %576 : vector<1x8xf32>
    %578 = vector.broadcast %577 : vector<1x8xf32> to vector<2x8xf32>
    %579 = vector.broadcast %19 : vector<2x1xf32> to vector<2x8xf32>
    %580 = arith.cmpf olt, %578, %579 : vector<2x8xf32>
    %cst_146 = arith.constant -1.000000e+30 : f32
    %581 = vector.broadcast %cst_146 : f32 to vector<2x8xf32>
    %582 = arith.select %580, %575, %581 : vector<2x8xi1>, vector<2x8xf32>
    %cst_147 = arith.constant dense<0xFF800000> : vector<2xf32>
    %583 = vector.multi_reduction <maximumf>, %582, %cst_147 [1] : vector<2x8xf32> to vector<2xf32>
    %584 = vector.shape_cast %583 : vector<2xf32> to vector<2x1xf32>
    %585 = vector.broadcast %584 : vector<2x1xf32> to vector<2x8xf32>
    %586 = arith.cmpf oge, %582, %585 : vector<2x8xf32>
    %cst_148 = arith.constant 8.000000e+00 : f32
    %587 = vector.shape_cast %21 : vector<1x8xf32> to vector<1x8xf32>
    %588 = vector.broadcast %587 : vector<1x8xf32> to vector<2x8xf32>
    %589 = vector.broadcast %cst_148 : f32 to vector<2x8xf32>
    %590 = arith.select %586, %588, %589 : vector<2x8xi1>, vector<2x8xf32>
    %cst_149 = arith.constant dense<0x7F800000> : vector<2xf32>
    %591 = vector.multi_reduction <minimumf>, %590, %cst_149 [1] : vector<2x8xf32> to vector<2xf32>
    %592 = vector.shape_cast %591 : vector<2xf32> to vector<2x1xf32>
    %593 = vector.broadcast %21 : vector<1x8xf32> to vector<2x8xf32>
    %594 = vector.broadcast %592 : vector<2x1xf32> to vector<2x8xf32>
    %595 = arith.cmpf oeq, %593, %594 : vector<2x8xf32>
    %596 = arith.extui %595 : vector<2x8xi1> to vector<2x8xi32>
    %597 = arith.sitofp %596 : vector<2x8xi32> to vector<2x8xf32>
    %598 = vector.broadcast %21 : vector<1x8xf32> to vector<2x8xf32>
    %599 = vector.broadcast %592 : vector<2x1xf32> to vector<2x8xf32>
    %600 = arith.cmpf olt, %598, %599 : vector<2x8xf32>
    %601 = arith.extui %600 : vector<2x8xi1> to vector<2x8xi32>
    %602 = arith.sitofp %601 : vector<2x8xi32> to vector<2x8xf32>
    %603 = vector.shape_cast %602 : vector<2x8xf32> to vector<2x8x1xf32>
    %604 = vector.broadcast %21 : vector<1x8xf32> to vector<2x8xf32>
    %605 = vector.broadcast %592 : vector<2x1xf32> to vector<2x8xf32>
    %606 = arith.cmpf ogt, %604, %605 : vector<2x8xf32>
    %607 = arith.extui %606 : vector<2x8xi1> to vector<2x8xi32>
    %608 = arith.sitofp %607 : vector<2x8xi32> to vector<2x8xf32>
    %609 = vector.shape_cast %608 : vector<2x8xf32> to vector<2x8x1xf32>
    %610 = vector.shape_cast %597 : vector<2x8xf32> to vector<2x8x1xf32>
    %611 = vector.broadcast %610 : vector<2x8x1xf32> to vector<2x8x128xf32>
    %612 = arith.mulf %611, %568 : vector<2x8x128xf32>
    %613 = vector.broadcast %603 : vector<2x8x1xf32> to vector<2x8x128xf32>
    %614 = arith.mulf %613, %522 : vector<2x8x128xf32>
    %615 = arith.addf %612, %614 : vector<2x8x128xf32>
    %616 = vector.broadcast %609 : vector<2x8x1xf32> to vector<2x8x128xf32>
    %617 = arith.mulf %616, %526 : vector<2x8x128xf32>
    %618 = arith.addf %615, %617 : vector<2x8x128xf32>
    %619 = vector.broadcast %610 : vector<2x8x1xf32> to vector<2x8x128xf32>
    %620 = arith.mulf %619, %561 : vector<2x8x128xf32>
    %621 = vector.broadcast %603 : vector<2x8x1xf32> to vector<2x8x128xf32>
    %622 = arith.mulf %621, %523 : vector<2x8x128xf32>
    %623 = arith.addf %620, %622 : vector<2x8x128xf32>
    %624 = vector.broadcast %609 : vector<2x8x1xf32> to vector<2x8x128xf32>
    %625 = arith.mulf %624, %529 : vector<2x8x128xf32>
    %626 = arith.addf %623, %625 : vector<2x8x128xf32>
    %627 = vector.broadcast %610 : vector<2x8x1xf32> to vector<2x8x128xf32>
    %628 = arith.mulf %627, %568 : vector<2x8x128xf32>
    %cst_150 = arith.constant dense<0.000000e+00> : vector<2x128xf32>
    %629 = vector.multi_reduction <add>, %628, %cst_150 [1] : vector<2x8x128xf32> to vector<2x128xf32>
    %630 = vector.shape_cast %572 : vector<2x1xf32> to vector<2x1x1xf32>
    %631 = vector.broadcast %630 : vector<2x1x1xf32> to vector<2x8x128xf32>
    %632 = arith.mulf %631, %618 : vector<2x8x128xf32>
    %cst_151 = arith.constant 1.000000e+00 : f32
    %633 = vector.broadcast %cst_151 : f32 to vector<2x1x1xf32>
    %634 = arith.subf %633, %630 : vector<2x1x1xf32>
    %635 = vector.broadcast %634 : vector<2x1x1xf32> to vector<2x8x128xf32>
    %636 = arith.mulf %635, %522 : vector<2x8x128xf32>
    %637 = arith.addf %632, %636 : vector<2x8x128xf32>
    %c0_152 = arith.constant 0 : index
    %c0_153 = arith.constant 0 : index
    %c0_154 = arith.constant 0 : index
    %638 = vector.load %arg12[%c0_152, %c0_153, %c0_154] : memref<2x8x128xf32, #tpu.memory_space<vmem>>, vector<2x8x128xf32>
    tpu.vector_store %arg12[%c0_152, %c0_153, %c0_154], %637 {strides = array<i32>} : memref<2x8x128xf32, #tpu.memory_space<vmem>>, vector<2x8x128xf32>,
    %639 = vector.broadcast %630 : vector<2x1x1xf32> to vector<2x8x128xf32>
    %640 = arith.mulf %639, %626 : vector<2x8x128xf32>
    %cst_155 = arith.constant 1.000000e+00 : f32
    %641 = vector.broadcast %cst_155 : f32 to vector<2x1x1xf32>
    %642 = arith.subf %641, %630 : vector<2x1x1xf32>
    %643 = vector.broadcast %642 : vector<2x1x1xf32> to vector<2x8x128xf32>
    %644 = arith.mulf %643, %523 : vector<2x8x128xf32>
    %645 = arith.addf %640, %644 : vector<2x8x128xf32>
    %c0_156 = arith.constant 0 : index
    %c0_157 = arith.constant 0 : index
    %c0_158 = arith.constant 0 : index
    %646 = vector.load %arg13[%c0_156, %c0_157, %c0_158] : memref<2x8x128xf32, #tpu.memory_space<vmem>>, vector<2x8x128xf32>
    tpu.vector_store %arg13[%c0_156, %c0_157, %c0_158], %645 {strides = array<i32>} : memref<2x8x128xf32, #tpu.memory_space<vmem>>, vector<2x8x128xf32>,
    %c0_159 = arith.constant 0 : index
    %c0_160 = arith.constant 0 : index
    %c0_161 = arith.constant 0 : index
    %647 = vector.load %arg12[%c0_159, %c0_160, %c0_161] : memref<2x8x128xf32, #tpu.memory_space<vmem>>, vector<2x8x128xf32>
    %c0_162 = arith.constant 0 : index
    %c0_163 = arith.constant 0 : index
    %c0_164 = arith.constant 0 : index
    %648 = vector.load %arg13[%c0_162, %c0_163, %c0_164] : memref<2x8x128xf32, #tpu.memory_space<vmem>>, vector<2x8x128xf32>
    %649 = vector.extract_strided_slice %647 {offsets = [0, 1, 0], sizes = [2, 7, 128], strides = [1, 1, 1]} : vector<2x8x128xf32> to vector<2x7x128xf32>
    %650 = vector.extract_strided_slice %647 {offsets = [0, 0, 0], sizes = [2, 1, 128], strides = [1, 1, 1]} : vector<2x8x128xf32> to vector<2x1x128xf32>
    %651 = tpu.concatenate %649, %650 in 1 : vector<2x7x128xf32>, vector<2x1x128xf32> -> vector<2x8x128xf32>
    %652 = vector.extract_strided_slice %648 {offsets = [0, 1, 0], sizes = [2, 7, 128], strides = [1, 1, 1]} : vector<2x8x128xf32> to vector<2x7x128xf32>
    %653 = vector.extract_strided_slice %648 {offsets = [0, 0, 0], sizes = [2, 1, 128], strides = [1, 1, 1]} : vector<2x8x128xf32> to vector<2x1x128xf32>
    %654 = tpu.concatenate %652, %653 in 1 : vector<2x7x128xf32>, vector<2x1x128xf32> -> vector<2x8x128xf32>
    %655 = tpu.concatenate %647, %651 in 2 : vector<2x8x128xf32>, vector<2x8x128xf32> -> vector<2x8x256xf32>
    %656 = vector.shape_cast %655 : vector<2x8x256xf32> to vector<16x256xf32>
    %cst_165 = arith.constant dense<0.000000e+00> : vector<16x640xf32>
    %657 = tpu.matmul %656, %13, %cst_165 {dimension_numbers = #tpu.dot_dimension_numbers<[1], [0], [0], [1], [0, 0, 1, 1], [], []>} : vector<16x256xf32>, vector<256x640xf32>, vector<16x640xf32> -> vector<16x640xf32>
    %658 = vector.shape_cast %657 : vector<16x640xf32> to vector<2x8x640xf32>
    %659 = vector.broadcast %15 : vector<1x1x640xf32> to vector<2x8x640xf32>
    %660 = arith.addf %658, %659 : vector<2x8x640xf32>
    %661 = vector.extract_strided_slice %660 {offsets = [0, 0, 0], sizes = [2, 8, 128], strides = [1, 1, 1]} : vector<2x8x640xf32> to vector<2x8x128xf32>
    %662 = vector.extract_strided_slice %660 {offsets = [0, 0, 128], sizes = [2, 8, 128], strides = [1, 1, 1]} : vector<2x8x640xf32> to vector<2x8x128xf32>
    %663 = vector.extract_strided_slice %660 {offsets = [0, 0, 256], sizes = [2, 8, 128], strides = [1, 1, 1]} : vector<2x8x640xf32> to vector<2x8x128xf32>
    %664 = vector.extract_strided_slice %660 {offsets = [0, 0, 384], sizes = [2, 8, 128], strides = [1, 1, 1]} : vector<2x8x640xf32> to vector<2x8x128xf32>
    %665 = vector.extract_strided_slice %660 {offsets = [0, 0, 512], sizes = [2, 8, 128], strides = [1, 1, 1]} : vector<2x8x640xf32> to vector<2x8x128xf32>
    %666 = arith.negf %662 : vector<2x8x128xf32>
    %667 = math.exp %666 : vector<2x8x128xf32>
    %cst_166 = arith.constant 1.000000e+00 : f32
    %668 = vector.broadcast %cst_166 : f32 to vector<2x8x128xf32>
    %669 = arith.addf %668, %667 : vector<2x8x128xf32>
    %670 = arith.divf %668, %669 : vector<2x8x128xf32>
    %671 = arith.mulf %648, %670 : vector<2x8x128xf32>
    %672 = arith.negf %663 : vector<2x8x128xf32>
    %673 = math.exp %672 : vector<2x8x128xf32>
    %cst_167 = arith.constant 1.000000e+00 : f32
    %674 = vector.broadcast %cst_167 : f32 to vector<2x8x128xf32>
    %675 = arith.addf %674, %673 : vector<2x8x128xf32>
    %676 = arith.divf %674, %675 : vector<2x8x128xf32>
    %677 = arith.mulf %654, %676 : vector<2x8x128xf32>
    %678 = arith.addf %671, %677 : vector<2x8x128xf32>
    %679 = math.tanh %664 : vector<2x8x128xf32>
    %680 = arith.negf %661 : vector<2x8x128xf32>
    %681 = math.exp %680 : vector<2x8x128xf32>
    %cst_168 = arith.constant 1.000000e+00 : f32
    %682 = vector.broadcast %cst_168 : f32 to vector<2x8x128xf32>
    %683 = arith.addf %682, %681 : vector<2x8x128xf32>
    %684 = arith.divf %682, %683 : vector<2x8x128xf32>
    %685 = arith.mulf %679, %684 : vector<2x8x128xf32>
    %686 = arith.addf %678, %685 : vector<2x8x128xf32>
    %687 = arith.negf %665 : vector<2x8x128xf32>
    %688 = math.exp %687 : vector<2x8x128xf32>
    %cst_169 = arith.constant 1.000000e+00 : f32
    %689 = vector.broadcast %cst_169 : f32 to vector<2x8x128xf32>
    %690 = arith.addf %689, %688 : vector<2x8x128xf32>
    %691 = arith.divf %689, %690 : vector<2x8x128xf32>
    %692 = math.tanh %686 : vector<2x8x128xf32>
    %693 = arith.mulf %691, %692 : vector<2x8x128xf32>
    %cst_170 = arith.constant 6.000000e+00 : f32
    %694 = vector.broadcast %cst_170 : f32 to vector<2x1xf32>
    %695 = arith.cmpf olt, %694, %19 : vector<2x1xf32>
    %696 = arith.extui %695 : vector<2x1xi1> to vector<2x1xi32>
    %697 = arith.sitofp %696 : vector<2x1xi32> to vector<2x1xf32>
    %698 = vector.broadcast %17 : vector<1x1x128xf32> to vector<2x8x128xf32>
    %699 = arith.mulf %693, %698 : vector<2x8x128xf32>
    %cst_171 = arith.constant dense<0.000000e+00> : vector<2x8xf32>
    %700 = vector.multi_reduction <add>, %699, %cst_171 [2] : vector<2x8x128xf32> to vector<2x8xf32>
    %cst_172 = arith.constant 6.000000e+00 : f32
    %701 = vector.broadcast %cst_172 : f32 to vector<1x8xf32>
    %702 = arith.addf %21, %701 : vector<1x8xf32>
    %703 = vector.broadcast %702 : vector<1x8xf32> to vector<2x8xf32>
    %704 = vector.broadcast %19 : vector<2x1xf32> to vector<2x8xf32>
    %705 = arith.cmpf olt, %703, %704 : vector<2x8xf32>
    %cst_173 = arith.constant -1.000000e+30 : f32
    %706 = vector.broadcast %cst_173 : f32 to vector<2x8xf32>
    %707 = arith.select %705, %700, %706 : vector<2x8xi1>, vector<2x8xf32>
    %cst_174 = arith.constant dense<0xFF800000> : vector<2xf32>
    %708 = vector.multi_reduction <maximumf>, %707, %cst_174 [1] : vector<2x8xf32> to vector<2xf32>
    %709 = vector.shape_cast %708 : vector<2xf32> to vector<2x1xf32>
    %710 = vector.broadcast %709 : vector<2x1xf32> to vector<2x8xf32>
    %711 = arith.cmpf oge, %707, %710 : vector<2x8xf32>
    %cst_175 = arith.constant 8.000000e+00 : f32
    %712 = vector.shape_cast %21 : vector<1x8xf32> to vector<1x8xf32>
    %713 = vector.broadcast %712 : vector<1x8xf32> to vector<2x8xf32>
    %714 = vector.broadcast %cst_175 : f32 to vector<2x8xf32>
    %715 = arith.select %711, %713, %714 : vector<2x8xi1>, vector<2x8xf32>
    %cst_176 = arith.constant dense<0x7F800000> : vector<2xf32>
    %716 = vector.multi_reduction <minimumf>, %715, %cst_176 [1] : vector<2x8xf32> to vector<2xf32>
    %717 = vector.shape_cast %716 : vector<2xf32> to vector<2x1xf32>
    %718 = vector.broadcast %21 : vector<1x8xf32> to vector<2x8xf32>
    %719 = vector.broadcast %717 : vector<2x1xf32> to vector<2x8xf32>
    %720 = arith.cmpf oeq, %718, %719 : vector<2x8xf32>
    %721 = arith.extui %720 : vector<2x8xi1> to vector<2x8xi32>
    %722 = arith.sitofp %721 : vector<2x8xi32> to vector<2x8xf32>
    %723 = vector.broadcast %21 : vector<1x8xf32> to vector<2x8xf32>
    %724 = vector.broadcast %717 : vector<2x1xf32> to vector<2x8xf32>
    %725 = arith.cmpf olt, %723, %724 : vector<2x8xf32>
    %726 = arith.extui %725 : vector<2x8xi1> to vector<2x8xi32>
    %727 = arith.sitofp %726 : vector<2x8xi32> to vector<2x8xf32>
    %728 = vector.shape_cast %727 : vector<2x8xf32> to vector<2x8x1xf32>
    %729 = vector.broadcast %21 : vector<1x8xf32> to vector<2x8xf32>
    %730 = vector.broadcast %717 : vector<2x1xf32> to vector<2x8xf32>
    %731 = arith.cmpf ogt, %729, %730 : vector<2x8xf32>
    %732 = arith.extui %731 : vector<2x8xi1> to vector<2x8xi32>
    %733 = arith.sitofp %732 : vector<2x8xi32> to vector<2x8xf32>
    %734 = vector.shape_cast %733 : vector<2x8xf32> to vector<2x8x1xf32>
    %735 = vector.shape_cast %722 : vector<2x8xf32> to vector<2x8x1xf32>
    %736 = vector.broadcast %735 : vector<2x8x1xf32> to vector<2x8x128xf32>
    %737 = arith.mulf %736, %693 : vector<2x8x128xf32>
    %738 = vector.broadcast %728 : vector<2x8x1xf32> to vector<2x8x128xf32>
    %739 = arith.mulf %738, %647 : vector<2x8x128xf32>
    %740 = arith.addf %737, %739 : vector<2x8x128xf32>
    %741 = vector.broadcast %734 : vector<2x8x1xf32> to vector<2x8x128xf32>
    %742 = arith.mulf %741, %651 : vector<2x8x128xf32>
    %743 = arith.addf %740, %742 : vector<2x8x128xf32>
    %744 = vector.broadcast %735 : vector<2x8x1xf32> to vector<2x8x128xf32>
    %745 = arith.mulf %744, %686 : vector<2x8x128xf32>
    %746 = vector.broadcast %728 : vector<2x8x1xf32> to vector<2x8x128xf32>
    %747 = arith.mulf %746, %648 : vector<2x8x128xf32>
    %748 = arith.addf %745, %747 : vector<2x8x128xf32>
    %749 = vector.broadcast %734 : vector<2x8x1xf32> to vector<2x8x128xf32>
    %750 = arith.mulf %749, %654 : vector<2x8x128xf32>
    %751 = arith.addf %748, %750 : vector<2x8x128xf32>
    %752 = vector.broadcast %735 : vector<2x8x1xf32> to vector<2x8x128xf32>
    %753 = arith.mulf %752, %693 : vector<2x8x128xf32>
    %cst_177 = arith.constant dense<0.000000e+00> : vector<2x128xf32>
    %754 = vector.multi_reduction <add>, %753, %cst_177 [1] : vector<2x8x128xf32> to vector<2x128xf32>
    %755 = vector.shape_cast %697 : vector<2x1xf32> to vector<2x1x1xf32>
    %756 = vector.broadcast %755 : vector<2x1x1xf32> to vector<2x8x128xf32>
    %757 = arith.mulf %756, %743 : vector<2x8x128xf32>
    %cst_178 = arith.constant 1.000000e+00 : f32
    %758 = vector.broadcast %cst_178 : f32 to vector<2x1x1xf32>
    %759 = arith.subf %758, %755 : vector<2x1x1xf32>
    %760 = vector.broadcast %759 : vector<2x1x1xf32> to vector<2x8x128xf32>
    %761 = arith.mulf %760, %647 : vector<2x8x128xf32>
    %762 = arith.addf %757, %761 : vector<2x8x128xf32>
    %c0_179 = arith.constant 0 : index
    %c0_180 = arith.constant 0 : index
    %c0_181 = arith.constant 0 : index
    %763 = vector.load %arg12[%c0_179, %c0_180, %c0_181] : memref<2x8x128xf32, #tpu.memory_space<vmem>>, vector<2x8x128xf32>
    tpu.vector_store %arg12[%c0_179, %c0_180, %c0_181], %762 {strides = array<i32>} : memref<2x8x128xf32, #tpu.memory_space<vmem>>, vector<2x8x128xf32>,
    %764 = vector.broadcast %755 : vector<2x1x1xf32> to vector<2x8x128xf32>
    %765 = arith.mulf %764, %751 : vector<2x8x128xf32>
    %cst_182 = arith.constant 1.000000e+00 : f32
    %766 = vector.broadcast %cst_182 : f32 to vector<2x1x1xf32>
    %767 = arith.subf %766, %755 : vector<2x1x1xf32>
    %768 = vector.broadcast %767 : vector<2x1x1xf32> to vector<2x8x128xf32>
    %769 = arith.mulf %768, %648 : vector<2x8x128xf32>
    %770 = arith.addf %765, %769 : vector<2x8x128xf32>
    %c0_183 = arith.constant 0 : index
    %c0_184 = arith.constant 0 : index
    %c0_185 = arith.constant 0 : index
    %771 = vector.load %arg13[%c0_183, %c0_184, %c0_185] : memref<2x8x128xf32, #tpu.memory_space<vmem>>, vector<2x8x128xf32>
    tpu.vector_store %arg13[%c0_183, %c0_184, %c0_185], %770 {strides = array<i32>} : memref<2x8x128xf32, #tpu.memory_space<vmem>>, vector<2x8x128xf32>,
    %c0_186 = arith.constant 0 : index
    %c0_187 = arith.constant 0 : index
    %c0_188 = arith.constant 0 : index
    %772 = vector.load %arg12[%c0_186, %c0_187, %c0_188] : memref<2x8x128xf32, #tpu.memory_space<vmem>>, vector<2x8x128xf32>
    %c0_189 = arith.constant 0 : index
    %c0_190 = arith.constant 0 : index
    %c0_191 = arith.constant 0 : index
    %773 = vector.load %arg13[%c0_189, %c0_190, %c0_191] : memref<2x8x128xf32, #tpu.memory_space<vmem>>, vector<2x8x128xf32>
    %774 = vector.extract_strided_slice %772 {offsets = [0, 1, 0], sizes = [2, 7, 128], strides = [1, 1, 1]} : vector<2x8x128xf32> to vector<2x7x128xf32>
    %775 = vector.extract_strided_slice %772 {offsets = [0, 0, 0], sizes = [2, 1, 128], strides = [1, 1, 1]} : vector<2x8x128xf32> to vector<2x1x128xf32>
    %776 = tpu.concatenate %774, %775 in 1 : vector<2x7x128xf32>, vector<2x1x128xf32> -> vector<2x8x128xf32>
    %777 = vector.extract_strided_slice %773 {offsets = [0, 1, 0], sizes = [2, 7, 128], strides = [1, 1, 1]} : vector<2x8x128xf32> to vector<2x7x128xf32>
    %778 = vector.extract_strided_slice %773 {offsets = [0, 0, 0], sizes = [2, 1, 128], strides = [1, 1, 1]} : vector<2x8x128xf32> to vector<2x1x128xf32>
    %779 = tpu.concatenate %777, %778 in 1 : vector<2x7x128xf32>, vector<2x1x128xf32> -> vector<2x8x128xf32>
    %780 = tpu.concatenate %772, %776 in 2 : vector<2x8x128xf32>, vector<2x8x128xf32> -> vector<2x8x256xf32>
    %781 = vector.shape_cast %780 : vector<2x8x256xf32> to vector<16x256xf32>
    %cst_192 = arith.constant dense<0.000000e+00> : vector<16x640xf32>
    %782 = tpu.matmul %781, %13, %cst_192 {dimension_numbers = #tpu.dot_dimension_numbers<[1], [0], [0], [1], [0, 0, 1, 1], [], []>} : vector<16x256xf32>, vector<256x640xf32>, vector<16x640xf32> -> vector<16x640xf32>
    %783 = vector.shape_cast %782 : vector<16x640xf32> to vector<2x8x640xf32>
    %784 = vector.broadcast %15 : vector<1x1x640xf32> to vector<2x8x640xf32>
    %785 = arith.addf %783, %784 : vector<2x8x640xf32>
    %786 = vector.extract_strided_slice %785 {offsets = [0, 0, 0], sizes = [2, 8, 128], strides = [1, 1, 1]} : vector<2x8x640xf32> to vector<2x8x128xf32>
    %787 = vector.extract_strided_slice %785 {offsets = [0, 0, 128], sizes = [2, 8, 128], strides = [1, 1, 1]} : vector<2x8x640xf32> to vector<2x8x128xf32>
    %788 = vector.extract_strided_slice %785 {offsets = [0, 0, 256], sizes = [2, 8, 128], strides = [1, 1, 1]} : vector<2x8x640xf32> to vector<2x8x128xf32>
    %789 = vector.extract_strided_slice %785 {offsets = [0, 0, 384], sizes = [2, 8, 128], strides = [1, 1, 1]} : vector<2x8x640xf32> to vector<2x8x128xf32>
    %790 = vector.extract_strided_slice %785 {offsets = [0, 0, 512], sizes = [2, 8, 128], strides = [1, 1, 1]} : vector<2x8x640xf32> to vector<2x8x128xf32>
    %791 = arith.negf %787 : vector<2x8x128xf32>
    %792 = math.exp %791 : vector<2x8x128xf32>
    %cst_193 = arith.constant 1.000000e+00 : f32
    %793 = vector.broadcast %cst_193 : f32 to vector<2x8x128xf32>
    %794 = arith.addf %793, %792 : vector<2x8x128xf32>
    %795 = arith.divf %793, %794 : vector<2x8x128xf32>
    %796 = arith.mulf %773, %795 : vector<2x8x128xf32>
    %797 = arith.negf %788 : vector<2x8x128xf32>
    %798 = math.exp %797 : vector<2x8x128xf32>
    %cst_194 = arith.constant 1.000000e+00 : f32
    %799 = vector.broadcast %cst_194 : f32 to vector<2x8x128xf32>
    %800 = arith.addf %799, %798 : vector<2x8x128xf32>
    %801 = arith.divf %799, %800 : vector<2x8x128xf32>
    %802 = arith.mulf %779, %801 : vector<2x8x128xf32>
    %803 = arith.addf %796, %802 : vector<2x8x128xf32>
    %804 = math.tanh %789 : vector<2x8x128xf32>
    %805 = arith.negf %786 : vector<2x8x128xf32>
    %806 = math.exp %805 : vector<2x8x128xf32>
    %cst_195 = arith.constant 1.000000e+00 : f32
    %807 = vector.broadcast %cst_195 : f32 to vector<2x8x128xf32>
    %808 = arith.addf %807, %806 : vector<2x8x128xf32>
    %809 = arith.divf %807, %808 : vector<2x8x128xf32>
    %810 = arith.mulf %804, %809 : vector<2x8x128xf32>
    %811 = arith.addf %803, %810 : vector<2x8x128xf32>
    %812 = arith.negf %790 : vector<2x8x128xf32>
    %813 = math.exp %812 : vector<2x8x128xf32>
    %cst_196 = arith.constant 1.000000e+00 : f32
    %814 = vector.broadcast %cst_196 : f32 to vector<2x8x128xf32>
    %815 = arith.addf %814, %813 : vector<2x8x128xf32>
    %816 = arith.divf %814, %815 : vector<2x8x128xf32>
    %817 = math.tanh %811 : vector<2x8x128xf32>
    %818 = arith.mulf %816, %817 : vector<2x8x128xf32>
    %cst_197 = arith.constant 7.000000e+00 : f32
    %819 = vector.broadcast %cst_197 : f32 to vector<2x1xf32>
    %820 = arith.cmpf olt, %819, %19 : vector<2x1xf32>
    %821 = arith.extui %820 : vector<2x1xi1> to vector<2x1xi32>
    %822 = arith.sitofp %821 : vector<2x1xi32> to vector<2x1xf32>
    %823 = vector.shape_cast %822 : vector<2x1xf32> to vector<2x1x1xf32>
    %824 = vector.broadcast %823 : vector<2x1x1xf32> to vector<2x8x128xf32>
    %825 = arith.mulf %824, %818 : vector<2x8x128xf32>
    %cst_198 = arith.constant 1.000000e+00 : f32
    %826 = vector.broadcast %cst_198 : f32 to vector<2x1x1xf32>
    %827 = arith.subf %826, %823 : vector<2x1x1xf32>
    %828 = vector.broadcast %827 : vector<2x1x1xf32> to vector<2x8x128xf32>
    %829 = arith.mulf %828, %772 : vector<2x8x128xf32>
    %830 = arith.addf %825, %829 : vector<2x8x128xf32>
    %c0_199 = arith.constant 0 : index
    %c0_200 = arith.constant 0 : index
    %c0_201 = arith.constant 0 : index
    %831 = vector.load %arg12[%c0_199, %c0_200, %c0_201] : memref<2x8x128xf32, #tpu.memory_space<vmem>>, vector<2x8x128xf32>
    tpu.vector_store %arg12[%c0_199, %c0_200, %c0_201], %830 {strides = array<i32>} : memref<2x8x128xf32, #tpu.memory_space<vmem>>, vector<2x8x128xf32>,
    %832 = vector.broadcast %823 : vector<2x1x1xf32> to vector<2x8x128xf32>
    %833 = arith.mulf %832, %811 : vector<2x8x128xf32>
    %cst_202 = arith.constant 1.000000e+00 : f32
    %834 = vector.broadcast %cst_202 : f32 to vector<2x1x1xf32>
    %835 = arith.subf %834, %823 : vector<2x1x1xf32>
    %836 = vector.broadcast %835 : vector<2x1x1xf32> to vector<2x8x128xf32>
    %837 = arith.mulf %836, %773 : vector<2x8x128xf32>
    %838 = arith.addf %833, %837 : vector<2x8x128xf32>
    %c0_203 = arith.constant 0 : index
    %c0_204 = arith.constant 0 : index
    %c0_205 = arith.constant 0 : index
    %839 = vector.load %arg13[%c0_203, %c0_204, %c0_205] : memref<2x8x128xf32, #tpu.memory_space<vmem>>, vector<2x8x128xf32>
    tpu.vector_store %arg13[%c0_203, %c0_204, %c0_205], %838 {strides = array<i32>} : memref<2x8x128xf32, #tpu.memory_space<vmem>>, vector<2x8x128xf32>,
    %c0_206 = arith.constant 0 : index
    %c0_207 = arith.constant 0 : index
    %c0_208 = arith.constant 0 : index
    %840 = vector.load %arg12[%c0_206, %c0_207, %c0_208] : memref<2x8x128xf32, #tpu.memory_space<vmem>>, vector<2x8x128xf32>
    %c0_209 = arith.constant 0 : index
    %c0_210 = arith.constant 0 : index
    %c0_211 = arith.constant 0 : index
    %841 = vector.load %arg13[%c0_209, %c0_210, %c0_211] : memref<2x8x128xf32, #tpu.memory_space<vmem>>, vector<2x8x128xf32>
    %842 = vector.extract_strided_slice %840 {offsets = [0, 0, 0], sizes = [2, 1, 128], strides = [1, 1, 1]} : vector<2x8x128xf32> to vector<2x1x128xf32>
    %c0_212 = arith.constant 0 : index
    %c0_213 = arith.constant 0 : index
    %c0_214 = arith.constant 0 : index
    %843 = vector.load %arg8[%c0_212, %c0_213, %c0_214] : memref<2x1x128xf32, #tpu.memory_space<vmem>>, vector<2x1x128xf32>
    tpu.vector_store %arg8[%c0_212, %c0_213, %c0_214], %842 {strides = array<i32>} : memref<2x1x128xf32, #tpu.memory_space<vmem>>, vector<2x1x128xf32>,
    %844 = vector.extract_strided_slice %841 {offsets = [0, 0, 0], sizes = [2, 1, 128], strides = [1, 1, 1]} : vector<2x8x128xf32> to vector<2x1x128xf32>
    %c0_215 = arith.constant 0 : index
    %c0_216 = arith.constant 0 : index
    %c0_217 = arith.constant 0 : index
    %845 = vector.load %arg9[%c0_215, %c0_216, %c0_217] : memref<2x1x128xf32, #tpu.memory_space<vmem>>, vector<2x1x128xf32>
    tpu.vector_store %arg9[%c0_215, %c0_216, %c0_217], %844 {strides = array<i32>} : memref<2x1x128xf32, #tpu.memory_space<vmem>>, vector<2x1x128xf32>,
    %846 = vector.shape_cast %129 : vector<2x128xf32> to vector<2x1x128xf32>
    %847 = vector.shape_cast %254 : vector<2x128xf32> to vector<2x1x128xf32>
    %848 = vector.shape_cast %379 : vector<2x128xf32> to vector<2x1x128xf32>
    %849 = vector.shape_cast %504 : vector<2x128xf32> to vector<2x1x128xf32>
    %850 = vector.shape_cast %629 : vector<2x128xf32> to vector<2x1x128xf32>
    %851 = vector.shape_cast %754 : vector<2x128xf32> to vector<2x1x128xf32>
    %852 = tpu.concatenate %846, %847, %848, %849, %850, %851 in 1 : vector<2x1x128xf32>, vector<2x1x128xf32>, vector<2x1x128xf32>, vector<2x1x128xf32>, vector<2x1x128xf32>, vector<2x1x128xf32> -> vector<2x6x128xf32>
    %853 = vector.extract_strided_slice %840 {offsets = [0, 0, 0], sizes = [2, 1, 128], strides = [1, 1, 1]} : vector<2x8x128xf32> to vector<2x1x128xf32>
    %854 = tpu.concatenate %852, %853 in 1 : vector<2x6x128xf32>, vector<2x1x128xf32> -> vector<2x7x128xf32>
    %c0_218 = arith.constant 0 : index
    %c8 = arith.constant 8 : index
    %c0_219 = arith.constant 0 : index
    %855 = vector.load %arg10[%c0_218, %c8, %c0_219] : memref<2x15x128xf32, #tpu.memory_space<vmem>>, vector<2x7x128xf32>
    tpu.vector_store %arg10[%c0_218, %c8, %c0_219], %854 {strides = array<i32>} : memref<2x15x128xf32, #tpu.memory_space<vmem>>, vector<2x7x128xf32>,
    %856 = vector.shape_cast %97 : vector<2x8xf32> to vector<2x1x8xf32>
    %857 = vector.shape_cast %222 : vector<2x8xf32> to vector<2x1x8xf32>
    %858 = vector.shape_cast %347 : vector<2x8xf32> to vector<2x1x8xf32>
    %859 = vector.shape_cast %472 : vector<2x8xf32> to vector<2x1x8xf32>
    %860 = vector.shape_cast %597 : vector<2x8xf32> to vector<2x1x8xf32>
    %861 = vector.shape_cast %722 : vector<2x8xf32> to vector<2x1x8xf32>
    %862 = tpu.concatenate %856, %857, %858, %859, %860, %861 in 1 : vector<2x1x8xf32>, vector<2x1x8xf32>, vector<2x1x8xf32>, vector<2x1x8xf32>, vector<2x1x8xf32>, vector<2x1x8xf32> -> vector<2x6x8xf32>
    %c0_220 = arith.constant 0 : index
    %c0_221 = arith.constant 0 : index
    %c0_222 = arith.constant 0 : index
    %863 = vector.load %arg11[%c0_220, %c0_221, %c0_222] : memref<2x6x8xf32, #tpu.memory_space<vmem>>, vector<2x6x8xf32>
    tpu.vector_store %arg11[%c0_220, %c0_221, %c0_222], %862 {strides = array<i32>} : memref<2x6x8xf32, #tpu.memory_space<vmem>>, vector<2x6x8xf32>,
    return
  }
  func.func @transform_0(%arg0: i32) -> (i32, i32, i32) {
    %c0_i32 = arith.constant 0 : i32
    %c0_i32_0 = arith.constant 0 : i32
    %c0_i32_1 = arith.constant 0 : i32
    return %arg0, %c0_i32, %c0_i32_0 : i32, i32, i32
  }
  func.func @transform_1(%arg0: i32) -> (i32, i32) {
    %c0_i32 = arith.constant 0 : i32
    %c0_i32_0 = arith.constant 0 : i32
    %c0_i32_1 = arith.constant 0 : i32
    return %c0_i32, %c0_i32_0 : i32, i32
  }
  func.func @transform_2(%arg0: i32) -> (i32, i32) {
    %c0_i32 = arith.constant 0 : i32
    %c0_i32_0 = arith.constant 0 : i32
    %c0_i32_1 = arith.constant 0 : i32
    return %c0_i32, %c0_i32_0 : i32, i32
  }
  func.func @transform_3(%arg0: i32) -> (i32, i32) {
    %c0_i32 = arith.constant 0 : i32
    %c0_i32_0 = arith.constant 0 : i32
    %c0_i32_1 = arith.constant 0 : i32
    return %c0_i32, %c0_i32_0 : i32, i32
  }
  func.func @transform_4(%arg0: i32) -> (i32, i32) {
    %c0_i32 = arith.constant 0 : i32
    %c0_i32_0 = arith.constant 0 : i32
    %c0_i32_1 = arith.constant 0 : i32
    return %c0_i32, %c0_i32_0 : i32, i32
  }
  func.func @transform_5(%arg0: i32) -> (i32, i32) {
    %c0_i32 = arith.constant 0 : i32
    %c0_i32_0 = arith.constant 0 : i32
    %c0_i32_1 = arith.constant 0 : i32
    return %c0_i32, %c0_i32_0 : i32, i32
  }
  func.func @transform_6(%arg0: i32) -> (i32, i32, i32) {
    %c0_i32 = arith.constant 0 : i32
    %c0_i32_0 = arith.constant 0 : i32
    %c0_i32_1 = arith.constant 0 : i32
    return %arg0, %c0_i32, %c0_i32_0 : i32, i32, i32
  }
  func.func @transform_7(%arg0: i32) -> (i32, i32, i32) {
    %c0_i32 = arith.constant 0 : i32
    %c0_i32_0 = arith.constant 0 : i32
    %c0_i32_1 = arith.constant 0 : i32
    return %arg0, %c0_i32, %c0_i32_0 : i32, i32, i32
  }
  func.func @transform_8(%arg0: i32) -> (i32, i32, i32) {
    %c0_i32 = arith.constant 0 : i32
    %c0_i32_0 = arith.constant 0 : i32
    %c0_i32_1 = arith.constant 0 : i32
    return %arg0, %c0_i32, %c0_i32_0 : i32, i32, i32
  }
  func.func @transform_9(%arg0: i32) -> (i32, i32, i32) {
    %c0_i32 = arith.constant 0 : i32
    %c0_i32_0 = arith.constant 0 : i32
    %c0_i32_1 = arith.constant 0 : i32
    return %arg0, %c0_i32, %c0_i32_0 : i32, i32, i32
  }
  func.func @transform_10(%arg0: i32) -> (i32, i32, i32) {
    %c0_i32 = arith.constant 0 : i32
    %c0_i32_0 = arith.constant 0 : i32
    %c0_i32_1 = arith.constant 0 : i32
    return %arg0, %c0_i32, %c0_i32_0 : i32, i32, i32
  }
}

</mosaic_0001>

<bundles_post_ra>
// kernel: tpu_custom_call.1
= control target key start
LH: loop header
LB: loop body
LE: loop exit
PB: predicated region body
PF: predicated region fallthrough
CT: control target
= control target key end

     0   :  { %16 = vsyncpa [#allocation5], 0  ;;  %s8816_s0 = inlined_call_operand.hbm [shape: f32[4,8,128], index: 0, kind: input, shape index: {}]   ;;  %s8817_s1 = inlined_call_operand.hbm [shape: f32[128,256], index: 1, kind: input, shape index: {}]   ;;  %s8818_s2 = inlined_call_operand.vmem [shape: f32[1,256], index: 2, kind: input, shape index: {}]   ;;  %s8819_s3 = inlined_call_operand.hbm [shape: f32[256,640], index: 3, kind: input, shape index: {}]   ;;  %s8820_s4 = inlined_call_operand.vmem [shape: f32[1,640], index: 4, kind: input, shape index: {}]   ;;  %s8821_s5 = inlined_call_operand.vmem [shape: f32[1,128], index: 5, kind: input, shape index: {}]   ;;  %s8822_s6 = inlined_call_operand.vmem [shape: f32[4,1,1], index: 6, kind: input, shape index: {}]   ;;  %s8823_s7 = inlined_call_operand.hbm [shape: f32[4,1,128], index: 7, kind: output, shape index: {0}]   ;;  %s8824_s8 = inlined_call_operand.hbm [shape: f32[4,1,128], index: 8, kind: output, shape index: {1}]   ;;  %s8825_s9 = inlined_call_operand.vmem [shape: f32[4,15,128], index: 9, kind: output, shape index: {2}]   ;;  %s8826_s10 = inlined_call_operand.vmem [shape: f32[4,6,8], index: 10, kind: output, shape index: {3}]  }
   0x1   :  { %18 = vsyncpa [#allocation5 + $0x1], 0 }
   0x2   :  { %19 = vsyncpa [#allocation8], 0 }
   0x3   :  { %20 = vsyncpa [#allocation6], 0 }
   0x4   :  { %22 = vsyncpa [#allocation6 + $0x1], 0 }
   0x5   :  { %23 = vsyncpa [#allocation12], 0 }
   0x6   :  { %25 = vsyncpa [#allocation12 + $0x1], 0  ;;  %s6853_s13 = smov 0   ;;  %s6855_s14 = smov 0  }
   0x7   :  { %s6857_s15 = smov 0   ;;  %s6859_s16 = smov 0  }
   0x8 LB: > { %9048 = sst [smem:[#allocation17_spill]] %s6768_s13  ;;  %s6874_s17 = sadd.s32 4294967295, %s6780_s16   ;;  %s6780_s16 = sphi %s6859_s16, %s9511_s16   ;;  %s6776_s15 = sphi %s6857_s15, %s9510_s15   ;;  %s6772_s14 = sphi %s6855_s14, %s9509_s14   ;;  %s6768_s13 = sphi %s6853_s13, %s9508_s13  }
   0x9   : > { %s4663_s18 = sadd.s32 4294967294, %s6780_s16   ;;  %p51_p0 = scmp.ne.s32.totalorder %s6772_s14, %s6768_s13 }
   0xa   : > { %p8827_p1 = scmp.eq.s32.totalorder %s6874_s17, 0  ;;  %p212_p3 = scmp.eq.s32.totalorder %s4663_s18, 1 }
   0xb   : > { %p4664_p5 = scmp.ge.s32.totalorder %s6780_s16, 1  ;;  %p297_p7 = scmp.lt.s32.totalorder %s6780_s16, 3 }
   0xc   : > { %p6883_p4 = por %p8827_p1, %p51_p0  ;;  %p6888_p6 = por %p212_p3, %p51_p0 }
   0xd   : > { %p6893_p8 = pnand %p4664_p5, %p297_p7  ;;  %s6782_s22 = smov [#allocation7]  }
   0xe   : > { %s9049_s19 = scalar_select %p6883_p4, 1, 0 }
   0xf   : > { %s9050_s20 = scalar_select %p6888_p6, 1, 0 }
  0x10   : > { %s309_s23 = sshll.u32 %s6782_s22, 4  ;;  %p6230_p9 = pneg %p6893_p8  ;;  %s6897_s23 = int_to_ptr.vmem [resolvable:$true] %s309_s23 }
  0x11   : > { %9051 = sst [smem:[#allocation18_spill]] %s9050_s20  ;;  %s6783_s25 = smov [#allocation9]  }
  0x12   : > { %p6904_p11 = pnand %p6230_p9, %p8827_p1  ;;  %s325_s26 = sshll.u32 %s6783_s25, 4  ;;  %s6908_s26 = int_to_ptr.vmem [resolvable:$true] %s325_s26 }
  0x13   : > { %s6592_s29 = scalar_lea.hbm %s8817_s1, 4096 }
  0x14   : > { %p6593_p12 = scmp.ne.s32.totalorder %s8817_s1, %s6592_s29  ;;  %p6594_p13 = pneg %p6904_p11 }
  0x15   : > { %p6599_p5 = scmp.lt.u32.totalorder %s6592_s29, %s8817_s1 }
  0x16   : > { %p6595_p0 = pnand %p6594_p13, %p6593_p12 }
  0x18   : > { %p6596_p3 = pneg %p6595_p0 }
  0x1a   : > { %p6601_p7 = pnand %p6599_p5, %p6596_p3 }
  0x1c   : > { %6604 = shalt.err (!%p6601_p7)
}
  0x1d   : > { %s6605_s22 = scalar_lea.vmem %s6897_s23, 4096  ;;  %p6613_p2 = scmp.lt.s32.totalorder %s6897_s23, %s6897_s23 }
  0x1e   : > { %p6606_p9 = scmp.ne.s32.totalorder %s6897_s23, %s6605_s22  ;;  %p6614_p12 = scmp.lt.s32.totalorder %s6605_s22, %s6605_s22 }
  0x20   : > { %p6608_p10 = pnand %p6606_p9, %p6594_p13  ;;  %p6615_p0 = por %p6614_p12, %p6613_p2 }
  0x22   : > { %p6609_p1 = pneg %p6608_p10 }
  0x24   : > { %p6616_p6 = pnand %p6615_p0, %p6609_p1 }
  0x26   : > { %6619 = shalt.err (!%p6616_p6)
}
  0x27   : > { %s6784_s25 = smov 256   ;;  %s6785_s27 = smov 16  }
  0x28   : > { %6233 = dma.hbm_to_vmem [thread:$0]  (!%p6904_p11), %s8817_s1, 4096, %s6897_s23, [#allocation8], %s6784_s25, %s6784_s25, %s6785_s27  }
  0x29   : > { %s6620_s12 = scalar_lea.hbm %s8819_s3, 20480 }
  0x2a   : > { %p6621_p2 = scmp.ne.s32.totalorder %s8819_s3, %s6620_s12  ;;  %p6627_p10 = scmp.lt.u32.totalorder %s6620_s12, %s8819_s3 }
  0x2c   : > { %p6623_p1 = pnand %p6621_p2, %p6594_p13 }
  0x2e   : > { %p6624_p6 = pneg %p6623_p1 }
  0x30   : > { %p6629_p3 = pnand %p6627_p10, %p6624_p6 }
  0x32   : > { %6632 = shalt.err (!%p6629_p3)
}
  0x33   : > { %s6633_s23 = scalar_lea.vmem %s6908_s26, 20480  ;;  %p6641_p12 = scmp.lt.s32.totalorder %s6908_s26, %s6908_s26 }
  0x34   : > { %p6634_p5 = scmp.ne.s32.totalorder %s6908_s26, %s6633_s23  ;;  %p6642_p0 = scmp.lt.s32.totalorder %s6633_s23, %s6633_s23 }
  0x36   : > { %p6636_p7 = pnand %p6634_p5, %p6594_p13  ;;  %p6643_p2 = por %p6642_p0, %p6641_p12 }
  0x38   : > { %p6637_p9 = pneg %p6636_p7 }
  0x3a   : > { %p6644_p1 = pnand %p6643_p2, %p6637_p9 }
  0x3c   : > { %6647 = shalt.err (!%p6644_p1)
}
  0x3d   : > { %s6786_s13 = smov 640   ;;  %s6787_s20 = smov 40  }
  0x3e   : > { %6236 = dma.hbm_to_vmem [thread:$0]  (!%p6904_p11), %s8819_s3, 20480, %s6908_s26, [#allocation8], %s6786_s13, %s6786_s13, %s6787_s20  }
  0x3f   : > { %s6963_s28 = sadd.s32 1, %s6780_s16   ;;  %s38_s30 = sadd.s32 1, %s6776_s15 }
  0x40   : > { %s35_s29 = ssub.s32 %s6780_s16, %s6963_s28  ;;  %p45_p6 = scmp.ne.s32.totalorder %s6776_s15, %s6772_s14 }
  0x41   : > { %p36_p13 = scmp.eq.s32.totalorder %s35_s29, 0  ;;  %p46_p10 = scmp.eq.s32.totalorder %s6780_s16, 0 }
  0x42   : > { %p9054_p5 = scmp.eq.s32.totalorder %s6874_s17, 1  ;;  %p6250_p9 = scmp.lt.s32.totalorder %s6780_s16, 2 }
  0x43   : > { %s6972_s11 = scalar_select %p36_p13, %s6776_s15, %s38_s30  }
  0x44   : > { %p47_p3 = por %p46_p10, %p45_p6  ;;  %p6976_p7 = por %p9054_p5, %p45_p6 }
  0x45   : > { %s345_s24 = sand.u32 1, %s6776_s15   ;;  %s4794_s26 = sshll.u32 %s6780_s16, 8 }
  0x46   : > { %s9055_s12 = scalar_select %p6976_p7, 1, 0 }
  0x47   : > { %s4668_s18 = sshll.u32 %s345_s24, 4  ;;  %s6986_s13 = scalar_lea.hbm %s8816_s0, %s4794_s26 }
  0x48   : > { %s349_s20 = scalar_lea.vmem [#allocation4], %s4668_s18  ;;  %p6990_p11 = pnand %p6250_p9, %p47_p3 }
  0x49   : > { %s356_s25 = sshll.u32 %s349_s20, 4  ;;  %s6994_s29 = scalar_lea.sflag [#allocation5], %s345_s24  ;;  %s6988_s25 = int_to_ptr.vmem [resolvable:$true] %s356_s25 }
  0x4a   : > { %s6648_s30 = scalar_lea.hbm %s6986_s13, 256  ;;  %p6650_p0 = pneg %p6990_p11 }
  0x4b   : > { %p6649_p12 = scmp.ne.s32.totalorder %s6986_s13, %s6648_s30  ;;  %s6653_s22 = scalar_lea.hbm %s8816_s0, 512 }
  0x4c   : > { %p6654_p13 = scmp.lt.u32.totalorder %s6986_s13, %s8816_s0  ;;  %p6655_p6 = scmp.lt.u32.totalorder %s6653_s22, %s6648_s30 }
  0x4d   : > { %p6651_p2 = pnand %p6650_p0, %p6649_p12  ;;  %p6657_p3 = scmp.lt.u32.totalorder %s6648_s30, %s6986_s13 }
  0x4e   : > { %p6656_p10 = por %p6655_p6, %p6654_p13 }
  0x4f   : > { %p6652_p1 = pneg %p6651_p2 }
  0x50   : > { %p6658_p5 = por %p6657_p3, %p6656_p10 }
  0x52   : > { %p6659_p9 = pnand %p6658_p5, %p6652_p1 }
  0x54   : > { %6662 = shalt.err (!%p6659_p9)
}
  0x55   : > { %s6663_s24 = scalar_lea.vmem %s6988_s25, 256  ;;  %s6788_s18 = smov [#allocation4]  }
  0x56   : > { %p6664_p12 = scmp.ne.s32.totalorder %s6988_s25, %s6663_s24  ;;  %s6668_s26 = sshll.u32 %s6788_s18, 4  ;;  %s6669_s26 = int_to_ptr.vmem [resolvable:$false] %s6668_s26 }
  0x57   : > { %s6670_s23 = scalar_lea.vmem %s6669_s26, 512  ;;  %p6671_p4 = scmp.lt.s32.totalorder %s6988_s25, %s6669_s26 }
  0x58   : > { %p6666_p2 = pnand %p6664_p12, %p6650_p0  ;;  %p6672_p13 = scmp.lt.s32.totalorder %s6670_s23, %s6663_s24 }
  0x5a   : > { %p6667_p7 = pneg %p6666_p2  ;;  %p6673_p6 = por %p6672_p13, %p6671_p4 }
  0x5c   : > { %p6674_p10 = pnand %p6673_p6, %p6667_p7 }
  0x5e   : > { %6677 = shalt.err (!%p6674_p10)
}
  0x5f   : > { %s6789_s30 = smov 128   ;;  %s6790_s22 = smov 8  }
  0x60   : > { %6240 = dma.hbm_to_vmem [thread:$0]  (!%p6990_p11), %s6986_s13, 256, %s6988_s25, %s6994_s29, %s6789_s30, %s6789_s30, %s6790_s22  }
  0x61   : > { %376 = sbr.rel (%p6893_p8) target bundleno = 5805 (0x16ad), region = 48 }
  0x68   : > { %s7025_s20 = sand.u32 1, %s6772_s14   ;;  %p9057_p4 = scmp.ne.s32.totalorder %s9049_s19, 0 }
  0x69   : > { %s4672_s24 = sshll.u32 %s7025_s20, 4  ;;  %s379_s18 = scalar_lea.sflag [#allocation5], %s7025_s20 }
  0x6a   : > { %s7029_s26 = scalar_lea.vmem [#allocation4], %s4672_s24 }
  0x6b   : > { %6751 = dma.done.wait (%p9057_p4), %s379_s18, 256  }
  0x6c   : > { %6753 = vsyncadd (%p9057_p4), %s379_s18, 4294967040  ;;  %p9058_p7 = scmp.eq.s32.totalorder %s6874_s17, 0 }
  0x6e   : > { %6755 = dma.done.wait (%p9058_p7), [#allocation8], 24576   ;;  %p9059_p8 = pmov %p9058_p7 }
  0x6f   : > { %v8832_v0 = vmov 0.0   ;;  %v471_v1 = vld [vmem:[#allocation7 + $0x8] sm:$0xff]  ;;  %v473_v2 = vld [vmem:[#allocation7 + $0x18] sm:$0xff]  ;;  %v470_v3 = vld [vmem:[#allocation7] sm:$0xff]  ;;  %s4677_s19 = sshll.u32 %s6874_s17, 1  ;;  %vm1180_vm0 = vcmask 1041409  }
  0x70   : > { %6757 = vsyncadd (%p9059_p8), [#allocation8], 4294942720  ;;  %578 = vmatprep.mubr.f32.mxu0 %v8832_v0  ;;  %v5064_v4 = vpack.c.bf16 %v473_v2, %v471_v1  ;;  %v472_v5 = vld [vmem:[#allocation7 + $0x10] sm:$0xff]  ;;  %v475_v6 = vld [vmem:[#allocation7 + $0x28] sm:$0xff]  ;;  %p449_p11 = scmp.lt.s32.totalorder %s4677_s19, 3  ;;  %vm1184_vm1 = vcmask 58368  }
  0x71   : > { %v477_v7 = vld [vmem:[#allocation7 + $0x38] sm:$0xff]  ;;  %v5066_v8 = vpack.c.bf16 %v472_v5, %v470_v3  ;;  %v474_v10 = vld [vmem:[#allocation7 + $0x20] sm:$0xff]  ;;  %v476_v11 = vld [vmem:[#allocation7 + $0x30] sm:$0xff]  ;;  %s9045_s13 = sshll.u32 %s6874_s17, 5  ;;  %p9500_p1 = scmp.ne.s32.totalorder %s9055_s12, 0 }
  0x72   : > { %v5068_v9 = vpack.c.bf16 %v477_v7, %v475_v6  ;;  %v479_v12 = vld [vmem:[#allocation7 + $0x48] sm:$0xff]  ;;  %5065 = vmatprep.subr.bf16.mxu0 %v5064_v4  ;;  %v481_v13 = vld [vmem:[#allocation7 + $0x58] sm:$0xff]  ;;  %v5070_v14 = vpack.c.bf16 %v476_v11, %v474_v10  ;;  %v478_v16 = vld [vmem:[#allocation7 + $0x40] sm:$0xff]  ;;  %s9513_s19 = smov (!%p449_p11, %s4677_s19), 3  ;;  %s8720_s30 = scalar_lea.hbm %s8824_s8, %s9045_s13 }
  0x73   : > { %5067 = vmatpush1.bf16.msra.mxu0 %v5066_v8  ;;  %v5072_v15 = vpack.c.bf16 %v481_v13, %v479_v12  ;;  %v480_v17 = vld [vmem:[#allocation7 + $0x50] sm:$0xff]  ;;  %v483_v18 = vld [vmem:[#allocation7 + $0x68] sm:$0xff]  ;;  %v485_v19 = vld [vmem:[#allocation7 + $0x78] sm:$0xff]  ;;  %s4795_s25 = sshll.u32 %s9513_s19, 4  ;;  %s7405_s24 = scalar_lea.vmem %s8822_s6, %s9513_s19 }
  0x74   : > { %5069 = vmatprep.subr.bf16.mxu0 %v5068_v9  ;;  %v5074_v20 = vpack.c.bf16 %v480_v17, %v478_v16  ;;  %v5076_v21 = vpack.c.bf16 %v485_v19, %v483_v18  ;;  %v482_v22 = vld [vmem:[#allocation7 + $0x60] sm:$0xff]  ;;  %v484_v23 = vld [vmem:[#allocation7 + $0x70] sm:$0xff]  ;;  %v487_v24 = vld [vmem:[#allocation7 + $0x88] sm:$0xff]  ;;  %s7259_s23 = scalar_lea.vmem %s8825_s9, %s4795_s25  ;;  %s4682_s22 = sshll.u32 %s9513_s19, 3 }
  0x75   : > { %v489_v25 = vld [vmem:[#allocation7 + $0x98] sm:$0xff]  ;;  %v598_v26 = vld [vmem:[#allocation9 + $0x8] sm:$0xff]  ;;  %v603_v27 = vld [vmem:[#allocation9 + $0x30] sm:$0xff]  ;;  %v5078_v28 = vpack.c.bf16 %v484_v23, %v482_v22  ;;  %s9046_s19 = sshll.u32 %s7025_s20, 1  ;;  %s6794_s18 = smov [#allocation11]  }
  0x76   : > { %v486_v29 = vld [vmem:[#allocation7 + $0x80] sm:$0xff]  ;;  %v7040_v30 = vpack.c.bf16 %v603_v27, %v598_v26  ;;  %v602_v32 = vld [vmem:[#allocation9 + $0x28] sm:$0xff]  ;;  %v5080_v33 = vpack.c.bf16 %v489_v25, %v487_v24  ;;  %v488_v34 = vld [vmem:[#allocation7 + $0x90] sm:$0xff]  ;;  %s8706_s21 = scalar_lea.vmem [#allocation11], %s9046_s19 }
  0x77   : > { %5071 = vmatpush1.bf16.msra.mxu0 %v5070_v14  ;;  %v597_v31 = vld [vmem:[#allocation9] sm:$0xff]  ;;  %v491_v35 = vld [vmem:[#allocation7 + $0xa8] sm:$0xff]  ;;  %v493_v36 = vld [vmem:[#allocation7 + $0xb8] sm:$0xff]  ;;  %v5082_v43 = vpack.c.bf16 %v488_v34, %v486_v29  ;;  %s4471_s25 = sshll.u32 %s8706_s21, 4  ;;  %s8722_s25 = int_to_ptr.vmem [resolvable:$true] %s4471_s25 }
  0x78   : > { %5073 = vmatprep.subr.bf16.mxu0 %v5072_v15  ;;  %9060 = vst [vmem:[#allocation19_spill] sm:$0xff] %v7040_v30  ;;  %v7042_v37 = vpack.c.bf16 %v602_v32, %v597_v31  ;;  %5097 = vmatprep.subr.bf16.mxu1 %v7040_v30  ;;  %v608_v38 = vld [vmem:[#allocation9 + $0x58] sm:$0xff]  ;;  %v613_v39 = vld [vmem:[#allocation9 + $0x80] sm:$0xff]  ;;  %v607_v40 = vld [vmem:[#allocation9 + $0x50] sm:$0xff]  ;;  %v5084_v48 = vpack.c.bf16 %v493_v36, %v491_v35 }
  0x79   : > { %v7046_v41 = vpack.c.bf16 %v613_v39, %v608_v38  ;;  %v612_v42 = vld [vmem:[#allocation9 + $0x78] sm:$0xff]  ;;  %v490_v44 = vld [vmem:[#allocation7 + $0xa0] sm:$0xff]  ;;  %v492_v45 = vld [vmem:[#allocation7 + $0xb0] sm:$0xff] }
  0x7a   : > { %9061 = vst [vmem:[#allocation20_spill] sm:$0xff] %v7042_v37  ;;  %5099 = vmatpush1.bf16.msra.mxu1 %v7042_v37  ;;  %v7048_v46 = vpack.c.bf16 %v612_v42, %v607_v40  ;;  %v618_v47 = vld [vmem:[#allocation9 + $0xa8] sm:$0xff]  ;;  %v623_v49 = vld [vmem:[#allocation9 + $0xd0] sm:$0xff]  ;;  %v617_v50 = vld [vmem:[#allocation9 + $0xa0] sm:$0xff]  ;;  %v5086_v58 = vpack.c.bf16 %v492_v45, %v490_v44 }
  0x7b   : > { %5075 = vmatpush1.bf16.msra.mxu0 %v5074_v20  ;;  %9062 = vst [vmem:[#allocation21_spill] sm:$0xff] %v7046_v41  ;;  %5101 = vmatprep.subr.bf16.mxu1 %v7046_v41  ;;  %v622_v51 = vld [vmem:[#allocation9 + $0xc8] sm:$0xff]  ;;  %v497_v53 = vld [vmem:[#allocation7 + $0xd8] sm:$0xff]  ;;  %v7051_v54 = vpack.c.bf16 %v623_v49, %v618_v47  ;;  %v633_v57 = vld [vmem:[#allocation9 + $0x120] sm:$0xff] }
  0x7c   : > { %5077 = vmatprep.subr.bf16.mxu0 %v5076_v21  ;;  %9063 = vst [vmem:[#allocation22_spill] sm:$0xff] %v7048_v46  ;;  %v495_v52 = vld [vmem:[#allocation7 + $0xc8] sm:$0xff]  ;;  %v7054_v55 = vpack.c.bf16 %v622_v51, %v617_v50  ;;  %v628_v56 = vld [vmem:[#allocation9 + $0xf8] sm:$0xff]  ;;  %v627_v60 = vld [vmem:[#allocation9 + $0xf0] sm:$0xff] }
  0x7d   : > { %9064 = vst [vmem:[#allocation23_spill] sm:$0xff] %v7051_v54  ;;  %v7057_v59 = vpack.c.bf16 %v633_v57, %v628_v56  ;;  %v632_v61 = vld [vmem:[#allocation9 + $0x118] sm:$0xff]  ;;  %v5088_v62 = vpack.c.bf16 %v497_v53, %v495_v52  ;;  %v494_v63 = vld [vmem:[#allocation7 + $0xc0] sm:$0xff]  ;;  %v496_v1 = vld [vmem:[#allocation7 + $0xd0] sm:$0xff] }
  0x7e   : > { %5103 = vmatpush1.bf16.msra.mxu1 %v7048_v46  ;;  %9065 = vst [vmem:[#allocation24_spill] sm:$0xff] %v7054_v55  ;;  %v499_v2 = vld [vmem:[#allocation7 + $0xe8] sm:$0xff]  ;;  %v501_v3 = vld [vmem:[#allocation7 + $0xf8] sm:$0xff]  ;;  %v643_v5 = vld [vmem:[#allocation9 + $0x170] sm:$0xff]  ;;  %v7060_v6 = vpack.c.bf16 %v632_v61, %v627_v60  ;;  %v5090_v7 = vpack.c.bf16 %v496_v1, %v494_v63 }
  0x7f   : > { %5079 = vmatpush1.bf16.msra.mxu0 %v5078_v28  ;;  %5105 = vmatprep.subr.bf16.mxu1 %v7051_v54  ;;  %v638_v4 = vld [vmem:[#allocation9 + $0x148] sm:$0xff]  ;;  %v498_v8 = vld [vmem:[#allocation7 + $0xe0] sm:$0xff]  ;;  %v5092_v12 = vpack.c.bf16 %v501_v3, %v499_v2  ;;  %v500_v13 = vld [vmem:[#allocation7 + $0xf0] sm:$0xff] }
  0x80   : > { %5081 = vmatprep.subr.bf16.mxu0 %v5080_v33  ;;  %9066 = vst [vmem:[#allocation25_spill] sm:$0xff] %v7060_v6  ;;  %v7063_v9 = vpack.c.bf16 %v643_v5, %v638_v4  ;;  %v637_v10 = vld [vmem:[#allocation9 + $0x140] sm:$0xff]  ;;  %v642_v11 = vld [vmem:[#allocation9 + $0x168] sm:$0xff]  ;;  %v648_v14 = vld [vmem:[#allocation9 + $0x198] sm:$0xff]  ;;  %v5094_v19 = vpack.c.bf16 %v500_v13, %v498_v8 }
  0x81   : > { %v653_v15 = vld [vmem:[#allocation9 + $0x1c0] sm:$0xff]  ;;  %v600_v16 = vld [vmem:[#allocation9 + $0x18] sm:$0xff]  ;;  %v7066_v18 = vpack.c.bf16 %v642_v11, %v637_v10  ;;  %v647_v21 = vld [vmem:[#allocation9 + $0x190] sm:$0xff] }
  0x82   : > { %5107 = vmatpush1.bf16.msra.mxu1 %v7054_v55  ;;  %v605_v17 = vld [vmem:[#allocation9 + $0x40] sm:$0xff]  ;;  %v7069_v20 = vpack.c.bf16 %v653_v15, %v648_v14  ;;  %v652_v22 = vld [vmem:[#allocation9 + $0x1b8] sm:$0xff]  ;;  %v599_v24 = vld [vmem:[#allocation9 + $0x10] sm:$0xff] }
  0x83   : > { %5083 = vmatpush1.bf16.msra.mxu0 %v5082_v43  ;;  %5109 = vmatprep.subr.bf16.mxu1 %v7057_v59  ;;  %v7071_v23 = vpack.c.bf16 %v605_v17, %v600_v16  ;;  %v604_v25 = vld [vmem:[#allocation9 + $0x38] sm:$0xff]  ;;  %v610_v26 = vld [vmem:[#allocation9 + $0x68] sm:$0xff]  ;;  %v615_v27 = vld [vmem:[#allocation9 + $0x90] sm:$0xff]  ;;  %v7075_v32 = vpack.c.bf16 %v652_v22, %v647_v21 }
  0x84   : > { %5085 = vmatprep.subr.bf16.mxu0 %v5084_v48  ;;  %v658_v28 = vld [vmem:[#allocation9 + $0x1e8] sm:$0xff]  ;;  %v663_v29 = vld [vmem:[#allocation9 + $0x210] sm:$0xff]  ;;  %v7077_v33 = vpack.c.bf16 %v604_v25, %v599_v24  ;;  %v609_v34 = vld [vmem:[#allocation9 + $0x60] sm:$0xff]  ;;  %v7081_v38 = vpack.c.bf16 %v615_v27, %v610_v26 }
  0x85   : > { %v468_v31 = vld [vmem:[%s7029_s26] sm:$0xff]  ;;  %v662_v36 = vld [vmem:[#allocation9 + $0x208] sm:$0xff]  ;;  %v7083_v40 = vpack.c.bf16 %v663_v29, %v658_v28  ;;  %v668_v42 = vld [vmem:[#allocation9 + $0x238] sm:$0xff] }
  0x86   : > { %5111 = vmatpush1.bf16.msra.mxu1 %v7060_v6  ;;  %9067 = vst [vmem:[#allocation26_spill] sm:$0xff] %v7077_v33  ;;  %v657_v35 = vld [vmem:[#allocation9 + $0x1e0] sm:$0xff]  ;;  %9068 = vst [vmem:[#allocation27_spill] sm:$0xff] %v7081_v38  ;;  %v614_v39 = vld [vmem:[#allocation9 + $0x88] sm:$0xff] }
  0x87   : > { %5087 = vmatpush1.bf16.msra.mxu0 %v5086_v58  ;;  %5113 = vmatprep.subr.bf16.mxu1 %v7063_v9  ;;  %v673_v43 = vld [vmem:[#allocation9 + $0x260] sm:$0xff]  ;;  %v620_v44 = vld [vmem:[#allocation9 + $0xb8] sm:$0xff]  ;;  %v7087_v48 = vpack.c.bf16 %v662_v36, %v657_v35  ;;  %v7091_v49 = vpack.c.bf16 %v614_v39, %v609_v34  ;;  %v619_v50 = vld [vmem:[#allocation9 + $0xb0] sm:$0xff] }
  0x88   : > { %5089 = vmatprep.subr.bf16.mxu0 %v5088_v62  ;;  %v625_v45 = vld [vmem:[#allocation9 + $0xe0] sm:$0xff]  ;;  %v469_v47 = vld [vmem:[%s7029_s26 + $0x8] sm:$0xff]  ;;  %v7093_v51 = vpack.c.bf16 %v673_v43, %v668_v42  ;;  %v667_v52 = vld [vmem:[#allocation9 + $0x230] sm:$0xff]  ;;  %s466_s26 = scalar_lea.vmem %s8826_s10, %s4682_s22  ;;  %s4431_s22 = scalar_lea.sflag [#allocation12], %s7025_s20 }
  0x89   : > { %9069 = vst [vmem:[#allocation28_spill] sm:$0xff] %v7091_v49  ;;  %v672_v53 = vld [vmem:[#allocation9 + $0x258] sm:$0xff]  ;;  %v7096_v56 = vpack.c.bf16 %v625_v45, %v620_v44  ;;  %v678_v58 = vld [vmem:[#allocation9 + $0x288] sm:$0xff]  ;;  %v683_v60 = vld [vmem:[#allocation9 + $0x2b0] sm:$0xff] }
  0x8a   : > { %5115 = vmatpush1.bf16.msra.mxu1 %v7066_v18  ;;  %v624_v57 = vld [vmem:[#allocation9 + $0xd8] sm:$0xff]  ;;  %v630_v61 = vld [vmem:[#allocation9 + $0x108] sm:$0xff]  ;;  %v635_v62 = vld [vmem:[#allocation9 + $0x130] sm:$0xff]  ;;  %v7100_v63 = vpack.c.bf16 %v672_v53, %v667_v52  ;;  %v7106_v3 = vpack.c.bf16 %v683_v60, %v678_v58 }
  0x8b   : > { %5091 = vmatpush1.bf16.msra.mxu0 %v5090_v7  ;;  %5117 = vmatprep.subr.bf16.mxu1 %v7069_v20  ;;  %9070 = vst [vmem:[#allocation29_spill] sm:$0xff] %v7096_v56  ;;  %v7103_v1 = vpack.c.bf16 %v624_v57, %v619_v50  ;;  %v629_v2 = vld [vmem:[#allocation9 + $0x100] sm:$0xff]  ;;  %v682_v5 = vld [vmem:[#allocation9 + $0x2a8] sm:$0xff]  ;;  %v7109_v7 = vpack.c.bf16 %v635_v62, %v630_v61  ;;  %v688_v10 = vld [vmem:[#allocation9 + $0x2d8] sm:$0xff] }
  0x8c   : > { %5093 = vmatprep.subr.bf16.mxu0 %v5092_v12  ;;  %v677_v4 = vld [vmem:[#allocation9 + $0x280] sm:$0xff]  ;;  %v634_v8 = vld [vmem:[#allocation9 + $0x128] sm:$0xff]  ;;  %v640_v12 = vld [vmem:[#allocation9 + $0x158] sm:$0xff] }
  0x8d   : > { %9071 = vst [vmem:[#allocation30_spill] sm:$0xff] %v7103_v1  ;;  %9072 = vst [vmem:[#allocation31_spill] sm:$0xff] %v7109_v7  ;;  %v693_v11 = vld [vmem:[#allocation9 + $0x300] sm:$0xff]  ;;  %v7112_v14 = vpack.c.bf16 %v682_v5, %v677_v4  ;;  %v7115_v15 = vpack.c.bf16 %v634_v8, %v629_v2  ;;  %v639_v16 = vld [vmem:[#allocation9 + $0x150] sm:$0xff] }
  0x8e   : > { %5119 = vmatpush1.bf16.msra.mxu1 %v7075_v32  ;;  %v645_v13 = vld [vmem:[#allocation9 + $0x180] sm:$0xff]  ;;  %v7118_v17 = vpack.c.bf16 %v693_v11, %v688_v10  ;;  %v692_v21 = vld [vmem:[#allocation9 + $0x2f8] sm:$0xff]  ;;  %v698_v25 = vld [vmem:[#allocation9 + $0x328] sm:$0xff] }
  0x8f   : > { %5095 = vmatpush1.bf16.msra.mxu0 %v5094_v19  ;;  %5121 = vmatprep.subr.bf16.mxu1 %v7083_v40  ;;  %9073 = vst [vmem:[#allocation32_spill] sm:$0xff] %v7112_v14  ;;  %9074 = vst [vmem:[#allocation33_spill] sm:$0xff] %v7115_v15  ;;  %v687_v19 = vld [vmem:[#allocation9 + $0x2d0] sm:$0xff]  ;;  %v7121_v22 = vpack.c.bf16 %v645_v13, %v640_v12  ;;  %v644_v24 = vld [vmem:[#allocation9 + $0x178] sm:$0xff] }
  0x90   : > { %5161 = vmatprep.subr.bf16.mxu0 %v7071_v23  ;;  %9075 = vst [vmem:[#allocation34_spill] sm:$0xff] %v7118_v17  ;;  %v703_v26 = vld [vmem:[#allocation9 + $0x350] sm:$0xff]  ;;  %v650_v27 = vld [vmem:[#allocation9 + $0x1a8] sm:$0xff]  ;;  %v7124_v29 = vpack.c.bf16 %v692_v21, %v687_v19  ;;  %v649_v34 = vld [vmem:[#allocation9 + $0x1a0] sm:$0xff] }
  0x91   : > { %9076 = vst [vmem:[#allocation35_spill] sm:$0xff] %v7121_v22  ;;  %v655_v28 = vld [vmem:[#allocation9 + $0x1d0] sm:$0xff]  ;;  %v7130_v35 = vpack.c.bf16 %v703_v26, %v698_v25  ;;  %v697_v36 = vld [vmem:[#allocation9 + $0x320] sm:$0xff]  ;;  %v702_v39 = vld [vmem:[#allocation9 + $0x348] sm:$0xff] }
  0x92   : > { %579 = vmatmul.mubr.f32.vlgmr.msra.gmra.mrb[0].mxu0 %v468_v31  ;;  %5123 = vmatpush1.bf16.msra.mxu1 %v7087_v48  ;;  %9077 = vst [vmem:[#allocation36_spill] sm:$0xff] %v7124_v29  ;;  %v7127_v31 = vpack.c.bf16 %v644_v24, %v639_v16  ;;  %v7133_v42 = vpack.c.bf16 %v655_v28, %v650_v27  ;;  %v654_v43 = vld [vmem:[#allocation9 + $0x1c8] sm:$0xff]  ;;  %v708_v44 = vld [vmem:[#allocation9 + $0x378] sm:$0xff]  ;;  %v713_v45 = vld [vmem:[#allocation9 + $0x3a0] sm:$0xff] }
  0x93   : > { %584 = vmatprep.mubr.f32.mxu0 %v8832_v0  ;;  %5163 = vmatpush1.bf16.msra.mxu0 %v7077_v33  ;;  %9079 = vst [vmem:[#allocation38_spill] sm:$0xff] %v7130_v35  ;;  %v665_v50 = vld [vmem:[#allocation9 + $0x220] sm:$0xff]  ;;  %v7136_v52 = vpack.c.bf16 %v702_v39, %v697_v36  ;;  %v7139_v53 = vpack.c.bf16 %v654_v43, %v649_v34  ;;  %v659_v57 = vld [vmem:[#allocation9 + $0x1f0] sm:$0xff]  ;;  %v712_v61 = vld [vmem:[#allocation9 + $0x398] sm:$0xff] }
  0x94   : > { %5165 = vmatprep.subr.bf16.mxu0 %v7081_v38  ;;  %5125 = vmatprep.subr.bf16.mxu1 %v7093_v51  ;;  %9078 = vst [vmem:[#allocation37_spill] sm:$0xff] %v7127_v31  ;;  %9080 = vst [vmem:[#allocation39_spill] sm:$0xff] %v7133_v42  ;;  %v7142_v58 = vpack.c.bf16 %v713_v45, %v708_v44  ;;  %v707_v60 = vld [vmem:[#allocation9 + $0x370] sm:$0xff]  ;;  %v664_v2 = vld [vmem:[#allocation9 + $0x218] sm:$0xff] }
  0x95   : > { %9081 = vst [vmem:[#allocation40_spill] sm:$0xff] %v7136_v52  ;;  %9082 = vst [vmem:[#allocation41_spill] sm:$0xff] %v7139_v53  ;;  %v718_v4 = vld [vmem:[#allocation9 + $0x3c8] sm:$0xff]  ;;  %v723_v5 = vld [vmem:[#allocation9 + $0x3f0] sm:$0xff]  ;;  %v7148_v11 = vpack.c.bf16 %v712_v61, %v707_v60  ;;  %v7151_v12 = vpack.c.bf16 %v664_v2, %v659_v57 }
  0x96   : > { %585 = vmatmul.mubr.f32.gmra.mrb[2].mxu0 %v469_v47  ;;  %5127 = vmatpush1.bf16.msra.mxu1 %v7100_v63  ;;  %v660_v47 = vld [vmem:[#allocation9 + $0x1f8] sm:$0xff]  ;;  %9083 = vst [vmem:[#allocation42_spill] sm:$0xff] %v7142_v58  ;;  %v670_v8 = vld [vmem:[#allocation9 + $0x248] sm:$0xff]  ;;  %v675_v10 = vld [vmem:[#allocation9 + $0x270] sm:$0xff]  ;;  %v7154_v16 = vpack.c.bf16 %v723_v5, %v718_v4 }
  0x97   : > { %5167 = vmatpush1.bf16.msra.mxu0 %v7091_v49  ;;  %5129 = vmatprep.subr.bf16.mxu1 %v7106_v3  ;;  %v7145_v62 = vpack.c.bf16 %v665_v50, %v660_v47  ;;  %9085 = vst [vmem:[#allocation44_spill] sm:$0xff] %v7148_v11  ;;  %9086 = vst [vmem:[#allocation45_spill] sm:$0xff] %v7151_v12  ;;  %v669_v13 = vld [vmem:[#allocation9 + $0x240] sm:$0xff]  ;;  %v722_v21 = vld [vmem:[#allocation9 + $0x3e8] sm:$0xff]  ;;  %v7157_v24 = vpack.c.bf16 %v675_v10, %v670_v8 }
  0x98   : > { %5169 = vmatprep.subr.bf16.mxu0 %v7096_v56  ;;  %9087 = vst [vmem:[#allocation46_spill] sm:$0xff] %v7154_v16  ;;  %v717_v19 = vld [vmem:[#allocation9 + $0x3c0] sm:$0xff]  ;;  %v674_v25 = vld [vmem:[#allocation9 + $0x268] sm:$0xff]  ;;  %v728_v26 = vld [vmem:[#allocation9 + $0x418] sm:$0xff] }
  0x99   : > { %9084 = vst [vmem:[#allocation43_spill] sm:$0xff] %v7145_v62  ;;  %9088 = vst [vmem:[#allocation47_spill] sm:$0xff] %v7157_v24  ;;  %v733_v27 = vld [vmem:[#allocation9 + $0x440] sm:$0xff]  ;;  %v680_v28 = vld [vmem:[#allocation9 + $0x298] sm:$0xff]  ;;  %v7160_v36 = vpack.c.bf16 %v722_v21, %v717_v19  ;;  %v7163_v39 = vpack.c.bf16 %v674_v25, %v669_v13 }
  0x9a   : > { %5131 = vmatpush1.bf16.msra.mxu1 %v7112_v14  ;;  %v685_v34 = vld [vmem:[#allocation9 + $0x2c0] sm:$0xff]  ;;  %v679_v43 = vld [vmem:[#allocation9 + $0x290] sm:$0xff]  ;;  %v7166_v44 = vpack.c.bf16 %v733_v27, %v728_v26  ;;  %v732_v47 = vld [vmem:[#allocation9 + $0x438] sm:$0xff] }
  0x9b   : > { %5171 = vmatpush1.bf16.msra.mxu0 %v7103_v1  ;;  %5133 = vmatprep.subr.bf16.mxu1 %v7118_v17  ;;  %9089 = vst [vmem:[#allocation48_spill] sm:$0xff] %v7160_v36  ;;  %9090 = vst [vmem:[#allocation49_spill] sm:$0xff] %v7163_v39  ;;  %v727_v45 = vld [vmem:[#allocation9 + $0x410] sm:$0xff]  ;;  %v7169_v50 = vpack.c.bf16 %v685_v34, %v680_v28  ;;  %v684_v57 = vld [vmem:[#allocation9 + $0x2b8] sm:$0xff] }
  0x9c   : > { %5173 = vmatprep.subr.bf16.mxu0 %v7109_v7  ;;  %9091 = vst [vmem:[#allocation50_spill] sm:$0xff] %v7166_v44  ;;  %v738_v60 = vld [vmem:[#allocation9 + $0x468] sm:$0xff]  ;;  %v743_v61 = vld [vmem:[#allocation9 + $0x490] sm:$0xff]  ;;  %v7172_v5 = vpack.c.bf16 %v732_v47, %v727_v45  ;;  %v7175_v8 = vpack.c.bf16 %v684_v57, %v679_v43  ;;  %v737_v13 = vld [vmem:[#allocation9 + $0x460] sm:$0xff] }
  0x9d   : > { %9092 = vst [vmem:[#allocation51_spill] sm:$0xff] %v7169_v50  ;;  %v690_v2 = vld [vmem:[#allocation9 + $0x2e8] sm:$0xff]  ;;  %v695_v4 = vld [vmem:[#allocation9 + $0x310] sm:$0xff]  ;;  %v7178_v10 = vpack.c.bf16 %v743_v61, %v738_v60  ;;  %v689_v25 = vld [vmem:[#allocation9 + $0x2e0] sm:$0xff] }
  0x9e   : > { %5135 = vmatpush1.bf16.msra.mxu1 %v7124_v29  ;;  %9093 = vst [vmem:[#allocation52_spill] sm:$0xff] %v7172_v5  ;;  %9094 = vst [vmem:[#allocation53_spill] sm:$0xff] %v7175_v8  ;;  %v742_v19 = vld [vmem:[#allocation9 + $0x488] sm:$0xff]  ;;  %v7181_v21 = vpack.c.bf16 %v695_v4, %v690_v2  ;;  %v700_v27 = vld [vmem:[#allocation9 + $0x338] sm:$0xff] }
  0x9f   : > { %5175 = vmatpush1.bf16.msra.mxu0 %v7115_v15  ;;  %5137 = vmatprep.subr.bf16.mxu1 %v7130_v35  ;;  %9095 = vst [vmem:[#allocation54_spill] sm:$0xff] %v7178_v10  ;;  %v694_v26 = vld [vmem:[#allocation9 + $0x308] sm:$0xff]  ;;  %v705_v28 = vld [vmem:[#allocation9 + $0x360] sm:$0xff]  ;;  %v7184_v34 = vpack.c.bf16 %v742_v19, %v737_v13  ;;  %v699_v47 = vld [vmem:[#allocation9 + $0x330] sm:$0xff] }
  0xa0   : > { %5177 = vmatprep.subr.bf16.mxu0 %v7121_v22  ;;  %9096 = vst [vmem:[#allocation55_spill] sm:$0xff] %v7181_v21  ;;  %v7187_v43 = vpack.c.bf16 %v694_v26, %v689_v25  ;;  %v7191_v45 = vpack.c.bf16 %v705_v28, %v700_v27  ;;  %v704_v57 = vld [vmem:[#allocation9 + $0x358] sm:$0xff]  ;;  %v710_v60 = vld [vmem:[#allocation9 + $0x388] sm:$0xff]  ;;  %v715_v61 = vld [vmem:[#allocation9 + $0x3b0] sm:$0xff] }
  0xa1   : > { %9097 = vst [vmem:[#allocation56_spill] sm:$0xff] %v7184_v34  ;;  %v7195_v2 = vpack.c.bf16 %v704_v57, %v699_v47  ;;  %v7198_v4 = vpack.c.bf16 %v715_v61, %v710_v60  ;;  %v709_v13 = vld [vmem:[#allocation9 + $0x380] sm:$0xff]  ;;  %v714_v19 = vld [vmem:[#allocation9 + $0x3a8] sm:$0xff]  ;;  %v720_v25 = vld [vmem:[#allocation9 + $0x3d8] sm:$0xff] }
  0xa2   : > { %5139 = vmatpush1.bf16.msra.mxu1 %v7136_v52  ;;  %9098 = vst [vmem:[#allocation57_spill] sm:$0xff] %v7187_v43  ;;  %9099 = vst [vmem:[#allocation58_spill] sm:$0xff] %v7191_v45  ;;  %v725_v26 = vld [vmem:[#allocation9 + $0x400] sm:$0xff]  ;;  %v7201_v27 = vpack.c.bf16 %v714_v19, %v709_v13  ;;  %v719_v0 = vld [vmem:[#allocation9 + $0x3d0] sm:$0xff] }
  0xa3   : > { %5179 = vmatpush1.bf16.msra.mxu0 %v7127_v31  ;;  %5141 = vmatprep.subr.bf16.mxu1 %v7142_v58  ;;  %9100 = vst [vmem:[#allocation59_spill] sm:$0xff] %v7195_v2  ;;  %9101 = vst [vmem:[#allocation60_spill] sm:$0xff] %v7198_v4  ;;  %v7204_v28 = vpack.c.bf16 %v725_v26, %v720_v25  ;;  %v730_v47 = vld [vmem:[#allocation9 + $0x428] sm:$0xff]  ;;  %v735_v57 = vld [vmem:[#allocation9 + $0x450] sm:$0xff] }
  0xa4   : > { %5181 = vmatprep.subr.bf16.mxu0 %v7133_v42  ;;  %9102 = vst [vmem:[#allocation61_spill] sm:$0xff] %v7201_v27  ;;  %v7210_v61 = vpack.c.bf16 %v735_v57, %v730_v47  ;;  %v740_v13 = vld [vmem:[#allocation9 + $0x478] sm:$0xff]  ;;  %v745_v19 = vld [vmem:[#allocation9 + $0x4a0] sm:$0xff] }
  0xa5   : > { %9103 = vst [vmem:[#allocation62_spill] sm:$0xff] %v7204_v28  ;;  %v7216_v26 = vpack.c.bf16 %v745_v19, %v740_v13  ;;  %v753_v47 = vld [vmem:[#allocation9 + $0x4e0] sm:$0xff]  ;;  %v755_v13 = vld [vmem:[#allocation9 + $0x4f0] sm:$0xff] }
  0xa6   : > { %5143 = vmatpush1.bf16.msra.mxu1 %v7148_v11  ;;  %9105 = vst [vmem:[#allocation64_spill] sm:$0xff] %v7210_v61  ;;  %v749_v19 = vld [vmem:[#allocation9 + $0x4c0] sm:$0xff] }
  0xa7   : > { %5183 = vmatpush1.bf16.msra.mxu0 %v7139_v53  ;;  %5145 = vmatprep.subr.bf16.mxu1 %v7154_v16  ;;  %9107 = vst [vmem:[#allocation66_spill] sm:$0xff] %v7216_v26 }
  0xa8   : > { %5185 = vmatprep.subr.bf16.mxu0 %v7145_v62 }
  0xaa   : > { %5147 = vmatpush1.bf16.msra.mxu1 %v7160_v36 }
  0xab   : > { %5187 = vmatpush1.bf16.msra.mxu0 %v7151_v12  ;;  %5149 = vmatprep.subr.bf16.mxu1 %v7166_v44 }
  0xac   : > { %5189 = vmatprep.subr.bf16.mxu0 %v7157_v24 }
  0xae   : > { %5151 = vmatpush1.bf16.msra.mxu1 %v7172_v5 }
  0xaf   : > { %5191 = vmatpush1.bf16.msra.mxu0 %v7163_v39  ;;  %5153 = vmatprep.subr.bf16.mxu1 %v7178_v10 }
  0xb0   : > { %5193 = vmatprep.subr.bf16.mxu0 %v7169_v50 }
  0xb2   : > { %5155 = vmatpush1.bf16.msra.mxu1 %v7184_v34 }
  0xb3   : > { %5195 = vmatpush1.bf16.msra.mxu0 %v7175_v8 }
  0xb4   : > { %5197 = vmatprep.subr.bf16.mxu0 %v7181_v21  ;;  %v616_v21 = vld [vmem:[#allocation9 + $0x98] sm:$0xff] }
  0xb7   : > { %5199 = vmatpush1.bf16.msra.mxu0 %v7187_v43  ;;  %v724_v43 = vld [vmem:[#allocation9 + $0x3f8] sm:$0xff] }
  0xb8   : > { %5201 = vmatprep.subr.bf16.mxu0 %v7191_v45  ;;  %v7207_v60 = vpack.c.bf16 %v724_v43, %v719_v0  ;;  %v729_v45 = vld [vmem:[#allocation9 + $0x420] sm:$0xff]  ;;  %v748_v43 = vld [vmem:[#allocation9 + $0x4b8] sm:$0xff] }
  0xb9   : > { %v7223_v57 = vpack.c.bf16 %v753_v47, %v748_v43  ;;  %v686_v43 = vld [vmem:[#allocation9 + $0x2c8] sm:$0xff] }
  0xba   : > { %9104 = vst [vmem:[#allocation63_spill] sm:$0xff] %v7207_v60 }
  0xbb   : > { %5203 = vmatpush1.bf16.msra.mxu0 %v7195_v2  ;;  %v734_v2 = vld [vmem:[#allocation9 + $0x448] sm:$0xff]  ;;  %9109 = vst [vmem:[#allocation68_spill] sm:$0xff] %v7223_v57  ;;  %5157 = vmatprep.subr.bf16.mxu1 %v7223_v57 }
  0xbc   : > { %5205 = vmatprep.subr.bf16.mxu0 %v7198_v4  ;;  %v7213_v25 = vpack.c.bf16 %v734_v2, %v729_v45  ;;  %v739_v4 = vld [vmem:[#allocation9 + $0x470] sm:$0xff]  ;;  %v752_v2 = vld [vmem:[#allocation9 + $0x4d8] sm:$0xff] }
  0xbd   : > { %v747_v45 = vld [vmem:[#allocation9 + $0x4b0] sm:$0xff] }
  0xbe   : > { %9106 = vst [vmem:[#allocation65_spill] sm:$0xff] %v7213_v25 }
  0xbf   : > { %5207 = vmatpush1.bf16.msra.mxu0 %v7201_v27  ;;  %v744_v27 = vld [vmem:[#allocation9 + $0x498] sm:$0xff] }
  0xc0   : > { %5209 = vmatprep.subr.bf16.mxu0 %v7204_v28  ;;  %v7219_v0 = vpack.c.bf16 %v744_v27, %v739_v4  ;;  %v754_v28 = vld [vmem:[#allocation9 + $0x4e8] sm:$0xff] }
  0xc1   : > { %v7230_v27 = vpack.c.bf16 %v754_v28, %v749_v19  ;;  %v601_v19 = vld [vmem:[#allocation9 + $0x20] sm:$0xff] }
  0xc2   : > { %9108 = vst [vmem:[#allocation67_spill] sm:$0xff] %v7219_v0 }
  0xc3   : > { %5211 = vmatpush1.bf16.msra.mxu0 %v7207_v60  ;;  %v750_v60 = vld [vmem:[#allocation9 + $0x4c8] sm:$0xff]  ;;  %9112 = vst [vmem:[#allocation71_spill] sm:$0xff] %v7230_v27 }
  0xc4   : > { %5213 = vmatprep.subr.bf16.mxu0 %v7210_v61  ;;  %v7225_v61 = vpack.c.bf16 %v752_v2, %v747_v45  ;;  %v7228_v4 = vpack.c.bf16 %v755_v13, %v750_v60  ;;  %v8852_v45 = vlaneseq }
  0xc6   : > { %9110 = vst [vmem:[#allocation69_spill] sm:$0xff] %v7225_v61  ;;  %9111 = vst [vmem:[#allocation70_spill] sm:$0xff] %v7228_v4  ;;  %5159 = vmatpush1.bf16.msra.mxu1 %v7225_v61  ;;  %v7241_v60 = vshrl.u32 %v8852_v45, 7 }
  0xc7   : > { %5215 = vmatpush1.bf16.msra.mxu0 %v7213_v25  ;;  %v611_v25 = vld [vmem:[#allocation9 + $0x70] sm:$0xff] }
  0xc8   : > { %5217 = vmatprep.subr.bf16.mxu0 %v7216_v26  ;;  %9114 = vst [vmem:[#allocation73_spill] sm:$0xff] %v7241_v60  ;;  %v7244_v28 = vsub.s32 0, %v7241_v60 }
  0xca   : > { %9115 = vst [vmem:[#allocation74_spill] sm:$0xff] %v7244_v28 }
  0xcb   : > { %5219 = vmatpush1.bf16.msra.mxu0 %v7219_v0  ;;  %v681_v0 = vld [vmem:[#allocation9 + $0x2a0] sm:$0xff] }
  0xcc   : > { %5221 = vmatprep.subr.bf16.mxu0 %v7228_v4  ;;  %v7234_v47 = vpack.c.bf16 %v686_v43, %v681_v0  ;;  %v7251_v0 = vld [vmem:[%s8818_s2] sm:$0x3]  ;;  %v606_v43 = vld [vmem:[#allocation9 + $0x48] sm:$0xff] }
  0xcd   : > { %9116 = vst [vmem:[#allocation75_spill] sm:$0xff] %v7251_v0  ;;  %v507_v2 = vrot.slane %v7251_v0, %v7244_v28  ;;  %v7268_v0 = vpack.c.bf16 %v606_v43, %v601_v19  ;;  %v626_v19 = vld [vmem:[#allocation9 + $0xe8] sm:$0xff]  ;;  %v711_v43 = vld [vmem:[#allocation9 + $0x390] sm:$0xff] }
  0xce   : > { %9113 = vst [vmem:[#allocation72_spill] sm:$0xff] %v7234_v47  ;;  %5225 = vmatprep.subr.bf16.mxu1 %v7234_v47 }
  0xcf   : > { %5223 = vmatpush1.bf16.msra.mxu0 %v7230_v27  ;;  %v696_v27 = vld [vmem:[#allocation9 + $0x318] sm:$0xff]  ;;  %9118 = vst [vmem:[#allocation77_spill] sm:$0xff] %v7268_v0 }
  0xd0   : > { %5257 = vmatprep.subr.bf16.mxu0 %v7040_v30  ;;  %v691_v30 = vld [vmem:[#allocation9 + $0x2f0] sm:$0xff] }
  0xd1   : > { %v7272_v26 = vpack.c.bf16 %v696_v27, %v691_v30  ;;  %v7286_v27 = vpack.c.bf16 %v616_v21, %v611_v25 }
  0xd3   : > { %9119 = vst [vmem:[#allocation78_spill] sm:$0xff] %v7272_v26  ;;  %9120 = vst [vmem:[#allocation79_spill] sm:$0xff] %v7286_v27 }
 0x165   : > { %v580_v13 = vpop.f32.mrb[0].mxu0 }
 0x166   : > { %v7261_v45 = vadd.f32 %v580_v13, %v507_v2  ;;  %v7263_v60 = vpop.f32.mrb[1].mxu0  ;;  %v701_v13 = vld [vmem:[#allocation9 + $0x340] sm:$0xff] }
 0x167   : > { %9117 = vst [vmem:[#allocation76_spill] sm:$0xff] %v7263_v60  ;;  %v706_v60 = vld [vmem:[#allocation9 + $0x368] sm:$0xff] }
 0x168   : > { %v7266_v4 = vrot.slane %v7261_v45, 1  ;;  %595 = vst [vmem:[%s7259_s23] sm:$0xff] %v7261_v45 }
 0x169   : > { %v586_v28 = vpop.f32.mrb[2].mxu0 }
 0x16a   : > { %v7274_v8 = vadd.f32 %v586_v28, %v507_v2  ;;  %849 = vmatprep.mubr.f32.mxu1 %v7266_v4  ;;  %926 = vmatprep.mubr.f32.mxu0 %v7266_v4  ;;  %v7278_v47 = vpop.f32.mrb[3].mxu0  ;;  %v7292_v28 = vpack.c.bf16 %v706_v60, %v701_v13  ;;  %v621_v2 = vld [vmem:[#allocation9 + $0xc0] sm:$0xff]  ;;  %v631_v60 = vld [vmem:[#allocation9 + $0x110] sm:$0xff]  ;;  %v636_v13 = vld [vmem:[#allocation9 + $0x138] sm:$0xff] }
 0x16b   : > { %850 = vmatmul.mubr.f32.vlgmr.msra.gmra.mrb[0].mxu1 %v7261_v45  ;;  %927 = vmatmul.mubr.f32.vlgmr.msra.gmra.mrb[4].mxu0 %v7261_v45  ;;  %v7301_v21 = vpack.c.bf16 %v626_v19, %v621_v2  ;;  %v641_v19 = vld [vmem:[#allocation9 + $0x160] sm:$0xff] }
 0x16c   : > { %5227 = vmatpush3.bf16.msra.mxu1 %v7268_v0  ;;  %v7284_v30 = vrot.slane %v7274_v8, 1  ;;  %596 = vst [vmem:[%s7259_s23 + $0x10] sm:$0xff] %v7274_v8  ;;  %5259 = vmatpush1.bf16.msra.mxu0 %v7042_v37  ;;  %9121 = vst [vmem:[#allocation80_spill] sm:$0xff] %v7292_v28  ;;  %v716_v0 = vld [vmem:[#allocation9 + $0x3b8] sm:$0xff]  ;;  %v7309_v37 = vpack.c.bf16 %v636_v13, %v631_v60  ;;  %v651_v13 = vld [vmem:[#allocation9 + $0x1b0] sm:$0xff] }
 0x16d   : > { %5229 = vmatprep.subr.bf16.mxu1 %v7272_v26  ;;  %5261 = vmatprep.subr.bf16.mxu0 %v7046_v41  ;;  %9122 = vst [vmem:[#allocation81_spill] sm:$0xff] %v7301_v21  ;;  %v7304_v25 = vpack.c.bf16 %v716_v0, %v711_v43  ;;  %v721_v41 = vld [vmem:[#allocation9 + $0x3e0] sm:$0xff]  ;;  %v726_v26 = vld [vmem:[#allocation9 + $0x408] sm:$0xff]  ;;  %v731_v0 = vld [vmem:[#allocation9 + $0x430] sm:$0xff] }
 0x16e   : > { %855 = vmatprep.mubr.f32.mxu1 %v7284_v30  ;;  %932 = vmatprep.mubr.f32.mxu0 %v7284_v30  ;;  %v7312_v2 = vpack.c.bf16 %v726_v26, %v721_v41  ;;  %v736_v43 = vld [vmem:[#allocation9 + $0x458] sm:$0xff]  ;;  %v741_v41 = vld [vmem:[#allocation9 + $0x480] sm:$0xff]  ;;  %v746_v26 = vld [vmem:[#allocation9 + $0x4a8] sm:$0xff] }
 0x16f   : > { %856 = vmatmul.mubr.f32.gmra.mrb[2].mxu1 %v7274_v8  ;;  %933 = vmatmul.mubr.f32.gmra.mrb[6].mxu0 %v7274_v8  ;;  %9123 = vst [vmem:[#allocation82_spill] sm:$0xff] %v7304_v25  ;;  %v7320_v60 = vpack.c.bf16 %v736_v43, %v731_v0  ;;  %v751_v0 = vld [vmem:[#allocation9 + $0x4d0] sm:$0xff]  ;;  %v756_v43 = vld [vmem:[#allocation9 + $0x4f8] sm:$0xff] }
 0x170   : > { %5231 = vmatpush3.bf16.msra.mxu1 %v7286_v27  ;;  %1003 = vmatprep.mubr.f32.mxu1 %v7266_v4  ;;  %9124 = vst [vmem:[#allocation83_spill] sm:$0xff] %v7312_v2 }
 0x171   : > { %5233 = vmatprep.subr.bf16.mxu1 %v7292_v28  ;;  %5263 = vmatpush1.bf16.msra.mxu0 %v7048_v46  ;;  %v646_v28 = vld [vmem:[#allocation9 + $0x188] sm:$0xff]  ;;  %9125 = vst [vmem:[#allocation84_spill] sm:$0xff] %v7320_v60 }
 0x172   : > { %5265 = vmatprep.subr.bf16.mxu0 %v7051_v54  ;;  %v7317_v46 = vpack.c.bf16 %v646_v28, %v641_v19  ;;  %v7328_v28 = vpack.c.bf16 %v746_v26, %v741_v41  ;;  %v661_v19 = vld [vmem:[#allocation9 + $0x200] sm:$0xff]  ;;  %v9128_v26 = vld [vmem:[#allocation55_spill] sm:$0xff] }
 0x174   : > { %5235 = vmatpush3.bf16.msra.mxu1 %v7301_v21 }
 0x175   : > { %5237 = vmatprep.subr.bf16.mxu1 %v7304_v25  ;;  %5267 = vmatpush1.bf16.msra.mxu0 %v7054_v55  ;;  %v656_v25 = vld [vmem:[#allocation9 + $0x1d8] sm:$0xff] }
 0x176   : > { %5269 = vmatprep.subr.bf16.mxu0 %v7057_v59  ;;  %v7325_v55 = vpack.c.bf16 %v656_v25, %v651_v13  ;;  %v7336_v25 = vpack.c.bf16 %v756_v43, %v751_v0  ;;  %v671_v13 = vld [vmem:[#allocation9 + $0x250] sm:$0xff]  ;;  %v9130_v0 = vld [vmem:[#allocation58_spill] sm:$0xff]  ;;  %v9131_v43 = vld [vmem:[#allocation59_spill] sm:$0xff] }
 0x178   : > { %5239 = vmatpush3.bf16.msra.mxu1 %v7309_v37 }
 0x179   : > { %5241 = vmatprep.subr.bf16.mxu1 %v7312_v2  ;;  %5271 = vmatpush1.bf16.msra.mxu0 %v7060_v6  ;;  %v666_v2 = vld [vmem:[#allocation9 + $0x228] sm:$0xff] }
 0x17a   : > { %5273 = vmatprep.subr.bf16.mxu0 %v7063_v9  ;;  %v7333_v6 = vpack.c.bf16 %v666_v2, %v661_v19  ;;  %v9126_v2 = vld [vmem:[#allocation72_spill] sm:$0xff]  ;;  %v9129_v19 = vld [vmem:[#allocation57_spill] sm:$0xff] }
 0x17c   : > { %5243 = vmatpush3.bf16.msra.mxu1 %v7317_v46 }
 0x17d   : > { %5245 = vmatprep.subr.bf16.mxu1 %v7320_v60  ;;  %5275 = vmatpush1.bf16.msra.mxu0 %v7066_v18  ;;  %v676_v60 = vld [vmem:[#allocation9 + $0x278] sm:$0xff] }
 0x17e   : > { %5277 = vmatprep.subr.bf16.mxu0 %v7069_v20  ;;  %v7341_v41 = vpack.c.bf16 %v676_v60, %v671_v13  ;;  %v9127_v60 = vld [vmem:[#allocation53_spill] sm:$0xff]  ;;  %v9132_v13 = vld [vmem:[#allocation60_spill] sm:$0xff] }
 0x180   : > { %5247 = vmatpush3.bf16.msra.mxu1 %v7325_v55 }
 0x181   : > { %5249 = vmatprep.subr.bf16.mxu1 %v7328_v28  ;;  %5279 = vmatpush1.bf16.msra.mxu0 %v7075_v32 }
 0x182   : > { %5281 = vmatprep.subr.bf16.mxu0 %v7083_v40 }
 0x184   : > { %5251 = vmatpush3.bf16.msra.mxu1 %v7333_v6 }
 0x185   : > { %5253 = vmatprep.subr.bf16.mxu1 %v7336_v25  ;;  %5283 = vmatpush1.bf16.msra.mxu0 %v7087_v48 }
 0x186   : > { %5285 = vmatprep.subr.bf16.mxu0 %v7093_v51 }
 0x188   : > { %5255 = vmatpush3.bf16.msra.mxu1 %v7341_v41 }
 0x189   : > { %5321 = vmatprep.subr.bf16.mxu1 %v7071_v23  ;;  %5287 = vmatpush1.bf16.msra.mxu0 %v7100_v63 }
 0x18a   : > { %5289 = vmatprep.subr.bf16.mxu0 %v7106_v3 }
 0x18b   : > { %1004 = vmatmul.mubr.f32.vlgmr.msra.gmra.mrb[4].mxu1 %v7261_v45 }
 0x18c   : > { %1008 = vmatprep.mubr.f32.mxu1 %v7284_v30  ;;  %5323 = vmatpush1.bf16.msra.mxu1 %v7077_v33 }
 0x18d   : > { %5325 = vmatprep.subr.bf16.mxu1 %v7081_v38  ;;  %5291 = vmatpush1.bf16.msra.mxu0 %v7112_v14 }
 0x18e   : > { %5293 = vmatprep.subr.bf16.mxu0 %v7118_v17 }
 0x18f   : > { %1009 = vmatmul.mubr.f32.gmra.mrb[6].mxu1 %v7274_v8 }
 0x190   : > { %5327 = vmatpush1.bf16.msra.mxu1 %v7091_v49 }
 0x191   : > { %5329 = vmatprep.subr.bf16.mxu1 %v7096_v56  ;;  %5295 = vmatpush1.bf16.msra.mxu0 %v7124_v29 }
 0x192   : > { %5297 = vmatprep.subr.bf16.mxu0 %v7130_v35 }
 0x194   : > { %5331 = vmatpush1.bf16.msra.mxu1 %v7103_v1 }
 0x195   : > { %5333 = vmatprep.subr.bf16.mxu1 %v7109_v7  ;;  %5299 = vmatpush1.bf16.msra.mxu0 %v7136_v52 }
 0x196   : > { %5301 = vmatprep.subr.bf16.mxu0 %v7142_v58 }
 0x198   : > { %5335 = vmatpush1.bf16.msra.mxu1 %v7115_v15 }
 0x199   : > { %5337 = vmatprep.subr.bf16.mxu1 %v7121_v22  ;;  %5303 = vmatpush1.bf16.msra.mxu0 %v7148_v11 }
 0x19a   : > { %5305 = vmatprep.subr.bf16.mxu0 %v7154_v16 }
 0x19c   : > { %5339 = vmatpush1.bf16.msra.mxu1 %v7127_v31 }
 0x19d   : > { %5341 = vmatprep.subr.bf16.mxu1 %v7133_v42  ;;  %5307 = vmatpush1.bf16.msra.mxu0 %v7160_v36 }
 0x19e   : > { %5309 = vmatprep.subr.bf16.mxu0 %v7166_v44 }
 0x1a0   : > { %5343 = vmatpush1.bf16.msra.mxu1 %v7139_v53 }
 0x1a1   : > { %5345 = vmatprep.subr.bf16.mxu1 %v7145_v62  ;;  %5311 = vmatpush1.bf16.msra.mxu0 %v7172_v5 }
 0x1a2   : > { %5313 = vmatprep.subr.bf16.mxu0 %v7178_v10 }
 0x1a4   : > { %5347 = vmatpush1.bf16.msra.mxu1 %v7151_v12 }
 0x1a5   : > { %5349 = vmatprep.subr.bf16.mxu1 %v7157_v24  ;;  %5315 = vmatpush1.bf16.msra.mxu0 %v7184_v34 }
 0x1a6   : > { %5317 = vmatprep.subr.bf16.mxu0 %v7223_v57  ;;  %v9138_v57 = vld [vmem:[#allocation66_spill] sm:$0xff] }
 0x1a8   : > { %5351 = vmatpush1.bf16.msra.mxu1 %v7163_v39  ;;  %v9133_v39 = vld [vmem:[#allocation61_spill] sm:$0xff] }
 0x1a9   : > { %5353 = vmatprep.subr.bf16.mxu1 %v7169_v50  ;;  %5319 = vmatpush1.bf16.msra.mxu0 %v7225_v61  ;;  %v9134_v50 = vld [vmem:[#allocation62_spill] sm:$0xff]  ;;  %v9135_v61 = vld [vmem:[#allocation63_spill] sm:$0xff] }
 0x1aa   : > { %5385 = vmatprep.subr.bf16.mxu0 %v9126_v2  ;;  %v9136_v2 = vld [vmem:[#allocation64_spill] sm:$0xff] }
 0x1ac   : > { %5355 = vmatpush1.bf16.msra.mxu1 %v9127_v60  ;;  %v9137_v60 = vld [vmem:[#allocation65_spill] sm:$0xff] }
 0x1ad   : > { %5357 = vmatprep.subr.bf16.mxu1 %v9128_v26  ;;  %v9139_v26 = vld [vmem:[#allocation67_spill] sm:$0xff] }
 0x1b0   : > { %5359 = vmatpush1.bf16.msra.mxu1 %v9129_v19  ;;  %v9140_v19 = vld [vmem:[#allocation70_spill] sm:$0xff] }
 0x1b1   : > { %5361 = vmatprep.subr.bf16.mxu1 %v9130_v0  ;;  %v9141_v0 = vld [vmem:[#allocation71_spill] sm:$0xff] }
 0x1b4   : > { %5363 = vmatpush1.bf16.msra.mxu1 %v9131_v43  ;;  %v9142_v43 = vld [vmem:[#allocation19_spill] sm:$0xff] }
 0x1b5   : > { %5365 = vmatprep.subr.bf16.mxu1 %v9132_v13 }
 0x1b8   : > { %5367 = vmatpush1.bf16.msra.mxu1 %v9133_v39 }
 0x1b9   : > { %5369 = vmatprep.subr.bf16.mxu1 %v9134_v50 }
 0x1bc   : > { %5371 = vmatpush1.bf16.msra.mxu1 %v9135_v61  ;;  %v9146_v61 = vld [vmem:[#allocation74_spill] sm:$0xff] }
 0x1bd   : > { %5373 = vmatprep.subr.bf16.mxu1 %v9136_v2  ;;  %v6792_v2 = vmov 0  }
 0x1be   : > { %6299 = vset.pattern.permute.xlu1 %v6792_v2  ;;  %6300 = vset.pattern.permute.xlu0 %v6792_v2 }
 0x1c0   : > { %5375 = vmatpush1.bf16.msra.mxu1 %v9137_v60  ;;  %v7408_v60 = vld [vmem:[%s7405_s24] sm:$0x1] }
 0x1c1   : > { %5377 = vmatprep.subr.bf16.mxu1 %v9138_v57  ;;  %1135 = vperm.xlu1 %6299, %v7408_v60   ;;  %vm4691_vm3 = vcmp.gt.f32.partialorder %v7408_v60, 1.0  ;;  %vm4707_vm10 = vcmp.gt.f32.partialorder %v7408_v60, 2.0 }
 0x1c4   : > { %5379 = vmatpush1.bf16.msra.mxu1 %v9139_v26  ;;  %v7412_v26 = vld [vmem:[%s7405_s24 + $0x1] sm:$0x1] }
 0x1c5   : > { %5381 = vmatprep.subr.bf16.mxu1 %v9140_v19  ;;  %9143 = vst [vmem:[#allocation85_spill] sm:$0xff] %v7412_v26  ;;  %1144 = vperm.xlu1 %6299, %v7412_v26   ;;  %v7419_v19 = vld [vmem:[%s8820_s4] sm:$0x1f]  ;;  %vm4692_vm5 = vcmp.gt.f32.partialorder %v7412_v26, 1.0 }
 0x1c6   : > { %v7426_v50 = vrot.slane %v7419_v19, %v9146_v61 }
 0x1c8   : > { %5383 = vmatpush1.bf16.msra.mxu1 %v9141_v0  ;;  %v9144_v0 = vld [vmem:[#allocation73_spill] sm:$0xff]  ;;  %9147 = vst [vmem:[#allocation86_spill] sm:$0xff] %v7426_v50 }
 0x1c9   : > { %5417 = vmatprep.subr.bf16.mxu1 %v9142_v43  ;;  %v1025_v43 = vsub.s32 2, %v9144_v0  ;;  %v7422_v57 = vsub.s32 1, %v9144_v0  ;;  %v1029_v31 = vsub.s32 3, %v9144_v0 }
 0x1cb   : > { %9145 = vst [vmem:[#allocation73_spill] sm:$0xff] %v7422_v57  ;;  %v7429_v2 = vrot.slane %v7419_v19, %v1025_v43  ;;  %v7433_v39 = vrot.slane %v7419_v19, %v7422_v57 }
 0x1cd   : > { %9148 = vst [vmem:[#allocation87_spill] sm:$0xff] %v7429_v2  ;;  %9149 = vst [vmem:[#allocation88_spill] sm:$0xff] %v7433_v39 }
 0x23e   : > { %v851_v13 = vpop.f32.mrb[0].mxu1  ;;  %v928_v34 = vpop.f32.mrb[4].mxu0 }
 0x23f   : > { %v1040_v24 = vadd.f32 %v7426_v50, %v851_v13  ;;  %v1042_v12 = vadd.f32 %v7429_v2, %v928_v34  ;;  %v853_v10 = vpop.f32.mrb[1].mxu1  ;;  %v930_v5 = vpop.f32.mrb[5].mxu0 }
 0x240   : > { %v1041_v62 = vadd.f32 %v7433_v39, %v853_v10 }
 0x241   : > { %v4687_v53 = vmul.f32 -1.442695, %v1040_v24  ;;  %v4685_v44 = vmul.f32 -1.442695, %v1042_v12 }
 0x242   : > { %v4683_v36 = vmul.f32 -1.442695, %v1041_v62  ;;  %v857_v42 = vpop.f32.mrb[2].mxu1  ;;  %v934_v43 = vpop.f32.mrb[6].mxu0  ;;  %v7443_v62 = vrot.slane %v7419_v19, %v1029_v31  ;;  %v9151_v31 = vld [vmem:[#allocation75_spill] sm:$0xff] }
 0x243   : > { %6306 = vpow2.f32 %v4687_v53  ;;  %v1045_v16 = vadd.f32 %v7426_v50, %v857_v42  ;;  %v1047_v11 = vadd.f32 %v7429_v2, %v934_v43  ;;  %v859_v22 = vpop.f32.mrb[3].mxu1  ;;  %v936_v13 = vpop.f32.mrb[7].mxu0 }
 0x244   : > { %6308 = vpow2.f32 %v4685_v44  ;;  %v1046_v34 = vadd.f32 %v7433_v39, %v859_v22  ;;  %9150 = vst [vmem:[#allocation89_spill] sm:$0xff] %v7443_v62  ;;  %v1043_v53 = vadd.f32 %v7443_v62, %v930_v5  ;;  %v1048_v22 = vadd.f32 %v7443_v62, %v936_v13 }
 0x245   : > { %6310 = vpow2.f32 %v4683_v36  ;;  %v4688_v15 = vmul.f32 -1.442695, %v1045_v16  ;;  %v4686_v10 = vmul.f32 -1.442695, %v1047_v11 }
 0x246   : > { %v4684_v24 = vmul.f32 -1.442695, %v1046_v34 }
 0x247   : > { %6312 = vpow2.f32 %v4688_v15  ;;  %v511_v15 = vrot.slane %v9151_v31, %v7422_v57 }
 0x248   : > { %6314 = vpow2.f32 %v4686_v10 }
 0x249   : > { %6316 = vpow2.f32 %v4684_v24  ;;  %v9152_v24 = vld [vmem:[#allocation76_spill] sm:$0xff] }
 0x24a   : > { %6318 = vtanh.f32 %v1043_v53  ;;  %v7450_v53 = vadd.f32 %v9152_v24, %v511_v15 }
 0x24d   : > { %v6307_v42 = vpop.eup %6306 }
 0x24e   : > { %v6309_v12 = vpop.eup %6308  ;;  %v1088_v43 = vadd.f32 1.0, %v6307_v42  ;;  %v7454_v42 = vadd.f32 %v7278_v47, %v511_v15 }
 0x24f   : > { %v6311_v2 = vpop.eup %6310  ;;  %v1070_v50 = vadd.f32 1.0, %v6309_v12  ;;  %v1033_v12 = vsub.s32 4, %v9144_v0 }
 0x250   : > { %6320 = vrcp.f32 %v1088_v43  ;;  %v1056_v16 = vadd.f32 1.0, %v6311_v2 }
 0x251   : > { %v6313_v11 = vpop.eup %6312  ;;  %6322 = vrcp.f32 %v1070_v50  ;;  %v8942_v50 = vrot.slane %v7450_v53, 1 }
 0x252   : > { %v6315_v36 = vpop.eup %6314  ;;  %6324 = vrcp.f32 %v1056_v16  ;;  %v1089_v44 = vadd.f32 1.0, %v6313_v11 }
 0x253   : > { %v6317_v34 = vpop.eup %6316  ;;  %v1071_v5 = vadd.f32 1.0, %v6315_v36  ;;  %6326 = vtanh.f32 %v1048_v22 }
 0x254   : > { %6328 = vrcp.f32 %v1089_v44  ;;  %v1057_v10 = vadd.f32 1.0, %v6317_v34  ;;  %v6319_v13 = vpop.eup %6318  ;;  %v8951_v34 = vrot.slane %v7454_v42, 1 }
 0x255   : > { %6330 = vrcp.f32 %v1071_v5 }
 0x256   : > { %6332 = vrcp.f32 %v1057_v10  ;;  %v7462_v10 = vrot.slane %v7419_v19, %v1033_v12 }
 0x258   : > { %9153 = vst [vmem:[#allocation75_spill] sm:$0xff] %v7462_v10 }
 0x25a   : > { %v6321_v2 = vpop.eup %6320 }
 0x25b   : > { %v6323_v43 = vpop.eup %6322  ;;  %v1094_v16 = vmul.f32 %v6321_v2, %v6319_v13 }
 0x25c   : > { %v6325_v11 = vpop.eup %6324  ;;  %v1076_v22 = vmul.f32 %v6323_v43, %v8942_v50 }
 0x25d   : > { %v6327_v36 = vpop.eup %6326  ;;  %v1062_v31 = vmul.f32 %v6325_v11, %v7450_v53 }
 0x25e   : > { %v6329_v44 = vpop.eup %6328  ;;  %v4830_v5 = vpop.f32.mrb[4].mxu1 }
 0x25f   : > { %v6331_v47 = vpop.eup %6330  ;;  %v1078_v15 = vadd.f32 %v1076_v22, %v1062_v31  ;;  %v1095_v24 = vmul.f32 %v6329_v44, %v6327_v36  ;;  %v4831_v62 = vpop.f32.mrb[5].mxu1 }
 0x260   : > { %v6333_v39 = vpop.eup %6332  ;;  %v1077_v13 = vmul.f32 %v6331_v47, %v8951_v34  ;;  %v4832_v2 = vadd.f32 %v4831_v62, %v4830_v5 }
 0x261   : > { %v7466_v43 = vadd.f32 %v1094_v16, %v1078_v15  ;;  %v1063_v11 = vmul.f32 %v6333_v39, %v7454_v42 }
 0x262   : > { %v1044_v50 = vadd.f32 %v4832_v2, %v7462_v10  ;;  %v4833_v58 = vpop.f32.mrb[6].mxu1  ;;  %v6793_v2 = vmov 1966171168  }
 0x263   : > { %v1079_v52 = vadd.f32 %v1077_v13, %v1063_v11  ;;  %v4834_v7 = vpop.f32.mrb[7].mxu1  ;;  %v1136_v13 = vpop.permute.xlu1 %1135  ;;  %v1155_v11 = vunpack.c.l.s4 %v6793_v2 }
 0x264   : > { %v4689_v19 = vmul.f32 -1.442695, %v1044_v50  ;;  %v4835_v12 = vadd.f32 %v4834_v7, %v4833_v58  ;;  %v7478_v7 = vld [vmem:[%s8821_s5] ss:$0 sm:$0xff] }
 0x265   : > { %v7470_v1 = vadd.f32 %v1095_v24, %v1079_v52 }
 0x266   : > { %6334 = vpow2.f32 %v4689_v19  ;;  %v1049_v22 = vadd.f32 %v4835_v12, %v7462_v10  ;;  %v1141_v12 = vrot.slane %v1136_v13, %v9146_v61 }
 0x267   : > { %v1145_v19 = vpop.permute.xlu1 %1144 }
 0x268   : > { %v4690_v36 = vmul.f32 -1.442695, %v1049_v22  ;;  %v1156_v22 = vunpack.c.0.s8 %v1155_v11 }
 0x26a   : > { %6336 = vpow2.f32 %v4690_v36  ;;  %v1150_v36 = vrot.slane %v1145_v19, %v9146_v61 }
 0x26b   : > { %6338 = vtanh.f32 %v7466_v43 }
 0x270   : > { %v6335_v31 = vpop.eup %6334 }
 0x271   : > { %v1104_v62 = vadd.f32 1.0, %v6335_v31  ;;  %v7491_v31 = vsub.s32 %v1156_v22, %v9144_v0  ;;  %v9159_v22 = vmov 0.0  }
 0x273   : > { %6340 = vrcp.f32 %v1104_v62  ;;  %9154 = vst [vmem:[#allocation76_spill] sm:$0xff] %v7491_v31  ;;  %v1153_v62 = vcombine.low %v1141_v12, %v1150_v36  ;;  %v4693_v36 = vsel %vm4691_vm3, 1.0, %v9159_v22 }
 0x274   : > { %v6337_v39 = vpop.eup %6336  ;;  %6342 = vtanh.f32 %v7470_v1 }
 0x275   : > { %v1105_v16 = vadd.f32 1.0, %v6337_v39  ;;  %v6339_v44 = vpop.eup %6338  ;;  %v9155_v39 = vlaneseq }
 0x277   : > { %6344 = vrcp.f32 %v1105_v16  ;;  %v762_v16 = vand.u32 127, %v9155_v39 }
 0x27a   : > { %v9220_v60 = vld [vmem:[#allocation76_spill] sm:$0xff] }
 0x27d   : > { %v6341_v50 = vpop.eup %6340 }
 0x27e   : > { %v7480_v52 = vmul.f32 %v6341_v50, %v6339_v44  ;;  %v6343_v58 = vpop.eup %6342  ;;  %v1160_v44 = vrot.slane %v1153_v62, %v7491_v31  ;;  %v7495_v50 = vcvt.s32.f32 %v762_v16  ;;  %v1281_v62 = vrot.slane %v4693_v36, %v9146_v61 }
 0x280   : > { %v1126_v5 = vmul.f32 %v7478_v7, %v7480_v52  ;;  %9156 = vst [vmem:[#allocation90_spill] sm:$0xff] %v7495_v50 }
 0x281   : > { %v6345_v47 = vpop.eup %6344 }
 0x282   : > { %1128 = vadd.xlane.f32.xlu0 %v1126_v5  ;;  %v7484_v15 = vmul.f32 %v6345_v47, %v6343_v58  ;;  %v7498_v5 = vsub.s32 %v762_v16, %v9144_v0  ;;  %v7501_v47 = vrot.slane %v1160_v44, %v7491_v31 }
 0x284   : > { %v1127_v24 = vmul.f32 %v7478_v7, %v7484_v15  ;;  %9157 = vst [vmem:[#allocation91_spill] sm:$0xff] %v7498_v5  ;;  %9158 = vst [vmem:[#allocation92_spill] sm:$0xff] %v7501_v47 }
 0x286   : > { %1130 = vadd.xlane.f32.xlu0 %v1127_v24  ;;  %v1132_v24 = vadd.f32 1.0, %v7495_v50 }
 0x288   : > { %vm1169_vm2 = vcmp.lt.f32.partialorder %v1132_v24, %v7501_v47 }
 0x30f   : > { %v1129_v58 = vpop.xlane.xlu0 %1128 }
 0x310   : > { %v1175_v2 = vrot.slane %v1129_v58, %v7498_v5  ;;  %v1296_v58 = vsub.f32 1.0, %v4693_v36 }
 0x312   : > { %v1303_v24 = vrot.slane %v1296_v58, %v9146_v61 }
 0x313   : > { %v1131_v13 = vpop.xlane.xlu0 %1130 }
 0x314   : > { %v1179_v11 = vrot.slane %v1131_v13, %v7498_v5  ;;  %v4694_v13 = vsel %vm4692_vm5, 1.0, %v9159_v22 }
 0x316   : > { %v1181_v19 = vsel %vm1180_vm0, %v1179_v11, %v1175_v2  ;;  %v1297_v11 = vsub.f32 1.0, %v4694_v13 }
 0x317   : > { %v1183_v12 = vsel %vm1169_vm2, %v1181_v19, -1e+30  ;;  %vm4196_vm2 = vcmask 1040384  }
 0x318   : > { %v1185_v0 = vsel %vm1184_vm1, %v1183_v12, -inf }
 0x319   : > { %1186 = vmax.xlane.f32.xlu0 %v1185_v0 }
 0x32f   : > { %1287 = vperm.xlu0 %6300, %v1281_v62  }
 0x3a6   : > { %v1187_v39 = vpop.xlane.xlu0 %1186 }
 0x3a7   : > { %vm1188_vm4 = vcmp.ge.f32.partialorder %v1183_v12, %v1187_v39  ;;  %v1307_v39 = vrot.slane %v1297_v11, %v9146_v61 }
 0x3a8   : > { %v1189_v16 = vsel %vm1188_vm4, %v7495_v50, 8.0 }
 0x3a9   : > { %v1190_v44 = vsel %vm1184_vm1, %v1189_v16, inf }
 0x3aa   : > { %1191 = vmin.xlane.f32.xlu1 %v1190_v44  ;;  %v1285_v44 = vrot.slane %v4694_v13, %v9146_v61 }
 0x3bb   : > { %1309 = vperm.xlu1 %6299, %v1303_v24  }
 0x437   : > { %v1192_v2 = vpop.xlane.xlu1 %1191 }
 0x438   : > { %vm1193_vm6 = vcmp.eq.f32.partialorder %v7495_v50, %v1192_v2  ;;  %vm1213_vm7 = vcmp.gt.f32.partialorder %v7495_v50, %v1192_v2  ;;  %vm1196_vm8 = vcmp.lt.f32.partialorder %v7495_v50, %v1192_v2 }
 0x439   : > { %v4698_v19 = vsel %vm1213_vm7, 1.0, %v9159_v22  ;;  %v4697_v12 = vsel %vm1196_vm8, 1.0, %v9159_v22  ;;  %v7525_v62 = vsel %vm1193_vm6, 1.0, %v9159_v22 }
 0x43a   : > { %v1219_v0 = vrot.slane %v4698_v19, %v9146_v61  ;;  %v1202_v36 = vrot.slane %v4697_v12, %v9146_v61  ;;  %9160 = vst [vmem:[#allocation93_spill] sm:$0xff] %v7525_v62  ;;  %v1233_v16 = vrot.slane %v7525_v62, %v9146_v61  ;;  %v1240_v58 = vrot.slane %v7525_v62, %v7422_v57 }
 0x43b   : > { %v1209_v24 = vrot.slane %v4697_v12, %v7422_v57  ;;  %v1226_v2 = vrot.slane %v4698_v19, %v7422_v57  ;;  %v7535_v11 = vpop.permute.xlu1 %1309  ;;  %v9161_v19 = vrot.slane %v7450_v53, 1 }
 0x43c   : > { %1221 = vbcast.lane.b32.xlu1 %v1219_v0, 256  ;;  %1204 = vbcast.lane.b32.xlu0 %v1202_v36, 256  ;;  %v1288_v0 = vpop.permute.xlu0 %1287  ;;  %v1316_v26 = vmul.f32 %v7535_v11, %v7261_v45 }
 0x440   : > { %1313 = vperm.xlu1 %6299, %v1307_v39   ;;  %1235 = vbcast.lane.b32.xlu0 %v1233_v16, 256 }
 0x444   : > { %1242 = vbcast.lane.b32.xlu1 %v1240_v58, 256  ;;  %1291 = vperm.xlu0 %6300, %v1285_v44  }
 0x448   : > { %1211 = vbcast.lane.b32.xlu0 %v1209_v24, 256 }
 0x44c   : > { %1228 = vbcast.lane.b32.xlu0 %v1226_v2, 256 }
 0x4ae   : > { %v1205_v36 = vpop.permute.xlu0 %1204  ;;  %v1222_v34 = vpop.permute.xlu1 %1221 }
 0x4af   : > { %v1246_v16 = vmul.f32 %v1205_v36, %v7261_v45  ;;  %v1256_v13 = vmul.f32 %v1205_v36, %v7450_v53  ;;  %v1250_v12 = vmul.f32 %v1222_v34, %v7266_v4  ;;  %v1260_v58 = vmul.f32 %v1222_v34, %v9161_v19  ;;  %v9162_v34 = vld [vmem:[#allocation77_spill] sm:$0xff]  ;;  %v9163_v45 = vld [vmem:[#allocation20_spill] sm:$0xff] }
 0x4b2   : > { %v1236_v39 = vpop.permute.xlu0 %1235 }
 0x4b3   : > { %v7540_v62 = vmul.f32 %v1236_v39, %v7480_v52  ;;  %v1254_v44 = vmul.f32 %v1236_v39, %v7466_v43 }
 0x4b5   : > { %v1248_v24 = vadd.f32 %v1246_v16, %v7540_v62  ;;  %v1258_v2 = vadd.f32 %v1256_v13, %v1254_v44 }
 0x4b7   : > { %v1252_v57 = vadd.f32 %v1250_v12, %v1248_v24  ;;  %v1262_v31 = vadd.f32 %v1260_v58, %v1258_v2  ;;  %v9168_v12 = vld [vmem:[#allocation24_spill] sm:$0xff]  ;;  %v9169_v24 = vld [vmem:[#allocation82_spill] sm:$0xff] }
 0x4b9   : > { %v1294_v61 = vmul.f32 %v1288_v0, %v1252_v57  ;;  %v7549_v36 = vmul.f32 %v1288_v0, %v1262_v31  ;;  %v9164_v57 = vld [vmem:[#allocation78_spill] sm:$0xff]  ;;  %v9167_v0 = vld [vmem:[#allocation80_spill] sm:$0xff] }
 0x4ba   : > { %v9166_v31 = vld [vmem:[#allocation22_spill] sm:$0xff] }
 0x4bb   : > { %v7551_v52 = vadd.f32 %v1316_v26, %v1294_v61  ;;  %v9165_v61 = vld [vmem:[#allocation21_spill] sm:$0xff] }
 0x4bd   : > { %v7554_v43 = vrot.slane %v7551_v52, 1 }
 0x4bf   : > { %1414 = vmatprep.mubr.f32.mxu0 %v7554_v43  ;;  %1491 = vmatprep.mubr.f32.mxu1 %v7554_v43  ;;  %v1314_v4 = vpop.permute.xlu1 %1313 }
 0x4c0   : > { %1415 = vmatmul.mubr.f32.vlgmr.msra.gmra.mrb[8].mxu0 %v7551_v52  ;;  %1492 = vmatmul.mubr.f32.vlgmr.msra.gmra.mrb[8].mxu1 %v7551_v52 }
 0x4c1   : > { %5387 = vmatpush3.bf16.msra.mxu0 %v9162_v34  ;;  %5419 = vmatpush1.bf16.msra.mxu1 %v9163_v45 }
 0x4c2   : > { %5389 = vmatprep.subr.bf16.mxu0 %v9164_v57  ;;  %5421 = vmatprep.subr.bf16.mxu1 %v9165_v61 }
 0x4c3   : > { %v1292_v26 = vpop.permute.xlu0 %1291  ;;  %v1243_v39 = vpop.permute.xlu1 %1242 }
 0x4c4   : > { %v7573_v19 = vmul.f32 %v1243_v39, %v7484_v15  ;;  %v1255_v58 = vmul.f32 %v1243_v39, %v7470_v1  ;;  %v9172_v1 = vld [vmem:[#allocation83_spill] sm:$0xff]  ;;  %v1317_v39 = vmul.f32 %v1314_v4, %v7274_v8 }
 0x4c5   : > { %5391 = vmatpush3.bf16.msra.mxu0 %v7286_v27  ;;  %5423 = vmatpush1.bf16.msra.mxu1 %v9166_v31 }
 0x4c6   : > { %5393 = vmatprep.subr.bf16.mxu0 %v9167_v0  ;;  %5425 = vmatprep.subr.bf16.mxu1 %v7051_v54 }
 0x4c7   : > { %v1212_v16 = vpop.permute.xlu0 %1211 }
 0x4c8   : > { %v1247_v13 = vmul.f32 %v1212_v16, %v7274_v8  ;;  %v1257_v44 = vmul.f32 %v1212_v16, %v7454_v42  ;;  %v9170_v16 = vrot.slane %v7454_v42, 1  ;;  %v9174_v8 = vld [vmem:[#allocation30_spill] sm:$0xff] }
 0x4c9   : > { %5395 = vmatpush3.bf16.msra.mxu0 %v7301_v21  ;;  %5427 = vmatpush1.bf16.msra.mxu1 %v9168_v12  ;;  %v9171_v12 = vld [vmem:[#allocation25_spill] sm:$0xff] }
 0x4ca   : > { %5397 = vmatprep.subr.bf16.mxu0 %v9169_v24  ;;  %5429 = vmatprep.subr.bf16.mxu1 %v7057_v59  ;;  %v1249_v54 = vadd.f32 %v1247_v13, %v7573_v19  ;;  %v1259_v0 = vadd.f32 %v1257_v44, %v1255_v58  ;;  %v1325_v13 = vmul.f32 %v1314_v4, %v7454_v42  ;;  %v9176_v42 = vld [vmem:[#allocation40_spill] sm:$0xff]  ;;  %v9177_v4 = vld [vmem:[#allocation42_spill] sm:$0xff] }
 0x4cb   : > { %v1229_v2 = vpop.permute.xlu0 %1228 }
 0x4cc   : > { %v1251_v31 = vmul.f32 %v1229_v2, %v7284_v30  ;;  %v1261_v21 = vmul.f32 %v1229_v2, %v9170_v16  ;;  %v9181_v16 = vld [vmem:[#allocation46_spill] sm:$0xff] }
 0x4cd   : > { %5399 = vmatpush3.bf16.msra.mxu0 %v7309_v37  ;;  %5431 = vmatpush1.bf16.msra.mxu1 %v9171_v12 }
 0x4ce   : > { %v1253_v15 = vadd.f32 %v1251_v31, %v1249_v54  ;;  %v1263_v27 = vadd.f32 %v1261_v21, %v1259_v0  ;;  %5401 = vmatprep.subr.bf16.mxu0 %v9172_v1  ;;  %5433 = vmatprep.subr.bf16.mxu1 %v7063_v9  ;;  %v9173_v54 = vld [vmem:[#allocation84_spill] sm:$0xff]  ;;  %v9179_v31 = vld [vmem:[#allocation35_spill] sm:$0xff] }
 0x4cf   : > { %v9180_v0 = vld [vmem:[#allocation44_spill] sm:$0xff] }
 0x4d0   : > { %v1295_v44 = vmul.f32 %v1292_v26, %v1253_v15  ;;  %v1323_v58 = vmul.f32 %v1292_v26, %v1263_v27  ;;  %v9175_v27 = vld [vmem:[#allocation31_spill] sm:$0xff]  ;;  %v9178_v26 = vld [vmem:[#allocation33_spill] sm:$0xff] }
 0x4d1   : > { %5403 = vmatpush3.bf16.msra.mxu0 %v7317_v46  ;;  %5435 = vmatpush1.bf16.msra.mxu1 %v7066_v18  ;;  %v9182_v15 = vld [vmem:[#allocation37_spill] sm:$0xff] }
 0x4d2   : > { %v7590_v30 = vadd.f32 %v1317_v39, %v1295_v44  ;;  %v7592_v2 = vadd.f32 %v1325_v13, %v1323_v58  ;;  %5405 = vmatprep.subr.bf16.mxu0 %v9173_v54  ;;  %5437 = vmatprep.subr.bf16.mxu1 %v7069_v20  ;;  %v9183_v39 = vld [vmem:[#allocation39_spill] sm:$0xff]  ;;  %v9184_v13 = vld [vmem:[#allocation48_spill] sm:$0xff]  ;;  %v9185_v44 = vld [vmem:[#allocation50_spill] sm:$0xff] }
 0x4d3   : > { %v9186_v58 = vld [vmem:[#allocation41_spill] sm:$0xff] }
 0x4d4   : > { %v7597_v21 = vrot.slane %v7590_v30, 1 }
 0x4d5   : > { %5407 = vmatpush3.bf16.msra.mxu0 %v7325_v55  ;;  %5439 = vmatpush1.bf16.msra.mxu1 %v7075_v32 }
 0x4d6   : > { %1420 = vmatprep.mubr.f32.mxu0 %v7597_v21  ;;  %1497 = vmatprep.mubr.f32.mxu1 %v7597_v21 }
 0x4d7   : > { %1421 = vmatmul.mubr.f32.gmra.mrb[10].mxu0 %v7590_v30  ;;  %1498 = vmatmul.mubr.f32.gmra.mrb[10].mxu1 %v7590_v30 }
 0x4d8   : > { %5409 = vmatprep.subr.bf16.mxu0 %v7328_v28  ;;  %1568 = vmatprep.mubr.f32.mxu0 %v7554_v43 }
 0x4d9   : > { %5411 = vmatpush3.bf16.msra.mxu0 %v7333_v6  ;;  %5441 = vmatprep.subr.bf16.mxu1 %v7083_v40 }
 0x4da   : > { %5413 = vmatprep.subr.bf16.mxu0 %v7336_v25  ;;  %5443 = vmatpush1.bf16.msra.mxu1 %v7087_v48 }
 0x4db   : > { %5445 = vmatprep.subr.bf16.mxu1 %v7093_v51 }
 0x4dd   : > { %5415 = vmatpush3.bf16.msra.mxu0 %v7341_v41 }
 0x4de   : > { %5481 = vmatprep.subr.bf16.mxu0 %v7071_v23  ;;  %5447 = vmatpush1.bf16.msra.mxu1 %v7100_v63 }
 0x4df   : > { %5449 = vmatprep.subr.bf16.mxu1 %v7106_v3 }
 0x4e0   : > { %1569 = vmatmul.mubr.f32.vlgmr.msra.gmra.mrb[12].mxu0 %v7551_v52 }
 0x4e1   : > { %1573 = vmatprep.mubr.f32.mxu0 %v7597_v21  ;;  %5483 = vmatpush1.bf16.msra.mxu0 %v7077_v33 }
 0x4e2   : > { %5485 = vmatprep.subr.bf16.mxu0 %v7081_v38  ;;  %5451 = vmatpush1.bf16.msra.mxu1 %v7112_v14 }
 0x4e3   : > { %5453 = vmatprep.subr.bf16.mxu1 %v7118_v17 }
 0x4e4   : > { %1574 = vmatmul.mubr.f32.gmra.mrb[14].mxu0 %v7590_v30 }
 0x4e5   : > { %5487 = vmatpush1.bf16.msra.mxu0 %v7091_v49 }
 0x4e6   : > { %5489 = vmatprep.subr.bf16.mxu0 %v7096_v56  ;;  %5455 = vmatpush1.bf16.msra.mxu1 %v7124_v29  ;;  %v9216_v29 = vld [vmem:[#allocation88_spill] sm:$0xff] }
 0x4e7   : > { %5457 = vmatprep.subr.bf16.mxu1 %v7130_v35 }
 0x4e9   : > { %5491 = vmatpush1.bf16.msra.mxu0 %v9174_v8  ;;  %v9215_v8 = vld [vmem:[#allocation87_spill] sm:$0xff] }
 0x4ea   : > { %5493 = vmatprep.subr.bf16.mxu0 %v9175_v27  ;;  %5459 = vmatpush1.bf16.msra.mxu1 %v9176_v42  ;;  %v9187_v42 = vld [vmem:[#allocation43_spill] sm:$0xff]  ;;  %v9214_v27 = vld [vmem:[#allocation86_spill] sm:$0xff] }
 0x4eb   : > { %5461 = vmatprep.subr.bf16.mxu1 %v9177_v4  ;;  %v9188_v4 = vld [vmem:[#allocation52_spill] sm:$0xff] }
 0x4ed   : > { %5495 = vmatpush1.bf16.msra.mxu0 %v9178_v26  ;;  %v9189_v26 = vld [vmem:[#allocation54_spill] sm:$0xff] }
 0x4ee   : > { %5497 = vmatprep.subr.bf16.mxu0 %v9179_v31  ;;  %5463 = vmatpush1.bf16.msra.mxu1 %v9180_v0  ;;  %v9190_v31 = vld [vmem:[#allocation45_spill] sm:$0xff]  ;;  %v9191_v0 = vld [vmem:[#allocation47_spill] sm:$0xff] }
 0x4ef   : > { %5465 = vmatprep.subr.bf16.mxu1 %v9181_v16  ;;  %v9192_v16 = vld [vmem:[#allocation56_spill] sm:$0xff] }
 0x4f1   : > { %5499 = vmatpush1.bf16.msra.mxu0 %v9182_v15  ;;  %v9193_v15 = vld [vmem:[#allocation68_spill] sm:$0xff] }
 0x4f2   : > { %5501 = vmatprep.subr.bf16.mxu0 %v9183_v39  ;;  %5467 = vmatpush1.bf16.msra.mxu1 %v9184_v13  ;;  %v9194_v39 = vld [vmem:[#allocation49_spill] sm:$0xff]  ;;  %v9195_v13 = vld [vmem:[#allocation51_spill] sm:$0xff] }
 0x4f3   : > { %5469 = vmatprep.subr.bf16.mxu1 %v9185_v44  ;;  %v9196_v44 = vld [vmem:[#allocation69_spill] sm:$0xff] }
 0x4f5   : > { %5503 = vmatpush1.bf16.msra.mxu0 %v9186_v58  ;;  %v9197_v58 = vld [vmem:[#allocation72_spill] sm:$0xff] }
 0x4f6   : > { %5505 = vmatprep.subr.bf16.mxu0 %v9187_v42  ;;  %5471 = vmatpush1.bf16.msra.mxu1 %v9188_v4  ;;  %v9198_v42 = vld [vmem:[#allocation53_spill] sm:$0xff]  ;;  %v9199_v4 = vld [vmem:[#allocation55_spill] sm:$0xff] }
 0x4f7   : > { %5473 = vmatprep.subr.bf16.mxu1 %v9189_v26  ;;  %v9200_v26 = vld [vmem:[#allocation57_spill] sm:$0xff] }
 0x4f9   : > { %5507 = vmatpush1.bf16.msra.mxu0 %v9190_v31  ;;  %v9201_v31 = vld [vmem:[#allocation58_spill] sm:$0xff] }
 0x4fa   : > { %5509 = vmatprep.subr.bf16.mxu0 %v9191_v0  ;;  %5475 = vmatpush1.bf16.msra.mxu1 %v9192_v16  ;;  %v9202_v0 = vld [vmem:[#allocation59_spill] sm:$0xff]  ;;  %v9203_v16 = vld [vmem:[#allocation60_spill] sm:$0xff] }
 0x4fb   : > { %5477 = vmatprep.subr.bf16.mxu1 %v9193_v15  ;;  %v9204_v15 = vld [vmem:[#allocation61_spill] sm:$0xff] }
 0x4fd   : > { %5511 = vmatpush1.bf16.msra.mxu0 %v9194_v39  ;;  %v9205_v39 = vld [vmem:[#allocation62_spill] sm:$0xff] }
 0x4fe   : > { %5513 = vmatprep.subr.bf16.mxu0 %v9195_v13  ;;  %5479 = vmatpush1.bf16.msra.mxu1 %v9196_v44  ;;  %v9206_v13 = vld [vmem:[#allocation63_spill] sm:$0xff]  ;;  %v9207_v44 = vld [vmem:[#allocation64_spill] sm:$0xff] }
 0x4ff   : > { %5545 = vmatprep.subr.bf16.mxu1 %v9197_v58  ;;  %v9208_v58 = vld [vmem:[#allocation65_spill] sm:$0xff] }
 0x501   : > { %5515 = vmatpush1.bf16.msra.mxu0 %v9198_v42  ;;  %v9209_v42 = vld [vmem:[#allocation66_spill] sm:$0xff] }
 0x502   : > { %5517 = vmatprep.subr.bf16.mxu0 %v9199_v4  ;;  %v9210_v4 = vld [vmem:[#allocation67_spill] sm:$0xff] }
 0x505   : > { %5519 = vmatpush1.bf16.msra.mxu0 %v9200_v26  ;;  %v9211_v26 = vld [vmem:[#allocation70_spill] sm:$0xff] }
 0x506   : > { %5521 = vmatprep.subr.bf16.mxu0 %v9201_v31  ;;  %v9212_v31 = vld [vmem:[#allocation71_spill] sm:$0xff] }
 0x509   : > { %5523 = vmatpush1.bf16.msra.mxu0 %v9202_v0  ;;  %v9213_v0 = vld [vmem:[#allocation19_spill] sm:$0xff] }
 0x50a   : > { %5525 = vmatprep.subr.bf16.mxu0 %v9203_v16 }
 0x50d   : > { %5527 = vmatpush1.bf16.msra.mxu0 %v9204_v15 }
 0x50e   : > { %5529 = vmatprep.subr.bf16.mxu0 %v9205_v39 }
 0x511   : > { %5531 = vmatpush1.bf16.msra.mxu0 %v9206_v13 }
 0x512   : > { %5533 = vmatprep.subr.bf16.mxu0 %v9207_v44 }
 0x515   : > { %5535 = vmatpush1.bf16.msra.mxu0 %v9208_v58 }
 0x516   : > { %5537 = vmatprep.subr.bf16.mxu0 %v9209_v42 }
 0x519   : > { %5539 = vmatpush1.bf16.msra.mxu0 %v9210_v4 }
 0x51a   : > { %5541 = vmatprep.subr.bf16.mxu0 %v9211_v26  ;;  %v9217_v26 = vld [vmem:[#allocation89_spill] sm:$0xff] }
 0x51d   : > { %5543 = vmatpush1.bf16.msra.mxu0 %v9212_v31 }
 0x51e   : > { %5577 = vmatprep.subr.bf16.mxu0 %v9213_v0 }
 0x593   : > { %v1416_v16 = vpop.f32.mrb[8].mxu0  ;;  %v1493_v15 = vpop.f32.mrb[8].mxu1 }
 0x594   : > { %v1579_v39 = vadd.f32 %v1416_v16, %v9214_v27  ;;  %v1581_v13 = vadd.f32 %v1493_v15, %v9215_v8  ;;  %v1418_v35 = vpop.f32.mrb[9].mxu0  ;;  %v1495_v44 = vpop.f32.mrb[9].mxu1 }
 0x595   : > { %v1580_v58 = vadd.f32 %v1418_v35, %v9216_v29  ;;  %v1582_v31 = vadd.f32 %v1495_v44, %v9217_v26  ;;  %v1324_v35 = vmul.f32 %v7535_v11, %v7450_v53 }
 0x596   : > { %v4703_v56 = vmul.f32 -1.442695, %v1579_v39  ;;  %v4701_v42 = vmul.f32 -1.442695, %v1581_v13 }
 0x597   : > { %v4699_v49 = vmul.f32 -1.442695, %v1580_v58 }
 0x598   : > { %6346 = vpow2.f32 %v4703_v56  ;;  %v7674_v56 = vadd.f32 %v1324_v35, %v7549_v36 }
 0x599   : > { %6348 = vpow2.f32 %v4701_v42 }
 0x59a   : > { %6350 = vpow2.f32 %v4699_v49  ;;  %v8983_v53 = vrot.slane %v7674_v56, 1 }
 0x59b   : > { %6352 = vtanh.f32 %v1582_v31 }
 0x5a2   : > { %v6347_v4 = vpop.eup %6346 }
 0x5a3   : > { %v6349_v0 = vpop.eup %6348  ;;  %v1627_v17 = vadd.f32 1.0, %v6347_v4 }
 0x5a4   : > { %v6351_v14 = vpop.eup %6350  ;;  %v1609_v38 = vadd.f32 1.0, %v6349_v0 }
 0x5a5   : > { %6354 = vrcp.f32 %v1627_v17  ;;  %v1595_v16 = vadd.f32 1.0, %v6351_v14 }
 0x5a6   : > { %6356 = vrcp.f32 %v1609_v38  ;;  %v6353_v38 = vpop.eup %6352 }
 0x5a7   : > { %6358 = vrcp.f32 %v1595_v16 }
 0x5aa   : > { %v1422_v15 = vpop.f32.mrb[10].mxu0  ;;  %v1499_v39 = vpop.f32.mrb[10].mxu1 }
 0x5ab   : > { %v1584_v49 = vadd.f32 %v1422_v15, %v9214_v27  ;;  %v1586_v42 = vadd.f32 %v1499_v39, %v9215_v8  ;;  %v1424_v4 = vpop.f32.mrb[11].mxu0  ;;  %v1501_v13 = vpop.f32.mrb[11].mxu1 }
 0x5ac   : > { %v1585_v31 = vadd.f32 %v1424_v4, %v9216_v29 }
 0x5ad   : > { %v4704_v17 = vmul.f32 -1.442695, %v1584_v49  ;;  %v4702_v14 = vmul.f32 -1.442695, %v1586_v42 }
 0x5ae   : > { %v4700_v0 = vmul.f32 -1.442695, %v1585_v31  ;;  %v1587_v31 = vadd.f32 %v1501_v13, %v9217_v26 }
 0x5af   : > { %v6355_v44 = vpop.eup %6354  ;;  %6360 = vpow2.f32 %v4704_v17 }
 0x5b0   : > { %v6357_v11 = vpop.eup %6356  ;;  %v1633_v58 = vmul.f32 %v6355_v44, %v6353_v38  ;;  %6362 = vpow2.f32 %v4702_v14 }
 0x5b1   : > { %v6359_v36 = vpop.eup %6358  ;;  %v1615_v16 = vmul.f32 %v6357_v11, %v8983_v53  ;;  %6364 = vpow2.f32 %v4700_v0 }
 0x5b2   : > { %v1601_v35 = vmul.f32 %v6359_v36, %v7674_v56  ;;  %6366 = vtanh.f32 %v1587_v31 }
 0x5b3   : > { %v4868_v15 = vpop.f32.mrb[12].mxu0 }
 0x5b4   : > { %v1617_v39 = vadd.f32 %v1615_v16, %v1601_v35  ;;  %v4869_v49 = vpop.f32.mrb[13].mxu0 }
 0x5b5   : > { %v4870_v42 = vadd.f32 %v4869_v49, %v4868_v15  ;;  %v8982_v49 = vrot.slane %v7592_v2, 1 }
 0x5b6   : > { %v7683_v4 = vadd.f32 %v1633_v58, %v1617_v39 }
 0x5b7   : > { %v1583_v17 = vadd.f32 %v4870_v42, %v7462_v10  ;;  %v4871_v29 = vpop.f32.mrb[14].mxu0 }
 0x5b8   : > { %v4872_v38 = vpop.f32.mrb[15].mxu0 }
 0x5b9   : > { %v6361_v14 = vpop.eup %6360  ;;  %v4705_v44 = vmul.f32 -1.442695, %v1583_v17  ;;  %v4873_v8 = vadd.f32 %v4872_v38, %v4871_v29 }
 0x5ba   : > { %v6363_v27 = vpop.eup %6362  ;;  %v1628_v11 = vadd.f32 1.0, %v6361_v14 }
 0x5bb   : > { %v6365_v0 = vpop.eup %6364  ;;  %v1610_v36 = vadd.f32 1.0, %v6363_v27  ;;  %6368 = vpow2.f32 %v4705_v44  ;;  %v1588_v16 = vadd.f32 %v4873_v8, %v7462_v10 }
 0x5bc   : > { %6370 = vrcp.f32 %v1628_v11  ;;  %v1596_v58 = vadd.f32 1.0, %v6365_v0  ;;  %v6367_v13 = vpop.eup %6366 }
 0x5bd   : > { %6372 = vrcp.f32 %v1610_v36  ;;  %v4706_v35 = vmul.f32 -1.442695, %v1588_v16 }
 0x5be   : > { %6374 = vrcp.f32 %v1596_v58 }
 0x5bf   : > { %6376 = vpow2.f32 %v4706_v35 }
 0x5c0   : > { %6378 = vtanh.f32 %v7683_v4 }
 0x5c5   : > { %v6369_v15 = vpop.eup %6368 }
 0x5c6   : > { %v6371_v39 = vpop.eup %6370  ;;  %v1643_v29 = vadd.f32 1.0, %v6369_v15 }
 0x5c7   : > { %v6373_v42 = vpop.eup %6372  ;;  %v1634_v17 = vmul.f32 %v6371_v39, %v6367_v13 }
 0x5c8   : > { %v6375_v27 = vpop.eup %6374  ;;  %v1616_v8 = vmul.f32 %v6373_v42, %v8982_v49  ;;  %6380 = vrcp.f32 %v1643_v29  ;;  %v1665_v42 = vadd.f32 2.0, %v7495_v50 }
 0x5c9   : > { %v6377_v31 = vpop.eup %6376  ;;  %v1602_v38 = vmul.f32 %v6375_v27, %v7592_v2 }
 0x5ca   : > { %v1644_v14 = vadd.f32 1.0, %v6377_v31  ;;  %v6379_v0 = vpop.eup %6378  ;;  %vm1666_vm9 = vcmp.lt.f32.partialorder %v1665_v42, %v7501_v47  ;;  %v9219_v42 = vld [vmem:[#allocation85_spill] sm:$0xff] }
 0x5cb   : > { %v1618_v44 = vadd.f32 %v1616_v8, %v1602_v38  ;;  %vm4708_vm12 = vcmp.gt.f32.partialorder %v9219_v42, 2.0 }
 0x5cc   : > { %6382 = vrcp.f32 %v1644_v14 }
 0x5cd   : > { %v7693_v11 = vadd.f32 %v1634_v17, %v1618_v44  ;;  %v9218_v44 = vld [vmem:[#allocation74_spill] sm:$0xff] }
 0x5cf   : > { %6384 = vtanh.f32 %v7693_v11 }
 0x5d2   : > { %v6381_v36 = vpop.eup %6380 }
 0x5d3   : > { %v7696_v16 = vmul.f32 %v6381_v36, %v6379_v0 }
 0x5d5   : > { %v1659_v58 = vmul.f32 %v7478_v7, %v7696_v16 }
 0x5d6   : > { %v6383_v35 = vpop.eup %6382 }
 0x5d7   : > { %1661 = vadd.xlane.f32.xlu1 %v1659_v58 }
 0x5d9   : > { %v6385_v13 = vpop.eup %6384 }
 0x5da   : > { %v7700_v15 = vmul.f32 %v6385_v13, %v6383_v35 }
 0x5dc   : > { %v1660_v39 = vmul.f32 %v7478_v7, %v7700_v15  ;;  %v4709_v7 = vsel %vm4707_vm10, 1.0, %v9159_v22  ;;  %vm4199_vm10 = vcmask 1041408  }
 0x5dd   : > { %v1776_v0 = vrot.slane %v4709_v7, %v9218_v44  ;;  %v1791_v13 = vsub.f32 1.0, %v4709_v7 }
 0x5de   : > { %1663 = vadd.xlane.f32.xlu0 %v1660_v39 }
 0x5df   : > { %v1798_v39 = vrot.slane %v1791_v13, %v9218_v44 }
 0x664   : > { %v1662_v29 = vpop.xlane.xlu1 %1661 }
 0x665   : > { %v1672_v27 = vrot.slane %v1662_v29, %v7498_v5 }
 0x66b   : > { %v1664_v17 = vpop.xlane.xlu0 %1663 }
 0x66c   : > { %v1676_v8 = vrot.slane %v1664_v17, %v7498_v5  ;;  %v9221_v17 = vld [vmem:[#allocation93_spill] sm:$0xff] }
 0x66e   : > { %v1677_v31 = vsel %vm1180_vm0, %v1676_v8, %v1672_v27  ;;  %v4229_v27 = vrot.slane %v9221_v17, %v9220_v60 }
 0x66f   : > { %v1679_v38 = vsel %vm1666_vm9, %v1677_v31, -1e+30 }
 0x670   : > { %v1680_v14 = vsel %vm1184_vm1, %v1679_v38, -inf  ;;  %v4237_v42 = vrot.slane %v4229_v27, %v9220_v60 }
 0x671   : > { %1681 = vmax.xlane.f32.xlu0 %v1680_v14 }
 0x687   : > { %1782 = vperm.xlu0 %6300, %v1776_v0   ;;  %v4710_v0 = vsel %vm4708_vm12, 1.0, %v9159_v22 }
 0x6fe   : > { %v1682_v36 = vpop.xlane.xlu0 %1681 }
 0x6ff   : > { %vm1683_vm11 = vcmp.ge.f32.partialorder %v1679_v38, %v1682_v36 }
 0x700   : > { %v1684_v58 = vsel %vm1683_vm11, %v7495_v50, 8.0 }
 0x701   : > { %v1685_v35 = vsel %vm1184_vm1, %v1684_v58, inf  ;;  %v4230_v58 = vcombine.high %v4229_v27, %v4229_v27  ;;  %v9224_v27 = vld [vmem:[#allocation73_spill] sm:$0xff] }
 0x702   : > { %1686 = vmin.xlane.f32.xlu1 %v1685_v35 }
 0x713   : > { %1804 = vperm.xlu1 %6299, %v1798_v39   ;;  %v1792_v39 = vsub.f32 1.0, %v4710_v0 }
 0x78f   : > { %v1687_v29 = vpop.xlane.xlu1 %1686 }
 0x790   : > { %vm1688_vm13 = vcmp.eq.f32.partialorder %v7495_v50, %v1687_v29  ;;  %vm1691_vm14 = vcmp.lt.f32.partialorder %v7495_v50, %v1687_v29  ;;  %vm1708_vm15 = vcmp.gt.f32.partialorder %v7495_v50, %v1687_v29  ;;  %v1780_v29 = vrot.slane %v4710_v0, %v9218_v44 }
 0x791   : > { %v4712_v8 = vsel %vm1691_vm14, 1.0, %v9159_v22  ;;  %v4711_v31 = vsel %vm1688_vm13, 1.0, %v9159_v22  ;;  %v4713_v36 = vsel %vm1708_vm15, 1.0, %v9159_v22  ;;  %v4244_v22 = vrot.slane %v4230_v58, %v9220_v60 }
 0x792   : > { %v1697_v38 = vrot.slane %v4712_v8, %v9218_v44  ;;  %v1728_v14 = vrot.slane %v4711_v31, %v9218_v44  ;;  %v4254_v7 = vrot.slane %v4711_v31, %v9220_v60  ;;  %v1714_v53 = vrot.slane %v4713_v36, %v9218_v44 }
 0x793   : > { %v1704_v0 = vrot.slane %v4712_v8, %v9224_v27  ;;  %v1721_v58 = vrot.slane %v4713_v36, %v9224_v27 }
 0x794   : > { %1699 = vbcast.lane.b32.xlu1 %v1697_v38, 256  ;;  %v4255_v35 = vcombine.high %v4254_v7, %v4254_v7  ;;  %v4262_v13 = vrot.slane %v4254_v7, %v9220_v60  ;;  %1730 = vbcast.lane.b32.xlu0 %v1728_v14, 256  ;;  %v1802_v14 = vrot.slane %v1792_v39, %v9218_v44 }
 0x796   : > { %v4269_v17 = vrot.slane %v4255_v35, %v9220_v60  ;;  %v4365_v49 = vrot.slane %v4262_v13, %v9218_v44  ;;  %v1735_v35 = vrot.slane %v4711_v31, %v9224_v27  ;;  %v7748_v13 = vpop.permute.xlu1 %1804  ;;  %v9225_v27 = vrot.slane %v7674_v56, 1 }
 0x798   : > { %v4369_v38 = vrot.slane %v4269_v17, %v9218_v44  ;;  %v7738_v47 = vsel %vm4196_vm2, %v4237_v42, %v4365_v49  ;;  %1716 = vbcast.lane.b32.xlu1 %v1714_v53, 256  ;;  %1786 = vperm.xlu0 %6300, %v1780_v29   ;;  %v1264_v49 = vrot.slane %v7540_v62, 4  ;;  %v1783_v53 = vpop.permute.xlu0 %1782  ;;  %v1811_v44 = vmul.f32 %v7748_v13, %v7551_v52 }
 0x799   : > { %9222 = vst [vmem:[#allocation77_spill] sm:$0xff] %v7738_v47 }
 0x79a   : > { %v7742_v7 = vsel %vm4196_vm2, %v4244_v22, %v4369_v38  ;;  %v1265_v39 = vadd.f32 %v1264_v49, %v7540_v62 }
 0x79b   : > { %9223 = vst [vmem:[#allocation20_spill] sm:$0xff] %v7742_v7 }
 0x79c   : > { %1808 = vperm.xlu1 %6299, %v1802_v14   ;;  %1706 = vbcast.lane.b32.xlu0 %v1704_v0, 256  ;;  %v1266_v17 = vrot.slane %v1265_v39, 2 }
 0x79e   : > { %v1267_v49 = vadd.f32 %v1266_v17, %v1265_v39 }
 0x7a0   : > { %1737 = vbcast.lane.b32.xlu1 %v1735_v35, 256  ;;  %1723 = vbcast.lane.b32.xlu0 %v1721_v58, 256 }
 0x806   : > { %v1700_v29 = vpop.permute.xlu1 %1699  ;;  %v1731_v42 = vpop.permute.xlu0 %1730 }
 0x807   : > { %v1741_v22 = vmul.f32 %v1700_v29, %v7551_v52  ;;  %v1751_v8 = vmul.f32 %v1700_v29, %v7674_v56  ;;  %v1739_v31 = vmul.f32 %v1731_v42, %v7696_v16  ;;  %v1749_v36 = vmul.f32 %v1731_v42, %v7683_v4 }
 0x808   : > { %v1268_v4 = vrot.slane %v1267_v49, 1 }
 0x809   : > { %v1753_v38 = vadd.f32 %v1751_v8, %v1749_v36  ;;  %v1759_v14 = vrot.slane %v1739_v31, 4  ;;  %v1743_v35 = vadd.f32 %v1741_v22, %v1739_v31  ;;  %v9228_v36 = vld [vmem:[#allocation80_spill] sm:$0xff] }
 0x80a   : > { %v1717_v0 = vpop.permute.xlu1 %1716 }
 0x80b   : > { %v1745_v58 = vmul.f32 %v1717_v0, %v7554_v43  ;;  %v1755_v62 = vmul.f32 %v1717_v0, %v9225_v27  ;;  %v1760_v7 = vadd.f32 %v1759_v14, %v1739_v31  ;;  %v1269_v27 = vadd.f32 %v1268_v4, %v1267_v49 }
 0x80d   : > { %v1747_v47 = vadd.f32 %v1745_v58, %v1743_v35  ;;  %v1757_v60 = vadd.f32 %v1755_v62, %v1753_v38  ;;  %v1761_v29 = vrot.slane %v1760_v7, 2  ;;  %v9229_v38 = vld [vmem:[#allocation23_spill] sm:$0xff]  ;;  %v9230_v35 = vld [vmem:[#allocation81_spill] sm:$0xff]  ;;  %v9231_v62 = vld [vmem:[#allocation24_spill] sm:$0xff] }
 0x80f   : > { %v1789_v16 = vmul.f32 %v1783_v53, %v1747_v47  ;;  %v7760_v5 = vmul.f32 %v1783_v53, %v1757_v60  ;;  %v1762_v8 = vadd.f32 %v1761_v29, %v1760_v7  ;;  %v1270_v47 = vrot.slane %v7573_v19, 4  ;;  %v9226_v60 = vld [vmem:[#allocation79_spill] sm:$0xff]  ;;  %v9227_v53 = vld [vmem:[#allocation22_spill] sm:$0xff] }
 0x811   : > { %v7762_v42 = vadd.f32 %v1811_v44, %v1789_v16  ;;  %v1763_v22 = vrot.slane %v1762_v8, 1  ;;  %v1271_v44 = vadd.f32 %v1270_v47, %v7573_v19 }
 0x813   : > { %v7765_v43 = vrot.slane %v7762_v42, 1  ;;  %v1764_v39 = vadd.f32 %v1763_v22, %v1762_v8  ;;  %v1272_v14 = vrot.slane %v1271_v44, 2 }
 0x815   : > { %1909 = vmatprep.mubr.f32.mxu1 %v7765_v43  ;;  %1986 = vmatprep.mubr.f32.mxu0 %v7765_v43  ;;  %v7770_v17 = vsel %vm4196_vm2, %v1269_v27, %v1764_v39  ;;  %v9232_v39 = vrot.slane %v7592_v2, 1 }
 0x816   : > { %1910 = vmatmul.mubr.f32.vlgmr.msra.gmra.mrb[12].mxu1 %v7762_v42  ;;  %1987 = vmatmul.mubr.f32.vlgmr.msra.gmra.mrb[16].mxu0 %v7762_v42 }
 0x817   : > { %5547 = vmatpush3.bf16.msra.mxu1 %v9162_v34  ;;  %5579 = vmatpush1.bf16.msra.mxu0 %v9163_v45  ;;  %v1787_v52 = vpop.permute.xlu0 %1786 }
 0x818   : > { %5549 = vmatprep.subr.bf16.mxu1 %v9164_v57  ;;  %5581 = vmatprep.subr.bf16.mxu0 %v9165_v61 }
 0x81b   : > { %5551 = vmatpush3.bf16.msra.mxu1 %v9226_v60  ;;  %v1809_v7 = vpop.permute.xlu1 %1808  ;;  %5583 = vmatpush1.bf16.msra.mxu0 %v9227_v53  ;;  %v1707_v31 = vpop.permute.xlu0 %1706 }
 0x81c   : > { %5553 = vmatprep.subr.bf16.mxu1 %v9228_v36  ;;  %5585 = vmatprep.subr.bf16.mxu0 %v9229_v38  ;;  %v1742_v0 = vmul.f32 %v1707_v31, %v7590_v30  ;;  %v1752_v19 = vmul.f32 %v1707_v31, %v7592_v2 }
 0x81f   : > { %5555 = vmatpush3.bf16.msra.mxu1 %v9230_v35  ;;  %v1738_v58 = vpop.permute.xlu1 %1737  ;;  %5587 = vmatpush1.bf16.msra.mxu0 %v9231_v62  ;;  %v1724_v16 = vpop.permute.xlu0 %1723  ;;  %v1273_v62 = vadd.f32 %v1272_v14, %v1271_v44 }
 0x820   : > { %v1740_v49 = vmul.f32 %v1738_v58, %v7700_v15  ;;  %v1750_v29 = vmul.f32 %v1738_v58, %v7693_v11  ;;  %5557 = vmatprep.subr.bf16.mxu1 %v9169_v24  ;;  %5589 = vmatprep.subr.bf16.mxu0 %v7057_v59  ;;  %v1746_v4 = vmul.f32 %v1724_v16, %v7597_v21 }
 0x821   : > { %v1756_v47 = vmul.f32 %v1724_v16, %v9232_v39  ;;  %v1812_v21 = vmul.f32 %v1809_v7, %v7590_v30  ;;  %v1820_v58 = vmul.f32 %v1809_v7, %v7592_v2  ;;  %v1274_v44 = vrot.slane %v1273_v62, 1  ;;  %v9237_v39 = vld [vmem:[#allocation29_spill] sm:$0xff] }
 0x822   : > { %v1754_v8 = vadd.f32 %v1752_v19, %v1750_v29  ;;  %v1765_v22 = vrot.slane %v1740_v49, 4  ;;  %v1744_v27 = vadd.f32 %v1742_v0, %v1740_v49 }
 0x823   : > { %5559 = vmatpush3.bf16.msra.mxu1 %v7309_v37  ;;  %5591 = vmatpush1.bf16.msra.mxu0 %v9171_v12 }
 0x824   : > { %v1766_v15 = vadd.f32 %v1765_v22, %v1740_v49  ;;  %v1748_v11 = vadd.f32 %v1746_v4, %v1744_v27  ;;  %v1758_v31 = vadd.f32 %v1756_v47, %v1754_v8  ;;  %5561 = vmatprep.subr.bf16.mxu1 %v9172_v1  ;;  %5593 = vmatprep.subr.bf16.mxu0 %v7063_v9  ;;  %v9234_v8 = vld [vmem:[#allocation32_spill] sm:$0xff]  ;;  %v9235_v22 = vld [vmem:[#allocation34_spill] sm:$0xff] }
 0x825   : > { %v9236_v27 = vld [vmem:[#allocation28_spill] sm:$0xff] }
 0x826   : > { %v1767_v0 = vrot.slane %v1766_v15, 2  ;;  %v1790_v19 = vmul.f32 %v1787_v52, %v1748_v11  ;;  %v1818_v29 = vmul.f32 %v1787_v52, %v1758_v31  ;;  %v1275_v52 = vadd.f32 %v1274_v44, %v1273_v62  ;;  %v9233_v62 = vld [vmem:[#allocation27_spill] sm:$0xff]  ;;  %v9238_v47 = vld [vmem:[#allocation36_spill] sm:$0xff]  ;;  %v9240_v11 = vld [vmem:[#allocation30_spill] sm:$0xff] }
 0x827   : > { %5563 = vmatpush3.bf16.msra.mxu1 %v7317_v46  ;;  %5595 = vmatpush1.bf16.msra.mxu0 %v7066_v18  ;;  %v9241_v31 = vld [vmem:[#allocation31_spill] sm:$0xff]  ;;  %v9247_v44 = vld [vmem:[#allocation46_spill] sm:$0xff] }
 0x828   : > { %v1768_v14 = vadd.f32 %v1767_v0, %v1766_v15  ;;  %v7803_v49 = vadd.f32 %v1812_v21, %v1790_v19  ;;  %v7805_v16 = vadd.f32 %v1820_v58, %v1818_v29  ;;  %5565 = vmatprep.subr.bf16.mxu1 %v9173_v54  ;;  %5597 = vmatprep.subr.bf16.mxu0 %v7069_v20  ;;  %v9239_v15 = vld [vmem:[#allocation38_spill] sm:$0xff]  ;;  %v9242_v21 = vld [vmem:[#allocation40_spill] sm:$0xff]  ;;  %v9244_v0 = vld [vmem:[#allocation33_spill] sm:$0xff] }
 0x829   : > { %v9243_v58 = vld [vmem:[#allocation42_spill] sm:$0xff]  ;;  %v9245_v19 = vld [vmem:[#allocation35_spill] sm:$0xff]  ;;  %v9246_v29 = vld [vmem:[#allocation44_spill] sm:$0xff] }
 0x82a   : > { %v1769_v30 = vrot.slane %v1768_v14, 1  ;;  %v7810_v2 = vrot.slane %v7803_v49, 1 }
 0x82b   : > { %5567 = vmatpush3.bf16.msra.mxu1 %v7325_v55  ;;  %5599 = vmatpush1.bf16.msra.mxu0 %v7075_v32 }
 0x82c   : > { %v1770_v7 = vadd.f32 %v1769_v30, %v1768_v14  ;;  %1915 = vmatprep.mubr.f32.mxu1 %v7810_v2  ;;  %1992 = vmatprep.mubr.f32.mxu0 %v7810_v2  ;;  %v9248_v14 = vld [vmem:[#allocation37_spill] sm:$0xff]  ;;  %v9249_v30 = vld [vmem:[#allocation39_spill] sm:$0xff] }
 0x82d   : > { %1916 = vmatmul.mubr.f32.gmra.mrb[14].mxu1 %v7803_v49  ;;  %1993 = vmatmul.mubr.f32.gmra.mrb[18].mxu0 %v7803_v49 }
 0x82e   : > { %v7819_v4 = vsel %vm4196_vm2, %v1275_v52, %v1770_v7  ;;  %5569 = vmatprep.subr.bf16.mxu1 %v7328_v28  ;;  %2063 = vmatprep.mubr.f32.mxu1 %v7765_v43  ;;  %v9250_v52 = vld [vmem:[#allocation48_spill] sm:$0xff]  ;;  %v9251_v7 = vld [vmem:[#allocation50_spill] sm:$0xff] }
 0x82f   : > { %5571 = vmatpush3.bf16.msra.mxu1 %v7333_v6  ;;  %5601 = vmatprep.subr.bf16.mxu0 %v7083_v40 }
 0x830   : > { %5573 = vmatprep.subr.bf16.mxu1 %v7336_v25  ;;  %5603 = vmatpush1.bf16.msra.mxu0 %v7087_v48 }
 0x831   : > { %5605 = vmatprep.subr.bf16.mxu0 %v7093_v51 }
 0x833   : > { %5575 = vmatpush3.bf16.msra.mxu1 %v7341_v41 }
 0x834   : > { %5641 = vmatprep.subr.bf16.mxu1 %v7071_v23  ;;  %5607 = vmatpush1.bf16.msra.mxu0 %v7100_v63 }
 0x835   : > { %5609 = vmatprep.subr.bf16.mxu0 %v7106_v3 }
 0x836   : > { %2064 = vmatmul.mubr.f32.vlgmr.msra.gmra.mrb[16].mxu1 %v7762_v42 }
 0x837   : > { %2068 = vmatprep.mubr.f32.mxu1 %v7810_v2  ;;  %5643 = vmatpush1.bf16.msra.mxu1 %v7077_v33 }
 0x838   : > { %5645 = vmatprep.subr.bf16.mxu1 %v9233_v62  ;;  %5611 = vmatpush1.bf16.msra.mxu0 %v9234_v8 }
 0x839   : > { %5613 = vmatprep.subr.bf16.mxu0 %v9235_v22 }
 0x83a   : > { %2069 = vmatmul.mubr.f32.gmra.mrb[18].mxu1 %v7803_v49 }
 0x83b   : > { %5647 = vmatpush1.bf16.msra.mxu1 %v9236_v27 }
 0x83c   : > { %5649 = vmatprep.subr.bf16.mxu1 %v9237_v39  ;;  %5615 = vmatpush1.bf16.msra.mxu0 %v9238_v47  ;;  %v9282_v39 = vld [vmem:[#allocation88_spill] sm:$0xff] }
 0x83d   : > { %5617 = vmatprep.subr.bf16.mxu0 %v9239_v15  ;;  %v9281_v15 = vld [vmem:[#allocation87_spill] sm:$0xff] }
 0x83f   : > { %5651 = vmatpush1.bf16.msra.mxu1 %v9240_v11  ;;  %v9280_v11 = vld [vmem:[#allocation86_spill] sm:$0xff] }
 0x840   : > { %5653 = vmatprep.subr.bf16.mxu1 %v9241_v31  ;;  %5619 = vmatpush1.bf16.msra.mxu0 %v9242_v21  ;;  %v9252_v31 = vld [vmem:[#allocation41_spill] sm:$0xff]  ;;  %v9253_v21 = vld [vmem:[#allocation43_spill] sm:$0xff] }
 0x841   : > { %5621 = vmatprep.subr.bf16.mxu0 %v9243_v58  ;;  %v9254_v58 = vld [vmem:[#allocation52_spill] sm:$0xff] }
 0x843   : > { %5655 = vmatpush1.bf16.msra.mxu1 %v9244_v0  ;;  %v9255_v0 = vld [vmem:[#allocation54_spill] sm:$0xff] }
 0x844   : > { %5657 = vmatprep.subr.bf16.mxu1 %v9245_v19  ;;  %5623 = vmatpush1.bf16.msra.mxu0 %v9246_v29  ;;  %v9256_v19 = vld [vmem:[#allocation45_spill] sm:$0xff]  ;;  %v9257_v29 = vld [vmem:[#allocation47_spill] sm:$0xff] }
 0x845   : > { %5625 = vmatprep.subr.bf16.mxu0 %v9247_v44  ;;  %v9258_v44 = vld [vmem:[#allocation56_spill] sm:$0xff] }
 0x847   : > { %5659 = vmatpush1.bf16.msra.mxu1 %v9248_v14  ;;  %v9259_v14 = vld [vmem:[#allocation68_spill] sm:$0xff] }
 0x848   : > { %5661 = vmatprep.subr.bf16.mxu1 %v9249_v30  ;;  %5627 = vmatpush1.bf16.msra.mxu0 %v9250_v52  ;;  %v9260_v30 = vld [vmem:[#allocation49_spill] sm:$0xff]  ;;  %v9261_v52 = vld [vmem:[#allocation51_spill] sm:$0xff] }
 0x849   : > { %5629 = vmatprep.subr.bf16.mxu0 %v9251_v7  ;;  %v9262_v7 = vld [vmem:[#allocation69_spill] sm:$0xff] }
 0x84b   : > { %5663 = vmatpush1.bf16.msra.mxu1 %v9252_v31  ;;  %v9263_v31 = vld [vmem:[#allocation72_spill] sm:$0xff] }
 0x84c   : > { %5665 = vmatprep.subr.bf16.mxu1 %v9253_v21  ;;  %5631 = vmatpush1.bf16.msra.mxu0 %v9254_v58  ;;  %v9264_v21 = vld [vmem:[#allocation53_spill] sm:$0xff]  ;;  %v9265_v58 = vld [vmem:[#allocation55_spill] sm:$0xff] }
 0x84d   : > { %5633 = vmatprep.subr.bf16.mxu0 %v9255_v0  ;;  %v9266_v0 = vld [vmem:[#allocation57_spill] sm:$0xff] }
 0x84f   : > { %5667 = vmatpush1.bf16.msra.mxu1 %v9256_v19  ;;  %v9267_v19 = vld [vmem:[#allocation58_spill] sm:$0xff] }
 0x850   : > { %5669 = vmatprep.subr.bf16.mxu1 %v9257_v29  ;;  %5635 = vmatpush1.bf16.msra.mxu0 %v9258_v44  ;;  %v9268_v29 = vld [vmem:[#allocation59_spill] sm:$0xff]  ;;  %v9269_v44 = vld [vmem:[#allocation60_spill] sm:$0xff] }
 0x851   : > { %5637 = vmatprep.subr.bf16.mxu0 %v9259_v14  ;;  %v9270_v14 = vld [vmem:[#allocation61_spill] sm:$0xff] }
 0x853   : > { %5671 = vmatpush1.bf16.msra.mxu1 %v9260_v30  ;;  %v9271_v30 = vld [vmem:[#allocation62_spill] sm:$0xff] }
 0x854   : > { %5673 = vmatprep.subr.bf16.mxu1 %v9261_v52  ;;  %5639 = vmatpush1.bf16.msra.mxu0 %v9262_v7  ;;  %v9272_v52 = vld [vmem:[#allocation63_spill] sm:$0xff]  ;;  %v9273_v7 = vld [vmem:[#allocation64_spill] sm:$0xff] }
 0x855   : > { %5705 = vmatprep.subr.bf16.mxu0 %v9263_v31  ;;  %v9274_v31 = vld [vmem:[#allocation65_spill] sm:$0xff] }
 0x857   : > { %5675 = vmatpush1.bf16.msra.mxu1 %v9264_v21  ;;  %v9275_v21 = vld [vmem:[#allocation66_spill] sm:$0xff] }
 0x858   : > { %5677 = vmatprep.subr.bf16.mxu1 %v9265_v58  ;;  %v9276_v58 = vld [vmem:[#allocation67_spill] sm:$0xff] }
 0x85b   : > { %5679 = vmatpush1.bf16.msra.mxu1 %v9266_v0  ;;  %v9277_v0 = vld [vmem:[#allocation70_spill] sm:$0xff] }
 0x85c   : > { %5681 = vmatprep.subr.bf16.mxu1 %v9267_v19  ;;  %v9278_v19 = vld [vmem:[#allocation71_spill] sm:$0xff] }
 0x85f   : > { %5683 = vmatpush1.bf16.msra.mxu1 %v9268_v29  ;;  %v9279_v29 = vld [vmem:[#allocation19_spill] sm:$0xff] }
 0x860   : > { %5685 = vmatprep.subr.bf16.mxu1 %v9269_v44 }
 0x863   : > { %5687 = vmatpush1.bf16.msra.mxu1 %v9270_v14 }
 0x864   : > { %5689 = vmatprep.subr.bf16.mxu1 %v9271_v30 }
 0x867   : > { %5691 = vmatpush1.bf16.msra.mxu1 %v9272_v52 }
 0x868   : > { %5693 = vmatprep.subr.bf16.mxu1 %v9273_v7 }
 0x86b   : > { %5695 = vmatpush1.bf16.msra.mxu1 %v9274_v31 }
 0x86c   : > { %5697 = vmatprep.subr.bf16.mxu1 %v9275_v21 }
 0x86f   : > { %5699 = vmatpush1.bf16.msra.mxu1 %v9276_v58 }
 0x870   : > { %5701 = vmatprep.subr.bf16.mxu1 %v9277_v0 }
 0x873   : > { %5703 = vmatpush1.bf16.msra.mxu1 %v9278_v19 }
 0x874   : > { %5737 = vmatprep.subr.bf16.mxu1 %v9279_v29 }
 0x8e9   : > { %v1911_v44 = vpop.f32.mrb[12].mxu1  ;;  %v1988_v14 = vpop.f32.mrb[16].mxu0 }
 0x8ea   : > { %v2074_v30 = vadd.f32 %v1911_v44, %v9280_v11  ;;  %v2076_v52 = vadd.f32 %v1988_v14, %v9281_v15  ;;  %v1913_v47 = vpop.f32.mrb[13].mxu1  ;;  %v1990_v7 = vpop.f32.mrb[17].mxu0 }
 0x8eb   : > { %v2075_v31 = vadd.f32 %v1913_v47, %v9282_v39  ;;  %v2077_v19 = vadd.f32 %v1990_v7, %v9217_v26  ;;  %v1819_v47 = vmul.f32 %v7748_v13, %v7674_v56 }
 0x8ec   : > { %v4718_v27 = vmul.f32 -1.442695, %v2074_v30  ;;  %v4716_v21 = vmul.f32 -1.442695, %v2076_v52 }
 0x8ed   : > { %v4714_v22 = vmul.f32 -1.442695, %v2075_v31 }
 0x8ee   : > { %6386 = vpow2.f32 %v4718_v27  ;;  %v7890_v27 = vadd.f32 %v1819_v47, %v7760_v5 }
 0x8ef   : > { %6388 = vpow2.f32 %v4716_v21 }
 0x8f0   : > { %6390 = vpow2.f32 %v4714_v22  ;;  %v8996_v56 = vrot.slane %v7890_v27, 1 }
 0x8f1   : > { %6392 = vtanh.f32 %v2077_v19 }
 0x8f8   : > { %v6387_v0 = vpop.eup %6386 }
 0x8f9   : > { %v6389_v29 = vpop.eup %6388  ;;  %v2122_v58 = vadd.f32 1.0, %v6387_v0 }
 0x8fa   : > { %v6391_v8 = vpop.eup %6390  ;;  %v2104_v62 = vadd.f32 1.0, %v6389_v29 }
 0x8fb   : > { %6394 = vrcp.f32 %v2122_v58  ;;  %v2090_v44 = vadd.f32 1.0, %v6391_v8 }
 0x8fc   : > { %6396 = vrcp.f32 %v2104_v62  ;;  %v6393_v62 = vpop.eup %6392 }
 0x8fd   : > { %6398 = vrcp.f32 %v2090_v44 }
 0x900   : > { %v1917_v14 = vpop.f32.mrb[14].mxu1  ;;  %v1994_v31 = vpop.f32.mrb[18].mxu0 }
 0x901   : > { %v2079_v22 = vadd.f32 %v1917_v14, %v9280_v11  ;;  %v2081_v21 = vadd.f32 %v1994_v31, %v9281_v15  ;;  %v1919_v0 = vpop.f32.mrb[15].mxu1  ;;  %v1996_v30 = vpop.f32.mrb[19].mxu0 }
 0x902   : > { %v2080_v19 = vadd.f32 %v1919_v0, %v9282_v39 }
 0x903   : > { %v4719_v58 = vmul.f32 -1.442695, %v2079_v22  ;;  %v4717_v8 = vmul.f32 -1.442695, %v2081_v21 }
 0x904   : > { %v4715_v29 = vmul.f32 -1.442695, %v2080_v19  ;;  %v2082_v19 = vadd.f32 %v1996_v30, %v9217_v26 }
 0x905   : > { %v6395_v52 = vpop.eup %6394  ;;  %6400 = vpow2.f32 %v4719_v58 }
 0x906   : > { %v6397_v13 = vpop.eup %6396  ;;  %v2128_v7 = vmul.f32 %v6395_v52, %v6393_v62  ;;  %6402 = vpow2.f32 %v4717_v8 }
 0x907   : > { %v6399_v5 = vpop.eup %6398  ;;  %v2110_v44 = vmul.f32 %v6397_v13, %v8996_v56  ;;  %6404 = vpow2.f32 %v4715_v29 }
 0x908   : > { %v2096_v47 = vmul.f32 %v6399_v5, %v7890_v27  ;;  %6406 = vtanh.f32 %v2082_v19 }
 0x909   : > { %v4906_v14 = vpop.f32.mrb[16].mxu1 }
 0x90a   : > { %v2112_v31 = vadd.f32 %v2110_v44, %v2096_v47  ;;  %v4907_v22 = vpop.f32.mrb[17].mxu1 }
 0x90b   : > { %v4908_v21 = vadd.f32 %v4907_v22, %v4906_v14  ;;  %v8995_v22 = vrot.slane %v7805_v16, 1 }
 0x90c   : > { %v7899_v0 = vadd.f32 %v2128_v7, %v2112_v31 }
 0x90d   : > { %v2078_v58 = vadd.f32 %v4908_v21, %v7462_v10  ;;  %v4909_v39 = vpop.f32.mrb[18].mxu1 }
 0x90e   : > { %v4910_v62 = vpop.f32.mrb[19].mxu1 }
 0x90f   : > { %v6401_v8 = vpop.eup %6400  ;;  %v4720_v52 = vmul.f32 -1.442695, %v2078_v58  ;;  %v4911_v15 = vadd.f32 %v4910_v62, %v4909_v39 }
 0x910   : > { %v6403_v11 = vpop.eup %6402  ;;  %v2123_v13 = vadd.f32 1.0, %v6401_v8 }
 0x911   : > { %v6405_v29 = vpop.eup %6404  ;;  %v2105_v5 = vadd.f32 1.0, %v6403_v11  ;;  %6408 = vpow2.f32 %v4720_v52  ;;  %v2083_v44 = vadd.f32 %v4911_v15, %v7462_v10  ;;  %v9291_v10 = vld [vmem:[#allocation77_spill] sm:$0xff] }
 0x912   : > { %6410 = vrcp.f32 %v2123_v13  ;;  %v2091_v7 = vadd.f32 1.0, %v6405_v29  ;;  %v6407_v30 = vpop.eup %6406 }
 0x913   : > { %6412 = vrcp.f32 %v2105_v5  ;;  %v4721_v47 = vmul.f32 -1.442695, %v2083_v44 }
 0x914   : > { %6414 = vrcp.f32 %v2091_v7  ;;  %v7917_v7 = vld [vmem:[%s8821_s5] ss:$0 sm:$0xff] }
 0x915   : > { %6416 = vpow2.f32 %v4721_v47  ;;  %9283 = vst [vmem:[#allocation78_spill] sm:$0xff] %v7917_v7 }
 0x916   : > { %6418 = vtanh.f32 %v7899_v0 }
 0x91b   : > { %v6409_v14 = vpop.eup %6408 }
 0x91c   : > { %v6411_v31 = vpop.eup %6410  ;;  %v2138_v39 = vadd.f32 1.0, %v6409_v14 }
 0x91d   : > { %v6413_v21 = vpop.eup %6412  ;;  %v2129_v58 = vmul.f32 %v6411_v31, %v6407_v30 }
 0x91e   : > { %v6415_v11 = vpop.eup %6414  ;;  %v2111_v15 = vmul.f32 %v6413_v21, %v8995_v22  ;;  %6420 = vrcp.f32 %v2138_v39 }
 0x91f   : > { %v6417_v19 = vpop.eup %6416  ;;  %v2097_v62 = vmul.f32 %v6415_v11, %v7805_v16 }
 0x920   : > { %v2139_v8 = vadd.f32 1.0, %v6417_v19  ;;  %v6419_v29 = vpop.eup %6418 }
 0x921   : > { %v2113_v52 = vadd.f32 %v2111_v15, %v2097_v62  ;;  %v9284_v15 = vld [vmem:[#allocation91_spill] sm:$0xff] }
 0x922   : > { %6422 = vrcp.f32 %v2139_v8  ;;  %v9285_v8 = vld [vmem:[#allocation92_spill] sm:$0xff] }
 0x923   : > { %v7909_v13 = vadd.f32 %v2129_v58, %v2113_v52  ;;  %v2160_v58 = vadd.f32 3.0, %v7495_v50 }
 0x925   : > { %6424 = vtanh.f32 %v7909_v13  ;;  %vm2161_vm3 = vcmp.lt.f32.partialorder %v2160_v58, %v9285_v8 }
 0x928   : > { %v6421_v5 = vpop.eup %6420 }
 0x929   : > { %v7912_v44 = vmul.f32 %v6421_v5, %v6419_v29 }
 0x92b   : > { %v2154_v47 = vmul.f32 %v7917_v7, %v7912_v44 }
 0x92c   : > { %v6423_v30 = vpop.eup %6422 }
 0x92d   : > { %2156 = vadd.xlane.f32.xlu1 %v2154_v47  ;;  %v7932_v47 = vld [vmem:[%s7405_s24] sm:$0x1] }
 0x92e   : > { %9286 = vst [vmem:[#allocation21_spill] sm:$0xff] %v7932_v47  ;;  %vm4722_vm4 = vcmp.gt.f32.partialorder %v7932_v47, 3.0 }
 0x92f   : > { %v6425_v14 = vpop.eup %6424 }
 0x930   : > { %v7921_v31 = vmul.f32 %v6425_v14, %v6423_v30  ;;  %v9287_v30 = vmov 0.0  }
 0x931   : > { %v4724_v14 = vsel %vm4722_vm4, 1.0, %v9287_v30  ;;  %vm4202_vm4 = vcmask 1042432  }
 0x932   : > { %v2155_v39 = vmul.f32 %v7917_v7, %v7921_v31 }
 0x934   : > { %2158 = vadd.xlane.f32.xlu0 %v2155_v39  ;;  %v9288_v39 = vld [vmem:[#allocation74_spill] sm:$0xff] }
 0x935   : > { %v2271_v22 = vrot.slane %v4724_v14, %v9288_v39 }
 0x9ba   : > { %v2157_v21 = vpop.xlane.xlu1 %2156 }
 0x9bb   : > { %v2167_v19 = vrot.slane %v2157_v21, %v9284_v15 }
 0x9c1   : > { %v2159_v11 = vpop.xlane.xlu0 %2158 }
 0x9c2   : > { %v2171_v62 = vrot.slane %v2159_v11, %v9284_v15 }
 0x9c4   : > { %v2172_v52 = vsel %vm1180_vm0, %v2171_v62, %v2167_v19  ;;  %v2286_v19 = vsub.f32 1.0, %v4724_v14 }
 0x9c5   : > { %v2174_v29 = vsel %vm2161_vm3, %v2172_v52, -1e+30 }
 0x9c6   : > { %v2175_v5 = vsel %vm1184_vm1, %v2174_v29, -inf  ;;  %v2293_v62 = vrot.slane %v2286_v19, %v9288_v39 }
 0x9c7   : > { %2176 = vmax.xlane.f32.xlu0 %v2175_v5  ;;  %v7941_v5 = vld [vmem:[%s7405_s24 + $0x1] sm:$0x1] }
 0x9c8   : > { %9289 = vst [vmem:[#allocation82_spill] sm:$0xff] %v7941_v5  ;;  %vm4723_vm6 = vcmp.gt.f32.partialorder %v7941_v5, 3.0 }
 0x9c9   : > { %v4725_v19 = vsel %vm4723_vm6, 1.0, %v9287_v30 }
 0x9ca   : > { %v2287_v47 = vsub.f32 1.0, %v4725_v19 }
 0x9dd   : > { %2277 = vperm.xlu0 %6300, %v2271_v22  }
 0xa54   : > { %v2177_v21 = vpop.xlane.xlu0 %2176 }
 0xa55   : > { %vm2178_vm5 = vcmp.ge.f32.partialorder %v2174_v29, %v2177_v21 }
 0xa56   : > { %v2179_v58 = vsel %vm2178_vm5, %v7495_v50, 8.0 }
 0xa57   : > { %v2180_v11 = vsel %vm1184_vm1, %v2179_v58, inf  ;;  %v9290_v58 = vld [vmem:[#allocation76_spill] sm:$0xff] }
 0xa58   : > { %2181 = vmin.xlane.f32.xlu1 %v2180_v11 }
 0xa69   : > { %2299 = vperm.xlu1 %6299, %v2293_v62  }
 0xae5   : > { %v2182_v52 = vpop.xlane.xlu1 %2181 }
 0xae6   : > { %vm2183_vm7 = vcmp.eq.f32.partialorder %v7495_v50, %v2182_v52  ;;  %vm2186_vm8 = vcmp.lt.f32.partialorder %v7495_v50, %v2182_v52  ;;  %vm2203_vm9 = vcmp.gt.f32.partialorder %v7495_v50, %v2182_v52  ;;  %v2275_v52 = vrot.slane %v4725_v19, %v9288_v39  ;;  %v9295_v19 = vld [vmem:[#allocation73_spill] sm:$0xff] }
 0xae7   : > { %v4727_v22 = vsel %vm2186_vm8, 1.0, %v9287_v30  ;;  %v4726_v29 = vsel %vm2183_vm7, 1.0, %v9287_v30  ;;  %v4728_v62 = vsel %vm2203_vm9, 1.0, %v9287_v30 }
 0xae8   : > { %v2192_v14 = vrot.slane %v4727_v22, %v9288_v39  ;;  %v2223_v21 = vrot.slane %v4726_v29, %v9288_v39  ;;  %v4277_v11 = vrot.slane %v4726_v29, %v9290_v58  ;;  %v2209_v50 = vrot.slane %v4728_v62, %v9288_v39 }
 0xaea   : > { %2194 = vbcast.lane.b32.xlu1 %v2192_v14, 256  ;;  %v4278_v56 = vcombine.high %v4277_v11, %v4277_v11  ;;  %v4285_v5 = vrot.slane %v4277_v11, %v9290_v58  ;;  %2225 = vbcast.lane.b32.xlu0 %v2223_v21, 256  ;;  %v2297_v14 = vrot.slane %v2287_v47, %v9288_v39  ;;  %v9293_v11 = vld [vmem:[#allocation20_spill] sm:$0xff] }
 0xaec   : > { %v4292_v8 = vrot.slane %v4278_v56, %v9290_v58  ;;  %v4375_v15 = vrot.slane %v4285_v5, %v9288_v39  ;;  %v2199_v56 = vrot.slane %v4727_v22, %v9295_v19  ;;  %v2230_v5 = vrot.slane %v4726_v29, %v9295_v19 }
 0xaee   : > { %v4379_v7 = vrot.slane %v4292_v8, %v9288_v39  ;;  %v7962_v30 = vsel %vm4199_vm10, %v9291_v10, %v4375_v15  ;;  %2211 = vbcast.lane.b32.xlu1 %v2209_v50, 256  ;;  %2281 = vperm.xlu0 %6300, %v2275_v52   ;;  %v2216_v8 = vrot.slane %v4728_v62, %v9295_v19  ;;  %v7972_v10 = vpop.permute.xlu1 %2299  ;;  %v2278_v50 = vpop.permute.xlu0 %2277 }
 0xaef   : > { %9292 = vst [vmem:[#allocation25_spill] sm:$0xff] %v7962_v30 }
 0xaf0   : > { %v7967_v21 = vsel %vm4199_vm10, %v9293_v11, %v4379_v7 }
 0xaf1   : > { %9294 = vst [vmem:[#allocation83_spill] sm:$0xff] %v7967_v21 }
 0xaf2   : > { %2303 = vperm.xlu1 %6299, %v2297_v14   ;;  %2201 = vbcast.lane.b32.xlu0 %v2199_v56, 256 }
 0xaf6   : > { %2232 = vbcast.lane.b32.xlu1 %v2230_v5, 256  ;;  %2218 = vbcast.lane.b32.xlu0 %v2216_v8, 256  ;;  %v9296_v5 = vrot.slane %v7890_v27, 1 }
 0xb5c   : > { %v2195_v15 = vpop.permute.xlu1 %2194  ;;  %v2226_v7 = vpop.permute.xlu0 %2225 }
 0xb5d   : > { %v2236_v47 = vmul.f32 %v2195_v15, %v7762_v42  ;;  %v2246_v52 = vmul.f32 %v2195_v15, %v7890_v27  ;;  %v2234_v11 = vmul.f32 %v2226_v7, %v7912_v44  ;;  %v2244_v22 = vmul.f32 %v2226_v7, %v7899_v0 }
 0xb5e   : > { %v2306_v15 = vmul.f32 %v7972_v10, %v7762_v42 }
 0xb5f   : > { %v2248_v14 = vadd.f32 %v2246_v52, %v2244_v22  ;;  %v2254_v56 = vrot.slane %v2234_v11, 4  ;;  %v2238_v21 = vadd.f32 %v2236_v47, %v2234_v11 }
 0xb60   : > { %v2212_v29 = vpop.permute.xlu1 %2211 }
 0xb61   : > { %v2240_v62 = vmul.f32 %v2212_v29, %v7765_v43  ;;  %v2250_v8 = vmul.f32 %v2212_v29, %v9296_v5  ;;  %v2255_v19 = vadd.f32 %v2254_v56, %v2234_v11  ;;  %v9298_v5 = vrot.slane %v7805_v16, 1 }
 0xb63   : > { %v2242_v30 = vadd.f32 %v2240_v62, %v2238_v21  ;;  %v2252_v58 = vadd.f32 %v2250_v8, %v2248_v14  ;;  %v2256_v39 = vrot.slane %v2255_v19, 2 }
 0xb65   : > { %v2284_v26 = vmul.f32 %v2278_v50, %v2242_v30  ;;  %v7983_v44 = vmul.f32 %v2278_v50, %v2252_v58  ;;  %v2257_v0 = vadd.f32 %v2256_v39, %v2255_v19  ;;  %v9297_v58 = vld [vmem:[#allocation24_spill] sm:$0xff] }
 0xb67   : > { %v7985_v52 = vadd.f32 %v2306_v15, %v2284_v26  ;;  %v2258_v7 = vrot.slane %v2257_v0, 1 }
 0xb69   : > { %v7988_v47 = vrot.slane %v7985_v52, 1  ;;  %v2259_v43 = vadd.f32 %v2258_v7, %v2257_v0 }
 0xb6b   : > { %2404 = vmatprep.mubr.f32.mxu0 %v7988_v47  ;;  %2481 = vmatprep.mubr.f32.mxu1 %v7988_v47  ;;  %v7994_v21 = vsel %vm4199_vm10, %v7770_v17, %v2259_v43 }
 0xb6c   : > { %2405 = vmatmul.mubr.f32.vlgmr.msra.gmra.mrb[20].mxu0 %v7985_v52  ;;  %2482 = vmatmul.mubr.f32.vlgmr.msra.gmra.mrb[20].mxu1 %v7985_v52 }
 0xb6d   : > { %5707 = vmatpush3.bf16.msra.mxu0 %v9162_v34  ;;  %5739 = vmatpush1.bf16.msra.mxu1 %v9163_v45  ;;  %v2282_v26 = vpop.permute.xlu0 %2281 }
 0xb6e   : > { %5709 = vmatprep.subr.bf16.mxu0 %v9164_v57  ;;  %5741 = vmatprep.subr.bf16.mxu1 %v9165_v61 }
 0xb71   : > { %5711 = vmatpush3.bf16.msra.mxu0 %v9226_v60  ;;  %v2304_v42 = vpop.permute.xlu1 %2303  ;;  %5743 = vmatpush1.bf16.msra.mxu1 %v9227_v53  ;;  %v2202_v17 = vpop.permute.xlu0 %2201 }
 0xb72   : > { %5713 = vmatprep.subr.bf16.mxu0 %v9228_v36  ;;  %5745 = vmatprep.subr.bf16.mxu1 %v9229_v38  ;;  %v2237_v30 = vmul.f32 %v2202_v17, %v7803_v49  ;;  %v2247_v19 = vmul.f32 %v2202_v17, %v7805_v16  ;;  %v2307_v0 = vmul.f32 %v2304_v42, %v7803_v49 }
 0xb75   : > { %5715 = vmatpush3.bf16.msra.mxu0 %v9230_v35  ;;  %v2233_v39 = vpop.permute.xlu1 %2232  ;;  %5747 = vmatpush1.bf16.msra.mxu1 %v9297_v58  ;;  %v2219_v22 = vpop.permute.xlu0 %2218 }
 0xb76   : > { %v2235_v50 = vmul.f32 %v2233_v39, %v7921_v31  ;;  %v2245_v11 = vmul.f32 %v2233_v39, %v7909_v13  ;;  %5717 = vmatprep.subr.bf16.mxu0 %v9169_v24  ;;  %5749 = vmatprep.subr.bf16.mxu1 %v7057_v59  ;;  %v2241_v14 = vmul.f32 %v2219_v22, %v7810_v2 }
 0xb77   : > { %v2251_v8 = vmul.f32 %v2219_v22, %v9298_v5  ;;  %v2315_v2 = vmul.f32 %v2304_v42, %v7805_v16  ;;  %v9300_v42 = vld [vmem:[#allocation32_spill] sm:$0xff]  ;;  %v9307_v5 = vld [vmem:[#allocation31_spill] sm:$0xff] }
 0xb78   : > { %v2249_v56 = vadd.f32 %v2247_v19, %v2245_v11  ;;  %v2260_v29 = vrot.slane %v2235_v50, 4  ;;  %v2239_v62 = vadd.f32 %v2237_v30, %v2235_v50  ;;  %v9301_v11 = vld [vmem:[#allocation34_spill] sm:$0xff]  ;;  %v9302_v22 = vld [vmem:[#allocation28_spill] sm:$0xff] }
 0xb79   : > { %5719 = vmatpush3.bf16.msra.mxu0 %v7309_v37  ;;  %5751 = vmatpush1.bf16.msra.mxu1 %v9171_v12 }
 0xb7a   : > { %v2261_v31 = vadd.f32 %v2260_v29, %v2235_v50  ;;  %v2243_v15 = vadd.f32 %v2241_v14, %v2239_v62  ;;  %v2253_v13 = vadd.f32 %v2251_v8, %v2249_v56  ;;  %5721 = vmatprep.subr.bf16.mxu0 %v9172_v1  ;;  %5753 = vmatprep.subr.bf16.mxu1 %v7063_v9  ;;  %v9303_v14 = vld [vmem:[#allocation29_spill] sm:$0xff]  ;;  %v9304_v56 = vld [vmem:[#allocation36_spill] sm:$0xff]  ;;  %v9305_v29 = vld [vmem:[#allocation38_spill] sm:$0xff] }
 0xb7b   : > { %v9306_v62 = vld [vmem:[#allocation30_spill] sm:$0xff]  ;;  %v9308_v8 = vld [vmem:[#allocation40_spill] sm:$0xff] }
 0xb7c   : > { %v2262_v7 = vrot.slane %v2261_v31, 2  ;;  %v2285_v43 = vmul.f32 %v2282_v26, %v2243_v15  ;;  %v2313_v17 = vmul.f32 %v2282_v26, %v2253_v13  ;;  %v9310_v15 = vld [vmem:[#allocation33_spill] sm:$0xff]  ;;  %v9311_v13 = vld [vmem:[#allocation35_spill] sm:$0xff] }
 0xb7d   : > { %5723 = vmatpush3.bf16.msra.mxu0 %v7317_v46  ;;  %5755 = vmatpush1.bf16.msra.mxu1 %v7066_v18 }
 0xb7e   : > { %v2263_v30 = vadd.f32 %v2262_v7, %v2261_v31  ;;  %v8025_v39 = vadd.f32 %v2307_v0, %v2285_v43  ;;  %v8027_v19 = vadd.f32 %v2315_v2, %v2313_v17  ;;  %5725 = vmatprep.subr.bf16.mxu0 %v9173_v54  ;;  %5757 = vmatprep.subr.bf16.mxu1 %v7069_v20  ;;  %v9309_v31 = vld [vmem:[#allocation42_spill] sm:$0xff]  ;;  %v9312_v0 = vld [vmem:[#allocation44_spill] sm:$0xff]  ;;  %v9314_v7 = vld [vmem:[#allocation37_spill] sm:$0xff] }
 0xb7f   : > { %v9313_v2 = vld [vmem:[#allocation46_spill] sm:$0xff]  ;;  %v9315_v43 = vld [vmem:[#allocation39_spill] sm:$0xff]  ;;  %v9316_v17 = vld [vmem:[#allocation48_spill] sm:$0xff] }
 0xb80   : > { %v2264_v50 = vrot.slane %v2263_v30, 1  ;;  %v8032_v49 = vrot.slane %v8025_v39, 1 }
 0xb81   : > { %5727 = vmatpush3.bf16.msra.mxu0 %v7325_v55  ;;  %5759 = vmatpush1.bf16.msra.mxu1 %v7075_v32 }
 0xb82   : > { %v2265_v16 = vadd.f32 %v2264_v50, %v2263_v30  ;;  %2410 = vmatprep.mubr.f32.mxu0 %v8032_v49  ;;  %2487 = vmatprep.mubr.f32.mxu1 %v8032_v49  ;;  %v9317_v30 = vld [vmem:[#allocation50_spill] sm:$0xff]  ;;  %v9318_v50 = vld [vmem:[#allocation41_spill] sm:$0xff] }
 0xb83   : > { %2411 = vmatmul.mubr.f32.gmra.mrb[22].mxu0 %v8025_v39  ;;  %2488 = vmatmul.mubr.f32.gmra.mrb[22].mxu1 %v8025_v39 }
 0xb84   : > { %v8042_v26 = vsel %vm4199_vm10, %v7819_v4, %v2265_v16  ;;  %5729 = vmatprep.subr.bf16.mxu0 %v7328_v28  ;;  %2558 = vmatprep.mubr.f32.mxu0 %v7988_v47  ;;  %v9299_v4 = vld [vmem:[#allocation27_spill] sm:$0xff] }
 0xb85   : > { %5731 = vmatpush3.bf16.msra.mxu0 %v7333_v6  ;;  %5761 = vmatprep.subr.bf16.mxu1 %v7083_v40  ;;  %v9319_v16 = vld [vmem:[#allocation43_spill] sm:$0xff] }
 0xb86   : > { %5733 = vmatprep.subr.bf16.mxu0 %v7336_v25  ;;  %5763 = vmatpush1.bf16.msra.mxu1 %v7087_v48 }
 0xb87   : > { %5765 = vmatprep.subr.bf16.mxu1 %v7093_v51 }
 0xb89   : > { %5735 = vmatpush3.bf16.msra.mxu0 %v7341_v41 }
 0xb8a   : > { %5801 = vmatprep.subr.bf16.mxu0 %v7071_v23  ;;  %5767 = vmatpush1.bf16.msra.mxu1 %v7100_v63 }
 0xb8b   : > { %5769 = vmatprep.subr.bf16.mxu1 %v7106_v3 }
 0xb8c   : > { %2559 = vmatmul.mubr.f32.vlgmr.msra.gmra.mrb[24].mxu0 %v7985_v52 }
 0xb8d   : > { %2563 = vmatprep.mubr.f32.mxu0 %v8032_v49  ;;  %5803 = vmatpush1.bf16.msra.mxu0 %v7077_v33 }
 0xb8e   : > { %5805 = vmatprep.subr.bf16.mxu0 %v9299_v4  ;;  %5771 = vmatpush1.bf16.msra.mxu1 %v9300_v42 }
 0xb8f   : > { %5773 = vmatprep.subr.bf16.mxu1 %v9301_v11 }
 0xb90   : > { %2564 = vmatmul.mubr.f32.gmra.mrb[26].mxu0 %v8025_v39 }
 0xb91   : > { %5807 = vmatpush1.bf16.msra.mxu0 %v9302_v22 }
 0xb92   : > { %5809 = vmatprep.subr.bf16.mxu0 %v9303_v14  ;;  %5775 = vmatpush1.bf16.msra.mxu1 %v9304_v56 }
 0xb93   : > { %5777 = vmatprep.subr.bf16.mxu1 %v9305_v29  ;;  %v9348_v29 = vld [vmem:[#allocation88_spill] sm:$0xff] }
 0xb95   : > { %5811 = vmatpush1.bf16.msra.mxu0 %v9306_v62 }
 0xb96   : > { %5813 = vmatprep.subr.bf16.mxu0 %v9307_v5  ;;  %5779 = vmatpush1.bf16.msra.mxu1 %v9308_v8  ;;  %v9346_v8 = vld [vmem:[#allocation86_spill] sm:$0xff]  ;;  %v9347_v5 = vld [vmem:[#allocation87_spill] sm:$0xff] }
 0xb97   : > { %5781 = vmatprep.subr.bf16.mxu1 %v9309_v31  ;;  %v9320_v31 = vld [vmem:[#allocation52_spill] sm:$0xff] }
 0xb99   : > { %5815 = vmatpush1.bf16.msra.mxu0 %v9310_v15  ;;  %v9321_v15 = vld [vmem:[#allocation54_spill] sm:$0xff] }
 0xb9a   : > { %5817 = vmatprep.subr.bf16.mxu0 %v9311_v13  ;;  %5783 = vmatpush1.bf16.msra.mxu1 %v9312_v0  ;;  %v9322_v13 = vld [vmem:[#allocation45_spill] sm:$0xff]  ;;  %v9323_v0 = vld [vmem:[#allocation47_spill] sm:$0xff] }
 0xb9b   : > { %5785 = vmatprep.subr.bf16.mxu1 %v9313_v2  ;;  %v9324_v2 = vld [vmem:[#allocation56_spill] sm:$0xff] }
 0xb9d   : > { %5819 = vmatpush1.bf16.msra.mxu0 %v9314_v7  ;;  %v9325_v7 = vld [vmem:[#allocation68_spill] sm:$0xff] }
 0xb9e   : > { %5821 = vmatprep.subr.bf16.mxu0 %v9315_v43  ;;  %5787 = vmatpush1.bf16.msra.mxu1 %v9316_v17  ;;  %v9326_v43 = vld [vmem:[#allocation49_spill] sm:$0xff]  ;;  %v9327_v17 = vld [vmem:[#allocation51_spill] sm:$0xff] }
 0xb9f   : > { %5789 = vmatprep.subr.bf16.mxu1 %v9317_v30  ;;  %v9328_v30 = vld [vmem:[#allocation69_spill] sm:$0xff] }
 0xba1   : > { %5823 = vmatpush1.bf16.msra.mxu0 %v9318_v50  ;;  %v9329_v50 = vld [vmem:[#allocation72_spill] sm:$0xff] }
 0xba2   : > { %5825 = vmatprep.subr.bf16.mxu0 %v9319_v16  ;;  %5791 = vmatpush1.bf16.msra.mxu1 %v9320_v31  ;;  %v9330_v16 = vld [vmem:[#allocation53_spill] sm:$0xff]  ;;  %v9331_v31 = vld [vmem:[#allocation55_spill] sm:$0xff] }
 0xba3   : > { %5793 = vmatprep.subr.bf16.mxu1 %v9321_v15  ;;  %v9332_v15 = vld [vmem:[#allocation57_spill] sm:$0xff] }
 0xba5   : > { %5827 = vmatpush1.bf16.msra.mxu0 %v9322_v13  ;;  %v9333_v13 = vld [vmem:[#allocation58_spill] sm:$0xff] }
 0xba6   : > { %5829 = vmatprep.subr.bf16.mxu0 %v9323_v0  ;;  %5795 = vmatpush1.bf16.msra.mxu1 %v9324_v2  ;;  %v9334_v0 = vld [vmem:[#allocation59_spill] sm:$0xff]  ;;  %v9335_v2 = vld [vmem:[#allocation60_spill] sm:$0xff] }
 0xba7   : > { %5797 = vmatprep.subr.bf16.mxu1 %v9325_v7  ;;  %v9336_v7 = vld [vmem:[#allocation61_spill] sm:$0xff] }
 0xba9   : > { %5831 = vmatpush1.bf16.msra.mxu0 %v9326_v43  ;;  %v9337_v43 = vld [vmem:[#allocation62_spill] sm:$0xff] }
 0xbaa   : > { %5833 = vmatprep.subr.bf16.mxu0 %v9327_v17  ;;  %5799 = vmatpush1.bf16.msra.mxu1 %v9328_v30  ;;  %v9338_v17 = vld [vmem:[#allocation63_spill] sm:$0xff]  ;;  %v9339_v30 = vld [vmem:[#allocation64_spill] sm:$0xff] }
 0xbab   : > { %5865 = vmatprep.subr.bf16.mxu1 %v9329_v50  ;;  %v9340_v50 = vld [vmem:[#allocation65_spill] sm:$0xff] }
 0xbad   : > { %5835 = vmatpush1.bf16.msra.mxu0 %v9330_v16  ;;  %v9341_v16 = vld [vmem:[#allocation66_spill] sm:$0xff] }
 0xbae   : > { %5837 = vmatprep.subr.bf16.mxu0 %v9331_v31  ;;  %v9342_v31 = vld [vmem:[#allocation67_spill] sm:$0xff] }
 0xbb1   : > { %5839 = vmatpush1.bf16.msra.mxu0 %v9332_v15  ;;  %v9343_v15 = vld [vmem:[#allocation70_spill] sm:$0xff] }
 0xbb2   : > { %5841 = vmatprep.subr.bf16.mxu0 %v9333_v13  ;;  %v9344_v13 = vld [vmem:[#allocation71_spill] sm:$0xff] }
 0xbb5   : > { %5843 = vmatpush1.bf16.msra.mxu0 %v9334_v0  ;;  %v9345_v0 = vld [vmem:[#allocation19_spill] sm:$0xff] }
 0xbb6   : > { %5845 = vmatprep.subr.bf16.mxu0 %v9335_v2 }
 0xbb9   : > { %5847 = vmatpush1.bf16.msra.mxu0 %v9336_v7 }
 0xbba   : > { %5849 = vmatprep.subr.bf16.mxu0 %v9337_v43 }
 0xbbd   : > { %5851 = vmatpush1.bf16.msra.mxu0 %v9338_v17 }
 0xbbe   : > { %5853 = vmatprep.subr.bf16.mxu0 %v9339_v30 }
 0xbc1   : > { %5855 = vmatpush1.bf16.msra.mxu0 %v9340_v50 }
 0xbc2   : > { %5857 = vmatprep.subr.bf16.mxu0 %v9341_v16 }
 0xbc5   : > { %5859 = vmatpush1.bf16.msra.mxu0 %v9342_v31 }
 0xbc6   : > { %5861 = vmatprep.subr.bf16.mxu0 %v9343_v15  ;;  %v9349_v15 = vld [vmem:[#allocation89_spill] sm:$0xff] }
 0xbc9   : > { %5863 = vmatpush1.bf16.msra.mxu0 %v9344_v13 }
 0xbca   : > { %5897 = vmatprep.subr.bf16.mxu0 %v9345_v0 }
 0xc3f   : > { %v2406_v2 = vpop.f32.mrb[20].mxu0  ;;  %v2483_v7 = vpop.f32.mrb[20].mxu1 }
 0xc40   : > { %v2569_v43 = vadd.f32 %v2406_v2, %v9346_v8  ;;  %v2571_v17 = vadd.f32 %v2483_v7, %v9347_v5  ;;  %v2408_v62 = vpop.f32.mrb[21].mxu0  ;;  %v2485_v30 = vpop.f32.mrb[21].mxu1 }
 0xc41   : > { %v2570_v50 = vadd.f32 %v2408_v62, %v9348_v29  ;;  %v2572_v13 = vadd.f32 %v2485_v30, %v9349_v15  ;;  %v2314_v62 = vmul.f32 %v7972_v10, %v7890_v27 }
 0xc42   : > { %v4733_v56 = vmul.f32 -1.442695, %v2569_v43  ;;  %v4731_v16 = vmul.f32 -1.442695, %v2571_v17 }
 0xc43   : > { %v4729_v14 = vmul.f32 -1.442695, %v2570_v50 }
 0xc44   : > { %6426 = vpow2.f32 %v4733_v56  ;;  %v8113_v56 = vadd.f32 %v2314_v62, %v7983_v44 }
 0xc45   : > { %6428 = vpow2.f32 %v4731_v16 }
 0xc46   : > { %6430 = vpow2.f32 %v4729_v14  ;;  %v9015_v27 = vrot.slane %v8113_v56, 1 }
 0xc47   : > { %6432 = vtanh.f32 %v2572_v13 }
 0xc4e   : > { %v6427_v31 = vpop.eup %6426 }
 0xc4f   : > { %v6429_v0 = vpop.eup %6428  ;;  %v2617_v22 = vadd.f32 1.0, %v6427_v31 }
 0xc50   : > { %v6431_v11 = vpop.eup %6430  ;;  %v2599_v42 = vadd.f32 1.0, %v6429_v0 }
 0xc51   : > { %6434 = vrcp.f32 %v2617_v22  ;;  %v2585_v2 = vadd.f32 1.0, %v6431_v11 }
 0xc52   : > { %6436 = vrcp.f32 %v2599_v42  ;;  %v6433_v42 = vpop.eup %6432 }
 0xc53   : > { %6438 = vrcp.f32 %v2585_v2 }
 0xc56   : > { %v2412_v7 = vpop.f32.mrb[22].mxu0  ;;  %v2489_v43 = vpop.f32.mrb[22].mxu1 }
 0xc57   : > { %v2574_v14 = vadd.f32 %v2412_v7, %v9346_v8  ;;  %v2576_v17 = vadd.f32 %v2489_v43, %v9347_v5  ;;  %v2414_v31 = vpop.f32.mrb[23].mxu0  ;;  %v2491_v30 = vpop.f32.mrb[23].mxu1 }
 0xc58   : > { %v2575_v13 = vadd.f32 %v2414_v31, %v9348_v29  ;;  %v9350_v29 = vld [vmem:[#allocation75_spill] sm:$0xff] }
 0xc59   : > { %v4734_v22 = vmul.f32 -1.442695, %v2574_v14  ;;  %v4732_v11 = vmul.f32 -1.442695, %v2576_v17 }
 0xc5a   : > { %v4730_v0 = vmul.f32 -1.442695, %v2575_v13  ;;  %v2577_v13 = vadd.f32 %v2491_v30, %v9349_v15  ;;  %v9360_v15 = vld [vmem:[#allocation25_spill] sm:$0xff] }
 0xc5b   : > { %v6435_v50 = vpop.eup %6434  ;;  %6440 = vpow2.f32 %v4734_v22 }
 0xc5c   : > { %v6437_v10 = vpop.eup %6436  ;;  %v2623_v16 = vmul.f32 %v6435_v50, %v6433_v42  ;;  %6442 = vpow2.f32 %v4732_v11 }
 0xc5d   : > { %v6439_v44 = vpop.eup %6438  ;;  %v2605_v2 = vmul.f32 %v6437_v10, %v9015_v27  ;;  %6444 = vpow2.f32 %v4730_v0 }
 0xc5e   : > { %v2591_v62 = vmul.f32 %v6439_v44, %v8113_v56  ;;  %6446 = vtanh.f32 %v2577_v13 }
 0xc5f   : > { %v4944_v7 = vpop.f32.mrb[24].mxu0 }
 0xc60   : > { %v2607_v43 = vadd.f32 %v2605_v2, %v2591_v62  ;;  %v4945_v14 = vpop.f32.mrb[25].mxu0 }
 0xc61   : > { %v4946_v17 = vadd.f32 %v4945_v14, %v4944_v7  ;;  %v9014_v14 = vrot.slane %v8027_v19, 1 }
 0xc62   : > { %v8122_v31 = vadd.f32 %v2623_v16, %v2607_v43 }
 0xc63   : > { %v2573_v22 = vadd.f32 %v4946_v17, %v9350_v29  ;;  %v4947_v5 = vpop.f32.mrb[26].mxu0 }
 0xc64   : > { %v4948_v42 = vpop.f32.mrb[27].mxu0 }
 0xc65   : > { %v6441_v11 = vpop.eup %6440  ;;  %v4735_v50 = vmul.f32 -1.442695, %v2573_v22  ;;  %v4949_v8 = vadd.f32 %v4948_v42, %v4947_v5 }
 0xc66   : > { %v6443_v4 = vpop.eup %6442  ;;  %v2618_v10 = vadd.f32 1.0, %v6441_v11 }
 0xc67   : > { %v6445_v0 = vpop.eup %6444  ;;  %v2600_v44 = vadd.f32 1.0, %v6443_v4  ;;  %6448 = vpow2.f32 %v4735_v50  ;;  %v2578_v2 = vadd.f32 %v4949_v8, %v9350_v29 }
 0xc68   : > { %6450 = vrcp.f32 %v2618_v10  ;;  %v2586_v16 = vadd.f32 1.0, %v6445_v0  ;;  %v6447_v30 = vpop.eup %6446 }
 0xc69   : > { %6452 = vrcp.f32 %v2600_v44  ;;  %v4736_v62 = vmul.f32 -1.442695, %v2578_v2 }
 0xc6a   : > { %6454 = vrcp.f32 %v2586_v16  ;;  %v9351_v16 = vld [vmem:[#allocation78_spill] sm:$0xff] }
 0xc6b   : > { %6456 = vpow2.f32 %v4736_v62 }
 0xc6c   : > { %6458 = vtanh.f32 %v8122_v31 }
 0xc71   : > { %v6449_v7 = vpop.eup %6448 }
 0xc72   : > { %v6451_v43 = vpop.eup %6450  ;;  %v2633_v5 = vadd.f32 1.0, %v6449_v7 }
 0xc73   : > { %v6453_v17 = vpop.eup %6452  ;;  %v2624_v22 = vmul.f32 %v6451_v43, %v6447_v30 }
 0xc74   : > { %v6455_v4 = vpop.eup %6454  ;;  %v2606_v8 = vmul.f32 %v6453_v17, %v9014_v14  ;;  %6460 = vrcp.f32 %v2633_v5 }
 0xc75   : > { %v6457_v13 = vpop.eup %6456  ;;  %v2592_v42 = vmul.f32 %v6455_v4, %v8027_v19 }
 0xc76   : > { %v2634_v11 = vadd.f32 1.0, %v6457_v13  ;;  %v6459_v0 = vpop.eup %6458  ;;  %v9353_v13 = vld [vmem:[#allocation91_spill] sm:$0xff] }
 0xc77   : > { %v2608_v50 = vadd.f32 %v2606_v8, %v2592_v42 }
 0xc78   : > { %6462 = vrcp.f32 %v2634_v11 }
 0xc79   : > { %v8132_v10 = vadd.f32 %v2624_v22, %v2608_v50  ;;  %v9352_v22 = vld [vmem:[#allocation90_spill] sm:$0xff]  ;;  %v9354_v50 = vld [vmem:[#allocation92_spill] sm:$0xff] }
 0xc7a   : > { %v2655_v4 = vadd.f32 4.0, %v9352_v22 }
 0xc7b   : > { %6464 = vtanh.f32 %v8132_v10 }
 0xc7c   : > { %vm2656_vm11 = vcmp.lt.f32.partialorder %v2655_v4, %v9354_v50 }
 0xc7e   : > { %v6461_v44 = vpop.eup %6460 }
 0xc7f   : > { %v8135_v2 = vmul.f32 %v6461_v44, %v6459_v0 }
 0xc81   : > { %v2649_v62 = vmul.f32 %v9351_v16, %v8135_v2 }
 0xc82   : > { %v6463_v30 = vpop.eup %6462 }
 0xc83   : > { %2651 = vadd.xlane.f32.xlu1 %v2649_v62 }
 0xc85   : > { %v6465_v7 = vpop.eup %6464 }
 0xc86   : > { %v8139_v43 = vmul.f32 %v6465_v7, %v6463_v30  ;;  %v9355_v30 = vld [vmem:[#allocation21_spill] sm:$0xff] }
 0xc87   : > { %vm4737_vm12 = vcmp.gt.f32.partialorder %v9355_v30, 4.0  ;;  %v9359_v30 = vld [vmem:[#allocation76_spill] sm:$0xff] }
 0xc88   : > { %v2650_v5 = vmul.f32 %v9351_v16, %v8139_v43  ;;  %v9356_v16 = vmov 0.0  }
 0xc89   : > { %v4739_v7 = vsel %vm4737_vm12, 1.0, %v9356_v16  ;;  %vm4205_vm12 = vcmask 1043456  }
 0xc8a   : > { %2653 = vadd.xlane.f32.xlu0 %v2650_v5  ;;  %v9357_v5 = vld [vmem:[#allocation74_spill] sm:$0xff]  ;;  %v2781_v4 = vsub.f32 1.0, %v4739_v7 }
 0xc8b   : > { %v2766_v14 = vrot.slane %v4739_v7, %v9357_v5 }
 0xd10   : > { %v2652_v17 = vpop.xlane.xlu1 %2651 }
 0xd11   : > { %v2662_v42 = vrot.slane %v2652_v17, %v9353_v13 }
 0xd17   : > { %v2654_v8 = vpop.xlane.xlu0 %2653 }
 0xd18   : > { %v2666_v11 = vrot.slane %v2654_v8, %v9353_v13 }
 0xd1a   : > { %v2667_v0 = vsel %vm1180_vm0, %v2666_v11, %v2662_v42  ;;  %v2788_v42 = vrot.slane %v2781_v4, %v9357_v5 }
 0xd1b   : > { %v2669_v44 = vsel %vm2656_vm11, %v2667_v0, -1e+30  ;;  %v9358_v0 = vld [vmem:[#allocation82_spill] sm:$0xff] }
 0xd1c   : > { %v2670_v62 = vsel %vm1184_vm1, %v2669_v44, -inf  ;;  %vm4738_vm14 = vcmp.gt.f32.partialorder %v9358_v0, 4.0 }
 0xd1d   : > { %2671 = vmax.xlane.f32.xlu0 %v2670_v62 }
 0xd33   : > { %2772 = vperm.xlu0 %6300, %v2766_v14  }
 0xdaa   : > { %v2672_v27 = vpop.xlane.xlu0 %2671 }
 0xdab   : > { %vm2673_vm13 = vcmp.ge.f32.partialorder %v2669_v44, %v2672_v27 }
 0xdac   : > { %v2674_v17 = vsel %vm2673_vm13, %v9352_v22, 8.0 }
 0xdad   : > { %v2675_v8 = vsel %vm1184_vm1, %v2674_v17, inf  ;;  %v4740_v17 = vsel %vm4738_vm14, 1.0, %v9356_v16 }
 0xdae   : > { %2676 = vmin.xlane.f32.xlu1 %v2675_v8  ;;  %v2782_v0 = vsub.f32 1.0, %v4740_v17 }
 0xdbf   : > { %2794 = vperm.xlu1 %6299, %v2788_v42  }
 0xe3b   : > { %v2677_v11 = vpop.xlane.xlu1 %2676 }
 0xe3c   : > { %vm2678_vm15 = vcmp.eq.f32.partialorder %v9352_v22, %v2677_v11  ;;  %vm2681_vm2 = vcmp.lt.f32.partialorder %v9352_v22, %v2677_v11  ;;  %vm2698_vm3 = vcmp.gt.f32.partialorder %v9352_v22, %v2677_v11  ;;  %v2770_v11 = vrot.slane %v4740_v17, %v9357_v5  ;;  %v9364_v17 = vld [vmem:[#allocation73_spill] sm:$0xff] }
 0xe3d   : > { %v4742_v27 = vsel %vm2681_vm2, 1.0, %v9356_v16  ;;  %v4741_v14 = vsel %vm2678_vm15, 1.0, %v9356_v16  ;;  %v4743_v8 = vsel %vm2698_vm3, 1.0, %v9356_v16 }
 0xe3e   : > { %v2687_v44 = vrot.slane %v4742_v27, %v9357_v5  ;;  %v2718_v62 = vrot.slane %v4741_v14, %v9357_v5  ;;  %v4300_v7 = vrot.slane %v4741_v14, %v9359_v30  ;;  %v2704_v22 = vrot.slane %v4743_v8, %v9357_v5 }
 0xe40   : > { %2689 = vbcast.lane.b32.xlu1 %v2687_v44, 256  ;;  %v4301_v4 = vcombine.high %v4300_v7, %v4300_v7  ;;  %v4308_v42 = vrot.slane %v4300_v7, %v9359_v30  ;;  %2720 = vbcast.lane.b32.xlu0 %v2718_v62, 256  ;;  %v2792_v44 = vrot.slane %v2782_v0, %v9357_v5  ;;  %v9362_v7 = vld [vmem:[#allocation83_spill] sm:$0xff] }
 0xe42   : > { %v4315_v50 = vrot.slane %v4301_v4, %v9359_v30  ;;  %v4385_v13 = vrot.slane %v4308_v42, %v9357_v5  ;;  %v2694_v4 = vrot.slane %v4742_v27, %v9364_v17  ;;  %v2725_v42 = vrot.slane %v4741_v14, %v9364_v17 }
 0xe44   : > { %v4389_v29 = vrot.slane %v4315_v50, %v9357_v5  ;;  %v8174_v16 = vsel %vm4202_vm4, %v9360_v15, %v4385_v13  ;;  %2706 = vbcast.lane.b32.xlu1 %v2704_v22, 256  ;;  %2776 = vperm.xlu0 %6300, %v2770_v11   ;;  %v2711_v50 = vrot.slane %v4743_v8, %v9364_v17  ;;  %v8184_v15 = vpop.permute.xlu1 %2794  ;;  %v2773_v22 = vpop.permute.xlu0 %2772 }
 0xe45   : > { %9361 = vst [vmem:[#allocation84_spill] sm:$0xff] %v8174_v16 }
 0xe46   : > { %v8179_v62 = vsel %vm4202_vm4, %v9362_v7, %v4389_v29 }
 0xe47   : > { %9363 = vst [vmem:[#allocation85_spill] sm:$0xff] %v8179_v62 }
 0xe48   : > { %2798 = vperm.xlu1 %6299, %v2792_v44   ;;  %2696 = vbcast.lane.b32.xlu0 %v2694_v4, 256 }
 0xe4c   : > { %2727 = vbcast.lane.b32.xlu1 %v2725_v42, 256  ;;  %2713 = vbcast.lane.b32.xlu0 %v2711_v50, 256  ;;  %v9365_v42 = vrot.slane %v8113_v56, 1 }
 0xeb2   : > { %v2690_v13 = vpop.permute.xlu1 %2689  ;;  %v2721_v29 = vpop.permute.xlu0 %2720 }
 0xeb3   : > { %v2731_v0 = vmul.f32 %v2690_v13, %v7985_v52  ;;  %v2741_v11 = vmul.f32 %v2690_v13, %v8113_v56  ;;  %v2729_v7 = vmul.f32 %v2721_v29, %v8135_v2  ;;  %v2739_v27 = vmul.f32 %v2721_v29, %v8122_v31 }
 0xeb4   : > { %v2801_v13 = vmul.f32 %v8184_v15, %v7985_v52 }
 0xeb5   : > { %v2743_v44 = vadd.f32 %v2741_v11, %v2739_v27  ;;  %v2749_v4 = vrot.slane %v2729_v7, 4  ;;  %v2733_v62 = vadd.f32 %v2731_v0, %v2729_v7 }
 0xeb6   : > { %v2707_v14 = vpop.permute.xlu1 %2706 }
 0xeb7   : > { %v2735_v8 = vmul.f32 %v2707_v14, %v7988_v47  ;;  %v2745_v50 = vmul.f32 %v2707_v14, %v9365_v42  ;;  %v2750_v17 = vadd.f32 %v2749_v4, %v2729_v7 }
 0xeb9   : > { %v2737_v16 = vadd.f32 %v2735_v8, %v2733_v62  ;;  %v2747_v30 = vadd.f32 %v2745_v50, %v2743_v44  ;;  %v2751_v5 = vrot.slane %v2750_v17, 2  ;;  %v9366_v8 = vrot.slane %v8027_v19, 1 }
 0xebb   : > { %v2779_v33 = vmul.f32 %v2773_v22, %v2737_v16  ;;  %v8195_v2 = vmul.f32 %v2773_v22, %v2747_v30  ;;  %v2752_v31 = vadd.f32 %v2751_v5, %v2750_v17 }
 0xebd   : > { %v8197_v11 = vadd.f32 %v2801_v13, %v2779_v33  ;;  %v2753_v29 = vrot.slane %v2752_v31, 1 }
 0xebf   : > { %v8200_v0 = vrot.slane %v8197_v11, 1  ;;  %v2754_v47 = vadd.f32 %v2753_v29, %v2752_v31 }
 0xec1   : > { %2899 = vmatprep.mubr.f32.mxu1 %v8200_v0  ;;  %2976 = vmatprep.mubr.f32.mxu0 %v8200_v0  ;;  %v8206_v62 = vsel %vm4202_vm4, %v7994_v21, %v2754_v47 }
 0xec2   : > { %2900 = vmatmul.mubr.f32.vlgmr.msra.gmra.mrb[24].mxu1 %v8197_v11  ;;  %2977 = vmatmul.mubr.f32.vlgmr.msra.gmra.mrb[28].mxu0 %v8197_v11 }
 0xec3   : > { %5867 = vmatpush3.bf16.msra.mxu1 %v9162_v34  ;;  %5899 = vmatpush1.bf16.msra.mxu0 %v9163_v45  ;;  %v2777_v33 = vpop.permute.xlu0 %2776 }
 0xec4   : > { %5869 = vmatprep.subr.bf16.mxu1 %v9164_v57  ;;  %5901 = vmatprep.subr.bf16.mxu0 %v9165_v61 }
 0xec7   : > { %5871 = vmatpush3.bf16.msra.mxu1 %v9226_v60  ;;  %v2799_v52 = vpop.permute.xlu1 %2798  ;;  %5903 = vmatpush1.bf16.msra.mxu0 %v9227_v53  ;;  %v2697_v21 = vpop.permute.xlu0 %2696 }
 0xec8   : > { %5873 = vmatprep.subr.bf16.mxu1 %v9228_v36  ;;  %5905 = vmatprep.subr.bf16.mxu0 %v9229_v38  ;;  %v2732_v16 = vmul.f32 %v2697_v21, %v8025_v39  ;;  %v2742_v30 = vmul.f32 %v2697_v21, %v8027_v19  ;;  %v2802_v13 = vmul.f32 %v2799_v52, %v8025_v39 }
 0xecb   : > { %5875 = vmatpush3.bf16.msra.mxu1 %v9230_v35  ;;  %v2728_v5 = vpop.permute.xlu1 %2727  ;;  %5907 = vmatpush1.bf16.msra.mxu0 %v9297_v58  ;;  %v2714_v7 = vpop.permute.xlu0 %2713 }
 0xecc   : > { %v2730_v17 = vmul.f32 %v2728_v5, %v8139_v43  ;;  %v2740_v22 = vmul.f32 %v2728_v5, %v8132_v10  ;;  %5877 = vmatprep.subr.bf16.mxu1 %v9169_v24  ;;  %5909 = vmatprep.subr.bf16.mxu0 %v7057_v59  ;;  %v2736_v27 = vmul.f32 %v2714_v7, %v8032_v49 }
 0xecd   : > { %v2746_v42 = vmul.f32 %v2714_v7, %v9366_v8  ;;  %v2810_v49 = vmul.f32 %v2799_v52, %v8027_v19  ;;  %v9368_v52 = vld [vmem:[#allocation27_spill] sm:$0xff]  ;;  %v9371_v7 = vld [vmem:[#allocation28_spill] sm:$0xff] }
 0xece   : > { %v2744_v44 = vadd.f32 %v2742_v30, %v2740_v22  ;;  %v2755_v4 = vrot.slane %v2730_v17, 4  ;;  %v2734_v14 = vadd.f32 %v2732_v16, %v2730_v17  ;;  %v9370_v22 = vld [vmem:[#allocation34_spill] sm:$0xff]  ;;  %v9376_v8 = vld [vmem:[#allocation31_spill] sm:$0xff] }
 0xecf   : > { %5879 = vmatpush3.bf16.msra.mxu1 %v7309_v37  ;;  %5911 = vmatpush1.bf16.msra.mxu0 %v9171_v12 }
 0xed0   : > { %v2756_v43 = vadd.f32 %v2755_v4, %v2730_v17  ;;  %v2738_v50 = vadd.f32 %v2736_v27, %v2734_v14  ;;  %v2748_v10 = vadd.f32 %v2746_v42, %v2744_v44  ;;  %5881 = vmatprep.subr.bf16.mxu1 %v9172_v1  ;;  %5913 = vmatprep.subr.bf16.mxu0 %v7063_v9  ;;  %v9369_v17 = vld [vmem:[#allocation32_spill] sm:$0xff]  ;;  %v9372_v27 = vld [vmem:[#allocation29_spill] sm:$0xff]  ;;  %v9374_v4 = vld [vmem:[#allocation38_spill] sm:$0xff] }
 0xed1   : > { %v9373_v44 = vld [vmem:[#allocation36_spill] sm:$0xff]  ;;  %v9375_v14 = vld [vmem:[#allocation30_spill] sm:$0xff] }
 0xed2   : > { %v2757_v31 = vrot.slane %v2756_v43, 2  ;;  %v2780_v29 = vmul.f32 %v2777_v33, %v2738_v50  ;;  %v2808_v47 = vmul.f32 %v2777_v33, %v2748_v10  ;;  %v9377_v42 = vld [vmem:[#allocation40_spill] sm:$0xff]  ;;  %v9379_v50 = vld [vmem:[#allocation33_spill] sm:$0xff]  ;;  %v9380_v10 = vld [vmem:[#allocation35_spill] sm:$0xff] }
 0xed3   : > { %5883 = vmatpush3.bf16.msra.mxu1 %v7317_v46  ;;  %5915 = vmatpush1.bf16.msra.mxu0 %v7066_v18 }
 0xed4   : > { %v2758_v21 = vadd.f32 %v2757_v31, %v2756_v43  ;;  %v8237_v16 = vadd.f32 %v2802_v13, %v2780_v29  ;;  %v8239_v5 = vadd.f32 %v2810_v49, %v2808_v47  ;;  %5885 = vmatprep.subr.bf16.mxu1 %v9173_v54  ;;  %5917 = vmatprep.subr.bf16.mxu0 %v7069_v20  ;;  %v9378_v43 = vld [vmem:[#allocation42_spill] sm:$0xff]  ;;  %v9381_v13 = vld [vmem:[#allocation44_spill] sm:$0xff]  ;;  %v9383_v31 = vld [vmem:[#allocation37_spill] sm:$0xff] }
 0xed5   : > { %v9382_v49 = vld [vmem:[#allocation46_spill] sm:$0xff]  ;;  %v9384_v29 = vld [vmem:[#allocation39_spill] sm:$0xff]  ;;  %v9385_v47 = vld [vmem:[#allocation48_spill] sm:$0xff] }
 0xed6   : > { %v2759_v30 = vrot.slane %v2758_v21, 1  ;;  %v8244_v39 = vrot.slane %v8237_v16, 1 }
 0xed7   : > { %5887 = vmatpush3.bf16.msra.mxu1 %v7325_v55  ;;  %5919 = vmatpush1.bf16.msra.mxu0 %v7075_v32 }
 0xed8   : > { %v2760_v19 = vadd.f32 %v2759_v30, %v2758_v21  ;;  %2905 = vmatprep.mubr.f32.mxu1 %v8244_v39  ;;  %2982 = vmatprep.mubr.f32.mxu0 %v8244_v39  ;;  %v9386_v21 = vld [vmem:[#allocation50_spill] sm:$0xff]  ;;  %v9387_v30 = vld [vmem:[#allocation41_spill] sm:$0xff] }
 0xed9   : > { %2906 = vmatmul.mubr.f32.gmra.mrb[26].mxu1 %v8237_v16  ;;  %2983 = vmatmul.mubr.f32.gmra.mrb[30].mxu0 %v8237_v16 }
 0xeda   : > { %v8254_v33 = vsel %vm4202_vm4, %v8042_v26, %v2760_v19  ;;  %5889 = vmatprep.subr.bf16.mxu1 %v7328_v28  ;;  %3053 = vmatprep.mubr.f32.mxu1 %v8200_v0  ;;  %v9367_v26 = vld [vmem:[#allocation26_spill] sm:$0xff]  ;;  %v9388_v19 = vld [vmem:[#allocation43_spill] sm:$0xff] }
 0xedb   : > { %5891 = vmatpush3.bf16.msra.mxu1 %v7333_v6  ;;  %5921 = vmatprep.subr.bf16.mxu0 %v7083_v40 }
 0xedc   : > { %5893 = vmatprep.subr.bf16.mxu1 %v7336_v25  ;;  %5923 = vmatpush1.bf16.msra.mxu0 %v7087_v48 }
 0xedd   : > { %5925 = vmatprep.subr.bf16.mxu0 %v7093_v51 }
 0xedf   : > { %5895 = vmatpush3.bf16.msra.mxu1 %v7341_v41 }
 0xee0   : > { %5961 = vmatprep.subr.bf16.mxu1 %v7071_v23  ;;  %5927 = vmatpush1.bf16.msra.mxu0 %v7100_v63 }
 0xee1   : > { %5929 = vmatprep.subr.bf16.mxu0 %v7106_v3 }
 0xee2   : > { %3054 = vmatmul.mubr.f32.vlgmr.msra.gmra.mrb[28].mxu1 %v8197_v11 }
 0xee3   : > { %3058 = vmatprep.mubr.f32.mxu1 %v8244_v39  ;;  %5963 = vmatpush1.bf16.msra.mxu1 %v9367_v26 }
 0xee4   : > { %5965 = vmatprep.subr.bf16.mxu1 %v9368_v52  ;;  %5931 = vmatpush1.bf16.msra.mxu0 %v9369_v17 }
 0xee5   : > { %5933 = vmatprep.subr.bf16.mxu0 %v9370_v22 }
 0xee6   : > { %3059 = vmatmul.mubr.f32.gmra.mrb[30].mxu1 %v8237_v16 }
 0xee7   : > { %5967 = vmatpush1.bf16.msra.mxu1 %v9371_v7 }
 0xee8   : > { %5969 = vmatprep.subr.bf16.mxu1 %v9372_v27  ;;  %5935 = vmatpush1.bf16.msra.mxu0 %v9373_v44 }
 0xee9   : > { %5937 = vmatprep.subr.bf16.mxu0 %v9374_v4  ;;  %v9417_v4 = vld [vmem:[#allocation88_spill] sm:$0xff] }
 0xeeb   : > { %5971 = vmatpush1.bf16.msra.mxu1 %v9375_v14 }
 0xeec   : > { %5973 = vmatprep.subr.bf16.mxu1 %v9376_v8  ;;  %5939 = vmatpush1.bf16.msra.mxu0 %v9377_v42  ;;  %v9415_v42 = vld [vmem:[#allocation86_spill] sm:$0xff]  ;;  %v9416_v8 = vld [vmem:[#allocation87_spill] sm:$0xff] }
 0xeed   : > { %5941 = vmatprep.subr.bf16.mxu0 %v9378_v43  ;;  %v9389_v43 = vld [vmem:[#allocation52_spill] sm:$0xff] }
 0xeef   : > { %5975 = vmatpush1.bf16.msra.mxu1 %v9379_v50  ;;  %v9390_v50 = vld [vmem:[#allocation54_spill] sm:$0xff] }
 0xef0   : > { %5977 = vmatprep.subr.bf16.mxu1 %v9380_v10  ;;  %5943 = vmatpush1.bf16.msra.mxu0 %v9381_v13  ;;  %v9391_v10 = vld [vmem:[#allocation45_spill] sm:$0xff]  ;;  %v9392_v13 = vld [vmem:[#allocation47_spill] sm:$0xff] }
 0xef1   : > { %5945 = vmatprep.subr.bf16.mxu0 %v9382_v49  ;;  %v9393_v49 = vld [vmem:[#allocation56_spill] sm:$0xff] }
 0xef3   : > { %5979 = vmatpush1.bf16.msra.mxu1 %v9383_v31  ;;  %v9394_v31 = vld [vmem:[#allocation68_spill] sm:$0xff] }
 0xef4   : > { %5981 = vmatprep.subr.bf16.mxu1 %v9384_v29  ;;  %5947 = vmatpush1.bf16.msra.mxu0 %v9385_v47  ;;  %v9395_v29 = vld [vmem:[#allocation49_spill] sm:$0xff]  ;;  %v9396_v47 = vld [vmem:[#allocation51_spill] sm:$0xff] }
 0xef5   : > { %5949 = vmatprep.subr.bf16.mxu0 %v9386_v21  ;;  %v9397_v21 = vld [vmem:[#allocation69_spill] sm:$0xff] }
 0xef7   : > { %5983 = vmatpush1.bf16.msra.mxu1 %v9387_v30  ;;  %v9398_v30 = vld [vmem:[#allocation72_spill] sm:$0xff] }
 0xef8   : > { %5985 = vmatprep.subr.bf16.mxu1 %v9388_v19  ;;  %5951 = vmatpush1.bf16.msra.mxu0 %v9389_v43  ;;  %v9399_v19 = vld [vmem:[#allocation53_spill] sm:$0xff]  ;;  %v9400_v43 = vld [vmem:[#allocation55_spill] sm:$0xff] }
 0xef9   : > { %5953 = vmatprep.subr.bf16.mxu0 %v9390_v50  ;;  %v9401_v50 = vld [vmem:[#allocation57_spill] sm:$0xff] }
 0xefb   : > { %5987 = vmatpush1.bf16.msra.mxu1 %v9391_v10  ;;  %v9402_v10 = vld [vmem:[#allocation58_spill] sm:$0xff] }
 0xefc   : > { %5989 = vmatprep.subr.bf16.mxu1 %v9392_v13  ;;  %5955 = vmatpush1.bf16.msra.mxu0 %v9393_v49  ;;  %v9403_v13 = vld [vmem:[#allocation59_spill] sm:$0xff]  ;;  %v9404_v49 = vld [vmem:[#allocation60_spill] sm:$0xff] }
 0xefd   : > { %5957 = vmatprep.subr.bf16.mxu0 %v9394_v31  ;;  %v9405_v31 = vld [vmem:[#allocation61_spill] sm:$0xff] }
 0xeff   : > { %5991 = vmatpush1.bf16.msra.mxu1 %v9395_v29  ;;  %v9406_v29 = vld [vmem:[#allocation62_spill] sm:$0xff] }
 0xf00   : > { %5993 = vmatprep.subr.bf16.mxu1 %v9396_v47  ;;  %5959 = vmatpush1.bf16.msra.mxu0 %v9397_v21  ;;  %v9407_v47 = vld [vmem:[#allocation63_spill] sm:$0xff]  ;;  %v9408_v21 = vld [vmem:[#allocation64_spill] sm:$0xff] }
 0xf01   : > { %6025 = vmatprep.subr.bf16.mxu0 %v9398_v30  ;;  %v9409_v30 = vld [vmem:[#allocation65_spill] sm:$0xff] }
 0xf03   : > { %5995 = vmatpush1.bf16.msra.mxu1 %v9399_v19  ;;  %v9410_v19 = vld [vmem:[#allocation66_spill] sm:$0xff] }
 0xf04   : > { %5997 = vmatprep.subr.bf16.mxu1 %v9400_v43  ;;  %v9411_v43 = vld [vmem:[#allocation67_spill] sm:$0xff] }
 0xf07   : > { %5999 = vmatpush1.bf16.msra.mxu1 %v9401_v50  ;;  %v9412_v50 = vld [vmem:[#allocation70_spill] sm:$0xff] }
 0xf08   : > { %6001 = vmatprep.subr.bf16.mxu1 %v9402_v10  ;;  %v9413_v10 = vld [vmem:[#allocation71_spill] sm:$0xff] }
 0xf0b   : > { %6003 = vmatpush1.bf16.msra.mxu1 %v9403_v13  ;;  %v9414_v13 = vld [vmem:[#allocation19_spill] sm:$0xff] }
 0xf0c   : > { %6005 = vmatprep.subr.bf16.mxu1 %v9404_v49 }
 0xf0f   : > { %6007 = vmatpush1.bf16.msra.mxu1 %v9405_v31 }
 0xf10   : > { %6009 = vmatprep.subr.bf16.mxu1 %v9406_v29 }
 0xf13   : > { %6011 = vmatpush1.bf16.msra.mxu1 %v9407_v47 }
 0xf14   : > { %6013 = vmatprep.subr.bf16.mxu1 %v9408_v21 }
 0xf17   : > { %6015 = vmatpush1.bf16.msra.mxu1 %v9409_v30 }
 0xf18   : > { %6017 = vmatprep.subr.bf16.mxu1 %v9410_v19 }
 0xf1b   : > { %6019 = vmatpush1.bf16.msra.mxu1 %v9411_v43 }
 0xf1c   : > { %6021 = vmatprep.subr.bf16.mxu1 %v9412_v50  ;;  %v9418_v50 = vld [vmem:[#allocation89_spill] sm:$0xff] }
 0xf1f   : > { %6023 = vmatpush1.bf16.msra.mxu1 %v9413_v10 }
 0xf20   : > { %6057 = vmatprep.subr.bf16.mxu1 %v9414_v13 }
 0xf95   : > { %v2901_v49 = vpop.f32.mrb[24].mxu1  ;;  %v2978_v31 = vpop.f32.mrb[28].mxu0 }
 0xf96   : > { %v3064_v29 = vadd.f32 %v2901_v49, %v9415_v42  ;;  %v3066_v47 = vadd.f32 %v2978_v31, %v9416_v8  ;;  %v2903_v14 = vpop.f32.mrb[25].mxu1  ;;  %v2980_v21 = vpop.f32.mrb[29].mxu0 }
 0xf97   : > { %v3065_v30 = vadd.f32 %v2903_v14, %v9417_v4  ;;  %v3067_v10 = vadd.f32 %v2980_v21, %v9418_v50  ;;  %v2809_v14 = vmul.f32 %v8184_v15, %v8113_v56 }
 0xf98   : > { %v4748_v44 = vmul.f32 -1.442695, %v3064_v29  ;;  %v4746_v19 = vmul.f32 -1.442695, %v3066_v47 }
 0xf99   : > { %v4744_v27 = vmul.f32 -1.442695, %v3065_v30 }
 0xf9a   : > { %6466 = vpow2.f32 %v4748_v44  ;;  %v8325_v44 = vadd.f32 %v2809_v14, %v8195_v2 }
 0xf9b   : > { %6468 = vpow2.f32 %v4746_v19 }
 0xf9c   : > { %6470 = vpow2.f32 %v4744_v27  ;;  %v9030_v56 = vrot.slane %v8325_v44, 1 }
 0xf9d   : > { %6472 = vtanh.f32 %v3067_v10 }
 0xfa4   : > { %v6467_v43 = vpop.eup %6466 }
 0xfa5   : > { %v6469_v13 = vpop.eup %6468  ;;  %v3112_v7 = vadd.f32 1.0, %v6467_v43 }
 0xfa6   : > { %v6471_v22 = vpop.eup %6470  ;;  %v3094_v17 = vadd.f32 1.0, %v6469_v13 }
 0xfa7   : > { %6474 = vrcp.f32 %v3112_v7  ;;  %v3080_v49 = vadd.f32 1.0, %v6471_v22 }
 0xfa8   : > { %6476 = vrcp.f32 %v3094_v17  ;;  %v6473_v17 = vpop.eup %6472 }
 0xfa9   : > { %6478 = vrcp.f32 %v3080_v49 }
 0xfac   : > { %v2907_v31 = vpop.f32.mrb[26].mxu1  ;;  %v2984_v29 = vpop.f32.mrb[30].mxu0 }
 0xfad   : > { %v3069_v27 = vadd.f32 %v2907_v31, %v9415_v42  ;;  %v3071_v47 = vadd.f32 %v2984_v29, %v9416_v8  ;;  %v2909_v43 = vpop.f32.mrb[27].mxu1  ;;  %v2986_v21 = vpop.f32.mrb[31].mxu0 }
 0xfae   : > { %v3070_v10 = vadd.f32 %v2909_v43, %v9417_v4  ;;  %v9419_v4 = vld [vmem:[#allocation75_spill] sm:$0xff] }
 0xfaf   : > { %v4749_v7 = vmul.f32 -1.442695, %v3069_v27  ;;  %v4747_v22 = vmul.f32 -1.442695, %v3071_v47 }
 0xfb0   : > { %v4745_v30 = vmul.f32 -1.442695, %v3070_v10  ;;  %v3072_v10 = vadd.f32 %v2986_v21, %v9418_v50  ;;  %v9429_v50 = vld [vmem:[#allocation84_spill] sm:$0xff] }
 0xfb1   : > { %v6475_v19 = vpop.eup %6474  ;;  %6480 = vpow2.f32 %v4749_v7 }
 0xfb2   : > { %v6477_v15 = vpop.eup %6476  ;;  %v3118_v13 = vmul.f32 %v6475_v19, %v6473_v17  ;;  %6482 = vpow2.f32 %v4747_v22 }
 0xfb3   : > { %v6479_v2 = vpop.eup %6478  ;;  %v3100_v49 = vmul.f32 %v6477_v15, %v9030_v56  ;;  %6484 = vpow2.f32 %v4745_v30 }
 0xfb4   : > { %v3086_v14 = vmul.f32 %v6479_v2, %v8325_v44  ;;  %6486 = vtanh.f32 %v3072_v10 }
 0xfb5   : > { %v4982_v31 = vpop.f32.mrb[28].mxu1 }
 0xfb6   : > { %v3102_v29 = vadd.f32 %v3100_v49, %v3086_v14  ;;  %v4983_v27 = vpop.f32.mrb[29].mxu1 }
 0xfb7   : > { %v4984_v47 = vadd.f32 %v4983_v27, %v4982_v31  ;;  %v9029_v27 = vrot.slane %v8239_v5, 1 }
 0xfb8   : > { %v8334_v43 = vadd.f32 %v3118_v13, %v3102_v29 }
 0xfb9   : > { %v3068_v7 = vadd.f32 %v4984_v47, %v9419_v4  ;;  %v4985_v8 = vpop.f32.mrb[30].mxu1 }
 0xfba   : > { %v4986_v17 = vpop.f32.mrb[31].mxu1 }
 0xfbb   : > { %v6481_v22 = vpop.eup %6480  ;;  %v4750_v19 = vmul.f32 -1.442695, %v3068_v7  ;;  %v4987_v42 = vadd.f32 %v4986_v17, %v4985_v8 }
 0xfbc   : > { %v6483_v52 = vpop.eup %6482  ;;  %v3113_v15 = vadd.f32 1.0, %v6481_v22 }
 0xfbd   : > { %v6485_v30 = vpop.eup %6484  ;;  %v3095_v2 = vadd.f32 1.0, %v6483_v52  ;;  %6488 = vpow2.f32 %v4750_v19  ;;  %v3073_v49 = vadd.f32 %v4987_v42, %v9419_v4 }
 0xfbe   : > { %6490 = vrcp.f32 %v3113_v15  ;;  %v3081_v13 = vadd.f32 1.0, %v6485_v30  ;;  %v6487_v21 = vpop.eup %6486 }
 0xfbf   : > { %6492 = vrcp.f32 %v3095_v2  ;;  %v4751_v14 = vmul.f32 -1.442695, %v3073_v49 }
 0xfc0   : > { %6494 = vrcp.f32 %v3081_v13  ;;  %v8352_v13 = vld [vmem:[%s8821_s5] ss:$0 sm:$0xff] }
 0xfc1   : > { %6496 = vpow2.f32 %v4751_v14  ;;  %9420 = vst [vmem:[#allocation93_spill] sm:$0xff] %v8352_v13 }
 0xfc2   : > { %6498 = vtanh.f32 %v8334_v43 }
 0xfc7   : > { %v6489_v31 = vpop.eup %6488 }
 0xfc8   : > { %v6491_v29 = vpop.eup %6490  ;;  %v3128_v8 = vadd.f32 1.0, %v6489_v31 }
 0xfc9   : > { %v6493_v47 = vpop.eup %6492  ;;  %v3119_v7 = vmul.f32 %v6491_v29, %v6487_v21 }
 0xfca   : > { %v6495_v52 = vpop.eup %6494  ;;  %v3101_v42 = vmul.f32 %v6493_v47, %v9029_v27  ;;  %6500 = vrcp.f32 %v3128_v8  ;;  %v9426_v27 = vld [vmem:[#allocation74_spill] sm:$0xff] }
 0xfcb   : > { %v6497_v10 = vpop.eup %6496  ;;  %v3087_v17 = vmul.f32 %v6495_v52, %v8239_v5 }
 0xfcc   : > { %v3129_v22 = vadd.f32 1.0, %v6497_v10  ;;  %v6499_v30 = vpop.eup %6498  ;;  %v9422_v10 = vld [vmem:[#allocation91_spill] sm:$0xff] }
 0xfcd   : > { %v3103_v19 = vadd.f32 %v3101_v42, %v3087_v17 }
 0xfce   : > { %6502 = vrcp.f32 %v3129_v22 }
 0xfcf   : > { %v8344_v15 = vadd.f32 %v3119_v7, %v3103_v19  ;;  %v9421_v7 = vld [vmem:[#allocation90_spill] sm:$0xff]  ;;  %v9423_v19 = vld [vmem:[#allocation92_spill] sm:$0xff] }
 0xfd0   : > { %v3150_v52 = vadd.f32 5.0, %v9421_v7 }
 0xfd1   : > { %6504 = vtanh.f32 %v8344_v15 }
 0xfd2   : > { %vm3151_vm5 = vcmp.lt.f32.partialorder %v3150_v52, %v9423_v19 }
 0xfd4   : > { %v6501_v2 = vpop.eup %6500 }
 0xfd5   : > { %v8347_v49 = vmul.f32 %v6501_v2, %v6499_v30 }
 0xfd7   : > { %v3144_v14 = vmul.f32 %v8352_v13, %v8347_v49 }
 0xfd8   : > { %v6503_v21 = vpop.eup %6502 }
 0xfd9   : > { %3146 = vadd.xlane.f32.xlu1 %v3144_v14 }
 0xfdb   : > { %v6505_v31 = vpop.eup %6504 }
 0xfdc   : > { %v8356_v29 = vmul.f32 %v6505_v31, %v6503_v21  ;;  %v8367_v21 = vld [vmem:[%s7405_s24] sm:$0x1]  ;;  %v9425_v31 = vmov 0.0  }
 0xfdd   : > { %9424 = vst [vmem:[#allocation79_spill] sm:$0xff] %v8367_v21  ;;  %vm4752_vm6 = vcmp.gt.f32.partialorder %v8367_v21, 5.0 }
 0xfde   : > { %v3145_v8 = vmul.f32 %v8352_v13, %v8356_v29 }
 0xfe0   : > { %3148 = vadd.xlane.f32.xlu0 %v3145_v8  ;;  %v4754_v8 = vsel %vm4752_vm6, 1.0, %v9425_v31 }
 0xfe1   : > { %v3261_v56 = vrot.slane %v4754_v8, %v9426_v27 }
0x1066   : > { %v3147_v47 = vpop.xlane.xlu1 %3146 }
0x1067   : > { %v3157_v17 = vrot.slane %v3147_v47, %v9422_v10 }
0x106d   : > { %v3149_v42 = vpop.xlane.xlu0 %3148 }
0x106e   : > { %v3161_v22 = vrot.slane %v3149_v42, %v9422_v10 }
0x1070   : > { %v3162_v30 = vsel %vm1180_vm0, %v3161_v22, %v3157_v17  ;;  %v3276_v17 = vsub.f32 1.0, %v4754_v8 }
0x1071   : > { %v3164_v2 = vsel %vm3151_vm5, %v3162_v30, -1e+30  ;;  %vm4422_vm5 = vcmask 62464  }
0x1072   : > { %v3165_v14 = vsel %vm1184_vm1, %v3164_v2, -inf  ;;  %v3283_v22 = vrot.slane %v3276_v17, %v9426_v27 }
0x1073   : > { %3166 = vmax.xlane.f32.xlu0 %v3165_v14  ;;  %v8376_v14 = vld [vmem:[%s7405_s24 + $0x1] sm:$0x1]  ;;  %s6678_s24 = scalar_lea.vmem %s8722_s25, 32 }
0x1074   : > { %9427 = vst [vmem:[#allocation22_spill] sm:$0xff] %v8376_v14  ;;  %vm4753_vm8 = vcmp.gt.f32.partialorder %v8376_v14, 5.0  ;;  %p6679_p0 = scmp.ne.s32.totalorder %s8722_s25, %s6678_s24 }
0x1075   : > { %v4755_v17 = vsel %vm4753_vm8, 1.0, %v9425_v31 }
0x1076   : > { %v3277_v19 = vsub.f32 1.0, %v4755_v17  ;;  %p6680_p3 = pnand %p6679_p0, %p9500_p1 }
0x1078   : > { %p6681_p5 = pneg %p6680_p3 }
0x1089   : > { %3267 = vperm.xlu0 %6300, %v3261_v56  }
0x1100   : > { %v3167_v47 = vpop.xlane.xlu0 %3166 }
0x1101   : > { %vm3168_vm7 = vcmp.ge.f32.partialorder %v3164_v2, %v3167_v47 }
0x1102   : > { %v3169_v52 = vsel %vm3168_vm7, %v9421_v7, 8.0 }
0x1103   : > { %v3170_v42 = vsel %vm1184_vm1, %v3169_v52, inf  ;;  %v9428_v52 = vld [vmem:[#allocation76_spill] sm:$0xff] }
0x1104   : > { %3171 = vmin.xlane.f32.xlu1 %v3170_v42 }
0x1115   : > { %3289 = vperm.xlu1 %6299, %v3283_v22  }
0x1191   : > { %v3172_v30 = vpop.xlane.xlu1 %3171 }
0x1192   : > { %vm3173_vm9 = vcmp.eq.f32.partialorder %v9421_v7, %v3172_v30  ;;  %vm3176_vm10 = vcmp.lt.f32.partialorder %v9421_v7, %v3172_v30  ;;  %vm3193_vm11 = vcmp.gt.f32.partialorder %v9421_v7, %v3172_v30  ;;  %v3265_v30 = vrot.slane %v4755_v17, %v9426_v27  ;;  %v9433_v17 = vld [vmem:[#allocation73_spill] sm:$0xff] }
0x1193   : > { %v4757_v56 = vsel %vm3176_vm10, 1.0, %v9425_v31  ;;  %v4756_v2 = vsel %vm3173_vm9, 1.0, %v9425_v31  ;;  %v4758_v22 = vsel %vm3193_vm11, 1.0, %v9425_v31 }
0x1194   : > { %v3182_v8 = vrot.slane %v4757_v56, %v9426_v27  ;;  %v3213_v47 = vrot.slane %v4756_v2, %v9426_v27  ;;  %v4323_v42 = vrot.slane %v4756_v2, %v9428_v52  ;;  %v3199_v13 = vrot.slane %v4758_v22, %v9426_v27 }
0x1196   : > { %3184 = vbcast.lane.b32.xlu1 %v3182_v8, 256  ;;  %v4324_v14 = vcombine.high %v4323_v42, %v4323_v42  ;;  %v4331_v21 = vrot.slane %v4323_v42, %v9428_v52  ;;  %3215 = vbcast.lane.b32.xlu0 %v3213_v47, 256  ;;  %v3287_v8 = vrot.slane %v3277_v19, %v9426_v27  ;;  %v9431_v42 = vld [vmem:[#allocation85_spill] sm:$0xff] }
0x1198   : > { %v4338_v10 = vrot.slane %v4324_v14, %v9428_v52  ;;  %v4395_v7 = vrot.slane %v4331_v21, %v9426_v27  ;;  %v3189_v14 = vrot.slane %v4757_v56, %v9433_v17  ;;  %v3220_v21 = vrot.slane %v4756_v2, %v9433_v17 }
0x119a   : > { %v4399_v4 = vrot.slane %v4338_v10, %v9426_v27  ;;  %v8397_v31 = vsel %vm4205_vm12, %v9429_v50, %v4395_v7  ;;  %3201 = vbcast.lane.b32.xlu1 %v3199_v13, 256  ;;  %3271 = vperm.xlu0 %6300, %v3265_v30   ;;  %v3206_v10 = vrot.slane %v4758_v22, %v9433_v17  ;;  %v8407_v50 = vpop.permute.xlu1 %3289  ;;  %v3268_v13 = vpop.permute.xlu0 %3267 }
0x119b   : > { %9430 = vst [vmem:[#allocation80_spill] sm:$0xff] %v8397_v31 }
0x119c   : > { %v8402_v47 = vsel %vm4205_vm12, %v9431_v42, %v4399_v4 }
0x119d   : > { %9432 = vst [vmem:[#allocation23_spill] sm:$0xff] %v8402_v47 }
0x119e   : > { %3293 = vperm.xlu1 %6299, %v3287_v8   ;;  %3191 = vbcast.lane.b32.xlu0 %v3189_v14, 256 }
0x11a2   : > { %3222 = vbcast.lane.b32.xlu1 %v3220_v21, 256  ;;  %3208 = vbcast.lane.b32.xlu0 %v3206_v10, 256  ;;  %v9434_v21 = vrot.slane %v8325_v44, 1 }
0x1208   : > { %v3185_v7 = vpop.permute.xlu1 %3184  ;;  %v3216_v4 = vpop.permute.xlu0 %3215 }
0x1209   : > { %v3226_v19 = vmul.f32 %v3185_v7, %v8197_v11  ;;  %v3236_v30 = vmul.f32 %v3185_v7, %v8325_v44  ;;  %v3224_v42 = vmul.f32 %v3216_v4, %v8347_v49  ;;  %v3234_v56 = vmul.f32 %v3216_v4, %v8334_v43 }
0x120a   : > { %v3296_v7 = vmul.f32 %v8407_v50, %v8197_v11 }
0x120b   : > { %v3238_v8 = vadd.f32 %v3236_v30, %v3234_v56  ;;  %v3244_v14 = vrot.slane %v3224_v42, 4  ;;  %v3228_v47 = vadd.f32 %v3226_v19, %v3224_v42  ;;  %v9435_v56 = vrot.slane %v8239_v5, 1 }
0x120c   : > { %v3202_v2 = vpop.permute.xlu1 %3201 }
0x120d   : > { %v3230_v22 = vmul.f32 %v3202_v2, %v8200_v0  ;;  %v3240_v10 = vmul.f32 %v3202_v2, %v9434_v21  ;;  %v3245_v17 = vadd.f32 %v3244_v14, %v3224_v42 }
0x120f   : > { %v3232_v31 = vadd.f32 %v3230_v22, %v3228_v47  ;;  %v3242_v52 = vadd.f32 %v3240_v10, %v3238_v8  ;;  %v3246_v27 = vrot.slane %v3245_v17, 2 }
0x1211   : > { %v3274_v26 = vmul.f32 %v3268_v13, %v3232_v31  ;;  %v8418_v49 = vmul.f32 %v3268_v13, %v3242_v52  ;;  %v3247_v43 = vadd.f32 %v3246_v27, %v3245_v17 }
0x1213   : > { %v8420_v30 = vadd.f32 %v3296_v7, %v3274_v26  ;;  %v3248_v4 = vrot.slane %v3247_v43, 1  ;;  %v9445_v7 = vld [vmem:[#allocation31_spill] sm:$0xff] }
0x1215   : > { %v8423_v19 = vrot.slane %v8420_v30, 1  ;;  %v3249_v0 = vadd.f32 %v3248_v4, %v3247_v43  ;;  %v9446_v43 = vld [vmem:[#allocation40_spill] sm:$0xff]  ;;  %v9447_v4 = vld [vmem:[#allocation42_spill] sm:$0xff] }
0x1217   : > { %3394 = vmatprep.mubr.f32.mxu0 %v8423_v19  ;;  %3471 = vmatprep.mubr.f32.mxu1 %v8423_v19  ;;  %v8429_v47 = vsel %vm4205_vm12, %v8206_v62, %v3249_v0  ;;  %v9448_v0 = vld [vmem:[#allocation33_spill] sm:$0xff] }
0x1218   : > { %3395 = vmatmul.mubr.f32.vlgmr.msra.gmra.mrb[32].mxu0 %v8420_v30  ;;  %3472 = vmatmul.mubr.f32.vlgmr.msra.gmra.mrb[32].mxu1 %v8420_v30 }
0x1219   : > { %6027 = vmatpush3.bf16.msra.mxu0 %v9162_v34  ;;  %6059 = vmatpush1.bf16.msra.mxu1 %v9163_v45  ;;  %v3272_v11 = vpop.permute.xlu0 %3271 }
0x121a   : > { %6029 = vmatprep.subr.bf16.mxu0 %v9164_v57  ;;  %6061 = vmatprep.subr.bf16.mxu1 %v9165_v61 }
0x121d   : > { %6031 = vmatpush3.bf16.msra.mxu0 %v9226_v60  ;;  %v3294_v26 = vpop.permute.xlu1 %3293  ;;  %6063 = vmatpush1.bf16.msra.mxu1 %v9227_v53  ;;  %v3192_v62 = vpop.permute.xlu0 %3191 }
0x121e   : > { %6033 = vmatprep.subr.bf16.mxu0 %v9228_v36  ;;  %6065 = vmatprep.subr.bf16.mxu1 %v9229_v38  ;;  %v3227_v27 = vmul.f32 %v3192_v62, %v8237_v16  ;;  %v3237_v31 = vmul.f32 %v3192_v62, %v8239_v5  ;;  %v9451_v62 = vld [vmem:[#allocation46_spill] sm:$0xff] }
0x1221   : > { %6035 = vmatpush3.bf16.msra.mxu0 %v9230_v35  ;;  %v3223_v45 = vpop.permute.xlu1 %3222  ;;  %6067 = vmatpush1.bf16.msra.mxu1 %v9297_v58  ;;  %v3209_v17 = vpop.permute.xlu0 %3208 }
0x1222   : > { %v3225_v61 = vmul.f32 %v3223_v45, %v8356_v29  ;;  %v3235_v52 = vmul.f32 %v3223_v45, %v8344_v15  ;;  %6037 = vmatprep.subr.bf16.mxu0 %v9169_v24  ;;  %6069 = vmatprep.subr.bf16.mxu1 %v7057_v59  ;;  %v3231_v53 = vmul.f32 %v3209_v17, %v8244_v39  ;;  %v9453_v45 = vld [vmem:[#allocation39_spill] sm:$0xff] }
0x1223   : > { %v3241_v8 = vmul.f32 %v3209_v17, %v9435_v56  ;;  %v3297_v59 = vmul.f32 %v3294_v26, %v8237_v16  ;;  %v3305_v39 = vmul.f32 %v3294_v26, %v8239_v5  ;;  %v9450_v26 = vld [vmem:[#allocation44_spill] sm:$0xff]  ;;  %v9457_v17 = vld [vmem:[#allocation43_spill] sm:$0xff] }
0x1224   : > { %v3239_v38 = vadd.f32 %v3237_v31, %v3235_v52  ;;  %v3250_v13 = vrot.slane %v3225_v61, 4  ;;  %v3229_v42 = vadd.f32 %v3227_v27, %v3225_v61  ;;  %v9452_v27 = vld [vmem:[#allocation37_spill] sm:$0xff]  ;;  %v9454_v31 = vld [vmem:[#allocation48_spill] sm:$0xff] }
0x1225   : > { %6039 = vmatpush3.bf16.msra.mxu0 %v7309_v37  ;;  %6071 = vmatpush1.bf16.msra.mxu1 %v9171_v12  ;;  %v9456_v52 = vld [vmem:[#allocation41_spill] sm:$0xff]  ;;  %v9462_v56 = vld [vmem:[#allocation56_spill] sm:$0xff] }
0x1226   : > { %v3251_v58 = vadd.f32 %v3250_v13, %v3225_v61  ;;  %v3233_v29 = vadd.f32 %v3231_v53, %v3229_v42  ;;  %v3243_v15 = vadd.f32 %v3241_v8, %v3239_v38  ;;  %6041 = vmatprep.subr.bf16.mxu0 %v9172_v1  ;;  %6073 = vmatprep.subr.bf16.mxu1 %v7063_v9  ;;  %v9455_v61 = vld [vmem:[#allocation50_spill] sm:$0xff]  ;;  %v9458_v53 = vld [vmem:[#allocation52_spill] sm:$0xff]  ;;  %v9460_v13 = vld [vmem:[#allocation45_spill] sm:$0xff] }
0x1227   : > { %v9459_v38 = vld [vmem:[#allocation54_spill] sm:$0xff]  ;;  %v9461_v42 = vld [vmem:[#allocation47_spill] sm:$0xff]  ;;  %v9463_v8 = vld [vmem:[#allocation68_spill] sm:$0xff] }
0x1228   : > { %v3252_v14 = vrot.slane %v3251_v58, 2  ;;  %v3275_v2 = vmul.f32 %v3272_v11, %v3233_v29  ;;  %v3303_v22 = vmul.f32 %v3272_v11, %v3243_v15  ;;  %v9449_v11 = vld [vmem:[#allocation35_spill] sm:$0xff]  ;;  %v9466_v15 = vld [vmem:[#allocation69_spill] sm:$0xff] }
0x1229   : > { %6043 = vmatpush3.bf16.msra.mxu0 %v7317_v46  ;;  %6075 = vmatpush1.bf16.msra.mxu1 %v7066_v18  ;;  %v9465_v29 = vld [vmem:[#allocation51_spill] sm:$0xff] }
0x122a   : > { %v3253_v21 = vadd.f32 %v3252_v14, %v3251_v58  ;;  %v8460_v12 = vadd.f32 %v3297_v59, %v3275_v2  ;;  %v8462_v10 = vadd.f32 %v3305_v39, %v3303_v22  ;;  %6045 = vmatprep.subr.bf16.mxu0 %v9173_v54  ;;  %6077 = vmatprep.subr.bf16.mxu1 %v7069_v20  ;;  %v9436_v20 = vld [vmem:[#allocation26_spill] sm:$0xff]  ;;  %v9464_v58 = vld [vmem:[#allocation49_spill] sm:$0xff]  ;;  %v9467_v59 = vld [vmem:[#allocation72_spill] sm:$0xff] }
0x122b   : > { %v9468_v39 = vld [vmem:[#allocation53_spill] sm:$0xff]  ;;  %v9469_v14 = vld [vmem:[#allocation55_spill] sm:$0xff]  ;;  %v9471_v22 = vld [vmem:[#allocation58_spill] sm:$0xff] }
0x122c   : > { %v3254_v9 = vrot.slane %v3253_v21, 1  ;;  %v8467_v16 = vrot.slane %v8460_v12, 1  ;;  %v9470_v2 = vld [vmem:[#allocation57_spill] sm:$0xff] }
0x122d   : > { %6047 = vmatpush3.bf16.msra.mxu0 %v7325_v55  ;;  %6079 = vmatpush1.bf16.msra.mxu1 %v7075_v32  ;;  %v9437_v32 = vld [vmem:[#allocation27_spill] sm:$0xff] }
0x122e   : > { %v3255_v5 = vadd.f32 %v3254_v9, %v3253_v21  ;;  %3400 = vmatprep.mubr.f32.mxu0 %v8467_v16  ;;  %3477 = vmatprep.mubr.f32.mxu1 %v8467_v16  ;;  %v9472_v21 = vld [vmem:[#allocation59_spill] sm:$0xff]  ;;  %v9473_v9 = vld [vmem:[#allocation60_spill] sm:$0xff] }
0x122f   : > { %3401 = vmatmul.mubr.f32.gmra.mrb[34].mxu0 %v8460_v12  ;;  %3478 = vmatmul.mubr.f32.gmra.mrb[34].mxu1 %v8460_v12 }
0x1230   : > { %v8477_v18 = vsel %vm4205_vm12, %v8254_v33, %v3255_v5  ;;  %6049 = vmatprep.subr.bf16.mxu0 %v7328_v28  ;;  %3548 = vmatprep.mubr.f32.mxu0 %v8423_v19  ;;  %v9444_v33 = vld [vmem:[#allocation30_spill] sm:$0xff]  ;;  %v9474_v5 = vld [vmem:[#allocation61_spill] sm:$0xff] }
0x1231   : > { %6051 = vmatpush3.bf16.msra.mxu0 %v7333_v6  ;;  %6081 = vmatprep.subr.bf16.mxu1 %v7083_v40  ;;  %v9438_v40 = vld [vmem:[#allocation32_spill] sm:$0xff] }
0x1232   : > { %6053 = vmatprep.subr.bf16.mxu0 %v7336_v25  ;;  %6083 = vmatpush1.bf16.msra.mxu1 %v7087_v48  ;;  %v9439_v48 = vld [vmem:[#allocation34_spill] sm:$0xff] }
0x1233   : > { %6085 = vmatprep.subr.bf16.mxu1 %v7093_v51  ;;  %v9440_v51 = vld [vmem:[#allocation28_spill] sm:$0xff] }
0x1235   : > { %6055 = vmatpush3.bf16.msra.mxu0 %v7341_v41 }
0x1236   : > { %6121 = vmatprep.subr.bf16.mxu0 %v7071_v23  ;;  %6087 = vmatpush1.bf16.msra.mxu1 %v7100_v63  ;;  %v9441_v23 = vld [vmem:[#allocation29_spill] sm:$0xff]  ;;  %v9442_v63 = vld [vmem:[#allocation36_spill] sm:$0xff] }
0x1237   : > { %6089 = vmatprep.subr.bf16.mxu1 %v7106_v3  ;;  %v9443_v3 = vld [vmem:[#allocation38_spill] sm:$0xff] }
0x1238   : > { %3549 = vmatmul.mubr.f32.vlgmr.msra.gmra.mrb[36].mxu0 %v8420_v30 }
0x1239   : > { %3553 = vmatprep.mubr.f32.mxu0 %v8467_v16  ;;  %6123 = vmatpush1.bf16.msra.mxu0 %v9436_v20  ;;  %v9475_v20 = vld [vmem:[#allocation62_spill] sm:$0xff] }
0x123a   : > { %6125 = vmatprep.subr.bf16.mxu0 %v9437_v32  ;;  %6091 = vmatpush1.bf16.msra.mxu1 %v9438_v40  ;;  %v9476_v32 = vld [vmem:[#allocation63_spill] sm:$0xff]  ;;  %v9477_v40 = vld [vmem:[#allocation64_spill] sm:$0xff] }
0x123b   : > { %6093 = vmatprep.subr.bf16.mxu1 %v9439_v48  ;;  %v9478_v48 = vld [vmem:[#allocation65_spill] sm:$0xff] }
0x123c   : > { %3554 = vmatmul.mubr.f32.gmra.mrb[38].mxu0 %v8460_v12 }
0x123d   : > { %6127 = vmatpush1.bf16.msra.mxu0 %v9440_v51  ;;  %v9479_v51 = vld [vmem:[#allocation66_spill] sm:$0xff] }
0x123e   : > { %6129 = vmatprep.subr.bf16.mxu0 %v9441_v23  ;;  %6095 = vmatpush1.bf16.msra.mxu1 %v9442_v63  ;;  %v9480_v23 = vld [vmem:[#allocation67_spill] sm:$0xff]  ;;  %v9481_v63 = vld [vmem:[#allocation70_spill] sm:$0xff] }
0x123f   : > { %6097 = vmatprep.subr.bf16.mxu1 %v9443_v3  ;;  %v9482_v3 = vld [vmem:[#allocation71_spill] sm:$0xff] }
0x1241   : > { %6131 = vmatpush1.bf16.msra.mxu0 %v9444_v33 }
0x1242   : > { %6133 = vmatprep.subr.bf16.mxu0 %v9445_v7  ;;  %6099 = vmatpush1.bf16.msra.mxu1 %v9446_v43  ;;  %v9483_v43 = vld [vmem:[#allocation86_spill] sm:$0xff] }
0x1243   : > { %6101 = vmatprep.subr.bf16.mxu1 %v9447_v4 }
0x1245   : > { %6135 = vmatpush1.bf16.msra.mxu0 %v9448_v0  ;;  %v9484_v0 = vld [vmem:[#allocation87_spill] sm:$0xff] }
0x1246   : > { %6137 = vmatprep.subr.bf16.mxu0 %v9449_v11  ;;  %6103 = vmatpush1.bf16.msra.mxu1 %v9450_v26 }
0x1247   : > { %6105 = vmatprep.subr.bf16.mxu1 %v9451_v62 }
0x1249   : > { %6139 = vmatpush1.bf16.msra.mxu0 %v9452_v27  ;;  %v9485_v27 = vld [vmem:[#allocation88_spill] sm:$0xff] }
0x124a   : > { %6141 = vmatprep.subr.bf16.mxu0 %v9453_v45  ;;  %6107 = vmatpush1.bf16.msra.mxu1 %v9454_v31 }
0x124b   : > { %6109 = vmatprep.subr.bf16.mxu1 %v9455_v61 }
0x124d   : > { %6143 = vmatpush1.bf16.msra.mxu0 %v9456_v52 }
0x124e   : > { %6145 = vmatprep.subr.bf16.mxu0 %v9457_v17  ;;  %6111 = vmatpush1.bf16.msra.mxu1 %v9458_v53  ;;  %v9486_v17 = vld [vmem:[#allocation89_spill] sm:$0xff] }
0x124f   : > { %6113 = vmatprep.subr.bf16.mxu1 %v9459_v38 }
0x1251   : > { %6147 = vmatpush1.bf16.msra.mxu0 %v9460_v13 }
0x1252   : > { %6149 = vmatprep.subr.bf16.mxu0 %v9461_v42  ;;  %6115 = vmatpush1.bf16.msra.mxu1 %v9462_v56 }
0x1253   : > { %6117 = vmatprep.subr.bf16.mxu1 %v9463_v8 }
0x1255   : > { %6151 = vmatpush1.bf16.msra.mxu0 %v9464_v58 }
0x1256   : > { %6153 = vmatprep.subr.bf16.mxu0 %v9465_v29  ;;  %6119 = vmatpush1.bf16.msra.mxu1 %v9466_v15  ;;  %v3304_v29 = vmul.f32 %v8407_v50, %v8325_v44 }
0x1257   : > { %6185 = vmatprep.subr.bf16.mxu1 %v9467_v59 }
0x1259   : > { %6155 = vmatpush1.bf16.msra.mxu0 %v9468_v39  ;;  %v8547_v39 = vadd.f32 %v3304_v29, %v8418_v49 }
0x125a   : > { %6157 = vmatprep.subr.bf16.mxu0 %v9469_v14 }
0x125b   : > { %v3324_v44 = vrot.slane %v8547_v39, 1 }
0x125d   : > { %6159 = vmatpush1.bf16.msra.mxu0 %v9470_v2 }
0x125e   : > { %6161 = vmatprep.subr.bf16.mxu0 %v9471_v22 }
0x1261   : > { %6163 = vmatpush1.bf16.msra.mxu0 %v9472_v21 }
0x1262   : > { %6165 = vmatprep.subr.bf16.mxu0 %v9473_v9 }
0x1265   : > { %6167 = vmatpush1.bf16.msra.mxu0 %v9474_v5 }
0x1266   : > { %6169 = vmatprep.subr.bf16.mxu0 %v9475_v20 }
0x1269   : > { %6171 = vmatpush1.bf16.msra.mxu0 %v9476_v32 }
0x126a   : > { %6173 = vmatprep.subr.bf16.mxu0 %v9477_v40 }
0x126d   : > { %6175 = vmatpush1.bf16.msra.mxu0 %v9478_v48 }
0x126e   : > { %6177 = vmatprep.subr.bf16.mxu0 %v9479_v51 }
0x1271   : > { %6179 = vmatpush1.bf16.msra.mxu0 %v9480_v23 }
0x1272   : > { %6181 = vmatprep.subr.bf16.mxu0 %v9481_v63 }
0x1275   : > { %6183 = vmatpush1.bf16.msra.mxu0 %v9482_v3 }
0x12eb   : > { %v3396_v33 = vpop.f32.mrb[32].mxu0  ;;  %v3473_v7 = vpop.f32.mrb[32].mxu1 }
0x12ec   : > { %v3559_v4 = vadd.f32 %v3396_v33, %v9483_v43  ;;  %v3561_v11 = vadd.f32 %v3473_v7, %v9484_v0  ;;  %v3398_v26 = vpop.f32.mrb[33].mxu0  ;;  %v3475_v62 = vpop.f32.mrb[33].mxu1 }
0x12ed   : > { %v3560_v45 = vadd.f32 %v3398_v26, %v9485_v27  ;;  %v3562_v53 = vadd.f32 %v3475_v62, %v9486_v17  ;;  %v9487_v62 = vld [vmem:[#allocation75_spill] sm:$0xff] }
0x12ee   : > { %v4763_v31 = vmul.f32 -1.442695, %v3559_v4  ;;  %v4761_v61 = vmul.f32 -1.442695, %v3561_v11 }
0x12ef   : > { %v4759_v52 = vmul.f32 -1.442695, %v3560_v45 }
0x12f0   : > { %6506 = vpow2.f32 %v4763_v31 }
0x12f1   : > { %6508 = vpow2.f32 %v4761_v61 }
0x12f2   : > { %6510 = vpow2.f32 %v4759_v52 }
0x12f3   : > { %6512 = vtanh.f32 %v3562_v53 }
0x12fa   : > { %v6507_v38 = vpop.eup %6506 }
0x12fb   : > { %v6509_v13 = vpop.eup %6508  ;;  %v3607_v42 = vadd.f32 1.0, %v6507_v38 }
0x12fc   : > { %v6511_v56 = vpop.eup %6510  ;;  %v3589_v8 = vadd.f32 1.0, %v6509_v13 }
0x12fd   : > { %6514 = vrcp.f32 %v3607_v42  ;;  %v3575_v58 = vadd.f32 1.0, %v6511_v56  ;;  %v6513_v32 = vpop.eup %6512 }
0x12fe   : > { %6516 = vrcp.f32 %v3589_v8 }
0x12ff   : > { %6518 = vrcp.f32 %v3575_v58 }
0x1302   : > { %v3402_v15 = vpop.f32.mrb[34].mxu0  ;;  %v3479_v59 = vpop.f32.mrb[34].mxu1 }
0x1303   : > { %v3564_v14 = vadd.f32 %v3402_v15, %v9483_v43  ;;  %v3566_v2 = vadd.f32 %v3479_v59, %v9484_v0  ;;  %v3404_v22 = vpop.f32.mrb[35].mxu0  ;;  %v3481_v21 = vpop.f32.mrb[35].mxu1 }
0x1304   : > { %v3565_v9 = vadd.f32 %v3404_v22, %v9485_v27  ;;  %v3567_v26 = vadd.f32 %v3481_v21, %v9486_v17  ;;  %v3325_v22 = vrot.slane %v8462_v10, 1 }
0x1305   : > { %v4764_v5 = vmul.f32 -1.442695, %v3564_v14  ;;  %v4762_v20 = vmul.f32 -1.442695, %v3566_v2 }
0x1306   : > { %v4760_v40 = vmul.f32 -1.442695, %v3565_v9 }
0x1307   : > { %v6515_v48 = vpop.eup %6514  ;;  %6520 = vpow2.f32 %v4764_v5 }
0x1308   : > { %v6517_v50 = vpop.eup %6516  ;;  %v3613_v51 = vmul.f32 %v6515_v48, %v6513_v32  ;;  %6522 = vpow2.f32 %v4762_v20 }
0x1309   : > { %v6519_v49 = vpop.eup %6518  ;;  %v3595_v23 = vmul.f32 %v6517_v50, %v3324_v44  ;;  %6524 = vpow2.f32 %v4760_v40 }
0x130a   : > { %v3581_v63 = vmul.f32 %v6519_v49, %v8547_v39  ;;  %6526 = vtanh.f32 %v3567_v26 }
0x130b   : > { %v5020_v3 = vpop.f32.mrb[36].mxu0 }
0x130c   : > { %v3597_v33 = vadd.f32 %v3595_v23, %v3581_v63  ;;  %v5021_v7 = vpop.f32.mrb[37].mxu0 }
0x130d   : > { %v5022_v4 = vadd.f32 %v5021_v7, %v5020_v3 }
0x130e   : > { %v8556_v11 = vadd.f32 %v3613_v51, %v3597_v33  ;;  %v9488_v33 = vld [vmem:[#allocation93_spill] sm:$0xff] }
0x130f   : > { %v3563_v45 = vadd.f32 %v5022_v4, %v9487_v62  ;;  %v5023_v31 = vpop.f32.mrb[38].mxu0 }
0x1310   : > { %v5024_v61 = vpop.f32.mrb[39].mxu0 }
0x1311   : > { %v6521_v52 = vpop.eup %6520  ;;  %v4765_v53 = vmul.f32 -1.442695, %v3563_v45  ;;  %v5025_v38 = vadd.f32 %v5024_v61, %v5023_v31 }
0x1312   : > { %v6523_v13 = vpop.eup %6522  ;;  %v3608_v42 = vadd.f32 1.0, %v6521_v52  ;;  %v9489_v52 = vld [vmem:[#allocation90_spill] sm:$0xff] }
0x1313   : > { %v6525_v56 = vpop.eup %6524  ;;  %v3590_v8 = vadd.f32 1.0, %v6523_v13  ;;  %6528 = vpow2.f32 %v4765_v53  ;;  %v3568_v58 = vadd.f32 %v5025_v38, %v9487_v62  ;;  %v3645_v53 = vadd.f32 6.0, %v9489_v52  ;;  %v9490_v13 = vld [vmem:[#allocation91_spill] sm:$0xff] }
0x1314   : > { %6530 = vrcp.f32 %v3608_v42  ;;  %v3576_v29 = vadd.f32 1.0, %v6525_v56  ;;  %v6527_v59 = vpop.eup %6526 }
0x1315   : > { %6532 = vrcp.f32 %v3590_v8  ;;  %v4766_v15 = vmul.f32 -1.442695, %v3568_v58  ;;  %v9491_v8 = vld [vmem:[#allocation92_spill] sm:$0xff] }
0x1316   : > { %6534 = vrcp.f32 %v3576_v29  ;;  %vm3646_vm13 = vcmp.lt.f32.partialorder %v3645_v53, %v9491_v8 }
0x1317   : > { %6536 = vpow2.f32 %v4766_v15 }
0x1318   : > { %6538 = vtanh.f32 %v8556_v11 }
0x131d   : > { %v6529_v14 = vpop.eup %6528 }
0x131e   : > { %v6531_v2 = vpop.eup %6530  ;;  %v3623_v21 = vadd.f32 1.0, %v6529_v14  ;;  %v9493_v14 = vmov 0.0  }
0x131f   : > { %v6533_v9 = vpop.eup %6532  ;;  %v3614_v5 = vmul.f32 %v6531_v2, %v6527_v59  ;;  %v9492_v59 = vld [vmem:[#allocation79_spill] sm:$0xff] }
0x1320   : > { %v6535_v20 = vpop.eup %6534  ;;  %v3596_v32 = vmul.f32 %v6533_v9, %v3325_v22  ;;  %6540 = vrcp.f32 %v3623_v21  ;;  %vm4767_vm14 = vcmp.gt.f32.partialorder %v9492_v59, 6.0  ;;  %v9494_v21 = vld [vmem:[#allocation74_spill] sm:$0xff]  ;;  %vm4782_vm6 = vcmp.gt.f32.partialorder %v9492_v59, 7.0 }
0x1321   : > { %v6537_v40 = vpop.eup %6536  ;;  %v3582_v48 = vmul.f32 %v6535_v20, %v8462_v10  ;;  %v4769_v2 = vsel %vm4767_vm14, 1.0, %v9493_v14 }
0x1322   : > { %v3624_v50 = vadd.f32 1.0, %v6537_v40  ;;  %v6539_v23 = vpop.eup %6538  ;;  %v3756_v9 = vrot.slane %v4769_v2, %v9494_v21  ;;  %v3771_v40 = vsub.f32 1.0, %v4769_v2  ;;  %v4784_v2 = vsel %vm4782_vm6, 1.0, %v9493_v14 }
0x1323   : > { %v3598_v51 = vadd.f32 %v3596_v32, %v3582_v48 }
0x1324   : > { %6542 = vrcp.f32 %v3624_v50  ;;  %v3778_v48 = vrot.slane %v3771_v40, %v9494_v21 }
0x1325   : > { %v8566_v49 = vadd.f32 %v3614_v5, %v3598_v51  ;;  %v9495_v51 = vld [vmem:[#allocation22_spill] sm:$0xff] }
0x1326   : > { %vm4783_vm7 = vcmp.gt.f32.partialorder %v9495_v51, 7.0 }
0x1327   : > { %6544 = vtanh.f32 %v8566_v49 }
0x132a   : > { %v6541_v63 = vpop.eup %6540 }
0x132b   : > { %v8569_v3 = vmul.f32 %v6541_v63, %v6539_v23 }
0x132d   : > { %v3639_v7 = vmul.f32 %v9488_v33, %v8569_v3 }
0x132e   : > { %v6543_v4 = vpop.eup %6542 }
0x132f   : > { %3641 = vadd.xlane.f32.xlu1 %v3639_v7 }
0x1331   : > { %v6545_v26 = vpop.eup %6544 }
0x1332   : > { %v8573_v45 = vmul.f32 %v6545_v26, %v6543_v4  ;;  %v9496_v4 = vld [vmem:[#allocation76_spill] sm:$0xff] }
0x1334   : > { %v3640_v31 = vmul.f32 %v9488_v33, %v8573_v45 }
0x1336   : > { %3643 = vadd.xlane.f32.xlu0 %v3640_v31 }
0x13bc   : > { %v3642_v61 = vpop.xlane.xlu1 %3641 }
0x13bd   : > { %v3652_v42 = vrot.slane %v3642_v61, %v9490_v13 }
0x13c3   : > { %v3644_v38 = vpop.xlane.xlu0 %3643 }
0x13c4   : > { %v3656_v56 = vrot.slane %v3644_v38, %v9490_v13 }
0x13c6   : > { %v3657_v58 = vsel %vm1180_vm0, %v3656_v56, %v3652_v42  ;;  %vm4768_vm0 = vcmp.gt.f32.partialorder %v9495_v51, 6.0  ;;  %v4154_v51 = vsub.f32 1.0, %v4784_v2 }
0x13c7   : > { %v3659_v29 = vsel %vm3646_vm13, %v3657_v58, -1e+30  ;;  %v4770_v31 = vsel %vm4768_vm0, 1.0, %v9493_v14 }
0x13c8   : > { %v3660_v15 = vsel %vm1184_vm1, %v3659_v29, -inf  ;;  %v3760_v13 = vrot.slane %v4770_v31, %v9494_v21 }
0x13c9   : > { %3661 = vmax.xlane.f32.xlu0 %v3660_v15 }
0x13df   : > { %3762 = vperm.xlu0 %6300, %v3756_v9   ;;  %v4785_v9 = vsel %vm4783_vm7, 1.0, %v9493_v14 }
0x1456   : > { %v3662_v5 = vpop.xlane.xlu0 %3661 }
0x1457   : > { %vm3663_vm15 = vcmp.ge.f32.partialorder %v3659_v29, %v3662_v5  ;;  %v9497_v29 = vld [vmem:[#allocation80_spill] sm:$0xff]  ;;  %v9498_v5 = vld [vmem:[#allocation23_spill] sm:$0xff] }
0x1458   : > { %v3664_v20 = vsel %vm3663_vm15, %v9489_v52, 8.0 }
0x1459   : > { %v3665_v32 = vsel %vm1184_vm1, %v3664_v20, inf  ;;  %vm4208_vm1 = vcmask 1044480  }
0x145a   : > { %3666 = vmin.xlane.f32.xlu1 %v3665_v32  ;;  %v9499_v32 = vld [vmem:[#allocation73_spill] sm:$0xff] }
0x146b   : > { %3784 = vperm.xlu1 %6299, %v3778_v48   ;;  %v4139_v48 = vrot.slane %v4784_v2, %v9494_v21 }
0x14e7   : > { %v3667_v50 = vpop.xlane.xlu1 %3666 }
0x14e8   : > { %vm3668_vm2 = vcmp.eq.f32.partialorder %v9489_v52, %v3667_v50  ;;  %vm3671_vm3 = vcmp.lt.f32.partialorder %v9489_v52, %v3667_v50  ;;  %vm3688_vm4 = vcmp.gt.f32.partialorder %v9489_v52, %v3667_v50  ;;  %v3772_v52 = vsub.f32 1.0, %v4770_v31 }
0x14e9   : > { %v4772_v23 = vsel %vm3671_vm3, 1.0, %v9493_v14  ;;  %v4771_v63 = vsel %vm3668_vm2, 1.0, %v9493_v14  ;;  %v4773_v61 = vsel %vm3688_vm4, 1.0, %v9493_v14  ;;  %v4143_v50 = vrot.slane %v4785_v9, %v9494_v21 }
0x14ea   : > { %v3677_v33 = vrot.slane %v4772_v23, %v9494_v21  ;;  %v3708_v7 = vrot.slane %v4771_v63, %v9494_v21  ;;  %v4346_v26 = vrot.slane %v4771_v63, %v9496_v4  ;;  %v3694_v8 = vrot.slane %v4773_v61, %v9494_v21 }
0x14eb   : > { %v3782_v59 = vrot.slane %v3772_v52, %v9494_v21  ;;  %v3684_v40 = vrot.slane %v4772_v23, %v9499_v32  ;;  %v6301_v14 = vpack.i.bf16 %v4143_v50, %v4139_v48  ;;  %v8628_v31 = vpop.permute.xlu1 %3784 }
0x14ec   : > { %3679 = vbcast.lane.b32.xlu1 %v3677_v33, 256  ;;  %v4347_v53 = vcombine.high %v4346_v26, %v4346_v26  ;;  %v4354_v38 = vrot.slane %v4346_v26, %v9496_v4  ;;  %3710 = vbcast.lane.b32.xlu0 %v3708_v7, 256  ;;  %v3715_v33 = vrot.slane %v4771_v63, %v9499_v32 }
0x14ed   : > { %v3701_v7 = vrot.slane %v4773_v61, %v9499_v32  ;;  %v4161_v26 = vrot.slane %v4154_v51, %v9494_v21 }
0x14ee   : > { %v4361_v42 = vrot.slane %v4347_v53, %v9496_v4  ;;  %v4405_v56 = vrot.slane %v4354_v38, %v9494_v21  ;;  %v4155_v4 = vsub.f32 1.0, %v4785_v9  ;;  %v3763_v53 = vpop.permute.xlu0 %3762 }
0x14f0   : > { %v4409_v58 = vrot.slane %v4361_v42, %v9494_v21  ;;  %v4420_v15 = vsel %vm4208_vm1, %v9497_v29, %v4405_v56  ;;  %3696 = vbcast.lane.b32.xlu1 %v3694_v8, 256  ;;  %3766 = vperm.xlu0 %6300, %v3760_v13   ;;  %v4165_v23 = vrot.slane %v4155_v4, %v9494_v21 }
0x14f1   : > { %4423 = vst.msk [vmem:[%s466_s26] sm:$0x3f] %vm4422_vm5, %v4420_v15 }
0x14f2   : > { %v4421_v20 = vsel %vm4208_vm1, %v9498_v5, %v4409_v58 }
0x14f3   : > { %4424 = vst.msk [vmem:[%s466_s26 + $0x8] sm:$0x3f] %vm4422_vm5, %v4421_v20  ;;  %v3791_v20 = vmul.f32 %v8628_v31, %v8420_v30  ;;  %s6682_s26 = sshll.u32 %s6794_s18, 4  ;;  %s6683_s26 = int_to_ptr.vmem [resolvable:$false] %s6682_s26 }
0x14f4   : > { %3788 = vperm.xlu1 %6299, %v3782_v59   ;;  %3686 = vbcast.lane.b32.xlu0 %v3684_v40, 256  ;;  %s6684_s27 = scalar_lea.vmem %s6683_s26, 64  ;;  %p6685_p9 = scmp.lt.s32.totalorder %s8722_s25, %s6683_s26 }
0x14f5   : > { %p6686_p12 = scmp.lt.s32.totalorder %s6684_s27, %s6678_s24 }
0x14f7   : > { %p6687_p2 = por %p6686_p12, %p6685_p9 }
0x14f8   : > { %3717 = vbcast.lane.b32.xlu1 %v3715_v33, 256  ;;  %3703 = vbcast.lane.b32.xlu0 %v3701_v7, 256 }
0x14f9   : > { %p6688_p13 = pnand %p6687_p2, %p6681_p5 }
0x14fc   : > { %6302 = vperm.xlu1 %6299, %v6301_v14   ;;  %4167 = vperm.xlu0 %6300, %v4161_v26  }
0x1500   : > { %4171 = vperm.xlu1 %6299, %v4165_v23  }
0x155e   : > { %v3680_v38 = vpop.permute.xlu1 %3679  ;;  %v3711_v61 = vpop.permute.xlu0 %3710 }
0x155f   : > { %v3721_v52 = vmul.f32 %v3680_v38, %v8420_v30  ;;  %v3731_v63 = vmul.f32 %v3680_v38, %v8547_v39  ;;  %v3719_v13 = vmul.f32 %v3711_v61, %v8569_v3  ;;  %v3729_v42 = vmul.f32 %v3711_v61, %v8556_v11 }
0x1561   : > { %v3733_v56 = vadd.f32 %v3731_v63, %v3729_v42  ;;  %v3739_v8 = vrot.slane %v3719_v13, 4  ;;  %v3723_v29 = vadd.f32 %v3721_v52, %v3719_v13 }
0x1562   : > { %v3697_v58 = vpop.permute.xlu1 %3696 }
0x1563   : > { %v3725_v21 = vmul.f32 %v3697_v58, %v8423_v19  ;;  %v3735_v15 = vmul.f32 %v3697_v58, %v3324_v44  ;;  %v3740_v59 = vadd.f32 %v3739_v8, %v3719_v13 }
0x1565   : > { %v3727_v2 = vadd.f32 %v3725_v21, %v3723_v29  ;;  %v3737_v9 = vadd.f32 %v3735_v15, %v3733_v56  ;;  %v3741_v5 = vrot.slane %v3740_v59, 2 }
0x1567   : > { %v3769_v32 = vmul.f32 %v3763_v53, %v3727_v2  ;;  %v8639_v3 = vmul.f32 %v3763_v53, %v3737_v9  ;;  %v3742_v11 = vadd.f32 %v3741_v5, %v3740_v59  ;;  %v3799_v9 = vmul.f32 %v8628_v31, %v8547_v39 }
0x1569   : > { %v8641_v40 = vadd.f32 %v3791_v20, %v3769_v32  ;;  %v3743_v48 = vrot.slane %v3742_v11, 1  ;;  %v3801_v5 = vadd.f32 %v3799_v9, %v8639_v3 }
0x156b   : > { %v3811_v50 = vrot.slane %v8641_v40, 1  ;;  %v3744_v19 = vadd.f32 %v3743_v48, %v3742_v11 }
0x156d   : > { %3889 = vmatprep.mubr.f32.mxu1 %v3811_v50  ;;  %3966 = vmatprep.mubr.f32.mxu0 %v3811_v50  ;;  %v8646_v44 = vsel %vm4208_vm1, %v8429_v47, %v3744_v19 }
0x156e   : > { %3890 = vmatmul.mubr.f32.vlgmr.msra.gmra.mrb[36].mxu1 %v8641_v40  ;;  %3967 = vmatmul.mubr.f32.vlgmr.msra.gmra.mrb[40].mxu0 %v8641_v40 }
0x156f   : > { %6187 = vmatpush3.bf16.msra.mxu1 %v9162_v34  ;;  %v3767_v30 = vpop.permute.xlu0 %3766 }
0x1570   : > { %6189 = vmatprep.subr.bf16.mxu1 %v9164_v57 }
0x1573   : > { %6191 = vmatpush3.bf16.msra.mxu1 %v9226_v60  ;;  %v3789_v51 = vpop.permute.xlu1 %3788  ;;  %v3687_v33 = vpop.permute.xlu0 %3686 }
0x1574   : > { %6193 = vmatprep.subr.bf16.mxu1 %v9228_v36  ;;  %v3722_v47 = vmul.f32 %v3687_v33, %v8460_v12  ;;  %v3732_v14 = vmul.f32 %v3687_v33, %v8462_v10 }
0x1577   : > { %6195 = vmatpush3.bf16.msra.mxu1 %v9230_v35  ;;  %v3718_v7 = vpop.permute.xlu1 %3717  ;;  %v3704_v26 = vpop.permute.xlu0 %3703 }
0x1578   : > { %v3720_v4 = vmul.f32 %v3718_v7, %v8573_v45  ;;  %v3730_v34 = vmul.f32 %v3718_v7, %v8566_v49  ;;  %6197 = vmatprep.subr.bf16.mxu1 %v9169_v24  ;;  %v3726_v57 = vmul.f32 %v3704_v26, %v8467_v16  ;;  %v3736_v36 = vmul.f32 %v3704_v26, %v3325_v22 }
0x1579   : > { %v3792_v49 = vmul.f32 %v3789_v51, %v8460_v12  ;;  %v3800_v45 = vmul.f32 %v3789_v51, %v8462_v10 }
0x157a   : > { %v3734_v60 = vadd.f32 %v3732_v14, %v3730_v34  ;;  %v3745_v23 = vrot.slane %v3720_v4, 4  ;;  %v3724_v53 = vadd.f32 %v3722_v47, %v3720_v4  ;;  %v3819_v14 = vrot.slane %v3801_v5, 1 }
0x157b   : > { %6199 = vmatpush3.bf16.msra.mxu1 %v7309_v37 }
0x157c   : > { %v3746_v35 = vadd.f32 %v3745_v23, %v3720_v4  ;;  %v3728_v38 = vadd.f32 %v3726_v57, %v3724_v53  ;;  %v3738_v52 = vadd.f32 %v3736_v36, %v3734_v60  ;;  %6201 = vmatprep.subr.bf16.mxu1 %v9172_v1  ;;  %v4168_v60 = vpop.permute.xlu0 %4167 }
0x157e   : > { %v3747_v24 = vrot.slane %v3746_v35, 2  ;;  %v3770_v63 = vmul.f32 %v3767_v30, %v3728_v38  ;;  %v3798_v16 = vmul.f32 %v3767_v30, %v3738_v52  ;;  %v4182_v52 = vmul.f32 %v4168_v60, %v3801_v5 }
0x157f   : > { %6203 = vmatpush3.bf16.msra.mxu1 %v7317_v46 }
0x1580   : > { %v3748_v61 = vadd.f32 %v3747_v24, %v3746_v35  ;;  %v8668_v13 = vadd.f32 %v3792_v49, %v3770_v63  ;;  %v8670_v22 = vadd.f32 %v3800_v45, %v3798_v16  ;;  %6205 = vmatprep.subr.bf16.mxu1 %v9173_v54 }
0x1582   : > { %v3749_v37 = vrot.slane %v3748_v61, 1  ;;  %v3812_v1 = vrot.slane %v8668_v13, 1 }
0x1583   : > { %6207 = vmatpush3.bf16.msra.mxu1 %v7325_v55 }
0x1584   : > { %v3750_v12 = vadd.f32 %v3749_v37, %v3748_v61  ;;  %6209 = vmatprep.subr.bf16.mxu1 %v7328_v28  ;;  %3895 = vmatprep.mubr.f32.mxu1 %v3812_v1 }
0x1585   : > { %3972 = vmatprep.mubr.f32.mxu0 %v3812_v1  ;;  %3896 = vmatmul.mubr.f32.gmra.mrb[38].mxu1 %v8668_v13 }
0x1586   : > { %v8678_v46 = vsel %vm4208_vm1, %v8477_v18, %v3750_v12  ;;  %3973 = vmatmul.mubr.f32.gmra.mrb[42].mxu0 %v8668_v13  ;;  %4043 = vmatprep.mubr.f32.mxu1 %v3811_v50 }
0x1587   : > { %6211 = vmatpush3.bf16.msra.mxu1 %v7333_v6 }
0x1588   : > { %6213 = vmatprep.subr.bf16.mxu1 %v7336_v25 }
0x158b   : > { %6215 = vmatpush3.bf16.msra.mxu1 %v7341_v41 }
0x158e   : > { %4044 = vmatmul.mubr.f32.vlgmr.msra.gmra.mrb[40].mxu1 %v8641_v40 }
0x158f   : > { %4048 = vmatprep.mubr.f32.mxu1 %v3812_v1 }
0x1592   : > { %4049 = vmatmul.mubr.f32.gmra.mrb[42].mxu1 %v8668_v13 }
0x1641   : > { %v3891_v55 = vpop.f32.mrb[36].mxu1  ;;  %v3968_v28 = vpop.f32.mrb[40].mxu0 }
0x1642   : > { %v4054_v54 = vadd.f32 %v3891_v55, %v9483_v43  ;;  %v4056_v10 = vadd.f32 %v3968_v28, %v9484_v0  ;;  %v3893_v18 = vpop.f32.mrb[37].mxu1  ;;  %v3970_v42 = vpop.f32.mrb[41].mxu0 }
0x1643   : > { %v4055_v6 = vadd.f32 %v3893_v18, %v9485_v27  ;;  %v4057_v41 = vadd.f32 %v3970_v42, %v9486_v17 }
0x1644   : > { %v4778_v56 = vmul.f32 -1.442695, %v4054_v54  ;;  %v4776_v8 = vmul.f32 -1.442695, %v4056_v10 }
0x1645   : > { %v4774_v25 = vmul.f32 -1.442695, %v4055_v6 }
0x1646   : > { %6546 = vpow2.f32 %v4778_v56 }
0x1647   : > { %6548 = vpow2.f32 %v4776_v8 }
0x1648   : > { %6550 = vpow2.f32 %v4774_v25 }
0x1649   : > { %6552 = vtanh.f32 %v4057_v41 }
0x1650   : > { %v6547_v58 = vpop.eup %6546 }
0x1651   : > { %v6549_v29 = vpop.eup %6548  ;;  %v4102_v21 = vadd.f32 1.0, %v6547_v58 }
0x1652   : > { %v6551_v15 = vpop.eup %6550  ;;  %v4084_v59 = vadd.f32 1.0, %v6549_v29 }
0x1653   : > { %6554 = vrcp.f32 %v4102_v21  ;;  %v4070_v2 = vadd.f32 1.0, %v6551_v15  ;;  %v6553_v51 = vpop.eup %6552 }
0x1654   : > { %6556 = vrcp.f32 %v4084_v59 }
0x1655   : > { %6558 = vrcp.f32 %v4070_v2 }
0x1658   : > { %v3897_v20 = vpop.f32.mrb[38].mxu1 }
0x1659   : > { %v3974_v32 = vpop.f32.mrb[42].mxu0  ;;  %v4059_v11 = vadd.f32 %v3897_v20, %v9483_v43  ;;  %v3899_v50 = vpop.f32.mrb[39].mxu1 }
0x165a   : > { %v4061_v48 = vadd.f32 %v3974_v32, %v9484_v0  ;;  %v3976_v19 = vpop.f32.mrb[43].mxu0  ;;  %v4060_v30 = vadd.f32 %v3899_v50, %v9485_v27  ;;  %v8697_v0 = vpop.permute.xlu1 %6302 }
0x165b   : > { %v4779_v33 = vmul.f32 -1.442695, %v4059_v11  ;;  %v6304_v53 = vunpack.i.l.bf16 %v8697_v0  ;;  %v4062_v45 = vadd.f32 %v3976_v19, %v9486_v17  ;;  %v6305_v2 = vunpack.i.h.bf16 %v8697_v0 }
0x165c   : > { %v4777_v7 = vmul.f32 -1.442695, %v4061_v48  ;;  %v4775_v4 = vmul.f32 -1.442695, %v4060_v30 }
0x165d   : > { %v6555_v47 = vpop.eup %6554  ;;  %6560 = vpow2.f32 %v4779_v33 }
0x165e   : > { %v6557_v34 = vpop.eup %6556  ;;  %v4108_v39 = vmul.f32 %v6555_v47, %v6553_v51  ;;  %6562 = vpow2.f32 %v4777_v7 }
0x165f   : > { %v6559_v31 = vpop.eup %6558  ;;  %v4090_v3 = vmul.f32 %v6557_v34, %v3819_v14  ;;  %6564 = vpow2.f32 %v4775_v4 }
0x1660   : > { %v4076_v43 = vmul.f32 %v6559_v31, %v3801_v5  ;;  %v4172_v5 = vpop.permute.xlu1 %4171 }
0x1661   : > { %v5058_v26 = vpop.f32.mrb[40].mxu1  ;;  %v4183_v20 = vmul.f32 %v4172_v5, %v8670_v22 }
0x1662   : > { %v4092_v57 = vadd.f32 %v4090_v3, %v4076_v43  ;;  %v5059_v27 = vpop.f32.mrb[41].mxu1 }
0x1663   : > { %v5060_v23 = vadd.f32 %v5059_v27, %v5058_v26 }
0x1664   : > { %v4110_v36 = vadd.f32 %v4108_v39, %v4092_v57 }
0x1665   : > { %v4058_v35 = vadd.f32 %v5060_v23, %v9487_v62  ;;  %v5061_v38 = vpop.f32.mrb[42].mxu1 }
0x1666   : > { %v4180_v49 = vmul.f32 %v6304_v53, %v4110_v36  ;;  %v5062_v24 = vpop.f32.mrb[43].mxu1 }
0x1667   : > { %v4780_v63 = vmul.f32 -1.442695, %v4058_v35  ;;  %v5063_v16 = vadd.f32 %v5062_v24, %v5061_v38  ;;  %v6561_v61 = vpop.eup %6560 }
0x1668   : > { %v4184_v37 = vadd.f32 %v4182_v52, %v4180_v49  ;;  %v6563_v1 = vpop.eup %6562  ;;  %v4103_v12 = vadd.f32 1.0, %v6561_v61 }
0x1669   : > { %6566 = vpow2.f32 %v4780_v63  ;;  %v4063_v55 = vadd.f32 %v5063_v16, %v9487_v62  ;;  %v6565_v28 = vpop.eup %6564  ;;  %v4085_v54 = vadd.f32 1.0, %v6563_v1  ;;  %v3820_v62 = vrot.slane %v8670_v22, 1 }
0x166a   : > { %6568 = vtanh.f32 %v4062_v45  ;;  %4194 = vst [vmem:[%s8706_s21] sm:$0x1] %v4184_v37  ;;  %v4071_v17 = vadd.f32 1.0, %v6565_v28 }
0x166b   : > { %6570 = vrcp.f32 %v4103_v12  ;;  %v4781_v10 = vmul.f32 -1.442695, %v4063_v55 }
0x166c   : > { %6572 = vrcp.f32 %v4085_v54 }
0x166d   : > { %6574 = vrcp.f32 %v4071_v17 }
0x166e   : > { %6576 = vpow2.f32 %v4781_v10 }
0x166f   : > { %6578 = vtanh.f32 %v4110_v36 }
0x1673   : > { %v6567_v18 = vpop.eup %6566 }
0x1674   : > { %v6569_v42 = vpop.eup %6568  ;;  %v4118_v6 = vadd.f32 1.0, %v6567_v18 }
0x1675   : > { %v6571_v56 = vpop.eup %6570 }
0x1676   : > { %v6573_v8 = vpop.eup %6572  ;;  %v4109_v25 = vmul.f32 %v6571_v56, %v6569_v42  ;;  %6580 = vrcp.f32 %v4118_v6 }
0x1677   : > { %v6575_v41 = vpop.eup %6574  ;;  %v4091_v58 = vmul.f32 %v6573_v8, %v3820_v62 }
0x1678   : > { %v6577_v29 = vpop.eup %6576  ;;  %v4077_v21 = vmul.f32 %v6575_v41, %v8670_v22  ;;  %v4174_v22 = vmul.f32 %v4168_v60, %v8641_v40 }
0x1679   : > { %v4119_v15 = vadd.f32 1.0, %v6577_v29  ;;  %v6579_v11 = vpop.eup %6578 }
0x167a   : > { %v4093_v59 = vadd.f32 %v4091_v58, %v4077_v21 }
0x167b   : > { %6582 = vrcp.f32 %v4119_v15 }
0x167c   : > { %v4111_v9 = vadd.f32 %v4109_v25, %v4093_v59 }
0x167e   : > { %6584 = vtanh.f32 %v4111_v9  ;;  %v4181_v32 = vmul.f32 %v6305_v2, %v4111_v9 }
0x1680   : > { %v6581_v48 = vpop.eup %6580  ;;  %v4185_v50 = vadd.f32 %v4183_v20, %v4181_v32 }
0x1681   : > { %v4126_v19 = vmul.f32 %v6581_v48, %v6579_v11 }
0x1682   : > { %4195 = vst [vmem:[%s8706_s21 + $0x1] sm:$0x1] %v4185_v50 }
0x1683   : > { %v4152_v30 = vmul.f32 %v6304_v53, %v4126_v19 }
0x1684   : > { %6691 = shalt.err (!%p6688_p13)
}
0x1685   : > { %s6692_s21 = scalar_lea.hbm %s8720_s30, 32  ;;  %s6696_s18 = scalar_lea.hbm %s8824_s8, 64 }
0x1686   : > { %p6693_p6 = scmp.ne.s32.totalorder %s8720_s30, %s6692_s21  ;;  %p6697_p7 = scmp.lt.u32.totalorder %s8720_s30, %s8824_s8 }
0x1687   : > { %p6698_p8 = scmp.lt.u32.totalorder %s6696_s18, %s6692_s21  ;;  %p6700_p0 = scmp.lt.u32.totalorder %s6692_s21, %s8720_s30 }
0x1688   : > { %p6694_p10 = pnand %p6693_p6, %p9500_p1 }
0x1689   : > { %p6699_p11 = por %p6698_p8, %p6697_p7 }
0x168a   : > { %p6695_p4 = pneg %p6694_p10 }
0x168b   : > { %p6701_p3 = por %p6700_p0, %p6699_p11 }
0x168d   : > { %p6702_p5 = pnand %p6701_p3, %p6695_p4 }
0x168f   : > { %6705 = shalt.err (!%p6702_p5)
}
0x1690   : > { %s9047_s24 = smov 16   ;;  %s6796_s27 = smov 1   ;;  %v4176_v40 = vadd.f32 %v4174_v22, %v4152_v30  ;;  %vm4217_vm8 = vcmask 1045504   ;;  %v6583_v51 = vpop.eup %6582  ;;  %v4175_v4 = vmul.f32 %v4172_v5, %v8668_v13 }
0x1691   : > { %6227 = dma.vmem_to_hbm [thread:$0]  (%p9500_p1), %s8722_s25, 32, %s8720_s30, %s4431_s22, %s9047_s24, %s9047_s24, %s6796_s27   ;;  %v6585_v7 = vpop.eup %6584 }
0x1692   : > { %s9501_s19 = sshll.u32 %s7025_s20, 1  ;;  %v4213_v33 = vrot.slane %v4176_v40, 2  ;;  %v4127_v47 = vmul.f32 %v6585_v7, %v6583_v51  ;;  %s9502_s25 = sshll.u32 %s6874_s17, 5 }
0x1693   : > { %s424_s13 = scalar_lea.vmem [#allocation10], %s9501_s19  ;;  %s8764_s29 = scalar_lea.hbm %s8823_s7, %s9502_s25 }
0x1694   : > { %4192 = vst [vmem:[%s424_s13] sm:$0x1] %v4176_v40  ;;  %v4218_v14 = vsel %vm4217_vm8, %v8646_v44, %v4213_v33  ;;  %s4455_s21 = sshll.u32 %s424_s13, 4  ;;  %v4153_v34 = vmul.f32 %v6305_v2, %v4127_v47  ;;  %s4426_s18 = scalar_lea.sflag [#allocation6], %s7025_s20  ;;  %s8766_s21 = int_to_ptr.vmem [resolvable:$true] %s4455_s21 }
0x1695   : > { %4220 = vst [vmem:[%s7259_s23 + $0x8] sm:$0x7f] %v4218_v14  ;;  %s6706_s26 = scalar_lea.vmem %s8766_s21, 32  ;;  %s6797_s19 = smov [#allocation10]  }
0x1696   : > { %v4177_v39 = vadd.f32 %v4175_v4, %v4153_v34  ;;  %p6707_p9 = scmp.ne.s32.totalorder %s8766_s21, %s6706_s26  ;;  %s6710_s17 = sshll.u32 %s6797_s19, 4  ;;  %s6711_s17 = int_to_ptr.vmem [resolvable:$false] %s6710_s17 }
0x1697   : > { %s6712_s24 = scalar_lea.vmem %s6711_s17, 64  ;;  %p6713_p13 = scmp.lt.s32.totalorder %s8766_s21, %s6711_s17 }
0x1698   : > { %4193 = vst [vmem:[%s424_s13 + $0x1] sm:$0x1] %v4177_v39  ;;  %v4214_v31 = vrot.slane %v4177_v39, 2  ;;  %p6708_p12 = pnand %p6707_p9, %p9500_p1  ;;  %p6714_p6 = scmp.lt.s32.totalorder %s6712_s24, %s6706_s26 }
0x169a   : > { %p6709_p2 = pneg %p6708_p12  ;;  %p6715_p10 = por %p6714_p6, %p6713_p13 }
0x169c   : > { %p6716_p4 = pnand %p6715_p10, %p6709_p2 }
0x169e   : > { %6719 = shalt.err (!%p6716_p4)
}
0x169f   : > { %s6720_s13 = scalar_lea.hbm %s8764_s29, 32  ;;  %s6724_s22 = scalar_lea.hbm %s8823_s7, 64 }
0x16a0   : > { %p6721_p7 = scmp.ne.s32.totalorder %s8764_s29, %s6720_s13  ;;  %p6725_p0 = scmp.lt.u32.totalorder %s8764_s29, %s8823_s7 }
0x16a1   : > { %p6726_p3 = scmp.lt.u32.totalorder %s6724_s22, %s6720_s13  ;;  %p6728_p9 = scmp.lt.u32.totalorder %s6720_s13, %s8764_s29 }
0x16a2   : > { %p6722_p8 = pnand %p6721_p7, %p9500_p1 }
0x16a3   : > { %p6727_p5 = por %p6726_p3, %p6725_p0 }
0x16a4   : > { %p6723_p11 = pneg %p6722_p8 }
0x16a5   : > { %p6729_p12 = por %p6728_p9, %p6727_p5 }
0x16a7   : > { %p6730_p2 = pnand %p6729_p12, %p6723_p11 }
0x16a9   : > { %6733 = shalt.err (!%p6730_p2)
}
0x16aa   : > { %s9503_s24 = smov 16   ;;  %v4219_v44 = vsel %vm4217_vm8, %v8678_v46, %v4214_v31 }
0x16ab   : > { %6226 = dma.vmem_to_hbm [thread:$0]  (%p9500_p1), %s8766_s21, 32, %s8764_s29, %s4426_s18, %s9503_s24, %s9503_s24, %s6796_s27  }
0x16ac   : > { %4221 = vst [vmem:[%s7259_s23 + $0x18] sm:$0x7f] %v4219_v44 }
0x16ad PF: > { %s9504_s26 = sld [smem:[#allocation17_spill]]  ;;  %s9505_s13 = sld [smem:[#allocation18_spill]] }
0x16ae   : > { %p9507_p6 = scmp.ge.s32.totalorder %s6780_s16, 2 }
0x16b3   : > { %s4494_s25 = sand.u32 1, %s9504_s26   ;;  %p9506_p13 = scmp.ne.s32.totalorder %s9505_s13, 0 }
0x16b4   : > { %s4495_s12 = scalar_lea.sflag [#allocation6], %s4494_s25 }
0x16b5   : > { %p6242_p10 = pnand %p9507_p6, %p9506_p13 }
0x16b7   : > { %6759 = dma.done.wait (!%p6242_p10), %s4495_s12, 32  }
0x16b8   : > { %6761 = vsyncadd (!%p6242_p10), %s4495_s12, 4294967264  ;;  %s4504_s20 = scalar_lea.sflag [#allocation12], %s4494_s25 }
0x16b9   : > { %6763 = dma.done.wait (!%p6242_p10), %s4504_s20, 32  }
0x16ba   : > { %6765 = vsyncadd (!%p6242_p10), %s4504_s20, 4294967264  ;;  %p28_p1 = scmp.ge.s32.totalorder %s6963_s28, 4   ;;  %s9508_s13 = smov %s6772_s14 }
0x16bb   : > { %s9509_s14 = smov %s6776_s15  ;;  %s9510_s15 = smov %s6972_s11 }
0x16bc   : > { %s9511_s16 = smov %s6963_s28  ;;  %30 = sbr.rel (!%p28_p1) target bundleno = 8 (0x8), region = 145 }
0x16c3   :  { %4526 = vsyncpa [#allocation5], 1 }
0x16c4   :  { %4528 = vsyncpa [#allocation5 + $0x1], 1 }
0x16c5   :  { %4529 = vsyncpa [#allocation8], 1 }
0x16c6   :  { %4530 = vsyncpa [#allocation6], 1 }
0x16c7   :  { %4532 = vsyncpa [#allocation6 + $0x1], 1 }
0x16c8   :  { %4533 = vsyncpa [#allocation12], 1 }
0x16c9   :  { %4535 = vsyncpa [#allocation12 + $0x1], 1 }

</bundles_post_ra>
